<compile_context>
chip_gen: v7x
topology: tpu7x:2x2x1
jax: 0.10.0
libtpu: 0.0.40
codegen_flags: <defaults>
</compile_context>

<pallas_src>
import jax
import jax.numpy as jnp
from jax.experimental import pallas as pl
from jax.experimental.pallas import tpu as pltpu

BN_EPS = 1e-5
_SQRT_2_OVER_PI = 0.7978845608028654


def _gelu(x):
    # tanh-approximate GELU (used identically in kernels and reference).
    return 0.5 * x * (1.0 + jnp.tanh(_SQRT_2_OVER_PI * (x + 0.044715 * x * x * x)))


# -----------------------------------------------------------------------------
# Kernels
# -----------------------------------------------------------------------------
def _make_dense3x3_kernel(Wp, Lp):
    """Dense 3x3 conv (pad=1) on the flat padded layout, BN folded, PReLU + ring mask.

    x_ref:     (Ci, Lext)   flat zero-padded image + Wp+1 extra zeros at both ends
    w_ref:     (9, Co, Ci)  per-tap weights (BN pre-folded)
    b_ref:     (Co, 1)      folded bias
    alpha_ref: (1, 1)       PReLU slope
    mask_ref:  (1, Lp)      1 inside the image, 0 on the pad ring
    o_ref:     (Co, Lp)     output in the SAME padded-image layout (ring forced to 0)
    """
    def kernel(x_ref, w_ref, b_ref, alpha_ref, mask_ref, o_ref):
        acc = jnp.zeros(o_ref.shape, jnp.float32)
        for t in range(9):
            dh, dw = t // 3, t % 3
            off = dh * Wp + dw                       # constant lane offset of tap t
            acc = acc + jnp.dot(w_ref[t], x_ref[:, off:off + Lp],
                                preferred_element_type=jnp.float32)
        z = acc + b_ref[...]
        z = jnp.where(z >= 0.0, z, alpha_ref[...] * z)
        o_ref[...] = z * mask_ref[...]
    return kernel


def _make_dwconv_kernel(Wp, Lp, K, dil, fuse_gelu):
    """Depthwise KxK conv (dilation dil) on the flat padded layout (lane-dense taps)."""
    def kernel(x_ref, w_ref, b_ref, o_ref):
        wv = w_ref[...]                              # (cc, K*K), single VMEM tile
        acc = jnp.zeros(o_ref.shape, jnp.float32)
        for t in range(K * K):
            dh, dw = t // K, t % K
            off = dh * dil * Wp + dw * dil
            acc = acc + wv[:, t:t + 1] * x_ref[:, off:off + Lp]
        z = acc + b_ref[...]
        if fuse_gelu:
            z = _gelu(z)
        o_ref[...] = z
    return kernel


def _proj1_gelu_kernel(x_ref, w_ref, b_ref, o_ref):
    z = jnp.dot(w_ref[...], x_ref[...], preferred_element_type=jnp.float32) + b_ref[...]
    o_ref[...] = _gelu(z)


def _fc1_kernel(x_ref, w_ref, b_ref, o_ref):
    o_ref[...] = (jnp.dot(w_ref[...], x_ref[...], preferred_element_type=jnp.float32)
                  + b_ref[...])


def _attn_tail_kernel(a_ref, t_ref, res_ref, w1_ref, b1_ref, w2_ref, b2_ref, ls_ref, o_ref):
    # attn = lka.conv1(a); g = t * attn; x2 = res + ls1 * (proj_2(g) + res)
    attn = jnp.dot(w1_ref[...], a_ref[...], preferred_element_type=jnp.float32) + b1_ref[...]
    g = t_ref[...] * attn
    z = jnp.dot(w2_ref[...], g, preferred_element_type=jnp.float32) + b2_ref[...]
    res = res_ref[...]
    o_ref[...] = res + ls_ref[...] * (z + res)


def _fc2_res_kernel(h_ref, res_ref, w_ref, b_ref, ls_ref, o_ref):
    z = jnp.dot(w_ref[...], h_ref[...], preferred_element_type=jnp.float32) + b_ref[...]
    o_ref[...] = res_ref[...] + ls_ref[...] * z


# -----------------------------------------------------------------------------
# pallas_call launchers
# -----------------------------------------------------------------------------
def _const_spec(arr):
    nd = arr.ndim
    return pl.BlockSpec(arr.shape, lambda *_, _nd=nd: (0,) * _nd)


def _choose_ts(S):
    # Largest lane tile (multiple of 128) dividing S: big tiles amortize the ~0.35 us
    # per-grid-step overhead and feed the MXU with N >= 256 lanes.
    for ts in (2048, 1024, 512, 256, 128):
        if S % ts == 0:
            return ts
    return S


def _pick_cc(C):
    # Channel tile (multiple of 8 sublanes) for the depthwise kernels: extra parallel
    # grid steps and bounded per-step VMEM for large C (v7x: 64 MiB VMEM, 2 TCs).
    if C > 16 and C % 16 == 0:
        return 16
    if C > 8 and C % 8 == 0:
        return 8
    return C


def _pw_call(kernel, out_channels, acts, consts, alias_idx=None):
    """GEMM/elementwise kernel over a (batch, spatial-tile) parallel grid.

    acts:   activations (B, C_i, S), tiled over S with lane-dense tiles.
    consts: small parameter arrays passed as full (revisited) blocks.
    alias_idx: input index aliased to the output buffer (residual in-place).
    """
    B, _, S = acts[0].shape
    ts = _choose_ts(S)
    ns = S // ts

    in_specs = [pl.BlockSpec((None, a.shape[1], ts), lambda bi, si: (bi, 0, si))
                for a in acts]
    in_specs += [_const_spec(c) for c in consts]
    out_spec = pl.BlockSpec((None, out_channels, ts), lambda bi, si: (bi, 0, si))

    extra = {}
    if alias_idx is not None:
        extra["input_output_aliases"] = {alias_idx: 0}

    return pl.pallas_call(
        kernel,
        out_shape=jax.ShapeDtypeStruct((B, out_channels, S), jnp.float32),
        grid_spec=pltpu.PrefetchScalarGridSpec(
            num_scalar_prefetch=0,
            grid=(B, ns),
            in_specs=in_specs,
            out_specs=out_spec),
        compiler_params=pltpu.CompilerParams(
            dimension_semantics=("parallel", "parallel")),
        **extra,
    )(*acts, *consts)


def _dw_call(kernel, x_ext, w, bias, C, Lp):
    B, _, Lext = x_ext.shape
    cc = _pick_cc(C)
    grid = (B, C // cc)
    in_specs = [
        pl.BlockSpec((None, cc, Lext), lambda bi, ci: (bi, ci, 0)),
        pl.BlockSpec((cc, w.shape[1]), lambda bi, ci: (ci, 0)),
        pl.BlockSpec((cc, 1), lambda bi, ci: (ci, 0)),
    ]
    out_spec = pl.BlockSpec((None, cc, Lp), lambda bi, ci: (bi, ci, 0))
    return pl.pallas_call(
        kernel,
        out_shape=jax.ShapeDtypeStruct((B, C, Lp), jnp.float32),
        grid_spec=pltpu.PrefetchScalarGridSpec(
            num_scalar_prefetch=0,
            grid=grid,
            in_specs=in_specs,
            out_specs=out_spec),
        compiler_params=pltpu.CompilerParams(
            dimension_semantics=("parallel", "parallel")),
    )(x_ext, w, bias)


def _dense3x3_call(kernel, x_ext, w9, bias, alpha, mask, Lp):
    B, Ci, Lext = x_ext.shape
    Co = w9.shape[1]
    consts = [w9, bias.reshape(-1, 1),
              jnp.reshape(alpha, (1, 1)).astype(jnp.float32), mask]
    in_specs = [pl.BlockSpec((None, Ci, Lext), lambda bi: (bi, 0, 0))]
    in_specs += [_const_spec(c) for c in consts]
    out_spec = pl.BlockSpec((None, Co, Lp), lambda bi: (bi, 0, 0))
    return pl.pallas_call(
        kernel,
        out_shape=jax.ShapeDtypeStruct((B, Co, Lp), jnp.float32),
        grid_spec=pltpu.PrefetchScalarGridSpec(
            num_scalar_prefetch=0,
            grid=(B,),
            in_specs=in_specs,
            out_specs=out_spec),
        compiler_params=pltpu.CompilerParams(
            dimension_semantics=("parallel",)),
    )(x_ext, *consts)


# -----------------------------------------------------------------------------
# Wrapper-side layout plumbing and trace-time parameter folding
# -----------------------------------------------------------------------------
def _bn_fold(bn):
    inv = jax.lax.rsqrt(bn["rv"] + BN_EPS)
    a = bn["gamma"] * inv
    c = bn["beta"] - bn["rm"] * a
    return a, c


def _pad_flat(x4, pad):
    """(B,C,H,W) -> spatial zero-pad by `pad`, flatten, flat-extend by pad*Wp+pad zeros."""
    B, C, H, W = x4.shape
    Hp, Wp = H + 2 * pad, W + 2 * pad
    xp = jnp.pad(x4, ((0, 0), (0, 0), (pad, pad), (pad, pad)))
    xf = xp.reshape(B, C, Hp * Wp)
    fpad = pad * Wp + pad
    return jnp.pad(xf, ((0, 0), (0, 0), (fpad, fpad))), Hp, Wp


def _strip(x_flat, H, W, pad):
    """(B,C,Hp*Wp) padded-image layout -> compact (B,C,H,W)."""
    B, C, _ = x_flat.shape
    Hp, Wp = H + 2 * pad, W + 2 * pad
    return x_flat.reshape(B, C, Hp, Wp)[:, :, pad:pad + H, pad:pad + W]


def _interior_mask(H, W, pad):
    Hp, Wp = H + 2 * pad, W + 2 * pad
    m = jnp.zeros((Hp, Wp), jnp.float32).at[pad:pad + H, pad:pad + W].set(1.0)
    return m.reshape(1, Hp * Wp)


def _conv3x3_bn_prelu(x_ext, Wp, Lp, w, b, bn, alpha, mask):
    """Dense 3x3 conv (pad=1) + folded BatchNorm + PReLU on the flat padded layout."""
    a_, c_ = _bn_fold(bn)
    wf = w * a_[:, None, None, None]
    bf = b * a_ + c_
    w9 = jnp.transpose(wf, (2, 3, 0, 1)).reshape(9, wf.shape[0], wf.shape[1])
    kern = _make_dense3x3_kernel(Wp, Lp)
    return _dense3x3_call(kern, x_ext, w9, bf, alpha, mask, Lp)       # (B, Co, Lp)


def _dwconv(x4, w_ckk, bias, K, dil, pad, fuse_gelu):
    B, C, H, W = x4.shape
    x_ext, Hp, Wp = _pad_flat(x4, pad)
    Lp = Hp * Wp
    wk = w_ckk.reshape(C, K * K)
    bk = bias.reshape(C, 1)
    kern = _make_dwconv_kernel(Wp, Lp, K, dil, fuse_gelu)
    out_flat = _dw_call(kern, x_ext, wk, bk, C, Lp)
    return _strip(out_flat, H, W, pad)                                # (B, C, H, W)


# -----------------------------------------------------------------------------
# LKA_Block forward (Pallas) and pure-JAX reference
# -----------------------------------------------------------------------------
def lka_block_forward(x, p):
    B, _, H, W = x.shape
    C = p["dc1_w"].shape[0]
    hid = p["fc1_w"].shape[0]
    S = H * W

    Hp, Wp = H + 2, W + 2
    Lp = Hp * Wp
    fpad = Wp + 1
    mask = _interior_mask(H, W, 1)

    # double_conv: [Conv3x3 -> BN -> PReLU] x 2 (BN folded; flat padded layout chained)
    x_ext, _, _ = _pad_flat(x, 1)
    y1 = _conv3x3_bn_prelu(x_ext, Wp, Lp, p["dc1_w"], p["dc1_b"], p["dc_bn1"],
                           p["prelu1"], mask)
    # y1's pad ring is zeroed -> it already IS conv2's zero-padded input; only the flat
    # end-padding (Wp+1 zeros each side) is added in the wrapper.
    y1_ext = jnp.pad(y1, ((0, 0), (0, 0), (fpad, fpad)))
    y2 = _conv3x3_bn_prelu(y1_ext, Wp, Lp, p["dc2_w"], p["dc2_b"], p["dc_bn2"],
                           p["prelu2"], mask)
    x1 = _strip(y2, H, W, 1).reshape(B, C, S)                          # (B, C, S)

    # Attention: proj_1 -> GELU -> LKA(5x5 dw, 7x7 dil3 dw, 1x1) gate -> proj_2
    # + inner shortcut, layer-scaled residual (gate/proj_2/residual fused in one kernel).
    t = _pw_call(_proj1_gelu_kernel, C, [x1],
                 [p["p1_w"], p["p1_b"].reshape(-1, 1)])                # (B, C, S)
    a4 = _dwconv(t.reshape(B, C, H, W), p["lka0_w"], p["lka0_b"],
                 K=5, dil=1, pad=2, fuse_gelu=False)
    a4 = _dwconv(a4, p["lkas_w"], p["lkas_b"], K=7, dil=3, pad=9, fuse_gelu=False)
    x2 = _pw_call(_attn_tail_kernel, C,
                  [a4.reshape(B, C, S), t, x1],
                  [p["lka1_w"], p["lka1_b"].reshape(-1, 1),
                   p["p2_w"], p["p2_b"].reshape(-1, 1), p["ls1"].reshape(-1, 1)],
                  alias_idx=2)                                         # (B, C, S)

    # MLP on norm2(x2); norm2 folded into fc1.
    an, cn = _bn_fold(p["bn2"])
    fc1_w = p["fc1_w"] * an[None, :]
    fc1_b = p["fc1_w"] @ cn + p["fc1_b"]
    h = _pw_call(_fc1_kernel, hid, [x2], [fc1_w, fc1_b.reshape(-1, 1)])
    h4 = _dwconv(h.reshape(B, hid, H, W), p["dw3_w"], p["dw3_b"],
                 K=3, dil=1, pad=1, fuse_gelu=True)
    x3 = _pw_call(_fc2_res_kernel, C,
                  [h4.reshape(B, hid, S), x2],
                  [p["fc2_w"], p["fc2_b"].reshape(-1, 1), p["ls2"].reshape(-1, 1)],
                  alias_idx=1)
    return x3.reshape(B, C, H, W)


def _conv2d_ref(x, w, b, padding=0, dilation=1, groups=1):
    out = jax.lax.conv_general_dilated(
        x, w, window_strides=(1, 1),
        padding=[(padding, padding), (padding, padding)],
        rhs_dilation=(dilation, dilation),
        dimension_numbers=("NCHW", "OIHW", "NCHW"),
        feature_group_count=groups,
        precision=jax.lax.Precision.HIGHEST)
    return out + b.reshape(1, -1, 1, 1)


def _bn_ref(x, bn):
    r = lambda v: v.reshape(1, -1, 1, 1)
    return (x - r(bn["rm"])) * jax.lax.rsqrt(r(bn["rv"]) + BN_EPS) * r(bn["gamma"]) + r(bn["beta"])


def _prelu_ref(x, alpha):
    return jnp.where(x >= 0.0, x, alpha * x)


def lka_block_reference(x, p):
    """Pure-JAX transcription of the PyTorch forward (eval-mode BN), for checking."""
    C = p["dc1_w"].shape[0]
    hid = p["fc1_w"].shape[0]
    e = lambda w: w[:, :, None, None]      # 1x1 conv weight  (Co, Ci) -> OIHW
    d = lambda w: w[:, None, :, :]         # depthwise weight (C, K, K) -> OIHW

    h = _conv2d_ref(x, p["dc1_w"], p["dc1_b"], padding=1)
    h = _prelu_ref(_bn_ref(h, p["dc_bn1"]), p["prelu1"])
    h = _conv2d_ref(h, p["dc2_w"], p["dc2_b"], padding=1)
    x1 = _prelu_ref(_bn_ref(h, p["dc_bn2"]), p["prelu2"])

    # Attention
    t = _gelu(_conv2d_ref(x1, e(p["p1_w"]), p["p1_b"]))
    a = _conv2d_ref(t, d(p["lka0_w"]), p["lka0_b"], padding=2, groups=C)
    a = _conv2d_ref(a, d(p["lkas_w"]), p["lkas_b"], padding=9, dilation=3, groups=C)
    attn = _conv2d_ref(a, e(p["lka1_w"]), p["lka1_b"])
    g = t * attn
    attn_out = _conv2d_ref(g, e(p["p2_w"]), p["p2_b"]) + x1
    x2 = x1 + p["ls1"].reshape(1, -1, 1, 1) * attn_out

    # MLP
    n = _bn_ref(x2, p["bn2"])
    m = _conv2d_ref(n, e(p["fc1_w"]), p["fc1_b"])
    m = _conv2d_ref(m, d(p["dw3_w"]), p["dw3_b"], padding=1, groups=hid)
    m = _gelu(m)
    m = _conv2d_ref(m, e(p["fc2_w"]), p["fc2_b"])
    return x2 + p["ls2"].reshape(1, -1, 1, 1) * m


def init_params(key, in_ch, out_ch, mlp_ratio=4.0):
    hid = int(out_ch * mlp_ratio)
    keys = iter(jax.random.split(key, 64))

    def nrm(shape, scale=1.0):
        return scale * jax.random.normal(next(keys), shape, jnp.float32)

    def bn(c):
        return dict(gamma=1.0 + 0.1 * nrm((c,)),
                    beta=0.1 * nrm((c,)),
                    rm=0.1 * nrm((c,)),
                    rv=jax.random.uniform(next(keys), (c,), jnp.float32, 0.5, 1.5))

    p = {
        "dc1_w": nrm((out_ch, in_ch, 3, 3), 1.0 / (3.0 * in_ch ** 0.5)),
        "dc1_b": 0.1 * nrm((out_ch,)),
        "dc_bn1": bn(out_ch),
        "prelu1": 0.25 + 0.05 * nrm(()),
        "dc2_w": nrm((out_ch, out_ch, 3, 3), 1.0 / (3.0 * out_ch ** 0.5)),
        "dc2_b": 0.1 * nrm((out_ch,)),
        "dc_bn2": bn(out_ch),
        "prelu2": 0.25 + 0.05 * nrm(()),
        "p1_w": nrm((out_ch, out_ch), out_ch ** -0.5),
        "p1_b": 0.1 * nrm((out_ch,)),
        "lka0_w": nrm((out_ch, 5, 5), 1.0 / 5.0),
        "lka0_b": 0.1 * nrm((out_ch,)),
        "lkas_w": nrm((out_ch, 7, 7), 1.0 / 7.0),
        "lkas_b": 0.1 * nrm((out_ch,)),
        "lka1_w": nrm((out_ch, out_ch), out_ch ** -0.5),
        "lka1_b": 0.1 * nrm((out_ch,)),
        "p2_w": nrm((out_ch, out_ch), out_ch ** -0.5),
        "p2_b": 0.1 * nrm((out_ch,)),
        "ls1": 0.01 * jnp.ones((out_ch,), jnp.float32),
        "bn2": bn(out_ch),
        "fc1_w": nrm((hid, out_ch), out_ch ** -0.5),
        "fc1_b": 0.1 * nrm((hid,)),
        "dw3_w": nrm((hid, 3, 3), 1.0 / 3.0),
        "dw3_b": 0.1 * nrm((hid,)),
        "fc2_w": nrm((out_ch, hid), hid ** -0.5),
        "fc2_b": 0.1 * nrm((out_ch,)),
        "ls2": 0.01 * jnp.ones((out_ch,), jnp.float32),
    }
    return p


if __name__ == "__main__":
    key = jax.random.PRNGKey(0)
    kx, kp = jax.random.split(key)

    B, C_in, C_out, H, W = 2, 4, 8, 16, 16
    x = jax.random.normal(kx, (B, C_in, H, W), jnp.float32)
    params = init_params(kp, C_in, C_out, mlp_ratio=4.0)

    fwd = jax.jit(lka_block_forward)
    out = jax.block_until_ready(fwd(x, params))

    ref = lka_block_reference(x, params)
    assert out.shape == (B, C_out, H, W)
    max_err = float(jnp.max(jnp.abs(out - ref)))
    assert max_err < 5e-3, f"mismatch vs reference: max abs err = {max_err:.3e}"

    print("KERNEL_OK")
</pallas_src>

<mosaic_0001>
module attributes {stable_mosaic.version = 11 : i64} {
  func.func @kernel(%arg0: i32, %arg1: memref<1x8x362xf32, #tpu.memory_space<vmem>>, %arg2: memref<9x8x8xf32, #tpu.memory_space<vmem>>, %arg3: memref<8x1xf32, #tpu.memory_space<vmem>>, %arg4: memref<1x1xf32, #tpu.memory_space<vmem>>, %arg5: memref<1x324xf32, #tpu.memory_space<vmem>>, %arg6: memref<1x8x324xf32, #tpu.memory_space<vmem>>) attributes {dimension_semantics = [#tpu.dimension_semantics<parallel>], iteration_bounds = array<i64: 2>, scalar_prefetch = 0 : i64, scratch_operands = 0 : i64, tpu.core_type = #tpu.core_type<tc>, window_params = [{transform_indices = @transform_0, window_bounds = array<i64: 1, 8, 362>}, {pipeline_mode = #tpu.pipeline_mode<synchronous>, transform_indices = @transform_1, window_bounds = array<i64: 9, 8, 8>}, {pipeline_mode = #tpu.pipeline_mode<synchronous>, transform_indices = @transform_2, window_bounds = array<i64: 8, 1>}, {pipeline_mode = #tpu.pipeline_mode<synchronous>, transform_indices = @transform_3, window_bounds = array<i64: 1, 1>}, {pipeline_mode = #tpu.pipeline_mode<synchronous>, transform_indices = @transform_4, window_bounds = array<i64: 1, 324>}, {transform_indices = @transform_5, window_bounds = array<i64: 1, 8, 324>}]} {
    %cst = arith.constant 0.000000e+00 : f32
    %0 = vector.broadcast %cst : f32 to vector<8x324xf32>
    %c0 = arith.constant 0 : index
    %c0_0 = arith.constant 0 : index
    %c0_1 = arith.constant 0 : index
    %1 = vector.load %arg2[%c0, %c0_0, %c0_1] : memref<9x8x8xf32, #tpu.memory_space<vmem>>, vector<1x8x8xf32>
    %2 = vector.shape_cast %1 : vector<1x8x8xf32> to vector<8x8xf32>
    %c0_2 = arith.constant 0 : index
    %c0_3 = arith.constant 0 : index
    %c0_4 = arith.constant 0 : index
    %3 = vector.load %arg1[%c0_2, %c0_3, %c0_4] : memref<1x8x362xf32, #tpu.memory_space<vmem>>, vector<1x8x324xf32>
    %4 = vector.shape_cast %3 : vector<1x8x324xf32> to vector<8x324xf32>
    %cst_5 = arith.constant dense<0.000000e+00> : vector<8x324xf32>
    %5 = tpu.matmul %2, %4, %cst_5 {dimension_numbers = #tpu.dot_dimension_numbers<[1], [0], [0], [1], [0, 0, 1, 1], [], []>} : vector<8x8xf32>, vector<8x324xf32>, vector<8x324xf32> -> vector<8x324xf32>
    %6 = arith.addf %0, %5 : vector<8x324xf32>
    %c1 = arith.constant 1 : index
    %c0_6 = arith.constant 0 : index
    %c0_7 = arith.constant 0 : index
    %7 = vector.load %arg2[%c1, %c0_6, %c0_7] : memref<9x8x8xf32, #tpu.memory_space<vmem>>, vector<1x8x8xf32>
    %8 = vector.shape_cast %7 : vector<1x8x8xf32> to vector<8x8xf32>
    %c0_8 = arith.constant 0 : index
    %c0_9 = arith.constant 0 : index
    %c1_10 = arith.constant 1 : index
    %9 = vector.load %arg1[%c0_8, %c0_9, %c1_10] : memref<1x8x362xf32, #tpu.memory_space<vmem>>, vector<1x8x324xf32>
    %10 = vector.shape_cast %9 : vector<1x8x324xf32> to vector<8x324xf32>
    %cst_11 = arith.constant dense<0.000000e+00> : vector<8x324xf32>
    %11 = tpu.matmul %8, %10, %cst_11 {dimension_numbers = #tpu.dot_dimension_numbers<[1], [0], [0], [1], [0, 0, 1, 1], [], []>} : vector<8x8xf32>, vector<8x324xf32>, vector<8x324xf32> -> vector<8x324xf32>
    %12 = arith.addf %6, %11 : vector<8x324xf32>
    %c2 = arith.constant 2 : index
    %c0_12 = arith.constant 0 : index
    %c0_13 = arith.constant 0 : index
    %13 = vector.load %arg2[%c2, %c0_12, %c0_13] : memref<9x8x8xf32, #tpu.memory_space<vmem>>, vector<1x8x8xf32>
    %14 = vector.shape_cast %13 : vector<1x8x8xf32> to vector<8x8xf32>
    %c0_14 = arith.constant 0 : index
    %c0_15 = arith.constant 0 : index
    %c2_16 = arith.constant 2 : index
    %15 = vector.load %arg1[%c0_14, %c0_15, %c2_16] : memref<1x8x362xf32, #tpu.memory_space<vmem>>, vector<1x8x324xf32>
    %16 = vector.shape_cast %15 : vector<1x8x324xf32> to vector<8x324xf32>
    %cst_17 = arith.constant dense<0.000000e+00> : vector<8x324xf32>
    %17 = tpu.matmul %14, %16, %cst_17 {dimension_numbers = #tpu.dot_dimension_numbers<[1], [0], [0], [1], [0, 0, 1, 1], [], []>} : vector<8x8xf32>, vector<8x324xf32>, vector<8x324xf32> -> vector<8x324xf32>
    %18 = arith.addf %12, %17 : vector<8x324xf32>
    %c3 = arith.constant 3 : index
    %c0_18 = arith.constant 0 : index
    %c0_19 = arith.constant 0 : index
    %19 = vector.load %arg2[%c3, %c0_18, %c0_19] : memref<9x8x8xf32, #tpu.memory_space<vmem>>, vector<1x8x8xf32>
    %20 = vector.shape_cast %19 : vector<1x8x8xf32> to vector<8x8xf32>
    %c0_20 = arith.constant 0 : index
    %c0_21 = arith.constant 0 : index
    %c18 = arith.constant 18 : index
    %21 = vector.load %arg1[%c0_20, %c0_21, %c18] : memref<1x8x362xf32, #tpu.memory_space<vmem>>, vector<1x8x324xf32>
    %22 = vector.shape_cast %21 : vector<1x8x324xf32> to vector<8x324xf32>
    %cst_22 = arith.constant dense<0.000000e+00> : vector<8x324xf32>
    %23 = tpu.matmul %20, %22, %cst_22 {dimension_numbers = #tpu.dot_dimension_numbers<[1], [0], [0], [1], [0, 0, 1, 1], [], []>} : vector<8x8xf32>, vector<8x324xf32>, vector<8x324xf32> -> vector<8x324xf32>
    %24 = arith.addf %18, %23 : vector<8x324xf32>
    %c4 = arith.constant 4 : index
    %c0_23 = arith.constant 0 : index
    %c0_24 = arith.constant 0 : index
    %25 = vector.load %arg2[%c4, %c0_23, %c0_24] : memref<9x8x8xf32, #tpu.memory_space<vmem>>, vector<1x8x8xf32>
    %26 = vector.shape_cast %25 : vector<1x8x8xf32> to vector<8x8xf32>
    %c0_25 = arith.constant 0 : index
    %c0_26 = arith.constant 0 : index
    %c19 = arith.constant 19 : index
    %27 = vector.load %arg1[%c0_25, %c0_26, %c19] : memref<1x8x362xf32, #tpu.memory_space<vmem>>, vector<1x8x324xf32>
    %28 = vector.shape_cast %27 : vector<1x8x324xf32> to vector<8x324xf32>
    %cst_27 = arith.constant dense<0.000000e+00> : vector<8x324xf32>
    %29 = tpu.matmul %26, %28, %cst_27 {dimension_numbers = #tpu.dot_dimension_numbers<[1], [0], [0], [1], [0, 0, 1, 1], [], []>} : vector<8x8xf32>, vector<8x324xf32>, vector<8x324xf32> -> vector<8x324xf32>
    %30 = arith.addf %24, %29 : vector<8x324xf32>
    %c5 = arith.constant 5 : index
    %c0_28 = arith.constant 0 : index
    %c0_29 = arith.constant 0 : index
    %31 = vector.load %arg2[%c5, %c0_28, %c0_29] : memref<9x8x8xf32, #tpu.memory_space<vmem>>, vector<1x8x8xf32>
    %32 = vector.shape_cast %31 : vector<1x8x8xf32> to vector<8x8xf32>
    %c0_30 = arith.constant 0 : index
    %c0_31 = arith.constant 0 : index
    %c20 = arith.constant 20 : index
    %33 = vector.load %arg1[%c0_30, %c0_31, %c20] : memref<1x8x362xf32, #tpu.memory_space<vmem>>, vector<1x8x324xf32>
    %34 = vector.shape_cast %33 : vector<1x8x324xf32> to vector<8x324xf32>
    %cst_32 = arith.constant dense<0.000000e+00> : vector<8x324xf32>
    %35 = tpu.matmul %32, %34, %cst_32 {dimension_numbers = #tpu.dot_dimension_numbers<[1], [0], [0], [1], [0, 0, 1, 1], [], []>} : vector<8x8xf32>, vector<8x324xf32>, vector<8x324xf32> -> vector<8x324xf32>
    %36 = arith.addf %30, %35 : vector<8x324xf32>
    %c6 = arith.constant 6 : index
    %c0_33 = arith.constant 0 : index
    %c0_34 = arith.constant 0 : index
    %37 = vector.load %arg2[%c6, %c0_33, %c0_34] : memref<9x8x8xf32, #tpu.memory_space<vmem>>, vector<1x8x8xf32>
    %38 = vector.shape_cast %37 : vector<1x8x8xf32> to vector<8x8xf32>
    %c0_35 = arith.constant 0 : index
    %c0_36 = arith.constant 0 : index
    %c36 = arith.constant 36 : index
    %39 = vector.load %arg1[%c0_35, %c0_36, %c36] : memref<1x8x362xf32, #tpu.memory_space<vmem>>, vector<1x8x324xf32>
    %40 = vector.shape_cast %39 : vector<1x8x324xf32> to vector<8x324xf32>
    %cst_37 = arith.constant dense<0.000000e+00> : vector<8x324xf32>
    %41 = tpu.matmul %38, %40, %cst_37 {dimension_numbers = #tpu.dot_dimension_numbers<[1], [0], [0], [1], [0, 0, 1, 1], [], []>} : vector<8x8xf32>, vector<8x324xf32>, vector<8x324xf32> -> vector<8x324xf32>
    %42 = arith.addf %36, %41 : vector<8x324xf32>
    %c7 = arith.constant 7 : index
    %c0_38 = arith.constant 0 : index
    %c0_39 = arith.constant 0 : index
    %43 = vector.load %arg2[%c7, %c0_38, %c0_39] : memref<9x8x8xf32, #tpu.memory_space<vmem>>, vector<1x8x8xf32>
    %44 = vector.shape_cast %43 : vector<1x8x8xf32> to vector<8x8xf32>
    %c0_40 = arith.constant 0 : index
    %c0_41 = arith.constant 0 : index
    %c37 = arith.constant 37 : index
    %45 = vector.load %arg1[%c0_40, %c0_41, %c37] : memref<1x8x362xf32, #tpu.memory_space<vmem>>, vector<1x8x324xf32>
    %46 = vector.shape_cast %45 : vector<1x8x324xf32> to vector<8x324xf32>
    %cst_42 = arith.constant dense<0.000000e+00> : vector<8x324xf32>
    %47 = tpu.matmul %44, %46, %cst_42 {dimension_numbers = #tpu.dot_dimension_numbers<[1], [0], [0], [1], [0, 0, 1, 1], [], []>} : vector<8x8xf32>, vector<8x324xf32>, vector<8x324xf32> -> vector<8x324xf32>
    %48 = arith.addf %42, %47 : vector<8x324xf32>
    %c8 = arith.constant 8 : index
    %c0_43 = arith.constant 0 : index
    %c0_44 = arith.constant 0 : index
    %49 = vector.load %arg2[%c8, %c0_43, %c0_44] : memref<9x8x8xf32, #tpu.memory_space<vmem>>, vector<1x8x8xf32>
    %50 = vector.shape_cast %49 : vector<1x8x8xf32> to vector<8x8xf32>
    %c0_45 = arith.constant 0 : index
    %c0_46 = arith.constant 0 : index
    %c38 = arith.constant 38 : index
    %51 = vector.load %arg1[%c0_45, %c0_46, %c38] : memref<1x8x362xf32, #tpu.memory_space<vmem>>, vector<1x8x324xf32>
    %52 = vector.shape_cast %51 : vector<1x8x324xf32> to vector<8x324xf32>
    %cst_47 = arith.constant dense<0.000000e+00> : vector<8x324xf32>
    %53 = tpu.matmul %50, %52, %cst_47 {dimension_numbers = #tpu.dot_dimension_numbers<[1], [0], [0], [1], [0, 0, 1, 1], [], []>} : vector<8x8xf32>, vector<8x324xf32>, vector<8x324xf32> -> vector<8x324xf32>
    %54 = arith.addf %48, %53 : vector<8x324xf32>
    %c0_48 = arith.constant 0 : index
    %c0_49 = arith.constant 0 : index
    %55 = vector.load %arg3[%c0_48, %c0_49] : memref<8x1xf32, #tpu.memory_space<vmem>>, vector<8x1xf32>
    %56 = vector.broadcast %55 : vector<8x1xf32> to vector<8x324xf32>
    %57 = arith.addf %54, %56 : vector<8x324xf32>
    %cst_50 = arith.constant 0.000000e+00 : f32
    %58 = vector.broadcast %cst_50 : f32 to vector<8x324xf32>
    %59 = arith.cmpf oge, %57, %58 : vector<8x324xf32>
    %c0_51 = arith.constant 0 : index
    %c0_52 = arith.constant 0 : index
    %60 = vector.load %arg4[%c0_51, %c0_52] : memref<1x1xf32, #tpu.memory_space<vmem>>, vector<1x1xf32>
    %61 = vector.broadcast %60 : vector<1x1xf32> to vector<8x324xf32>
    %62 = arith.mulf %61, %57 : vector<8x324xf32>
    %63 = arith.select %59, %57, %62 : vector<8x324xi1>, vector<8x324xf32>
    %c0_53 = arith.constant 0 : index
    %c0_54 = arith.constant 0 : index
    %64 = vector.load %arg5[%c0_53, %c0_54] : memref<1x324xf32, #tpu.memory_space<vmem>>, vector<1x324xf32>
    %65 = vector.broadcast %64 : vector<1x324xf32> to vector<8x324xf32>
    %66 = arith.mulf %63, %65 : vector<8x324xf32>
    %c0_55 = arith.constant 0 : index
    %c0_56 = arith.constant 0 : index
    %c0_57 = arith.constant 0 : index
    %67 = vector.load %arg6[%c0_55, %c0_56, %c0_57] : memref<1x8x324xf32, #tpu.memory_space<vmem>>, vector<1x8x324xf32>
    %68 = vector.shape_cast %67 : vector<1x8x324xf32> to vector<8x324xf32>
    %69 = vector.shape_cast %66 : vector<8x324xf32> to vector<1x8x324xf32>
    tpu.vector_store %arg6[%c0_55, %c0_56, %c0_57], %69 {strides = array<i32>} : memref<1x8x324xf32, #tpu.memory_space<vmem>>, vector<1x8x324xf32>,
    return
  }
  func.func @transform_0(%arg0: i32) -> (i32, i32, i32) {
    %c0_i32 = arith.constant 0 : i32
    %c0_i32_0 = arith.constant 0 : i32
    %c0_i32_1 = arith.constant 0 : i32
    return %arg0, %c0_i32, %c0_i32_0 : i32, i32, i32
  }
  func.func @transform_1(%arg0: i32) -> (i32, i32, i32) {
    %c0_i32 = arith.constant 0 : i32
    %c0_i32_0 = arith.constant 0 : i32
    %c0_i32_1 = arith.constant 0 : i32
    %c0_i32_2 = arith.constant 0 : i32
    return %c0_i32, %c0_i32_0, %c0_i32_1 : i32, i32, i32
  }
  func.func @transform_2(%arg0: i32) -> (i32, i32) {
    %c0_i32 = arith.constant 0 : i32
    %c0_i32_0 = arith.constant 0 : i32
    %c0_i32_1 = arith.constant 0 : i32
    return %c0_i32, %c0_i32_0 : i32, i32
  }
  func.func @transform_3(%arg0: i32) -> (i32, i32) {
    %c0_i32 = arith.constant 0 : i32
    %c0_i32_0 = arith.constant 0 : i32
    %c0_i32_1 = arith.constant 0 : i32
    return %c0_i32, %c0_i32_0 : i32, i32
  }
  func.func @transform_4(%arg0: i32) -> (i32, i32) {
    %c0_i32 = arith.constant 0 : i32
    %c0_i32_0 = arith.constant 0 : i32
    %c0_i32_1 = arith.constant 0 : i32
    return %c0_i32, %c0_i32_0 : i32, i32
  }
  func.func @transform_5(%arg0: i32) -> (i32, i32, i32) {
    %c0_i32 = arith.constant 0 : i32
    %c0_i32_0 = arith.constant 0 : i32
    %c0_i32_1 = arith.constant 0 : i32
    return %arg0, %c0_i32, %c0_i32_0 : i32, i32, i32
  }
}

module attributes {stable_mosaic.version = 11 : i64} {
  func.func @kernel(%arg0: i32, %arg1: memref<1x4x362xf32, #tpu.memory_space<vmem>>, %arg2: memref<9x8x4xf32, #tpu.memory_space<vmem>>, %arg3: memref<8x1xf32, #tpu.memory_space<vmem>>, %arg4: memref<1x1xf32, #tpu.memory_space<vmem>>, %arg5: memref<1x324xf32, #tpu.memory_space<vmem>>, %arg6: memref<1x8x324xf32, #tpu.memory_space<vmem>>) attributes {dimension_semantics = [#tpu.dimension_semantics<parallel>], iteration_bounds = array<i64: 2>, scalar_prefetch = 0 : i64, scratch_operands = 0 : i64, tpu.core_type = #tpu.core_type<tc>, window_params = [{transform_indices = @transform_0, window_bounds = array<i64: 1, 4, 362>}, {pipeline_mode = #tpu.pipeline_mode<synchronous>, transform_indices = @transform_1, window_bounds = array<i64: 9, 8, 4>}, {pipeline_mode = #tpu.pipeline_mode<synchronous>, transform_indices = @transform_2, window_bounds = array<i64: 8, 1>}, {pipeline_mode = #tpu.pipeline_mode<synchronous>, transform_indices = @transform_3, window_bounds = array<i64: 1, 1>}, {pipeline_mode = #tpu.pipeline_mode<synchronous>, transform_indices = @transform_4, window_bounds = array<i64: 1, 324>}, {transform_indices = @transform_5, window_bounds = array<i64: 1, 8, 324>}]} {
    %cst = arith.constant 0.000000e+00 : f32
    %0 = vector.broadcast %cst : f32 to vector<8x324xf32>
    %c0 = arith.constant 0 : index
    %c0_0 = arith.constant 0 : index
    %c0_1 = arith.constant 0 : index
    %1 = vector.load %arg2[%c0, %c0_0, %c0_1] : memref<9x8x4xf32, #tpu.memory_space<vmem>>, vector<1x8x4xf32>
    %2 = vector.shape_cast %1 : vector<1x8x4xf32> to vector<8x4xf32>
    %c0_2 = arith.constant 0 : index
    %c0_3 = arith.constant 0 : index
    %c0_4 = arith.constant 0 : index
    %3 = vector.load %arg1[%c0_2, %c0_3, %c0_4] : memref<1x4x362xf32, #tpu.memory_space<vmem>>, vector<1x4x324xf32>
    %4 = vector.shape_cast %3 : vector<1x4x324xf32> to vector<4x324xf32>
    %cst_5 = arith.constant dense<0.000000e+00> : vector<8x324xf32>
    %5 = tpu.matmul %2, %4, %cst_5 {dimension_numbers = #tpu.dot_dimension_numbers<[1], [0], [0], [1], [0, 0, 1, 1], [], []>} : vector<8x4xf32>, vector<4x324xf32>, vector<8x324xf32> -> vector<8x324xf32>
    %6 = arith.addf %0, %5 : vector<8x324xf32>
    %c1 = arith.constant 1 : index
    %c0_6 = arith.constant 0 : index
    %c0_7 = arith.constant 0 : index
    %7 = vector.load %arg2[%c1, %c0_6, %c0_7] : memref<9x8x4xf32, #tpu.memory_space<vmem>>, vector<1x8x4xf32>
    %8 = vector.shape_cast %7 : vector<1x8x4xf32> to vector<8x4xf32>
    %c0_8 = arith.constant 0 : index
    %c0_9 = arith.constant 0 : index
    %c1_10 = arith.constant 1 : index
    %9 = vector.load %arg1[%c0_8, %c0_9, %c1_10] : memref<1x4x362xf32, #tpu.memory_space<vmem>>, vector<1x4x324xf32>
    %10 = vector.shape_cast %9 : vector<1x4x324xf32> to vector<4x324xf32>
    %cst_11 = arith.constant dense<0.000000e+00> : vector<8x324xf32>
    %11 = tpu.matmul %8, %10, %cst_11 {dimension_numbers = #tpu.dot_dimension_numbers<[1], [0], [0], [1], [0, 0, 1, 1], [], []>} : vector<8x4xf32>, vector<4x324xf32>, vector<8x324xf32> -> vector<8x324xf32>
    %12 = arith.addf %6, %11 : vector<8x324xf32>
    %c2 = arith.constant 2 : index
    %c0_12 = arith.constant 0 : index
    %c0_13 = arith.constant 0 : index
    %13 = vector.load %arg2[%c2, %c0_12, %c0_13] : memref<9x8x4xf32, #tpu.memory_space<vmem>>, vector<1x8x4xf32>
    %14 = vector.shape_cast %13 : vector<1x8x4xf32> to vector<8x4xf32>
    %c0_14 = arith.constant 0 : index
    %c0_15 = arith.constant 0 : index
    %c2_16 = arith.constant 2 : index
    %15 = vector.load %arg1[%c0_14, %c0_15, %c2_16] : memref<1x4x362xf32, #tpu.memory_space<vmem>>, vector<1x4x324xf32>
    %16 = vector.shape_cast %15 : vector<1x4x324xf32> to vector<4x324xf32>
    %cst_17 = arith.constant dense<0.000000e+00> : vector<8x324xf32>
    %17 = tpu.matmul %14, %16, %cst_17 {dimension_numbers = #tpu.dot_dimension_numbers<[1], [0], [0], [1], [0, 0, 1, 1], [], []>} : vector<8x4xf32>, vector<4x324xf32>, vector<8x324xf32> -> vector<8x324xf32>
    %18 = arith.addf %12, %17 : vector<8x324xf32>
    %c3 = arith.constant 3 : index
    %c0_18 = arith.constant 0 : index
    %c0_19 = arith.constant 0 : index
    %19 = vector.load %arg2[%c3, %c0_18, %c0_19] : memref<9x8x4xf32, #tpu.memory_space<vmem>>, vector<1x8x4xf32>
    %20 = vector.shape_cast %19 : vector<1x8x4xf32> to vector<8x4xf32>
    %c0_20 = arith.constant 0 : index
    %c0_21 = arith.constant 0 : index
    %c18 = arith.constant 18 : index
    %21 = vector.load %arg1[%c0_20, %c0_21, %c18] : memref<1x4x362xf32, #tpu.memory_space<vmem>>, vector<1x4x324xf32>
    %22 = vector.shape_cast %21 : vector<1x4x324xf32> to vector<4x324xf32>
    %cst_22 = arith.constant dense<0.000000e+00> : vector<8x324xf32>
    %23 = tpu.matmul %20, %22, %cst_22 {dimension_numbers = #tpu.dot_dimension_numbers<[1], [0], [0], [1], [0, 0, 1, 1], [], []>} : vector<8x4xf32>, vector<4x324xf32>, vector<8x324xf32> -> vector<8x324xf32>
    %24 = arith.addf %18, %23 : vector<8x324xf32>
    %c4 = arith.constant 4 : index
    %c0_23 = arith.constant 0 : index
    %c0_24 = arith.constant 0 : index
    %25 = vector.load %arg2[%c4, %c0_23, %c0_24] : memref<9x8x4xf32, #tpu.memory_space<vmem>>, vector<1x8x4xf32>
    %26 = vector.shape_cast %25 : vector<1x8x4xf32> to vector<8x4xf32>
    %c0_25 = arith.constant 0 : index
    %c0_26 = arith.constant 0 : index
    %c19 = arith.constant 19 : index
    %27 = vector.load %arg1[%c0_25, %c0_26, %c19] : memref<1x4x362xf32, #tpu.memory_space<vmem>>, vector<1x4x324xf32>
    %28 = vector.shape_cast %27 : vector<1x4x324xf32> to vector<4x324xf32>
    %cst_27 = arith.constant dense<0.000000e+00> : vector<8x324xf32>
    %29 = tpu.matmul %26, %28, %cst_27 {dimension_numbers = #tpu.dot_dimension_numbers<[1], [0], [0], [1], [0, 0, 1, 1], [], []>} : vector<8x4xf32>, vector<4x324xf32>, vector<8x324xf32> -> vector<8x324xf32>
    %30 = arith.addf %24, %29 : vector<8x324xf32>
    %c5 = arith.constant 5 : index
    %c0_28 = arith.constant 0 : index
    %c0_29 = arith.constant 0 : index
    %31 = vector.load %arg2[%c5, %c0_28, %c0_29] : memref<9x8x4xf32, #tpu.memory_space<vmem>>, vector<1x8x4xf32>
    %32 = vector.shape_cast %31 : vector<1x8x4xf32> to vector<8x4xf32>
    %c0_30 = arith.constant 0 : index
    %c0_31 = arith.constant 0 : index
    %c20 = arith.constant 20 : index
    %33 = vector.load %arg1[%c0_30, %c0_31, %c20] : memref<1x4x362xf32, #tpu.memory_space<vmem>>, vector<1x4x324xf32>
    %34 = vector.shape_cast %33 : vector<1x4x324xf32> to vector<4x324xf32>
    %cst_32 = arith.constant dense<0.000000e+00> : vector<8x324xf32>
    %35 = tpu.matmul %32, %34, %cst_32 {dimension_numbers = #tpu.dot_dimension_numbers<[1], [0], [0], [1], [0, 0, 1, 1], [], []>} : vector<8x4xf32>, vector<4x324xf32>, vector<8x324xf32> -> vector<8x324xf32>
    %36 = arith.addf %30, %35 : vector<8x324xf32>
    %c6 = arith.constant 6 : index
    %c0_33 = arith.constant 0 : index
    %c0_34 = arith.constant 0 : index
    %37 = vector.load %arg2[%c6, %c0_33, %c0_34] : memref<9x8x4xf32, #tpu.memory_space<vmem>>, vector<1x8x4xf32>
    %38 = vector.shape_cast %37 : vector<1x8x4xf32> to vector<8x4xf32>
    %c0_35 = arith.constant 0 : index
    %c0_36 = arith.constant 0 : index
    %c36 = arith.constant 36 : index
    %39 = vector.load %arg1[%c0_35, %c0_36, %c36] : memref<1x4x362xf32, #tpu.memory_space<vmem>>, vector<1x4x324xf32>
    %40 = vector.shape_cast %39 : vector<1x4x324xf32> to vector<4x324xf32>
    %cst_37 = arith.constant dense<0.000000e+00> : vector<8x324xf32>
    %41 = tpu.matmul %38, %40, %cst_37 {dimension_numbers = #tpu.dot_dimension_numbers<[1], [0], [0], [1], [0, 0, 1, 1], [], []>} : vector<8x4xf32>, vector<4x324xf32>, vector<8x324xf32> -> vector<8x324xf32>
    %42 = arith.addf %36, %41 : vector<8x324xf32>
    %c7 = arith.constant 7 : index
    %c0_38 = arith.constant 0 : index
    %c0_39 = arith.constant 0 : index
    %43 = vector.load %arg2[%c7, %c0_38, %c0_39] : memref<9x8x4xf32, #tpu.memory_space<vmem>>, vector<1x8x4xf32>
    %44 = vector.shape_cast %43 : vector<1x8x4xf32> to vector<8x4xf32>
    %c0_40 = arith.constant 0 : index
    %c0_41 = arith.constant 0 : index
    %c37 = arith.constant 37 : index
    %45 = vector.load %arg1[%c0_40, %c0_41, %c37] : memref<1x4x362xf32, #tpu.memory_space<vmem>>, vector<1x4x324xf32>
    %46 = vector.shape_cast %45 : vector<1x4x324xf32> to vector<4x324xf32>
    %cst_42 = arith.constant dense<0.000000e+00> : vector<8x324xf32>
    %47 = tpu.matmul %44, %46, %cst_42 {dimension_numbers = #tpu.dot_dimension_numbers<[1], [0], [0], [1], [0, 0, 1, 1], [], []>} : vector<8x4xf32>, vector<4x324xf32>, vector<8x324xf32> -> vector<8x324xf32>
    %48 = arith.addf %42, %47 : vector<8x324xf32>
    %c8 = arith.constant 8 : index
    %c0_43 = arith.constant 0 : index
    %c0_44 = arith.constant 0 : index
    %49 = vector.load %arg2[%c8, %c0_43, %c0_44] : memref<9x8x4xf32, #tpu.memory_space<vmem>>, vector<1x8x4xf32>
    %50 = vector.shape_cast %49 : vector<1x8x4xf32> to vector<8x4xf32>
    %c0_45 = arith.constant 0 : index
    %c0_46 = arith.constant 0 : index
    %c38 = arith.constant 38 : index
    %51 = vector.load %arg1[%c0_45, %c0_46, %c38] : memref<1x4x362xf32, #tpu.memory_space<vmem>>, vector<1x4x324xf32>
    %52 = vector.shape_cast %51 : vector<1x4x324xf32> to vector<4x324xf32>
    %cst_47 = arith.constant dense<0.000000e+00> : vector<8x324xf32>
    %53 = tpu.matmul %50, %52, %cst_47 {dimension_numbers = #tpu.dot_dimension_numbers<[1], [0], [0], [1], [0, 0, 1, 1], [], []>} : vector<8x4xf32>, vector<4x324xf32>, vector<8x324xf32> -> vector<8x324xf32>
    %54 = arith.addf %48, %53 : vector<8x324xf32>
    %c0_48 = arith.constant 0 : index
    %c0_49 = arith.constant 0 : index
    %55 = vector.load %arg3[%c0_48, %c0_49] : memref<8x1xf32, #tpu.memory_space<vmem>>, vector<8x1xf32>
    %56 = vector.broadcast %55 : vector<8x1xf32> to vector<8x324xf32>
    %57 = arith.addf %54, %56 : vector<8x324xf32>
    %cst_50 = arith.constant 0.000000e+00 : f32
    %58 = vector.broadcast %cst_50 : f32 to vector<8x324xf32>
    %59 = arith.cmpf oge, %57, %58 : vector<8x324xf32>
    %c0_51 = arith.constant 0 : index
    %c0_52 = arith.constant 0 : index
    %60 = vector.load %arg4[%c0_51, %c0_52] : memref<1x1xf32, #tpu.memory_space<vmem>>, vector<1x1xf32>
    %61 = vector.broadcast %60 : vector<1x1xf32> to vector<8x324xf32>
    %62 = arith.mulf %61, %57 : vector<8x324xf32>
    %63 = arith.select %59, %57, %62 : vector<8x324xi1>, vector<8x324xf32>
    %c0_53 = arith.constant 0 : index
    %c0_54 = arith.constant 0 : index
    %64 = vector.load %arg5[%c0_53, %c0_54] : memref<1x324xf32, #tpu.memory_space<vmem>>, vector<1x324xf32>
    %65 = vector.broadcast %64 : vector<1x324xf32> to vector<8x324xf32>
    %66 = arith.mulf %63, %65 : vector<8x324xf32>
    %c0_55 = arith.constant 0 : index
    %c0_56 = arith.constant 0 : index
    %c0_57 = arith.constant 0 : index
    %67 = vector.load %arg6[%c0_55, %c0_56, %c0_57] : memref<1x8x324xf32, #tpu.memory_space<vmem>>, vector<1x8x324xf32>
    %68 = vector.shape_cast %67 : vector<1x8x324xf32> to vector<8x324xf32>
    %69 = vector.shape_cast %66 : vector<8x324xf32> to vector<1x8x324xf32>
    tpu.vector_store %arg6[%c0_55, %c0_56, %c0_57], %69 {strides = array<i32>} : memref<1x8x324xf32, #tpu.memory_space<vmem>>, vector<1x8x324xf32>,
    return
  }
  func.func @transform_0(%arg0: i32) -> (i32, i32, i32) {
    %c0_i32 = arith.constant 0 : i32
    %c0_i32_0 = arith.constant 0 : i32
    %c0_i32_1 = arith.constant 0 : i32
    return %arg0, %c0_i32, %c0_i32_0 : i32, i32, i32
  }
  func.func @transform_1(%arg0: i32) -> (i32, i32, i32) {
    %c0_i32 = arith.constant 0 : i32
    %c0_i32_0 = arith.constant 0 : i32
    %c0_i32_1 = arith.constant 0 : i32
    %c0_i32_2 = arith.constant 0 : i32
    return %c0_i32, %c0_i32_0, %c0_i32_1 : i32, i32, i32
  }
  func.func @transform_2(%arg0: i32) -> (i32, i32) {
    %c0_i32 = arith.constant 0 : i32
    %c0_i32_0 = arith.constant 0 : i32
    %c0_i32_1 = arith.constant 0 : i32
    return %c0_i32, %c0_i32_0 : i32, i32
  }
  func.func @transform_3(%arg0: i32) -> (i32, i32) {
    %c0_i32 = arith.constant 0 : i32
    %c0_i32_0 = arith.constant 0 : i32
    %c0_i32_1 = arith.constant 0 : i32
    return %c0_i32, %c0_i32_0 : i32, i32
  }
  func.func @transform_4(%arg0: i32) -> (i32, i32) {
    %c0_i32 = arith.constant 0 : i32
    %c0_i32_0 = arith.constant 0 : i32
    %c0_i32_1 = arith.constant 0 : i32
    return %c0_i32, %c0_i32_0 : i32, i32
  }
  func.func @transform_5(%arg0: i32) -> (i32, i32, i32) {
    %c0_i32 = arith.constant 0 : i32
    %c0_i32_0 = arith.constant 0 : i32
    %c0_i32_1 = arith.constant 0 : i32
    return %arg0, %c0_i32, %c0_i32_0 : i32, i32, i32
  }
}

module attributes {stable_mosaic.version = 11 : i64} {
  func.func @_proj1_gelu_kernel(%arg0: i32, %arg1: i32, %arg2: memref<1x8x256xf32, #tpu.memory_space<vmem>>, %arg3: memref<8x8xf32, #tpu.memory_space<vmem>>, %arg4: memref<8x1xf32, #tpu.memory_space<vmem>>, %arg5: memref<1x8x256xf32, #tpu.memory_space<vmem>>) attributes {dimension_semantics = [#tpu.dimension_semantics<parallel>, #tpu.dimension_semantics<parallel>], iteration_bounds = array<i64: 2, 1>, scalar_prefetch = 0 : i64, scratch_operands = 0 : i64, tpu.core_type = #tpu.core_type<tc>, window_params = [{transform_indices = @transform_0, window_bounds = array<i64: 1, 8, 256>}, {pipeline_mode = #tpu.pipeline_mode<synchronous>, transform_indices = @transform_1, window_bounds = array<i64: 8, 8>}, {pipeline_mode = #tpu.pipeline_mode<synchronous>, transform_indices = @transform_2, window_bounds = array<i64: 8, 1>}, {transform_indices = @transform_3, window_bounds = array<i64: 1, 8, 256>}]} {
    %c0 = arith.constant 0 : index
    %c0_0 = arith.constant 0 : index
    %0 = vector.load %arg3[%c0, %c0_0] : memref<8x8xf32, #tpu.memory_space<vmem>>, vector<8x8xf32>
    %c0_1 = arith.constant 0 : index
    %c0_2 = arith.constant 0 : index
    %c0_3 = arith.constant 0 : index
    %1 = vector.load %arg2[%c0_1, %c0_2, %c0_3] : memref<1x8x256xf32, #tpu.memory_space<vmem>>, vector<1x8x256xf32>
    %2 = vector.shape_cast %1 : vector<1x8x256xf32> to vector<8x256xf32>
    %cst = arith.constant dense<0.000000e+00> : vector<8x256xf32>
    %3 = tpu.matmul %0, %2, %cst {dimension_numbers = #tpu.dot_dimension_numbers<[1], [0], [0], [1], [0, 0, 1, 1], [], []>} : vector<8x8xf32>, vector<8x256xf32>, vector<8x256xf32> -> vector<8x256xf32>
    %c0_4 = arith.constant 0 : index
    %c0_5 = arith.constant 0 : index
    %4 = vector.load %arg4[%c0_4, %c0_5] : memref<8x1xf32, #tpu.memory_space<vmem>>, vector<8x1xf32>
    %5 = vector.broadcast %4 : vector<8x1xf32> to vector<8x256xf32>
    %6 = arith.addf %3, %5 : vector<8x256xf32>
    %cst_6 = arith.constant 5.000000e-01 : f32
    %7 = vector.broadcast %cst_6 : f32 to vector<8x256xf32>
    %8 = arith.mulf %7, %6 : vector<8x256xf32>
    %cst_7 = arith.constant 4.471500e-02 : f32
    %9 = vector.broadcast %cst_7 : f32 to vector<8x256xf32>
    %10 = arith.mulf %9, %6 : vector<8x256xf32>
    %11 = arith.mulf %10, %6 : vector<8x256xf32>
    %12 = arith.mulf %11, %6 : vector<8x256xf32>
    %13 = arith.addf %6, %12 : vector<8x256xf32>
    %cst_8 = arith.constant 0.797884583 : f32
    %14 = vector.broadcast %cst_8 : f32 to vector<8x256xf32>
    %15 = arith.mulf %14, %13 : vector<8x256xf32>
    %16 = math.tanh %15 : vector<8x256xf32>
    %cst_9 = arith.constant 1.000000e+00 : f32
    %17 = vector.broadcast %cst_9 : f32 to vector<8x256xf32>
    %18 = arith.addf %17, %16 : vector<8x256xf32>
    %19 = arith.mulf %8, %18 : vector<8x256xf32>
    %c0_10 = arith.constant 0 : index
    %c0_11 = arith.constant 0 : index
    %c0_12 = arith.constant 0 : index
    %20 = vector.load %arg5[%c0_10, %c0_11, %c0_12] : memref<1x8x256xf32, #tpu.memory_space<vmem>>, vector<1x8x256xf32>
    %21 = vector.shape_cast %20 : vector<1x8x256xf32> to vector<8x256xf32>
    %22 = vector.shape_cast %19 : vector<8x256xf32> to vector<1x8x256xf32>
    tpu.vector_store %arg5[%c0_10, %c0_11, %c0_12], %22 {strides = array<i32>} : memref<1x8x256xf32, #tpu.memory_space<vmem>>, vector<1x8x256xf32>,
    return
  }
  func.func @transform_0(%arg0: i32, %arg1: i32) -> (i32, i32, i32) {
    %c0_i32 = arith.constant 0 : i32
    %c0_i32_0 = arith.constant 0 : i32
    return %arg0, %c0_i32, %arg1 : i32, i32, i32
  }
  func.func @transform_1(%arg0: i32, %arg1: i32) -> (i32, i32) {
    %c0_i32 = arith.constant 0 : i32
    %c0_i32_0 = arith.constant 0 : i32
    %c0_i32_1 = arith.constant 0 : i32
    return %c0_i32, %c0_i32_0 : i32, i32
  }
  func.func @transform_2(%arg0: i32, %arg1: i32) -> (i32, i32) {
    %c0_i32 = arith.constant 0 : i32
    %c0_i32_0 = arith.constant 0 : i32
    %c0_i32_1 = arith.constant 0 : i32
    return %c0_i32, %c0_i32_0 : i32, i32
  }
  func.func @transform_3(%arg0: i32, %arg1: i32) -> (i32, i32, i32) {
    %c0_i32 = arith.constant 0 : i32
    %c0_i32_0 = arith.constant 0 : i32
    return %arg0, %c0_i32, %arg1 : i32, i32, i32
  }
}

module attributes {stable_mosaic.version = 11 : i64} {
  func.func @kernel(%arg0: i32, %arg1: i32, %arg2: memref<1x8x484xf32, #tpu.memory_space<vmem>>, %arg3: memref<8x25xf32, #tpu.memory_space<vmem>>, %arg4: memref<8x1xf32, #tpu.memory_space<vmem>>, %arg5: memref<1x8x400xf32, #tpu.memory_space<vmem>>) attributes {dimension_semantics = [#tpu.dimension_semantics<parallel>, #tpu.dimension_semantics<parallel>], iteration_bounds = array<i64: 2, 1>, scalar_prefetch = 0 : i64, scratch_operands = 0 : i64, tpu.core_type = #tpu.core_type<tc>, window_params = [{transform_indices = @transform_0, window_bounds = array<i64: 1, 8, 484>}, {transform_indices = @transform_1, window_bounds = array<i64: 8, 25>}, {transform_indices = @transform_2, window_bounds = array<i64: 8, 1>}, {transform_indices = @transform_3, window_bounds = array<i64: 1, 8, 400>}]} {
    %c0 = arith.constant 0 : index
    %c0_0 = arith.constant 0 : index
    %0 = vector.load %arg3[%c0, %c0_0] : memref<8x25xf32, #tpu.memory_space<vmem>>, vector<8x25xf32>
    %cst = arith.constant 0.000000e+00 : f32
    %1 = vector.broadcast %cst : f32 to vector<8x400xf32>
    %2 = vector.extract_strided_slice %0 {offsets = [0, 0], sizes = [8, 1], strides = [1, 1]} : vector<8x25xf32> to vector<8x1xf32>
    %c0_1 = arith.constant 0 : index
    %c0_2 = arith.constant 0 : index
    %c0_3 = arith.constant 0 : index
    %3 = vector.load %arg2[%c0_1, %c0_2, %c0_3] : memref<1x8x484xf32, #tpu.memory_space<vmem>>, vector<1x8x400xf32>
    %4 = vector.shape_cast %3 : vector<1x8x400xf32> to vector<8x400xf32>
    %5 = vector.broadcast %2 : vector<8x1xf32> to vector<8x400xf32>
    %6 = arith.mulf %5, %4 : vector<8x400xf32>
    %7 = arith.addf %1, %6 : vector<8x400xf32>
    %8 = vector.extract_strided_slice %0 {offsets = [0, 1], sizes = [8, 1], strides = [1, 1]} : vector<8x25xf32> to vector<8x1xf32>
    %c0_4 = arith.constant 0 : index
    %c0_5 = arith.constant 0 : index
    %c1 = arith.constant 1 : index
    %9 = vector.load %arg2[%c0_4, %c0_5, %c1] : memref<1x8x484xf32, #tpu.memory_space<vmem>>, vector<1x8x400xf32>
    %10 = vector.shape_cast %9 : vector<1x8x400xf32> to vector<8x400xf32>
    %11 = vector.broadcast %8 : vector<8x1xf32> to vector<8x400xf32>
    %12 = arith.mulf %11, %10 : vector<8x400xf32>
    %13 = arith.addf %7, %12 : vector<8x400xf32>
    %14 = vector.extract_strided_slice %0 {offsets = [0, 2], sizes = [8, 1], strides = [1, 1]} : vector<8x25xf32> to vector<8x1xf32>
    %c0_6 = arith.constant 0 : index
    %c0_7 = arith.constant 0 : index
    %c2 = arith.constant 2 : index
    %15 = vector.load %arg2[%c0_6, %c0_7, %c2] : memref<1x8x484xf32, #tpu.memory_space<vmem>>, vector<1x8x400xf32>
    %16 = vector.shape_cast %15 : vector<1x8x400xf32> to vector<8x400xf32>
    %17 = vector.broadcast %14 : vector<8x1xf32> to vector<8x400xf32>
    %18 = arith.mulf %17, %16 : vector<8x400xf32>
    %19 = arith.addf %13, %18 : vector<8x400xf32>
    %20 = vector.extract_strided_slice %0 {offsets = [0, 3], sizes = [8, 1], strides = [1, 1]} : vector<8x25xf32> to vector<8x1xf32>
    %c0_8 = arith.constant 0 : index
    %c0_9 = arith.constant 0 : index
    %c3 = arith.constant 3 : index
    %21 = vector.load %arg2[%c0_8, %c0_9, %c3] : memref<1x8x484xf32, #tpu.memory_space<vmem>>, vector<1x8x400xf32>
    %22 = vector.shape_cast %21 : vector<1x8x400xf32> to vector<8x400xf32>
    %23 = vector.broadcast %20 : vector<8x1xf32> to vector<8x400xf32>
    %24 = arith.mulf %23, %22 : vector<8x400xf32>
    %25 = arith.addf %19, %24 : vector<8x400xf32>
    %26 = vector.extract_strided_slice %0 {offsets = [0, 4], sizes = [8, 1], strides = [1, 1]} : vector<8x25xf32> to vector<8x1xf32>
    %c0_10 = arith.constant 0 : index
    %c0_11 = arith.constant 0 : index
    %c4 = arith.constant 4 : index
    %27 = vector.load %arg2[%c0_10, %c0_11, %c4] : memref<1x8x484xf32, #tpu.memory_space<vmem>>, vector<1x8x400xf32>
    %28 = vector.shape_cast %27 : vector<1x8x400xf32> to vector<8x400xf32>
    %29 = vector.broadcast %26 : vector<8x1xf32> to vector<8x400xf32>
    %30 = arith.mulf %29, %28 : vector<8x400xf32>
    %31 = arith.addf %25, %30 : vector<8x400xf32>
    %32 = vector.extract_strided_slice %0 {offsets = [0, 5], sizes = [8, 1], strides = [1, 1]} : vector<8x25xf32> to vector<8x1xf32>
    %c0_12 = arith.constant 0 : index
    %c0_13 = arith.constant 0 : index
    %c20 = arith.constant 20 : index
    %33 = vector.load %arg2[%c0_12, %c0_13, %c20] : memref<1x8x484xf32, #tpu.memory_space<vmem>>, vector<1x8x400xf32>
    %34 = vector.shape_cast %33 : vector<1x8x400xf32> to vector<8x400xf32>
    %35 = vector.broadcast %32 : vector<8x1xf32> to vector<8x400xf32>
    %36 = arith.mulf %35, %34 : vector<8x400xf32>
    %37 = arith.addf %31, %36 : vector<8x400xf32>
    %38 = vector.extract_strided_slice %0 {offsets = [0, 6], sizes = [8, 1], strides = [1, 1]} : vector<8x25xf32> to vector<8x1xf32>
    %c0_14 = arith.constant 0 : index
    %c0_15 = arith.constant 0 : index
    %c21 = arith.constant 21 : index
    %39 = vector.load %arg2[%c0_14, %c0_15, %c21] : memref<1x8x484xf32, #tpu.memory_space<vmem>>, vector<1x8x400xf32>
    %40 = vector.shape_cast %39 : vector<1x8x400xf32> to vector<8x400xf32>
    %41 = vector.broadcast %38 : vector<8x1xf32> to vector<8x400xf32>
    %42 = arith.mulf %41, %40 : vector<8x400xf32>
    %43 = arith.addf %37, %42 : vector<8x400xf32>
    %44 = vector.extract_strided_slice %0 {offsets = [0, 7], sizes = [8, 1], strides = [1, 1]} : vector<8x25xf32> to vector<8x1xf32>
    %c0_16 = arith.constant 0 : index
    %c0_17 = arith.constant 0 : index
    %c22 = arith.constant 22 : index
    %45 = vector.load %arg2[%c0_16, %c0_17, %c22] : memref<1x8x484xf32, #tpu.memory_space<vmem>>, vector<1x8x400xf32>
    %46 = vector.shape_cast %45 : vector<1x8x400xf32> to vector<8x400xf32>
    %47 = vector.broadcast %44 : vector<8x1xf32> to vector<8x400xf32>
    %48 = arith.mulf %47, %46 : vector<8x400xf32>
    %49 = arith.addf %43, %48 : vector<8x400xf32>
    %50 = vector.extract_strided_slice %0 {offsets = [0, 8], sizes = [8, 1], strides = [1, 1]} : vector<8x25xf32> to vector<8x1xf32>
    %c0_18 = arith.constant 0 : index
    %c0_19 = arith.constant 0 : index
    %c23 = arith.constant 23 : index
    %51 = vector.load %arg2[%c0_18, %c0_19, %c23] : memref<1x8x484xf32, #tpu.memory_space<vmem>>, vector<1x8x400xf32>
    %52 = vector.shape_cast %51 : vector<1x8x400xf32> to vector<8x400xf32>
    %53 = vector.broadcast %50 : vector<8x1xf32> to vector<8x400xf32>
    %54 = arith.mulf %53, %52 : vector<8x400xf32>
    %55 = arith.addf %49, %54 : vector<8x400xf32>
    %56 = vector.extract_strided_slice %0 {offsets = [0, 9], sizes = [8, 1], strides = [1, 1]} : vector<8x25xf32> to vector<8x1xf32>
    %c0_20 = arith.constant 0 : index
    %c0_21 = arith.constant 0 : index
    %c24 = arith.constant 24 : index
    %57 = vector.load %arg2[%c0_20, %c0_21, %c24] : memref<1x8x484xf32, #tpu.memory_space<vmem>>, vector<1x8x400xf32>
    %58 = vector.shape_cast %57 : vector<1x8x400xf32> to vector<8x400xf32>
    %59 = vector.broadcast %56 : vector<8x1xf32> to vector<8x400xf32>
    %60 = arith.mulf %59, %58 : vector<8x400xf32>
    %61 = arith.addf %55, %60 : vector<8x400xf32>
    %62 = vector.extract_strided_slice %0 {offsets = [0, 10], sizes = [8, 1], strides = [1, 1]} : vector<8x25xf32> to vector<8x1xf32>
    %c0_22 = arith.constant 0 : index
    %c0_23 = arith.constant 0 : index
    %c40 = arith.constant 40 : index
    %63 = vector.load %arg2[%c0_22, %c0_23, %c40] : memref<1x8x484xf32, #tpu.memory_space<vmem>>, vector<1x8x400xf32>
    %64 = vector.shape_cast %63 : vector<1x8x400xf32> to vector<8x400xf32>
    %65 = vector.broadcast %62 : vector<8x1xf32> to vector<8x400xf32>
    %66 = arith.mulf %65, %64 : vector<8x400xf32>
    %67 = arith.addf %61, %66 : vector<8x400xf32>
    %68 = vector.extract_strided_slice %0 {offsets = [0, 11], sizes = [8, 1], strides = [1, 1]} : vector<8x25xf32> to vector<8x1xf32>
    %c0_24 = arith.constant 0 : index
    %c0_25 = arith.constant 0 : index
    %c41 = arith.constant 41 : index
    %69 = vector.load %arg2[%c0_24, %c0_25, %c41] : memref<1x8x484xf32, #tpu.memory_space<vmem>>, vector<1x8x400xf32>
    %70 = vector.shape_cast %69 : vector<1x8x400xf32> to vector<8x400xf32>
    %71 = vector.broadcast %68 : vector<8x1xf32> to vector<8x400xf32>
    %72 = arith.mulf %71, %70 : vector<8x400xf32>
    %73 = arith.addf %67, %72 : vector<8x400xf32>
    %74 = vector.extract_strided_slice %0 {offsets = [0, 12], sizes = [8, 1], strides = [1, 1]} : vector<8x25xf32> to vector<8x1xf32>
    %c0_26 = arith.constant 0 : index
    %c0_27 = arith.constant 0 : index
    %c42 = arith.constant 42 : index
    %75 = vector.load %arg2[%c0_26, %c0_27, %c42] : memref<1x8x484xf32, #tpu.memory_space<vmem>>, vector<1x8x400xf32>
    %76 = vector.shape_cast %75 : vector<1x8x400xf32> to vector<8x400xf32>
    %77 = vector.broadcast %74 : vector<8x1xf32> to vector<8x400xf32>
    %78 = arith.mulf %77, %76 : vector<8x400xf32>
    %79 = arith.addf %73, %78 : vector<8x400xf32>
    %80 = vector.extract_strided_slice %0 {offsets = [0, 13], sizes = [8, 1], strides = [1, 1]} : vector<8x25xf32> to vector<8x1xf32>
    %c0_28 = arith.constant 0 : index
    %c0_29 = arith.constant 0 : index
    %c43 = arith.constant 43 : index
    %81 = vector.load %arg2[%c0_28, %c0_29, %c43] : memref<1x8x484xf32, #tpu.memory_space<vmem>>, vector<1x8x400xf32>
    %82 = vector.shape_cast %81 : vector<1x8x400xf32> to vector<8x400xf32>
    %83 = vector.broadcast %80 : vector<8x1xf32> to vector<8x400xf32>
    %84 = arith.mulf %83, %82 : vector<8x400xf32>
    %85 = arith.addf %79, %84 : vector<8x400xf32>
    %86 = vector.extract_strided_slice %0 {offsets = [0, 14], sizes = [8, 1], strides = [1, 1]} : vector<8x25xf32> to vector<8x1xf32>
    %c0_30 = arith.constant 0 : index
    %c0_31 = arith.constant 0 : index
    %c44 = arith.constant 44 : index
    %87 = vector.load %arg2[%c0_30, %c0_31, %c44] : memref<1x8x484xf32, #tpu.memory_space<vmem>>, vector<1x8x400xf32>
    %88 = vector.shape_cast %87 : vector<1x8x400xf32> to vector<8x400xf32>
    %89 = vector.broadcast %86 : vector<8x1xf32> to vector<8x400xf32>
    %90 = arith.mulf %89, %88 : vector<8x400xf32>
    %91 = arith.addf %85, %90 : vector<8x400xf32>
    %92 = vector.extract_strided_slice %0 {offsets = [0, 15], sizes = [8, 1], strides = [1, 1]} : vector<8x25xf32> to vector<8x1xf32>
    %c0_32 = arith.constant 0 : index
    %c0_33 = arith.constant 0 : index
    %c60 = arith.constant 60 : index
    %93 = vector.load %arg2[%c0_32, %c0_33, %c60] : memref<1x8x484xf32, #tpu.memory_space<vmem>>, vector<1x8x400xf32>
    %94 = vector.shape_cast %93 : vector<1x8x400xf32> to vector<8x400xf32>
    %95 = vector.broadcast %92 : vector<8x1xf32> to vector<8x400xf32>
    %96 = arith.mulf %95, %94 : vector<8x400xf32>
    %97 = arith.addf %91, %96 : vector<8x400xf32>
    %98 = vector.extract_strided_slice %0 {offsets = [0, 16], sizes = [8, 1], strides = [1, 1]} : vector<8x25xf32> to vector<8x1xf32>
    %c0_34 = arith.constant 0 : index
    %c0_35 = arith.constant 0 : index
    %c61 = arith.constant 61 : index
    %99 = vector.load %arg2[%c0_34, %c0_35, %c61] : memref<1x8x484xf32, #tpu.memory_space<vmem>>, vector<1x8x400xf32>
    %100 = vector.shape_cast %99 : vector<1x8x400xf32> to vector<8x400xf32>
    %101 = vector.broadcast %98 : vector<8x1xf32> to vector<8x400xf32>
    %102 = arith.mulf %101, %100 : vector<8x400xf32>
    %103 = arith.addf %97, %102 : vector<8x400xf32>
    %104 = vector.extract_strided_slice %0 {offsets = [0, 17], sizes = [8, 1], strides = [1, 1]} : vector<8x25xf32> to vector<8x1xf32>
    %c0_36 = arith.constant 0 : index
    %c0_37 = arith.constant 0 : index
    %c62 = arith.constant 62 : index
    %105 = vector.load %arg2[%c0_36, %c0_37, %c62] : memref<1x8x484xf32, #tpu.memory_space<vmem>>, vector<1x8x400xf32>
    %106 = vector.shape_cast %105 : vector<1x8x400xf32> to vector<8x400xf32>
    %107 = vector.broadcast %104 : vector<8x1xf32> to vector<8x400xf32>
    %108 = arith.mulf %107, %106 : vector<8x400xf32>
    %109 = arith.addf %103, %108 : vector<8x400xf32>
    %110 = vector.extract_strided_slice %0 {offsets = [0, 18], sizes = [8, 1], strides = [1, 1]} : vector<8x25xf32> to vector<8x1xf32>
    %c0_38 = arith.constant 0 : index
    %c0_39 = arith.constant 0 : index
    %c63 = arith.constant 63 : index
    %111 = vector.load %arg2[%c0_38, %c0_39, %c63] : memref<1x8x484xf32, #tpu.memory_space<vmem>>, vector<1x8x400xf32>
    %112 = vector.shape_cast %111 : vector<1x8x400xf32> to vector<8x400xf32>
    %113 = vector.broadcast %110 : vector<8x1xf32> to vector<8x400xf32>
    %114 = arith.mulf %113, %112 : vector<8x400xf32>
    %115 = arith.addf %109, %114 : vector<8x400xf32>
    %116 = vector.extract_strided_slice %0 {offsets = [0, 19], sizes = [8, 1], strides = [1, 1]} : vector<8x25xf32> to vector<8x1xf32>
    %c0_40 = arith.constant 0 : index
    %c0_41 = arith.constant 0 : index
    %c64 = arith.constant 64 : index
    %117 = vector.load %arg2[%c0_40, %c0_41, %c64] : memref<1x8x484xf32, #tpu.memory_space<vmem>>, vector<1x8x400xf32>
    %118 = vector.shape_cast %117 : vector<1x8x400xf32> to vector<8x400xf32>
    %119 = vector.broadcast %116 : vector<8x1xf32> to vector<8x400xf32>
    %120 = arith.mulf %119, %118 : vector<8x400xf32>
    %121 = arith.addf %115, %120 : vector<8x400xf32>
    %122 = vector.extract_strided_slice %0 {offsets = [0, 20], sizes = [8, 1], strides = [1, 1]} : vector<8x25xf32> to vector<8x1xf32>
    %c0_42 = arith.constant 0 : index
    %c0_43 = arith.constant 0 : index
    %c80 = arith.constant 80 : index
    %123 = vector.load %arg2[%c0_42, %c0_43, %c80] : memref<1x8x484xf32, #tpu.memory_space<vmem>>, vector<1x8x400xf32>
    %124 = vector.shape_cast %123 : vector<1x8x400xf32> to vector<8x400xf32>
    %125 = vector.broadcast %122 : vector<8x1xf32> to vector<8x400xf32>
    %126 = arith.mulf %125, %124 : vector<8x400xf32>
    %127 = arith.addf %121, %126 : vector<8x400xf32>
    %128 = vector.extract_strided_slice %0 {offsets = [0, 21], sizes = [8, 1], strides = [1, 1]} : vector<8x25xf32> to vector<8x1xf32>
    %c0_44 = arith.constant 0 : index
    %c0_45 = arith.constant 0 : index
    %c81 = arith.constant 81 : index
    %129 = vector.load %arg2[%c0_44, %c0_45, %c81] : memref<1x8x484xf32, #tpu.memory_space<vmem>>, vector<1x8x400xf32>
    %130 = vector.shape_cast %129 : vector<1x8x400xf32> to vector<8x400xf32>
    %131 = vector.broadcast %128 : vector<8x1xf32> to vector<8x400xf32>
    %132 = arith.mulf %131, %130 : vector<8x400xf32>
    %133 = arith.addf %127, %132 : vector<8x400xf32>
    %134 = vector.extract_strided_slice %0 {offsets = [0, 22], sizes = [8, 1], strides = [1, 1]} : vector<8x25xf32> to vector<8x1xf32>
    %c0_46 = arith.constant 0 : index
    %c0_47 = arith.constant 0 : index
    %c82 = arith.constant 82 : index
    %135 = vector.load %arg2[%c0_46, %c0_47, %c82] : memref<1x8x484xf32, #tpu.memory_space<vmem>>, vector<1x8x400xf32>
    %136 = vector.shape_cast %135 : vector<1x8x400xf32> to vector<8x400xf32>
    %137 = vector.broadcast %134 : vector<8x1xf32> to vector<8x400xf32>
    %138 = arith.mulf %137, %136 : vector<8x400xf32>
    %139 = arith.addf %133, %138 : vector<8x400xf32>
    %140 = vector.extract_strided_slice %0 {offsets = [0, 23], sizes = [8, 1], strides = [1, 1]} : vector<8x25xf32> to vector<8x1xf32>
    %c0_48 = arith.constant 0 : index
    %c0_49 = arith.constant 0 : index
    %c83 = arith.constant 83 : index
    %141 = vector.load %arg2[%c0_48, %c0_49, %c83] : memref<1x8x484xf32, #tpu.memory_space<vmem>>, vector<1x8x400xf32>
    %142 = vector.shape_cast %141 : vector<1x8x400xf32> to vector<8x400xf32>
    %143 = vector.broadcast %140 : vector<8x1xf32> to vector<8x400xf32>
    %144 = arith.mulf %143, %142 : vector<8x400xf32>
    %145 = arith.addf %139, %144 : vector<8x400xf32>
    %146 = vector.extract_strided_slice %0 {offsets = [0, 24], sizes = [8, 1], strides = [1, 1]} : vector<8x25xf32> to vector<8x1xf32>
    %c0_50 = arith.constant 0 : index
    %c0_51 = arith.constant 0 : index
    %c84 = arith.constant 84 : index
    %147 = vector.load %arg2[%c0_50, %c0_51, %c84] : memref<1x8x484xf32, #tpu.memory_space<vmem>>, vector<1x8x400xf32>
    %148 = vector.shape_cast %147 : vector<1x8x400xf32> to vector<8x400xf32>
    %149 = vector.broadcast %146 : vector<8x1xf32> to vector<8x400xf32>
    %150 = arith.mulf %149, %148 : vector<8x400xf32>
    %151 = arith.addf %145, %150 : vector<8x400xf32>
    %c0_52 = arith.constant 0 : index
    %c0_53 = arith.constant 0 : index
    %152 = vector.load %arg4[%c0_52, %c0_53] : memref<8x1xf32, #tpu.memory_space<vmem>>, vector<8x1xf32>
    %153 = vector.broadcast %152 : vector<8x1xf32> to vector<8x400xf32>
    %154 = arith.addf %151, %153 : vector<8x400xf32>
    %c0_54 = arith.constant 0 : index
    %c0_55 = arith.constant 0 : index
    %c0_56 = arith.constant 0 : index
    %155 = vector.load %arg5[%c0_54, %c0_55, %c0_56] : memref<1x8x400xf32, #tpu.memory_space<vmem>>, vector<1x8x400xf32>
    %156 = vector.shape_cast %155 : vector<1x8x400xf32> to vector<8x400xf32>
    %157 = vector.shape_cast %154 : vector<8x400xf32> to vector<1x8x400xf32>
    tpu.vector_store %arg5[%c0_54, %c0_55, %c0_56], %157 {strides = array<i32>} : memref<1x8x400xf32, #tpu.memory_space<vmem>>, vector<1x8x400xf32>,
    return
  }
  func.func @transform_0(%arg0: i32, %arg1: i32) -> (i32, i32, i32) {
    %c0_i32 = arith.constant 0 : i32
    %c0_i32_0 = arith.constant 0 : i32
    return %arg0, %arg1, %c0_i32 : i32, i32, i32
  }
  func.func @transform_1(%arg0: i32, %arg1: i32) -> (i32, i32) {
    %c0_i32 = arith.constant 0 : i32
    %c0_i32_0 = arith.constant 0 : i32
    return %arg1, %c0_i32 : i32, i32
  }
  func.func @transform_2(%arg0: i32, %arg1: i32) -> (i32, i32) {
    %c0_i32 = arith.constant 0 : i32
    %c0_i32_0 = arith.constant 0 : i32
    return %arg1, %c0_i32 : i32, i32
  }
  func.func @transform_3(%arg0: i32, %arg1: i32) -> (i32, i32, i32) {
    %c0_i32 = arith.constant 0 : i32
    %c0_i32_0 = arith.constant 0 : i32
    return %arg0, %arg1, %c0_i32 : i32, i32, i32
  }
}

module attributes {stable_mosaic.version = 11 : i64} {
  func.func @kernel(%arg0: i32, %arg1: i32, %arg2: memref<1x8x1786xf32, #tpu.memory_space<vmem>>, %arg3: memref<8x49xf32, #tpu.memory_space<vmem>>, %arg4: memref<8x1xf32, #tpu.memory_space<vmem>>, %arg5: memref<1x8x1156xf32, #tpu.memory_space<vmem>>) attributes {dimension_semantics = [#tpu.dimension_semantics<parallel>, #tpu.dimension_semantics<parallel>], iteration_bounds = array<i64: 2, 1>, scalar_prefetch = 0 : i64, scratch_operands = 0 : i64, tpu.core_type = #tpu.core_type<tc>, window_params = [{transform_indices = @transform_0, window_bounds = array<i64: 1, 8, 1786>}, {transform_indices = @transform_1, window_bounds = array<i64: 8, 49>}, {transform_indices = @transform_2, window_bounds = array<i64: 8, 1>}, {transform_indices = @transform_3, window_bounds = array<i64: 1, 8, 1156>}]} {
    %c0 = arith.constant 0 : index
    %c0_0 = arith.constant 0 : index
    %0 = vector.load %arg3[%c0, %c0_0] : memref<8x49xf32, #tpu.memory_space<vmem>>, vector<8x49xf32>
    %cst = arith.constant 0.000000e+00 : f32
    %1 = vector.broadcast %cst : f32 to vector<8x1156xf32>
    %2 = vector.extract_strided_slice %0 {offsets = [0, 0], sizes = [8, 1], strides = [1, 1]} : vector<8x49xf32> to vector<8x1xf32>
    %c0_1 = arith.constant 0 : index
    %c0_2 = arith.constant 0 : index
    %c0_3 = arith.constant 0 : index
    %3 = vector.load %arg2[%c0_1, %c0_2, %c0_3] : memref<1x8x1786xf32, #tpu.memory_space<vmem>>, vector<1x8x1156xf32>
    %4 = vector.shape_cast %3 : vector<1x8x1156xf32> to vector<8x1156xf32>
    %5 = vector.broadcast %2 : vector<8x1xf32> to vector<8x1156xf32>
    %6 = arith.mulf %5, %4 : vector<8x1156xf32>
    %7 = arith.addf %1, %6 : vector<8x1156xf32>
    %8 = vector.extract_strided_slice %0 {offsets = [0, 1], sizes = [8, 1], strides = [1, 1]} : vector<8x49xf32> to vector<8x1xf32>
    %c0_4 = arith.constant 0 : index
    %c0_5 = arith.constant 0 : index
    %c3 = arith.constant 3 : index
    %9 = vector.load %arg2[%c0_4, %c0_5, %c3] : memref<1x8x1786xf32, #tpu.memory_space<vmem>>, vector<1x8x1156xf32>
    %10 = vector.shape_cast %9 : vector<1x8x1156xf32> to vector<8x1156xf32>
    %11 = vector.broadcast %8 : vector<8x1xf32> to vector<8x1156xf32>
    %12 = arith.mulf %11, %10 : vector<8x1156xf32>
    %13 = arith.addf %7, %12 : vector<8x1156xf32>
    %14 = vector.extract_strided_slice %0 {offsets = [0, 2], sizes = [8, 1], strides = [1, 1]} : vector<8x49xf32> to vector<8x1xf32>
    %c0_6 = arith.constant 0 : index
    %c0_7 = arith.constant 0 : index
    %c6 = arith.constant 6 : index
    %15 = vector.load %arg2[%c0_6, %c0_7, %c6] : memref<1x8x1786xf32, #tpu.memory_space<vmem>>, vector<1x8x1156xf32>
    %16 = vector.shape_cast %15 : vector<1x8x1156xf32> to vector<8x1156xf32>
    %17 = vector.broadcast %14 : vector<8x1xf32> to vector<8x1156xf32>
    %18 = arith.mulf %17, %16 : vector<8x1156xf32>
    %19 = arith.addf %13, %18 : vector<8x1156xf32>
    %20 = vector.extract_strided_slice %0 {offsets = [0, 3], sizes = [8, 1], strides = [1, 1]} : vector<8x49xf32> to vector<8x1xf32>
    %c0_8 = arith.constant 0 : index
    %c0_9 = arith.constant 0 : index
    %c9 = arith.constant 9 : index
    %21 = vector.load %arg2[%c0_8, %c0_9, %c9] : memref<1x8x1786xf32, #tpu.memory_space<vmem>>, vector<1x8x1156xf32>
    %22 = vector.shape_cast %21 : vector<1x8x1156xf32> to vector<8x1156xf32>
    %23 = vector.broadcast %20 : vector<8x1xf32> to vector<8x1156xf32>
    %24 = arith.mulf %23, %22 : vector<8x1156xf32>
    %25 = arith.addf %19, %24 : vector<8x1156xf32>
    %26 = vector.extract_strided_slice %0 {offsets = [0, 4], sizes = [8, 1], strides = [1, 1]} : vector<8x49xf32> to vector<8x1xf32>
    %c0_10 = arith.constant 0 : index
    %c0_11 = arith.constant 0 : index
    %c12 = arith.constant 12 : index
    %27 = vector.load %arg2[%c0_10, %c0_11, %c12] : memref<1x8x1786xf32, #tpu.memory_space<vmem>>, vector<1x8x1156xf32>
    %28 = vector.shape_cast %27 : vector<1x8x1156xf32> to vector<8x1156xf32>
    %29 = vector.broadcast %26 : vector<8x1xf32> to vector<8x1156xf32>
    %30 = arith.mulf %29, %28 : vector<8x1156xf32>
    %31 = arith.addf %25, %30 : vector<8x1156xf32>
    %32 = vector.extract_strided_slice %0 {offsets = [0, 5], sizes = [8, 1], strides = [1, 1]} : vector<8x49xf32> to vector<8x1xf32>
    %c0_12 = arith.constant 0 : index
    %c0_13 = arith.constant 0 : index
    %c15 = arith.constant 15 : index
    %33 = vector.load %arg2[%c0_12, %c0_13, %c15] : memref<1x8x1786xf32, #tpu.memory_space<vmem>>, vector<1x8x1156xf32>
    %34 = vector.shape_cast %33 : vector<1x8x1156xf32> to vector<8x1156xf32>
    %35 = vector.broadcast %32 : vector<8x1xf32> to vector<8x1156xf32>
    %36 = arith.mulf %35, %34 : vector<8x1156xf32>
    %37 = arith.addf %31, %36 : vector<8x1156xf32>
    %38 = vector.extract_strided_slice %0 {offsets = [0, 6], sizes = [8, 1], strides = [1, 1]} : vector<8x49xf32> to vector<8x1xf32>
    %c0_14 = arith.constant 0 : index
    %c0_15 = arith.constant 0 : index
    %c18 = arith.constant 18 : index
    %39 = vector.load %arg2[%c0_14, %c0_15, %c18] : memref<1x8x1786xf32, #tpu.memory_space<vmem>>, vector<1x8x1156xf32>
    %40 = vector.shape_cast %39 : vector<1x8x1156xf32> to vector<8x1156xf32>
    %41 = vector.broadcast %38 : vector<8x1xf32> to vector<8x1156xf32>
    %42 = arith.mulf %41, %40 : vector<8x1156xf32>
    %43 = arith.addf %37, %42 : vector<8x1156xf32>
    %44 = vector.extract_strided_slice %0 {offsets = [0, 7], sizes = [8, 1], strides = [1, 1]} : vector<8x49xf32> to vector<8x1xf32>
    %c0_16 = arith.constant 0 : index
    %c0_17 = arith.constant 0 : index
    %c102 = arith.constant 102 : index
    %45 = vector.load %arg2[%c0_16, %c0_17, %c102] : memref<1x8x1786xf32, #tpu.memory_space<vmem>>, vector<1x8x1156xf32>
    %46 = vector.shape_cast %45 : vector<1x8x1156xf32> to vector<8x1156xf32>
    %47 = vector.broadcast %44 : vector<8x1xf32> to vector<8x1156xf32>
    %48 = arith.mulf %47, %46 : vector<8x1156xf32>
    %49 = arith.addf %43, %48 : vector<8x1156xf32>
    %50 = vector.extract_strided_slice %0 {offsets = [0, 8], sizes = [8, 1], strides = [1, 1]} : vector<8x49xf32> to vector<8x1xf32>
    %c0_18 = arith.constant 0 : index
    %c0_19 = arith.constant 0 : index
    %c105 = arith.constant 105 : index
    %51 = vector.load %arg2[%c0_18, %c0_19, %c105] : memref<1x8x1786xf32, #tpu.memory_space<vmem>>, vector<1x8x1156xf32>
    %52 = vector.shape_cast %51 : vector<1x8x1156xf32> to vector<8x1156xf32>
    %53 = vector.broadcast %50 : vector<8x1xf32> to vector<8x1156xf32>
    %54 = arith.mulf %53, %52 : vector<8x1156xf32>
    %55 = arith.addf %49, %54 : vector<8x1156xf32>
    %56 = vector.extract_strided_slice %0 {offsets = [0, 9], sizes = [8, 1], strides = [1, 1]} : vector<8x49xf32> to vector<8x1xf32>
    %c0_20 = arith.constant 0 : index
    %c0_21 = arith.constant 0 : index
    %c108 = arith.constant 108 : index
    %57 = vector.load %arg2[%c0_20, %c0_21, %c108] : memref<1x8x1786xf32, #tpu.memory_space<vmem>>, vector<1x8x1156xf32>
    %58 = vector.shape_cast %57 : vector<1x8x1156xf32> to vector<8x1156xf32>
    %59 = vector.broadcast %56 : vector<8x1xf32> to vector<8x1156xf32>
    %60 = arith.mulf %59, %58 : vector<8x1156xf32>
    %61 = arith.addf %55, %60 : vector<8x1156xf32>
    %62 = vector.extract_strided_slice %0 {offsets = [0, 10], sizes = [8, 1], strides = [1, 1]} : vector<8x49xf32> to vector<8x1xf32>
    %c0_22 = arith.constant 0 : index
    %c0_23 = arith.constant 0 : index
    %c111 = arith.constant 111 : index
    %63 = vector.load %arg2[%c0_22, %c0_23, %c111] : memref<1x8x1786xf32, #tpu.memory_space<vmem>>, vector<1x8x1156xf32>
    %64 = vector.shape_cast %63 : vector<1x8x1156xf32> to vector<8x1156xf32>
    %65 = vector.broadcast %62 : vector<8x1xf32> to vector<8x1156xf32>
    %66 = arith.mulf %65, %64 : vector<8x1156xf32>
    %67 = arith.addf %61, %66 : vector<8x1156xf32>
    %68 = vector.extract_strided_slice %0 {offsets = [0, 11], sizes = [8, 1], strides = [1, 1]} : vector<8x49xf32> to vector<8x1xf32>
    %c0_24 = arith.constant 0 : index
    %c0_25 = arith.constant 0 : index
    %c114 = arith.constant 114 : index
    %69 = vector.load %arg2[%c0_24, %c0_25, %c114] : memref<1x8x1786xf32, #tpu.memory_space<vmem>>, vector<1x8x1156xf32>
    %70 = vector.shape_cast %69 : vector<1x8x1156xf32> to vector<8x1156xf32>
    %71 = vector.broadcast %68 : vector<8x1xf32> to vector<8x1156xf32>
    %72 = arith.mulf %71, %70 : vector<8x1156xf32>
    %73 = arith.addf %67, %72 : vector<8x1156xf32>
    %74 = vector.extract_strided_slice %0 {offsets = [0, 12], sizes = [8, 1], strides = [1, 1]} : vector<8x49xf32> to vector<8x1xf32>
    %c0_26 = arith.constant 0 : index
    %c0_27 = arith.constant 0 : index
    %c117 = arith.constant 117 : index
    %75 = vector.load %arg2[%c0_26, %c0_27, %c117] : memref<1x8x1786xf32, #tpu.memory_space<vmem>>, vector<1x8x1156xf32>
    %76 = vector.shape_cast %75 : vector<1x8x1156xf32> to vector<8x1156xf32>
    %77 = vector.broadcast %74 : vector<8x1xf32> to vector<8x1156xf32>
    %78 = arith.mulf %77, %76 : vector<8x1156xf32>
    %79 = arith.addf %73, %78 : vector<8x1156xf32>
    %80 = vector.extract_strided_slice %0 {offsets = [0, 13], sizes = [8, 1], strides = [1, 1]} : vector<8x49xf32> to vector<8x1xf32>
    %c0_28 = arith.constant 0 : index
    %c0_29 = arith.constant 0 : index
    %c120 = arith.constant 120 : index
    %81 = vector.load %arg2[%c0_28, %c0_29, %c120] : memref<1x8x1786xf32, #tpu.memory_space<vmem>>, vector<1x8x1156xf32>
    %82 = vector.shape_cast %81 : vector<1x8x1156xf32> to vector<8x1156xf32>
    %83 = vector.broadcast %80 : vector<8x1xf32> to vector<8x1156xf32>
    %84 = arith.mulf %83, %82 : vector<8x1156xf32>
    %85 = arith.addf %79, %84 : vector<8x1156xf32>
    %86 = vector.extract_strided_slice %0 {offsets = [0, 14], sizes = [8, 1], strides = [1, 1]} : vector<8x49xf32> to vector<8x1xf32>
    %c0_30 = arith.constant 0 : index
    %c0_31 = arith.constant 0 : index
    %c204 = arith.constant 204 : index
    %87 = vector.load %arg2[%c0_30, %c0_31, %c204] : memref<1x8x1786xf32, #tpu.memory_space<vmem>>, vector<1x8x1156xf32>
    %88 = vector.shape_cast %87 : vector<1x8x1156xf32> to vector<8x1156xf32>
    %89 = vector.broadcast %86 : vector<8x1xf32> to vector<8x1156xf32>
    %90 = arith.mulf %89, %88 : vector<8x1156xf32>
    %91 = arith.addf %85, %90 : vector<8x1156xf32>
    %92 = vector.extract_strided_slice %0 {offsets = [0, 15], sizes = [8, 1], strides = [1, 1]} : vector<8x49xf32> to vector<8x1xf32>
    %c0_32 = arith.constant 0 : index
    %c0_33 = arith.constant 0 : index
    %c207 = arith.constant 207 : index
    %93 = vector.load %arg2[%c0_32, %c0_33, %c207] : memref<1x8x1786xf32, #tpu.memory_space<vmem>>, vector<1x8x1156xf32>
    %94 = vector.shape_cast %93 : vector<1x8x1156xf32> to vector<8x1156xf32>
    %95 = vector.broadcast %92 : vector<8x1xf32> to vector<8x1156xf32>
    %96 = arith.mulf %95, %94 : vector<8x1156xf32>
    %97 = arith.addf %91, %96 : vector<8x1156xf32>
    %98 = vector.extract_strided_slice %0 {offsets = [0, 16], sizes = [8, 1], strides = [1, 1]} : vector<8x49xf32> to vector<8x1xf32>
    %c0_34 = arith.constant 0 : index
    %c0_35 = arith.constant 0 : index
    %c210 = arith.constant 210 : index
    %99 = vector.load %arg2[%c0_34, %c0_35, %c210] : memref<1x8x1786xf32, #tpu.memory_space<vmem>>, vector<1x8x1156xf32>
    %100 = vector.shape_cast %99 : vector<1x8x1156xf32> to vector<8x1156xf32>
    %101 = vector.broadcast %98 : vector<8x1xf32> to vector<8x1156xf32>
    %102 = arith.mulf %101, %100 : vector<8x1156xf32>
    %103 = arith.addf %97, %102 : vector<8x1156xf32>
    %104 = vector.extract_strided_slice %0 {offsets = [0, 17], sizes = [8, 1], strides = [1, 1]} : vector<8x49xf32> to vector<8x1xf32>
    %c0_36 = arith.constant 0 : index
    %c0_37 = arith.constant 0 : index
    %c213 = arith.constant 213 : index
    %105 = vector.load %arg2[%c0_36, %c0_37, %c213] : memref<1x8x1786xf32, #tpu.memory_space<vmem>>, vector<1x8x1156xf32>
    %106 = vector.shape_cast %105 : vector<1x8x1156xf32> to vector<8x1156xf32>
    %107 = vector.broadcast %104 : vector<8x1xf32> to vector<8x1156xf32>
    %108 = arith.mulf %107, %106 : vector<8x1156xf32>
    %109 = arith.addf %103, %108 : vector<8x1156xf32>
    %110 = vector.extract_strided_slice %0 {offsets = [0, 18], sizes = [8, 1], strides = [1, 1]} : vector<8x49xf32> to vector<8x1xf32>
    %c0_38 = arith.constant 0 : index
    %c0_39 = arith.constant 0 : index
    %c216 = arith.constant 216 : index
    %111 = vector.load %arg2[%c0_38, %c0_39, %c216] : memref<1x8x1786xf32, #tpu.memory_space<vmem>>, vector<1x8x1156xf32>
    %112 = vector.shape_cast %111 : vector<1x8x1156xf32> to vector<8x1156xf32>
    %113 = vector.broadcast %110 : vector<8x1xf32> to vector<8x1156xf32>
    %114 = arith.mulf %113, %112 : vector<8x1156xf32>
    %115 = arith.addf %109, %114 : vector<8x1156xf32>
    %116 = vector.extract_strided_slice %0 {offsets = [0, 19], sizes = [8, 1], strides = [1, 1]} : vector<8x49xf32> to vector<8x1xf32>
    %c0_40 = arith.constant 0 : index
    %c0_41 = arith.constant 0 : index
    %c219 = arith.constant 219 : index
    %117 = vector.load %arg2[%c0_40, %c0_41, %c219] : memref<1x8x1786xf32, #tpu.memory_space<vmem>>, vector<1x8x1156xf32>
    %118 = vector.shape_cast %117 : vector<1x8x1156xf32> to vector<8x1156xf32>
    %119 = vector.broadcast %116 : vector<8x1xf32> to vector<8x1156xf32>
    %120 = arith.mulf %119, %118 : vector<8x1156xf32>
    %121 = arith.addf %115, %120 : vector<8x1156xf32>
    %122 = vector.extract_strided_slice %0 {offsets = [0, 20], sizes = [8, 1], strides = [1, 1]} : vector<8x49xf32> to vector<8x1xf32>
    %c0_42 = arith.constant 0 : index
    %c0_43 = arith.constant 0 : index
    %c222 = arith.constant 222 : index
    %123 = vector.load %arg2[%c0_42, %c0_43, %c222] : memref<1x8x1786xf32, #tpu.memory_space<vmem>>, vector<1x8x1156xf32>
    %124 = vector.shape_cast %123 : vector<1x8x1156xf32> to vector<8x1156xf32>
    %125 = vector.broadcast %122 : vector<8x1xf32> to vector<8x1156xf32>
    %126 = arith.mulf %125, %124 : vector<8x1156xf32>
    %127 = arith.addf %121, %126 : vector<8x1156xf32>
    %128 = vector.extract_strided_slice %0 {offsets = [0, 21], sizes = [8, 1], strides = [1, 1]} : vector<8x49xf32> to vector<8x1xf32>
    %c0_44 = arith.constant 0 : index
    %c0_45 = arith.constant 0 : index
    %c306 = arith.constant 306 : index
    %129 = vector.load %arg2[%c0_44, %c0_45, %c306] : memref<1x8x1786xf32, #tpu.memory_space<vmem>>, vector<1x8x1156xf32>
    %130 = vector.shape_cast %129 : vector<1x8x1156xf32> to vector<8x1156xf32>
    %131 = vector.broadcast %128 : vector<8x1xf32> to vector<8x1156xf32>
    %132 = arith.mulf %131, %130 : vector<8x1156xf32>
    %133 = arith.addf %127, %132 : vector<8x1156xf32>
    %134 = vector.extract_strided_slice %0 {offsets = [0, 22], sizes = [8, 1], strides = [1, 1]} : vector<8x49xf32> to vector<8x1xf32>
    %c0_46 = arith.constant 0 : index
    %c0_47 = arith.constant 0 : index
    %c309 = arith.constant 309 : index
    %135 = vector.load %arg2[%c0_46, %c0_47, %c309] : memref<1x8x1786xf32, #tpu.memory_space<vmem>>, vector<1x8x1156xf32>
    %136 = vector.shape_cast %135 : vector<1x8x1156xf32> to vector<8x1156xf32>
    %137 = vector.broadcast %134 : vector<8x1xf32> to vector<8x1156xf32>
    %138 = arith.mulf %137, %136 : vector<8x1156xf32>
    %139 = arith.addf %133, %138 : vector<8x1156xf32>
    %140 = vector.extract_strided_slice %0 {offsets = [0, 23], sizes = [8, 1], strides = [1, 1]} : vector<8x49xf32> to vector<8x1xf32>
    %c0_48 = arith.constant 0 : index
    %c0_49 = arith.constant 0 : index
    %c312 = arith.constant 312 : index
    %141 = vector.load %arg2[%c0_48, %c0_49, %c312] : memref<1x8x1786xf32, #tpu.memory_space<vmem>>, vector<1x8x1156xf32>
    %142 = vector.shape_cast %141 : vector<1x8x1156xf32> to vector<8x1156xf32>
    %143 = vector.broadcast %140 : vector<8x1xf32> to vector<8x1156xf32>
    %144 = arith.mulf %143, %142 : vector<8x1156xf32>
    %145 = arith.addf %139, %144 : vector<8x1156xf32>
    %146 = vector.extract_strided_slice %0 {offsets = [0, 24], sizes = [8, 1], strides = [1, 1]} : vector<8x49xf32> to vector<8x1xf32>
    %c0_50 = arith.constant 0 : index
    %c0_51 = arith.constant 0 : index
    %c315 = arith.constant 315 : index
    %147 = vector.load %arg2[%c0_50, %c0_51, %c315] : memref<1x8x1786xf32, #tpu.memory_space<vmem>>, vector<1x8x1156xf32>
    %148 = vector.shape_cast %147 : vector<1x8x1156xf32> to vector<8x1156xf32>
    %149 = vector.broadcast %146 : vector<8x1xf32> to vector<8x1156xf32>
    %150 = arith.mulf %149, %148 : vector<8x1156xf32>
    %151 = arith.addf %145, %150 : vector<8x1156xf32>
    %152 = vector.extract_strided_slice %0 {offsets = [0, 25], sizes = [8, 1], strides = [1, 1]} : vector<8x49xf32> to vector<8x1xf32>
    %c0_52 = arith.constant 0 : index
    %c0_53 = arith.constant 0 : index
    %c318 = arith.constant 318 : index
    %153 = vector.load %arg2[%c0_52, %c0_53, %c318] : memref<1x8x1786xf32, #tpu.memory_space<vmem>>, vector<1x8x1156xf32>
    %154 = vector.shape_cast %153 : vector<1x8x1156xf32> to vector<8x1156xf32>
    %155 = vector.broadcast %152 : vector<8x1xf32> to vector<8x1156xf32>
    %156 = arith.mulf %155, %154 : vector<8x1156xf32>
    %157 = arith.addf %151, %156 : vector<8x1156xf32>
    %158 = vector.extract_strided_slice %0 {offsets = [0, 26], sizes = [8, 1], strides = [1, 1]} : vector<8x49xf32> to vector<8x1xf32>
    %c0_54 = arith.constant 0 : index
    %c0_55 = arith.constant 0 : index
    %c321 = arith.constant 321 : index
    %159 = vector.load %arg2[%c0_54, %c0_55, %c321] : memref<1x8x1786xf32, #tpu.memory_space<vmem>>, vector<1x8x1156xf32>
    %160 = vector.shape_cast %159 : vector<1x8x1156xf32> to vector<8x1156xf32>
    %161 = vector.broadcast %158 : vector<8x1xf32> to vector<8x1156xf32>
    %162 = arith.mulf %161, %160 : vector<8x1156xf32>
    %163 = arith.addf %157, %162 : vector<8x1156xf32>
    %164 = vector.extract_strided_slice %0 {offsets = [0, 27], sizes = [8, 1], strides = [1, 1]} : vector<8x49xf32> to vector<8x1xf32>
    %c0_56 = arith.constant 0 : index
    %c0_57 = arith.constant 0 : index
    %c324 = arith.constant 324 : index
    %165 = vector.load %arg2[%c0_56, %c0_57, %c324] : memref<1x8x1786xf32, #tpu.memory_space<vmem>>, vector<1x8x1156xf32>
    %166 = vector.shape_cast %165 : vector<1x8x1156xf32> to vector<8x1156xf32>
    %167 = vector.broadcast %164 : vector<8x1xf32> to vector<8x1156xf32>
    %168 = arith.mulf %167, %166 : vector<8x1156xf32>
    %169 = arith.addf %163, %168 : vector<8x1156xf32>
    %170 = vector.extract_strided_slice %0 {offsets = [0, 28], sizes = [8, 1], strides = [1, 1]} : vector<8x49xf32> to vector<8x1xf32>
    %c0_58 = arith.constant 0 : index
    %c0_59 = arith.constant 0 : index
    %c408 = arith.constant 408 : index
    %171 = vector.load %arg2[%c0_58, %c0_59, %c408] : memref<1x8x1786xf32, #tpu.memory_space<vmem>>, vector<1x8x1156xf32>
    %172 = vector.shape_cast %171 : vector<1x8x1156xf32> to vector<8x1156xf32>
    %173 = vector.broadcast %170 : vector<8x1xf32> to vector<8x1156xf32>
    %174 = arith.mulf %173, %172 : vector<8x1156xf32>
    %175 = arith.addf %169, %174 : vector<8x1156xf32>
    %176 = vector.extract_strided_slice %0 {offsets = [0, 29], sizes = [8, 1], strides = [1, 1]} : vector<8x49xf32> to vector<8x1xf32>
    %c0_60 = arith.constant 0 : index
    %c0_61 = arith.constant 0 : index
    %c411 = arith.constant 411 : index
    %177 = vector.load %arg2[%c0_60, %c0_61, %c411] : memref<1x8x1786xf32, #tpu.memory_space<vmem>>, vector<1x8x1156xf32>
    %178 = vector.shape_cast %177 : vector<1x8x1156xf32> to vector<8x1156xf32>
    %179 = vector.broadcast %176 : vector<8x1xf32> to vector<8x1156xf32>
    %180 = arith.mulf %179, %178 : vector<8x1156xf32>
    %181 = arith.addf %175, %180 : vector<8x1156xf32>
    %182 = vector.extract_strided_slice %0 {offsets = [0, 30], sizes = [8, 1], strides = [1, 1]} : vector<8x49xf32> to vector<8x1xf32>
    %c0_62 = arith.constant 0 : index
    %c0_63 = arith.constant 0 : index
    %c414 = arith.constant 414 : index
    %183 = vector.load %arg2[%c0_62, %c0_63, %c414] : memref<1x8x1786xf32, #tpu.memory_space<vmem>>, vector<1x8x1156xf32>
    %184 = vector.shape_cast %183 : vector<1x8x1156xf32> to vector<8x1156xf32>
    %185 = vector.broadcast %182 : vector<8x1xf32> to vector<8x1156xf32>
    %186 = arith.mulf %185, %184 : vector<8x1156xf32>
    %187 = arith.addf %181, %186 : vector<8x1156xf32>
    %188 = vector.extract_strided_slice %0 {offsets = [0, 31], sizes = [8, 1], strides = [1, 1]} : vector<8x49xf32> to vector<8x1xf32>
    %c0_64 = arith.constant 0 : index
    %c0_65 = arith.constant 0 : index
    %c417 = arith.constant 417 : index
    %189 = vector.load %arg2[%c0_64, %c0_65, %c417] : memref<1x8x1786xf32, #tpu.memory_space<vmem>>, vector<1x8x1156xf32>
    %190 = vector.shape_cast %189 : vector<1x8x1156xf32> to vector<8x1156xf32>
    %191 = vector.broadcast %188 : vector<8x1xf32> to vector<8x1156xf32>
    %192 = arith.mulf %191, %190 : vector<8x1156xf32>
    %193 = arith.addf %187, %192 : vector<8x1156xf32>
    %194 = vector.extract_strided_slice %0 {offsets = [0, 32], sizes = [8, 1], strides = [1, 1]} : vector<8x49xf32> to vector<8x1xf32>
    %c0_66 = arith.constant 0 : index
    %c0_67 = arith.constant 0 : index
    %c420 = arith.constant 420 : index
    %195 = vector.load %arg2[%c0_66, %c0_67, %c420] : memref<1x8x1786xf32, #tpu.memory_space<vmem>>, vector<1x8x1156xf32>
    %196 = vector.shape_cast %195 : vector<1x8x1156xf32> to vector<8x1156xf32>
    %197 = vector.broadcast %194 : vector<8x1xf32> to vector<8x1156xf32>
    %198 = arith.mulf %197, %196 : vector<8x1156xf32>
    %199 = arith.addf %193, %198 : vector<8x1156xf32>
    %200 = vector.extract_strided_slice %0 {offsets = [0, 33], sizes = [8, 1], strides = [1, 1]} : vector<8x49xf32> to vector<8x1xf32>
    %c0_68 = arith.constant 0 : index
    %c0_69 = arith.constant 0 : index
    %c423 = arith.constant 423 : index
    %201 = vector.load %arg2[%c0_68, %c0_69, %c423] : memref<1x8x1786xf32, #tpu.memory_space<vmem>>, vector<1x8x1156xf32>
    %202 = vector.shape_cast %201 : vector<1x8x1156xf32> to vector<8x1156xf32>
    %203 = vector.broadcast %200 : vector<8x1xf32> to vector<8x1156xf32>
    %204 = arith.mulf %203, %202 : vector<8x1156xf32>
    %205 = arith.addf %199, %204 : vector<8x1156xf32>
    %206 = vector.extract_strided_slice %0 {offsets = [0, 34], sizes = [8, 1], strides = [1, 1]} : vector<8x49xf32> to vector<8x1xf32>
    %c0_70 = arith.constant 0 : index
    %c0_71 = arith.constant 0 : index
    %c426 = arith.constant 426 : index
    %207 = vector.load %arg2[%c0_70, %c0_71, %c426] : memref<1x8x1786xf32, #tpu.memory_space<vmem>>, vector<1x8x1156xf32>
    %208 = vector.shape_cast %207 : vector<1x8x1156xf32> to vector<8x1156xf32>
    %209 = vector.broadcast %206 : vector<8x1xf32> to vector<8x1156xf32>
    %210 = arith.mulf %209, %208 : vector<8x1156xf32>
    %211 = arith.addf %205, %210 : vector<8x1156xf32>
    %212 = vector.extract_strided_slice %0 {offsets = [0, 35], sizes = [8, 1], strides = [1, 1]} : vector<8x49xf32> to vector<8x1xf32>
    %c0_72 = arith.constant 0 : index
    %c0_73 = arith.constant 0 : index
    %c510 = arith.constant 510 : index
    %213 = vector.load %arg2[%c0_72, %c0_73, %c510] : memref<1x8x1786xf32, #tpu.memory_space<vmem>>, vector<1x8x1156xf32>
    %214 = vector.shape_cast %213 : vector<1x8x1156xf32> to vector<8x1156xf32>
    %215 = vector.broadcast %212 : vector<8x1xf32> to vector<8x1156xf32>
    %216 = arith.mulf %215, %214 : vector<8x1156xf32>
    %217 = arith.addf %211, %216 : vector<8x1156xf32>
    %218 = vector.extract_strided_slice %0 {offsets = [0, 36], sizes = [8, 1], strides = [1, 1]} : vector<8x49xf32> to vector<8x1xf32>
    %c0_74 = arith.constant 0 : index
    %c0_75 = arith.constant 0 : index
    %c513 = arith.constant 513 : index
    %219 = vector.load %arg2[%c0_74, %c0_75, %c513] : memref<1x8x1786xf32, #tpu.memory_space<vmem>>, vector<1x8x1156xf32>
    %220 = vector.shape_cast %219 : vector<1x8x1156xf32> to vector<8x1156xf32>
    %221 = vector.broadcast %218 : vector<8x1xf32> to vector<8x1156xf32>
    %222 = arith.mulf %221, %220 : vector<8x1156xf32>
    %223 = arith.addf %217, %222 : vector<8x1156xf32>
    %224 = vector.extract_strided_slice %0 {offsets = [0, 37], sizes = [8, 1], strides = [1, 1]} : vector<8x49xf32> to vector<8x1xf32>
    %c0_76 = arith.constant 0 : index
    %c0_77 = arith.constant 0 : index
    %c516 = arith.constant 516 : index
    %225 = vector.load %arg2[%c0_76, %c0_77, %c516] : memref<1x8x1786xf32, #tpu.memory_space<vmem>>, vector<1x8x1156xf32>
    %226 = vector.shape_cast %225 : vector<1x8x1156xf32> to vector<8x1156xf32>
    %227 = vector.broadcast %224 : vector<8x1xf32> to vector<8x1156xf32>
    %228 = arith.mulf %227, %226 : vector<8x1156xf32>
    %229 = arith.addf %223, %228 : vector<8x1156xf32>
    %230 = vector.extract_strided_slice %0 {offsets = [0, 38], sizes = [8, 1], strides = [1, 1]} : vector<8x49xf32> to vector<8x1xf32>
    %c0_78 = arith.constant 0 : index
    %c0_79 = arith.constant 0 : index
    %c519 = arith.constant 519 : index
    %231 = vector.load %arg2[%c0_78, %c0_79, %c519] : memref<1x8x1786xf32, #tpu.memory_space<vmem>>, vector<1x8x1156xf32>
    %232 = vector.shape_cast %231 : vector<1x8x1156xf32> to vector<8x1156xf32>
    %233 = vector.broadcast %230 : vector<8x1xf32> to vector<8x1156xf32>
    %234 = arith.mulf %233, %232 : vector<8x1156xf32>
    %235 = arith.addf %229, %234 : vector<8x1156xf32>
    %236 = vector.extract_strided_slice %0 {offsets = [0, 39], sizes = [8, 1], strides = [1, 1]} : vector<8x49xf32> to vector<8x1xf32>
    %c0_80 = arith.constant 0 : index
    %c0_81 = arith.constant 0 : index
    %c522 = arith.constant 522 : index
    %237 = vector.load %arg2[%c0_80, %c0_81, %c522] : memref<1x8x1786xf32, #tpu.memory_space<vmem>>, vector<1x8x1156xf32>
    %238 = vector.shape_cast %237 : vector<1x8x1156xf32> to vector<8x1156xf32>
    %239 = vector.broadcast %236 : vector<8x1xf32> to vector<8x1156xf32>
    %240 = arith.mulf %239, %238 : vector<8x1156xf32>
    %241 = arith.addf %235, %240 : vector<8x1156xf32>
    %242 = vector.extract_strided_slice %0 {offsets = [0, 40], sizes = [8, 1], strides = [1, 1]} : vector<8x49xf32> to vector<8x1xf32>
    %c0_82 = arith.constant 0 : index
    %c0_83 = arith.constant 0 : index
    %c525 = arith.constant 525 : index
    %243 = vector.load %arg2[%c0_82, %c0_83, %c525] : memref<1x8x1786xf32, #tpu.memory_space<vmem>>, vector<1x8x1156xf32>
    %244 = vector.shape_cast %243 : vector<1x8x1156xf32> to vector<8x1156xf32>
    %245 = vector.broadcast %242 : vector<8x1xf32> to vector<8x1156xf32>
    %246 = arith.mulf %245, %244 : vector<8x1156xf32>
    %247 = arith.addf %241, %246 : vector<8x1156xf32>
    %248 = vector.extract_strided_slice %0 {offsets = [0, 41], sizes = [8, 1], strides = [1, 1]} : vector<8x49xf32> to vector<8x1xf32>
    %c0_84 = arith.constant 0 : index
    %c0_85 = arith.constant 0 : index
    %c528 = arith.constant 528 : index
    %249 = vector.load %arg2[%c0_84, %c0_85, %c528] : memref<1x8x1786xf32, #tpu.memory_space<vmem>>, vector<1x8x1156xf32>
    %250 = vector.shape_cast %249 : vector<1x8x1156xf32> to vector<8x1156xf32>
    %251 = vector.broadcast %248 : vector<8x1xf32> to vector<8x1156xf32>
    %252 = arith.mulf %251, %250 : vector<8x1156xf32>
    %253 = arith.addf %247, %252 : vector<8x1156xf32>
    %254 = vector.extract_strided_slice %0 {offsets = [0, 42], sizes = [8, 1], strides = [1, 1]} : vector<8x49xf32> to vector<8x1xf32>
    %c0_86 = arith.constant 0 : index
    %c0_87 = arith.constant 0 : index
    %c612 = arith.constant 612 : index
    %255 = vector.load %arg2[%c0_86, %c0_87, %c612] : memref<1x8x1786xf32, #tpu.memory_space<vmem>>, vector<1x8x1156xf32>
    %256 = vector.shape_cast %255 : vector<1x8x1156xf32> to vector<8x1156xf32>
    %257 = vector.broadcast %254 : vector<8x1xf32> to vector<8x1156xf32>
    %258 = arith.mulf %257, %256 : vector<8x1156xf32>
    %259 = arith.addf %253, %258 : vector<8x1156xf32>
    %260 = vector.extract_strided_slice %0 {offsets = [0, 43], sizes = [8, 1], strides = [1, 1]} : vector<8x49xf32> to vector<8x1xf32>
    %c0_88 = arith.constant 0 : index
    %c0_89 = arith.constant 0 : index
    %c615 = arith.constant 615 : index
    %261 = vector.load %arg2[%c0_88, %c0_89, %c615] : memref<1x8x1786xf32, #tpu.memory_space<vmem>>, vector<1x8x1156xf32>
    %262 = vector.shape_cast %261 : vector<1x8x1156xf32> to vector<8x1156xf32>
    %263 = vector.broadcast %260 : vector<8x1xf32> to vector<8x1156xf32>
    %264 = arith.mulf %263, %262 : vector<8x1156xf32>
    %265 = arith.addf %259, %264 : vector<8x1156xf32>
    %266 = vector.extract_strided_slice %0 {offsets = [0, 44], sizes = [8, 1], strides = [1, 1]} : vector<8x49xf32> to vector<8x1xf32>
    %c0_90 = arith.constant 0 : index
    %c0_91 = arith.constant 0 : index
    %c618 = arith.constant 618 : index
    %267 = vector.load %arg2[%c0_90, %c0_91, %c618] : memref<1x8x1786xf32, #tpu.memory_space<vmem>>, vector<1x8x1156xf32>
    %268 = vector.shape_cast %267 : vector<1x8x1156xf32> to vector<8x1156xf32>
    %269 = vector.broadcast %266 : vector<8x1xf32> to vector<8x1156xf32>
    %270 = arith.mulf %269, %268 : vector<8x1156xf32>
    %271 = arith.addf %265, %270 : vector<8x1156xf32>
    %272 = vector.extract_strided_slice %0 {offsets = [0, 45], sizes = [8, 1], strides = [1, 1]} : vector<8x49xf32> to vector<8x1xf32>
    %c0_92 = arith.constant 0 : index
    %c0_93 = arith.constant 0 : index
    %c621 = arith.constant 621 : index
    %273 = vector.load %arg2[%c0_92, %c0_93, %c621] : memref<1x8x1786xf32, #tpu.memory_space<vmem>>, vector<1x8x1156xf32>
    %274 = vector.shape_cast %273 : vector<1x8x1156xf32> to vector<8x1156xf32>
    %275 = vector.broadcast %272 : vector<8x1xf32> to vector<8x1156xf32>
    %276 = arith.mulf %275, %274 : vector<8x1156xf32>
    %277 = arith.addf %271, %276 : vector<8x1156xf32>
    %278 = vector.extract_strided_slice %0 {offsets = [0, 46], sizes = [8, 1], strides = [1, 1]} : vector<8x49xf32> to vector<8x1xf32>
    %c0_94 = arith.constant 0 : index
    %c0_95 = arith.constant 0 : index
    %c624 = arith.constant 624 : index
    %279 = vector.load %arg2[%c0_94, %c0_95, %c624] : memref<1x8x1786xf32, #tpu.memory_space<vmem>>, vector<1x8x1156xf32>
    %280 = vector.shape_cast %279 : vector<1x8x1156xf32> to vector<8x1156xf32>
    %281 = vector.broadcast %278 : vector<8x1xf32> to vector<8x1156xf32>
    %282 = arith.mulf %281, %280 : vector<8x1156xf32>
    %283 = arith.addf %277, %282 : vector<8x1156xf32>
    %284 = vector.extract_strided_slice %0 {offsets = [0, 47], sizes = [8, 1], strides = [1, 1]} : vector<8x49xf32> to vector<8x1xf32>
    %c0_96 = arith.constant 0 : index
    %c0_97 = arith.constant 0 : index
    %c627 = arith.constant 627 : index
    %285 = vector.load %arg2[%c0_96, %c0_97, %c627] : memref<1x8x1786xf32, #tpu.memory_space<vmem>>, vector<1x8x1156xf32>
    %286 = vector.shape_cast %285 : vector<1x8x1156xf32> to vector<8x1156xf32>
    %287 = vector.broadcast %284 : vector<8x1xf32> to vector<8x1156xf32>
    %288 = arith.mulf %287, %286 : vector<8x1156xf32>
    %289 = arith.addf %283, %288 : vector<8x1156xf32>
    %290 = vector.extract_strided_slice %0 {offsets = [0, 48], sizes = [8, 1], strides = [1, 1]} : vector<8x49xf32> to vector<8x1xf32>
    %c0_98 = arith.constant 0 : index
    %c0_99 = arith.constant 0 : index
    %c630 = arith.constant 630 : index
    %291 = vector.load %arg2[%c0_98, %c0_99, %c630] : memref<1x8x1786xf32, #tpu.memory_space<vmem>>, vector<1x8x1156xf32>
    %292 = vector.shape_cast %291 : vector<1x8x1156xf32> to vector<8x1156xf32>
    %293 = vector.broadcast %290 : vector<8x1xf32> to vector<8x1156xf32>
    %294 = arith.mulf %293, %292 : vector<8x1156xf32>
    %295 = arith.addf %289, %294 : vector<8x1156xf32>
    %c0_100 = arith.constant 0 : index
    %c0_101 = arith.constant 0 : index
    %296 = vector.load %arg4[%c0_100, %c0_101] : memref<8x1xf32, #tpu.memory_space<vmem>>, vector<8x1xf32>
    %297 = vector.broadcast %296 : vector<8x1xf32> to vector<8x1156xf32>
    %298 = arith.addf %295, %297 : vector<8x1156xf32>
    %c0_102 = arith.constant 0 : index
    %c0_103 = arith.constant 0 : index
    %c0_104 = arith.constant 0 : index
    %299 = vector.load %arg5[%c0_102, %c0_103, %c0_104] : memref<1x8x1156xf32, #tpu.memory_space<vmem>>, vector<1x8x1156xf32>
    %300 = vector.shape_cast %299 : vector<1x8x1156xf32> to vector<8x1156xf32>
    %301 = vector.shape_cast %298 : vector<8x1156xf32> to vector<1x8x1156xf32>
    tpu.vector_store %arg5[%c0_102, %c0_103, %c0_104], %301 {strides = array<i32>} : memref<1x8x1156xf32, #tpu.memory_space<vmem>>, vector<1x8x1156xf32>,
    return
  }
  func.func @transform_0(%arg0: i32, %arg1: i32) -> (i32, i32, i32) {
    %c0_i32 = arith.constant 0 : i32
    %c0_i32_0 = arith.constant 0 : i32
    return %arg0, %arg1, %c0_i32 : i32, i32, i32
  }
  func.func @transform_1(%arg0: i32, %arg1: i32) -> (i32, i32) {
    %c0_i32 = arith.constant 0 : i32
    %c0_i32_0 = arith.constant 0 : i32
    return %arg1, %c0_i32 : i32, i32
  }
  func.func @transform_2(%arg0: i32, %arg1: i32) -> (i32, i32) {
    %c0_i32 = arith.constant 0 : i32
    %c0_i32_0 = arith.constant 0 : i32
    return %arg1, %c0_i32 : i32, i32
  }
  func.func @transform_3(%arg0: i32, %arg1: i32) -> (i32, i32, i32) {
    %c0_i32 = arith.constant 0 : i32
    %c0_i32_0 = arith.constant 0 : i32
    return %arg0, %arg1, %c0_i32 : i32, i32, i32
  }
}

module attributes {stable_mosaic.version = 11 : i64} {
  func.func @_attn_tail_kernel(%arg0: i32, %arg1: i32, %arg2: memref<1x8x256xf32, #tpu.memory_space<vmem>>, %arg3: memref<1x8x256xf32, #tpu.memory_space<vmem>>, %arg4: memref<1x8x256xf32, #tpu.memory_space<vmem>>, %arg5: memref<8x8xf32, #tpu.memory_space<vmem>>, %arg6: memref<8x1xf32, #tpu.memory_space<vmem>>, %arg7: memref<8x8xf32, #tpu.memory_space<vmem>>, %arg8: memref<8x1xf32, #tpu.memory_space<vmem>>, %arg9: memref<8x1xf32, #tpu.memory_space<vmem>>, %arg10: memref<1x8x256xf32, #tpu.memory_space<vmem>>) attributes {dimension_semantics = [#tpu.dimension_semantics<parallel>, #tpu.dimension_semantics<parallel>], iteration_bounds = array<i64: 2, 1>, scalar_prefetch = 0 : i64, scratch_operands = 0 : i64, tpu.core_type = #tpu.core_type<tc>, window_params = [{transform_indices = @transform_0, window_bounds = array<i64: 1, 8, 256>}, {transform_indices = @transform_1, window_bounds = array<i64: 1, 8, 256>}, {transform_indices = @transform_2, window_bounds = array<i64: 1, 8, 256>}, {pipeline_mode = #tpu.pipeline_mode<synchronous>, transform_indices = @transform_3, window_bounds = array<i64: 8, 8>}, {pipeline_mode = #tpu.pipeline_mode<synchronous>, transform_indices = @transform_4, window_bounds = array<i64: 8, 1>}, {pipeline_mode = #tpu.pipeline_mode<synchronous>, transform_indices = @transform_5, window_bounds = array<i64: 8, 8>}, {pipeline_mode = #tpu.pipeline_mode<synchronous>, transform_indices = @transform_6, window_bounds = array<i64: 8, 1>}, {pipeline_mode = #tpu.pipeline_mode<synchronous>, transform_indices = @transform_7, window_bounds = array<i64: 8, 1>}, {transform_indices = @transform_8, window_bounds = array<i64: 1, 8, 256>}]} {
    %c0 = arith.constant 0 : index
    %c0_0 = arith.constant 0 : index
    %0 = vector.load %arg5[%c0, %c0_0] : memref<8x8xf32, #tpu.memory_space<vmem>>, vector<8x8xf32>
    %c0_1 = arith.constant 0 : index
    %c0_2 = arith.constant 0 : index
    %c0_3 = arith.constant 0 : index
    %1 = vector.load %arg2[%c0_1, %c0_2, %c0_3] : memref<1x8x256xf32, #tpu.memory_space<vmem>>, vector<1x8x256xf32>
    %2 = vector.shape_cast %1 : vector<1x8x256xf32> to vector<8x256xf32>
    %cst = arith.constant dense<0.000000e+00> : vector<8x256xf32>
    %3 = tpu.matmul %0, %2, %cst {dimension_numbers = #tpu.dot_dimension_numbers<[1], [0], [0], [1], [0, 0, 1, 1], [], []>} : vector<8x8xf32>, vector<8x256xf32>, vector<8x256xf32> -> vector<8x256xf32>
    %c0_4 = arith.constant 0 : index
    %c0_5 = arith.constant 0 : index
    %4 = vector.load %arg6[%c0_4, %c0_5] : memref<8x1xf32, #tpu.memory_space<vmem>>, vector<8x1xf32>
    %5 = vector.broadcast %4 : vector<8x1xf32> to vector<8x256xf32>
    %6 = arith.addf %3, %5 : vector<8x256xf32>
    %c0_6 = arith.constant 0 : index
    %c0_7 = arith.constant 0 : index
    %c0_8 = arith.constant 0 : index
    %7 = vector.load %arg3[%c0_6, %c0_7, %c0_8] : memref<1x8x256xf32, #tpu.memory_space<vmem>>, vector<1x8x256xf32>
    %8 = vector.shape_cast %7 : vector<1x8x256xf32> to vector<8x256xf32>
    %9 = arith.mulf %8, %6 : vector<8x256xf32>
    %c0_9 = arith.constant 0 : index
    %c0_10 = arith.constant 0 : index
    %10 = vector.load %arg7[%c0_9, %c0_10] : memref<8x8xf32, #tpu.memory_space<vmem>>, vector<8x8xf32>
    %cst_11 = arith.constant dense<0.000000e+00> : vector<8x256xf32>
    %11 = tpu.matmul %10, %9, %cst_11 {dimension_numbers = #tpu.dot_dimension_numbers<[1], [0], [0], [1], [0, 0, 1, 1], [], []>} : vector<8x8xf32>, vector<8x256xf32>, vector<8x256xf32> -> vector<8x256xf32>
    %c0_12 = arith.constant 0 : index
    %c0_13 = arith.constant 0 : index
    %12 = vector.load %arg8[%c0_12, %c0_13] : memref<8x1xf32, #tpu.memory_space<vmem>>, vector<8x1xf32>
    %13 = vector.broadcast %12 : vector<8x1xf32> to vector<8x256xf32>
    %14 = arith.addf %11, %13 : vector<8x256xf32>
    %c0_14 = arith.constant 0 : index
    %c0_15 = arith.constant 0 : index
    %c0_16 = arith.constant 0 : index
    %15 = vector.load %arg4[%c0_14, %c0_15, %c0_16] : memref<1x8x256xf32, #tpu.memory_space<vmem>>, vector<1x8x256xf32>
    %16 = vector.shape_cast %15 : vector<1x8x256xf32> to vector<8x256xf32>
    %c0_17 = arith.constant 0 : index
    %c0_18 = arith.constant 0 : index
    %17 = vector.load %arg9[%c0_17, %c0_18] : memref<8x1xf32, #tpu.memory_space<vmem>>, vector<8x1xf32>
    %18 = arith.addf %14, %16 : vector<8x256xf32>
    %19 = vector.broadcast %17 : vector<8x1xf32> to vector<8x256xf32>
    %20 = arith.mulf %19, %18 : vector<8x256xf32>
    %21 = arith.addf %16, %20 : vector<8x256xf32>
    %c0_19 = arith.constant 0 : index
    %c0_20 = arith.constant 0 : index
    %c0_21 = arith.constant 0 : index
    %22 = vector.load %arg10[%c0_19, %c0_20, %c0_21] : memref<1x8x256xf32, #tpu.memory_space<vmem>>, vector<1x8x256xf32>
    %23 = vector.shape_cast %22 : vector<1x8x256xf32> to vector<8x256xf32>
    %24 = vector.shape_cast %21 : vector<8x256xf32> to vector<1x8x256xf32>
    tpu.vector_store %arg10[%c0_19, %c0_20, %c0_21], %24 {strides = array<i32>} : memref<1x8x256xf32, #tpu.memory_space<vmem>>, vector<1x8x256xf32>,
    return
  }
  func.func @transform_0(%arg0: i32, %arg1: i32) -> (i32, i32, i32) {
    %c0_i32 = arith.constant 0 : i32
    %c0_i32_0 = arith.constant 0 : i32
    return %arg0, %c0_i32, %arg1 : i32, i32, i32
  }
  func.func @transform_1(%arg0: i32, %arg1: i32) -> (i32, i32, i32) {
    %c0_i32 = arith.constant 0 : i32
    %c0_i32_0 = arith.constant 0 : i32
    return %arg0, %c0_i32, %arg1 : i32, i32, i32
  }
  func.func @transform_2(%arg0: i32, %arg1: i32) -> (i32, i32, i32) {
    %c0_i32 = arith.constant 0 : i32
    %c0_i32_0 = arith.constant 0 : i32
    return %arg0, %c0_i32, %arg1 : i32, i32, i32
  }
  func.func @transform_3(%arg0: i32, %arg1: i32) -> (i32, i32) {
    %c0_i32 = arith.constant 0 : i32
    %c0_i32_0 = arith.constant 0 : i32
    %c0_i32_1 = arith.constant 0 : i32
    return %c0_i32, %c0_i32_0 : i32, i32
  }
  func.func @transform_4(%arg0: i32, %arg1: i32) -> (i32, i32) {
    %c0_i32 = arith.constant 0 : i32
    %c0_i32_0 = arith.constant 0 : i32
    %c0_i32_1 = arith.constant 0 : i32
    return %c0_i32, %c0_i32_0 : i32, i32
  }
  func.func @transform_5(%arg0: i32, %arg1: i32) -> (i32, i32) {
    %c0_i32 = arith.constant 0 : i32
    %c0_i32_0 = arith.constant 0 : i32
    %c0_i32_1 = arith.constant 0 : i32
    return %c0_i32, %c0_i32_0 : i32, i32
  }
  func.func @transform_6(%arg0: i32, %arg1: i32) -> (i32, i32) {
    %c0_i32 = arith.constant 0 : i32
    %c0_i32_0 = arith.constant 0 : i32
    %c0_i32_1 = arith.constant 0 : i32
    return %c0_i32, %c0_i32_0 : i32, i32
  }
  func.func @transform_7(%arg0: i32, %arg1: i32) -> (i32, i32) {
    %c0_i32 = arith.constant 0 : i32
    %c0_i32_0 = arith.constant 0 : i32
    %c0_i32_1 = arith.constant 0 : i32
    return %c0_i32, %c0_i32_0 : i32, i32
  }
  func.func @transform_8(%arg0: i32, %arg1: i32) -> (i32, i32, i32) {
    %c0_i32 = arith.constant 0 : i32
    %c0_i32_0 = arith.constant 0 : i32
    return %arg0, %c0_i32, %arg1 : i32, i32, i32
  }
}

module attributes {stable_mosaic.version = 11 : i64} {
  func.func @_fc1_kernel(%arg0: i32, %arg1: i32, %arg2: memref<1x8x256xf32, #tpu.memory_space<vmem>>, %arg3: memref<32x8xf32, #tpu.memory_space<vmem>>, %arg4: memref<32x1xf32, #tpu.memory_space<vmem>>, %arg5: memref<1x32x256xf32, #tpu.memory_space<vmem>>) attributes {dimension_semantics = [#tpu.dimension_semantics<parallel>, #tpu.dimension_semantics<parallel>], iteration_bounds = array<i64: 2, 1>, scalar_prefetch = 0 : i64, scratch_operands = 0 : i64, tpu.core_type = #tpu.core_type<tc>, window_params = [{transform_indices = @transform_0, window_bounds = array<i64: 1, 8, 256>}, {pipeline_mode = #tpu.pipeline_mode<synchronous>, transform_indices = @transform_1, window_bounds = array<i64: 32, 8>}, {pipeline_mode = #tpu.pipeline_mode<synchronous>, transform_indices = @transform_2, window_bounds = array<i64: 32, 1>}, {transform_indices = @transform_3, window_bounds = array<i64: 1, 32, 256>}]} {
    %c0 = arith.constant 0 : index
    %c0_0 = arith.constant 0 : index
    %0 = vector.load %arg3[%c0, %c0_0] : memref<32x8xf32, #tpu.memory_space<vmem>>, vector<32x8xf32>
    %c0_1 = arith.constant 0 : index
    %c0_2 = arith.constant 0 : index
    %c0_3 = arith.constant 0 : index
    %1 = vector.load %arg2[%c0_1, %c0_2, %c0_3] : memref<1x8x256xf32, #tpu.memory_space<vmem>>, vector<1x8x256xf32>
    %2 = vector.shape_cast %1 : vector<1x8x256xf32> to vector<8x256xf32>
    %cst = arith.constant dense<0.000000e+00> : vector<32x256xf32>
    %3 = tpu.matmul %0, %2, %cst {dimension_numbers = #tpu.dot_dimension_numbers<[1], [0], [0], [1], [0, 0, 1, 1], [], []>} : vector<32x8xf32>, vector<8x256xf32>, vector<32x256xf32> -> vector<32x256xf32>
    %c0_4 = arith.constant 0 : index
    %c0_5 = arith.constant 0 : index
    %4 = vector.load %arg4[%c0_4, %c0_5] : memref<32x1xf32, #tpu.memory_space<vmem>>, vector<32x1xf32>
    %5 = vector.broadcast %4 : vector<32x1xf32> to vector<32x256xf32>
    %6 = arith.addf %3, %5 : vector<32x256xf32>
    %c0_6 = arith.constant 0 : index
    %c0_7 = arith.constant 0 : index
    %c0_8 = arith.constant 0 : index
    %7 = vector.load %arg5[%c0_6, %c0_7, %c0_8] : memref<1x32x256xf32, #tpu.memory_space<vmem>>, vector<1x32x256xf32>
    %8 = vector.shape_cast %7 : vector<1x32x256xf32> to vector<32x256xf32>
    %9 = vector.shape_cast %6 : vector<32x256xf32> to vector<1x32x256xf32>
    tpu.vector_store %arg5[%c0_6, %c0_7, %c0_8], %9 {strides = array<i32>} : memref<1x32x256xf32, #tpu.memory_space<vmem>>, vector<1x32x256xf32>,
    return
  }
  func.func @transform_0(%arg0: i32, %arg1: i32) -> (i32, i32, i32) {
    %c0_i32 = arith.constant 0 : i32
    %c0_i32_0 = arith.constant 0 : i32
    return %arg0, %c0_i32, %arg1 : i32, i32, i32
  }
  func.func @transform_1(%arg0: i32, %arg1: i32) -> (i32, i32) {
    %c0_i32 = arith.constant 0 : i32
    %c0_i32_0 = arith.constant 0 : i32
    %c0_i32_1 = arith.constant 0 : i32
    return %c0_i32, %c0_i32_0 : i32, i32
  }
  func.func @transform_2(%arg0: i32, %arg1: i32) -> (i32, i32) {
    %c0_i32 = arith.constant 0 : i32
    %c0_i32_0 = arith.constant 0 : i32
    %c0_i32_1 = arith.constant 0 : i32
    return %c0_i32, %c0_i32_0 : i32, i32
  }
  func.func @transform_3(%arg0: i32, %arg1: i32) -> (i32, i32, i32) {
    %c0_i32 = arith.constant 0 : i32
    %c0_i32_0 = arith.constant 0 : i32
    return %arg0, %c0_i32, %arg1 : i32, i32, i32
  }
}

module attributes {stable_mosaic.version = 11 : i64} {
  func.func @kernel(%arg0: i32, %arg1: i32, %arg2: memref<1x16x362xf32, #tpu.memory_space<vmem>>, %arg3: memref<16x9xf32, #tpu.memory_space<vmem>>, %arg4: memref<16x1xf32, #tpu.memory_space<vmem>>, %arg5: memref<1x16x324xf32, #tpu.memory_space<vmem>>) attributes {dimension_semantics = [#tpu.dimension_semantics<parallel>, #tpu.dimension_semantics<parallel>], iteration_bounds = array<i64: 2, 2>, scalar_prefetch = 0 : i64, scratch_operands = 0 : i64, tpu.core_type = #tpu.core_type<tc>, window_params = [{transform_indices = @transform_0, window_bounds = array<i64: 1, 16, 362>}, {transform_indices = @transform_1, window_bounds = array<i64: 16, 9>}, {transform_indices = @transform_2, window_bounds = array<i64: 16, 1>}, {transform_indices = @transform_3, window_bounds = array<i64: 1, 16, 324>}]} {
    %c0 = arith.constant 0 : index
    %c0_0 = arith.constant 0 : index
    %0 = vector.load %arg3[%c0, %c0_0] : memref<16x9xf32, #tpu.memory_space<vmem>>, vector<16x9xf32>
    %cst = arith.constant 0.000000e+00 : f32
    %1 = vector.broadcast %cst : f32 to vector<16x324xf32>
    %2 = vector.extract_strided_slice %0 {offsets = [0, 0], sizes = [16, 1], strides = [1, 1]} : vector<16x9xf32> to vector<16x1xf32>
    %c0_1 = arith.constant 0 : index
    %c0_2 = arith.constant 0 : index
    %c0_3 = arith.constant 0 : index
    %3 = vector.load %arg2[%c0_1, %c0_2, %c0_3] : memref<1x16x362xf32, #tpu.memory_space<vmem>>, vector<1x16x324xf32>
    %4 = vector.shape_cast %3 : vector<1x16x324xf32> to vector<16x324xf32>
    %5 = vector.broadcast %2 : vector<16x1xf32> to vector<16x324xf32>
    %6 = arith.mulf %5, %4 : vector<16x324xf32>
    %7 = arith.addf %1, %6 : vector<16x324xf32>
    %8 = vector.extract_strided_slice %0 {offsets = [0, 1], sizes = [16, 1], strides = [1, 1]} : vector<16x9xf32> to vector<16x1xf32>
    %c0_4 = arith.constant 0 : index
    %c0_5 = arith.constant 0 : index
    %c1 = arith.constant 1 : index
    %9 = vector.load %arg2[%c0_4, %c0_5, %c1] : memref<1x16x362xf32, #tpu.memory_space<vmem>>, vector<1x16x324xf32>
    %10 = vector.shape_cast %9 : vector<1x16x324xf32> to vector<16x324xf32>
    %11 = vector.broadcast %8 : vector<16x1xf32> to vector<16x324xf32>
    %12 = arith.mulf %11, %10 : vector<16x324xf32>
    %13 = arith.addf %7, %12 : vector<16x324xf32>
    %14 = vector.extract_strided_slice %0 {offsets = [0, 2], sizes = [16, 1], strides = [1, 1]} : vector<16x9xf32> to vector<16x1xf32>
    %c0_6 = arith.constant 0 : index
    %c0_7 = arith.constant 0 : index
    %c2 = arith.constant 2 : index
    %15 = vector.load %arg2[%c0_6, %c0_7, %c2] : memref<1x16x362xf32, #tpu.memory_space<vmem>>, vector<1x16x324xf32>
    %16 = vector.shape_cast %15 : vector<1x16x324xf32> to vector<16x324xf32>
    %17 = vector.broadcast %14 : vector<16x1xf32> to vector<16x324xf32>
    %18 = arith.mulf %17, %16 : vector<16x324xf32>
    %19 = arith.addf %13, %18 : vector<16x324xf32>
    %20 = vector.extract_strided_slice %0 {offsets = [0, 3], sizes = [16, 1], strides = [1, 1]} : vector<16x9xf32> to vector<16x1xf32>
    %c0_8 = arith.constant 0 : index
    %c0_9 = arith.constant 0 : index
    %c18 = arith.constant 18 : index
    %21 = vector.load %arg2[%c0_8, %c0_9, %c18] : memref<1x16x362xf32, #tpu.memory_space<vmem>>, vector<1x16x324xf32>
    %22 = vector.shape_cast %21 : vector<1x16x324xf32> to vector<16x324xf32>
    %23 = vector.broadcast %20 : vector<16x1xf32> to vector<16x324xf32>
    %24 = arith.mulf %23, %22 : vector<16x324xf32>
    %25 = arith.addf %19, %24 : vector<16x324xf32>
    %26 = vector.extract_strided_slice %0 {offsets = [0, 4], sizes = [16, 1], strides = [1, 1]} : vector<16x9xf32> to vector<16x1xf32>
    %c0_10 = arith.constant 0 : index
    %c0_11 = arith.constant 0 : index
    %c19 = arith.constant 19 : index
    %27 = vector.load %arg2[%c0_10, %c0_11, %c19] : memref<1x16x362xf32, #tpu.memory_space<vmem>>, vector<1x16x324xf32>
    %28 = vector.shape_cast %27 : vector<1x16x324xf32> to vector<16x324xf32>
    %29 = vector.broadcast %26 : vector<16x1xf32> to vector<16x324xf32>
    %30 = arith.mulf %29, %28 : vector<16x324xf32>
    %31 = arith.addf %25, %30 : vector<16x324xf32>
    %32 = vector.extract_strided_slice %0 {offsets = [0, 5], sizes = [16, 1], strides = [1, 1]} : vector<16x9xf32> to vector<16x1xf32>
    %c0_12 = arith.constant 0 : index
    %c0_13 = arith.constant 0 : index
    %c20 = arith.constant 20 : index
    %33 = vector.load %arg2[%c0_12, %c0_13, %c20] : memref<1x16x362xf32, #tpu.memory_space<vmem>>, vector<1x16x324xf32>
    %34 = vector.shape_cast %33 : vector<1x16x324xf32> to vector<16x324xf32>
    %35 = vector.broadcast %32 : vector<16x1xf32> to vector<16x324xf32>
    %36 = arith.mulf %35, %34 : vector<16x324xf32>
    %37 = arith.addf %31, %36 : vector<16x324xf32>
    %38 = vector.extract_strided_slice %0 {offsets = [0, 6], sizes = [16, 1], strides = [1, 1]} : vector<16x9xf32> to vector<16x1xf32>
    %c0_14 = arith.constant 0 : index
    %c0_15 = arith.constant 0 : index
    %c36 = arith.constant 36 : index
    %39 = vector.load %arg2[%c0_14, %c0_15, %c36] : memref<1x16x362xf32, #tpu.memory_space<vmem>>, vector<1x16x324xf32>
    %40 = vector.shape_cast %39 : vector<1x16x324xf32> to vector<16x324xf32>
    %41 = vector.broadcast %38 : vector<16x1xf32> to vector<16x324xf32>
    %42 = arith.mulf %41, %40 : vector<16x324xf32>
    %43 = arith.addf %37, %42 : vector<16x324xf32>
    %44 = vector.extract_strided_slice %0 {offsets = [0, 7], sizes = [16, 1], strides = [1, 1]} : vector<16x9xf32> to vector<16x1xf32>
    %c0_16 = arith.constant 0 : index
    %c0_17 = arith.constant 0 : index
    %c37 = arith.constant 37 : index
    %45 = vector.load %arg2[%c0_16, %c0_17, %c37] : memref<1x16x362xf32, #tpu.memory_space<vmem>>, vector<1x16x324xf32>
    %46 = vector.shape_cast %45 : vector<1x16x324xf32> to vector<16x324xf32>
    %47 = vector.broadcast %44 : vector<16x1xf32> to vector<16x324xf32>
    %48 = arith.mulf %47, %46 : vector<16x324xf32>
    %49 = arith.addf %43, %48 : vector<16x324xf32>
    %50 = vector.extract_strided_slice %0 {offsets = [0, 8], sizes = [16, 1], strides = [1, 1]} : vector<16x9xf32> to vector<16x1xf32>
    %c0_18 = arith.constant 0 : index
    %c0_19 = arith.constant 0 : index
    %c38 = arith.constant 38 : index
    %51 = vector.load %arg2[%c0_18, %c0_19, %c38] : memref<1x16x362xf32, #tpu.memory_space<vmem>>, vector<1x16x324xf32>
    %52 = vector.shape_cast %51 : vector<1x16x324xf32> to vector<16x324xf32>
    %53 = vector.broadcast %50 : vector<16x1xf32> to vector<16x324xf32>
    %54 = arith.mulf %53, %52 : vector<16x324xf32>
    %55 = arith.addf %49, %54 : vector<16x324xf32>
    %c0_20 = arith.constant 0 : index
    %c0_21 = arith.constant 0 : index
    %56 = vector.load %arg4[%c0_20, %c0_21] : memref<16x1xf32, #tpu.memory_space<vmem>>, vector<16x1xf32>
    %57 = vector.broadcast %56 : vector<16x1xf32> to vector<16x324xf32>
    %58 = arith.addf %55, %57 : vector<16x324xf32>
    %cst_22 = arith.constant 5.000000e-01 : f32
    %59 = vector.broadcast %cst_22 : f32 to vector<16x324xf32>
    %60 = arith.mulf %59, %58 : vector<16x324xf32>
    %cst_23 = arith.constant 4.471500e-02 : f32
    %61 = vector.broadcast %cst_23 : f32 to vector<16x324xf32>
    %62 = arith.mulf %61, %58 : vector<16x324xf32>
    %63 = arith.mulf %62, %58 : vector<16x324xf32>
    %64 = arith.mulf %63, %58 : vector<16x324xf32>
    %65 = arith.addf %58, %64 : vector<16x324xf32>
    %cst_24 = arith.constant 0.797884583 : f32
    %66 = vector.broadcast %cst_24 : f32 to vector<16x324xf32>
    %67 = arith.mulf %66, %65 : vector<16x324xf32>
    %68 = math.tanh %67 : vector<16x324xf32>
    %cst_25 = arith.constant 1.000000e+00 : f32
    %69 = vector.broadcast %cst_25 : f32 to vector<16x324xf32>
    %70 = arith.addf %69, %68 : vector<16x324xf32>
    %71 = arith.mulf %60, %70 : vector<16x324xf32>
    %c0_26 = arith.constant 0 : index
    %c0_27 = arith.constant 0 : index
    %c0_28 = arith.constant 0 : index
    %72 = vector.load %arg5[%c0_26, %c0_27, %c0_28] : memref<1x16x324xf32, #tpu.memory_space<vmem>>, vector<1x16x324xf32>
    %73 = vector.shape_cast %72 : vector<1x16x324xf32> to vector<16x324xf32>
    %74 = vector.shape_cast %71 : vector<16x324xf32> to vector<1x16x324xf32>
    tpu.vector_store %arg5[%c0_26, %c0_27, %c0_28], %74 {strides = array<i32>} : memref<1x16x324xf32, #tpu.memory_space<vmem>>, vector<1x16x324xf32>,
    return
  }
  func.func @transform_0(%arg0: i32, %arg1: i32) -> (i32, i32, i32) {
    %c0_i32 = arith.constant 0 : i32
    %c0_i32_0 = arith.constant 0 : i32
    return %arg0, %arg1, %c0_i32 : i32, i32, i32
  }
  func.func @transform_1(%arg0: i32, %arg1: i32) -> (i32, i32) {
    %c0_i32 = arith.constant 0 : i32
    %c0_i32_0 = arith.constant 0 : i32
    return %arg1, %c0_i32 : i32, i32
  }
  func.func @transform_2(%arg0: i32, %arg1: i32) -> (i32, i32) {
    %c0_i32 = arith.constant 0 : i32
    %c0_i32_0 = arith.constant 0 : i32
    return %arg1, %c0_i32 : i32, i32
  }
  func.func @transform_3(%arg0: i32, %arg1: i32) -> (i32, i32, i32) {
    %c0_i32 = arith.constant 0 : i32
    %c0_i32_0 = arith.constant 0 : i32
    return %arg0, %arg1, %c0_i32 : i32, i32, i32
  }
}

module attributes {stable_mosaic.version = 11 : i64} {
  func.func @_fc2_res_kernel(%arg0: i32, %arg1: i32, %arg2: memref<1x32x256xf32, #tpu.memory_space<vmem>>, %arg3: memref<1x8x256xf32, #tpu.memory_space<vmem>>, %arg4: memref<8x32xf32, #tpu.memory_space<vmem>>, %arg5: memref<8x1xf32, #tpu.memory_space<vmem>>, %arg6: memref<8x1xf32, #tpu.memory_space<vmem>>, %arg7: memref<1x8x256xf32, #tpu.memory_space<vmem>>) attributes {dimension_semantics = [#tpu.dimension_semantics<parallel>, #tpu.dimension_semantics<parallel>], iteration_bounds = array<i64: 2, 1>, scalar_prefetch = 0 : i64, scratch_operands = 0 : i64, tpu.core_type = #tpu.core_type<tc>, window_params = [{transform_indices = @transform_0, window_bounds = array<i64: 1, 32, 256>}, {transform_indices = @transform_1, window_bounds = array<i64: 1, 8, 256>}, {pipeline_mode = #tpu.pipeline_mode<synchronous>, transform_indices = @transform_2, window_bounds = array<i64: 8, 32>}, {pipeline_mode = #tpu.pipeline_mode<synchronous>, transform_indices = @transform_3, window_bounds = array<i64: 8, 1>}, {pipeline_mode = #tpu.pipeline_mode<synchronous>, transform_indices = @transform_4, window_bounds = array<i64: 8, 1>}, {transform_indices = @transform_5, window_bounds = array<i64: 1, 8, 256>}]} {
    %c0 = arith.constant 0 : index
    %c0_0 = arith.constant 0 : index
    %0 = vector.load %arg4[%c0, %c0_0] : memref<8x32xf32, #tpu.memory_space<vmem>>, vector<8x32xf32>
    %c0_1 = arith.constant 0 : index
    %c0_2 = arith.constant 0 : index
    %c0_3 = arith.constant 0 : index
    %1 = vector.load %arg2[%c0_1, %c0_2, %c0_3] : memref<1x32x256xf32, #tpu.memory_space<vmem>>, vector<1x32x256xf32>
    %2 = vector.shape_cast %1 : vector<1x32x256xf32> to vector<32x256xf32>
    %cst = arith.constant dense<0.000000e+00> : vector<8x256xf32>
    %3 = tpu.matmul %0, %2, %cst {dimension_numbers = #tpu.dot_dimension_numbers<[1], [0], [0], [1], [0, 0, 1, 1], [], []>} : vector<8x32xf32>, vector<32x256xf32>, vector<8x256xf32> -> vector<8x256xf32>
    %c0_4 = arith.constant 0 : index
    %c0_5 = arith.constant 0 : index
    %4 = vector.load %arg5[%c0_4, %c0_5] : memref<8x1xf32, #tpu.memory_space<vmem>>, vector<8x1xf32>
    %5 = vector.broadcast %4 : vector<8x1xf32> to vector<8x256xf32>
    %6 = arith.addf %3, %5 : vector<8x256xf32>
    %c0_6 = arith.constant 0 : index
    %c0_7 = arith.constant 0 : index
    %c0_8 = arith.constant 0 : index
    %7 = vector.load %arg3[%c0_6, %c0_7, %c0_8] : memref<1x8x256xf32, #tpu.memory_space<vmem>>, vector<1x8x256xf32>
    %8 = vector.shape_cast %7 : vector<1x8x256xf32> to vector<8x256xf32>
    %c0_9 = arith.constant 0 : index
    %c0_10 = arith.constant 0 : index
    %9 = vector.load %arg6[%c0_9, %c0_10] : memref<8x1xf32, #tpu.memory_space<vmem>>, vector<8x1xf32>
    %10 = vector.broadcast %9 : vector<8x1xf32> to vector<8x256xf32>
    %11 = arith.mulf %10, %6 : vector<8x256xf32>
    %12 = arith.addf %8, %11 : vector<8x256xf32>
    %c0_11 = arith.constant 0 : index
    %c0_12 = arith.constant 0 : index
    %c0_13 = arith.constant 0 : index
    %13 = vector.load %arg7[%c0_11, %c0_12, %c0_13] : memref<1x8x256xf32, #tpu.memory_space<vmem>>, vector<1x8x256xf32>
    %14 = vector.shape_cast %13 : vector<1x8x256xf32> to vector<8x256xf32>
    %15 = vector.shape_cast %12 : vector<8x256xf32> to vector<1x8x256xf32>
    tpu.vector_store %arg7[%c0_11, %c0_12, %c0_13], %15 {strides = array<i32>} : memref<1x8x256xf32, #tpu.memory_space<vmem>>, vector<1x8x256xf32>,
    return
  }
  func.func @transform_0(%arg0: i32, %arg1: i32) -> (i32, i32, i32) {
    %c0_i32 = arith.constant 0 : i32
    %c0_i32_0 = arith.constant 0 : i32
    return %arg0, %c0_i32, %arg1 : i32, i32, i32
  }
  func.func @transform_1(%arg0: i32, %arg1: i32) -> (i32, i32, i32) {
    %c0_i32 = arith.constant 0 : i32
    %c0_i32_0 = arith.constant 0 : i32
    return %arg0, %c0_i32, %arg1 : i32, i32, i32
  }
  func.func @transform_2(%arg0: i32, %arg1: i32) -> (i32, i32) {
    %c0_i32 = arith.constant 0 : i32
    %c0_i32_0 = arith.constant 0 : i32
    %c0_i32_1 = arith.constant 0 : i32
    return %c0_i32, %c0_i32_0 : i32, i32
  }
  func.func @transform_3(%arg0: i32, %arg1: i32) -> (i32, i32) {
    %c0_i32 = arith.constant 0 : i32
    %c0_i32_0 = arith.constant 0 : i32
    %c0_i32_1 = arith.constant 0 : i32
    return %c0_i32, %c0_i32_0 : i32, i32
  }
  func.func @transform_4(%arg0: i32, %arg1: i32) -> (i32, i32) {
    %c0_i32 = arith.constant 0 : i32
    %c0_i32_0 = arith.constant 0 : i32
    %c0_i32_1 = arith.constant 0 : i32
    return %c0_i32, %c0_i32_0 : i32, i32
  }
  func.func @transform_5(%arg0: i32, %arg1: i32) -> (i32, i32, i32) {
    %c0_i32 = arith.constant 0 : i32
    %c0_i32_0 = arith.constant 0 : i32
    return %arg0, %c0_i32, %arg1 : i32, i32, i32
  }
}

</mosaic_0001>

<bundles_post_ra>
// kernel: lka_block_forward.11
= control target key start
LH: loop header
LB: loop body
LE: loop exit
PB: predicated region body
PF: predicated region fallthrough
CT: control target
= control target key end

     0   :  { %s492_s12 = smov 0   ;;  %s494_s13 = smov 0   ;;  %s538_s0 = inlined_call_operand.vmem [shape: f32[2,8,256], index: 0, kind: input, shape index: {}]   ;;  %s539_s1 = inlined_call_operand.vmem [shape: f32[8,8], index: 1, kind: input, shape index: {}]   ;;  %s540_s2 = inlined_call_operand.vmem [shape: f32[8,1], index: 2, kind: input, shape index: {}]   ;;  %s541_s3 = inlined_call_operand.vmem [shape: f32[2,8,256], index: 3, kind: output, shape index: {}]  }
   0x1   :  { %s496_s14 = smov 0  }
   0x2 LB: > { %s25_s15 = sadd.s32 1, %s464_s13  ;;  %p405_p0 = scmp.ge.s32.totalorder %s468_s14, 1  ;;  %s468_s14 = sphi %s496_s14, %s13_s14   ;;  %s464_s13 = sphi %s494_s13, %s543_s13   ;;  %s460_s12 = sphi %s492_s12, %s542_s12  }
   0x3   : > { %p27_p1 = scmp.ge.s32.totalorder %s25_s15, 2  ;;  %p158_p2 = scmp.lt.s32.totalorder %s468_s14, 3 }
   0x5   : > { %s545_s15 = smov (%p27_p1, %s25_s15), 0  ;;  %p159_p3 = pnand %p405_p0, %p158_p2 }
   0x6   : > { %p191_p4 = scmp.lt.s32.totalorder (!%p159_p3), %s460_s12, 1  ;;  %v213_v0 = vld [vmem:[%s540_s2] sm:$0xff] (!%p159_p3)  ;;  %v470_v1 = vmov (!%p159_p3), 0.0   ;;  %v471_v2 = vmov (!%p159_p3), 0   ;;  %vm219_vm0 = vcmask (!%p159_p3), 64512  }
   0x7   : > { %162 = sbr.rel (%p159_p3) target bundleno = 261 (0x105), region = 32  ;;  %287 = vmatprep.mubr.f32.mxu0 (!%p159_p3), %v470_v1  ;;  %441 = vset.pattern.permute.xlu0 (!%p159_p3), %v471_v2  ;;  %v210_v5 = vld [vmem:[%s539_s1] sm:$0xff] (!%p159_p3) }
   0x8   : > { %216 = vperm.xlu0 (!%p159_p3), %441, %v213_v0  }
   0xe   : > { %s547_s12 = smov (!%p191_p4, %s460_s12), 1 }
   0xf   : > { %s413_s18 = sshll.u32 %s547_s12, 4 }
  0x10   : > { %s198_s21 = scalar_lea.vmem %s538_s0, %s413_s18  ;;  %s208_s26 = scalar_lea.vmem %s541_s3, %s413_s18 }
  0x11   : > { %v212_v3 = vld [vmem:[%s198_s21 + $0x8] sm:$0xff]  ;;  %v211_v4 = vld [vmem:[%s198_s21] sm:$0xff] }
  0x12   : > { %223 = vmatprep.subr.mxu0 %v212_v3 }
  0x13   : > { %224 = vmatpush1.msra.mxu0 %v211_v4 }
  0x14   : > { %410 = vmatmul.mubr.msk.f32.vlgmr.msra.gmra.mrb[0].mxu0 %vm219_vm0, %v210_v5 }
  0x87   : > { %v217_v6 = vpop.permute.xlu0 %216 }
  0xe7   : > { %v289_v7 = vpop.f32.mrb[0].mxu0 }
  0xe8   : > { %v290_v8 = vadd.f32 %v289_v7, %v217_v6  ;;  %v291_v9 = vpop.f32.mrb[1].mxu0 }
  0xe9   : > { %v292_v10 = vadd.f32 %v291_v9, %v217_v6 }
  0xea   : > { %v296_v11 = vmul.f32 0.044715, %v290_v8  ;;  %v294_v23 = vmul.f32 0.5, %v290_v8 }
  0xeb   : > { %v297_v12 = vmul.f32 0.044715, %v292_v10  ;;  %v295_v25 = vmul.f32 0.5, %v292_v10 }
  0xec   : > { %v298_v13 = vmul.f32 %v296_v11, %v290_v8 }
  0xed   : > { %v299_v14 = vmul.f32 %v297_v12, %v292_v10 }
  0xee   : > { %v300_v15 = vmul.f32 %v298_v13, %v290_v8 }
  0xef   : > { %v301_v16 = vmul.f32 %v299_v14, %v292_v10 }
  0xf0   : > { %v302_v17 = vadd.f32 %v300_v15, %v290_v8 }
  0xf1   : > { %v303_v18 = vadd.f32 %v301_v16, %v292_v10 }
  0xf2   : > { %v304_v19 = vmul.f32 0.7978846, %v302_v17 }
  0xf3   : > { %v305_v20 = vmul.f32 0.7978846, %v303_v18 }
  0xf4   : > { %442 = vtanh.f32 %v304_v19 }
  0xf5   : > { %444 = vtanh.f32 %v305_v20 }
  0xfe   : > { %v443_v21 = vpop.eup %442 }
  0xff   : > { %v445_v22 = vpop.eup %444  ;;  %v308_v24 = vadd.f32 1.0, %v443_v21 }
 0x100   : > { %v309_v26 = vadd.f32 1.0, %v445_v22 }
 0x101   : > { %v310_v27 = vmul.f32 %v308_v24, %v294_v23 }
 0x102   : > { %v311_v28 = vmul.f32 %v309_v26, %v295_v25 }
 0x103   : > { %312 = vst [vmem:[%s208_s26] sm:$0xff] %v310_v27 }
 0x104   : > { %313 = vst [vmem:[%s208_s26 + $0x8] sm:$0xff] %v311_v28 }
 0x105 PF: > { %s13_s14 = sadd.s32 1, %s468_s14   ;;  %s542_s12 = smov %s464_s13 }
 0x106   : > { %p10_p5 = scmp.ge.s32.totalorder %s13_s14, 4   ;;  %s543_s13 = smov %s545_s15 }
 0x108   :  { %12 = sbr.rel (!%p10_p5) target bundleno = 2 (0x2), region = 62 }

// kernel: lka_block_forward.10
= control target key start
LH: loop header
LB: loop body
LE: loop exit
PB: predicated region body
PF: predicated region fallthrough
CT: control target
= control target key end

     0   :  { %s1960_s20 = smov 0   ;;  %s2081_s0 = inlined_call_operand.vmem [shape: f32[2,8,362], index: 0, kind: input, shape index: {}]   ;;  %s2082_s1 = inlined_call_operand.vmem [shape: f32[9,8,8], index: 1, kind: input, shape index: {}]   ;;  %s2083_s2 = inlined_call_operand.vmem [shape: f32[8,1], index: 2, kind: input, shape index: {}]   ;;  %s2084_s3 = inlined_call_operand.<no memory space> [shape: f32[1,1], index: 3, kind: input, shape index: {}]   ;;  %s2085_s4 = inlined_call_operand.vmem [shape: f32[1,324], index: 4, kind: input, shape index: {}]   ;;  %s2086_s5 = inlined_call_operand.vmem [shape: f32[2,8,324], index: 5, kind: output, shape index: {}]  }
   0x1   :  { %v10_v0 = vstv %s2084_s3 }
   0x2   :  { %11 = vst [vmem:[#allocation2] sm:$0x1] %v10_v0 }
   0x3 LB: > { %s1771_s21 = sadd.s32 4294967295, %s1914_s20   ;;  %p1775_p0 = scmp.ge.s32.totalorder %s1914_s20, 1  ;;  %s1914_s20 = sphi %s1960_s20, %s17_s20  }
   0x4   : > { %p189_p1 = scmp.lt.s32.totalorder %s1914_s20, 3 }
   0x6   : > { %p190_p2 = pnand %p1775_p0, %p189_p1 }
   0x7   : > { %p217_p3 = scmp.lt.s32.totalorder (!%p190_p2), %s1771_s21, 1  ;;  %v1916_v1 = vmov (!%p190_p2), 0.0   ;;  %vm1917_vm0 = vmmov (!%p190_p2), 0   ;;  %s1918_s25 = smov (!%p190_p2), 127   ;;  %v1664_v5 = vld [vmem:[%s2083_s2] sm:$0xff] (!%p190_p2)  ;;  %v1926_v7 = vmov (!%p190_p2), 0  }
   0x8   : > { %193 = sbr.rel (%p190_p2) target bundleno = 427 (0x1ab), region = 40  ;;  %1825 = vmatprep.subr.mxu1 (!%p190_p2), %v1916_v1  ;;  %316 = vmatprep.mubr.f32.mxu0 (!%p190_p2), %v1916_v1  ;;  %s1919_s26 = smov (!%p190_p2), 126   ;;  %vm242_vm1 = vcmask (!%p190_p2), 1039360   ;;  %v1778_v13 = vld [vmem:[%s2082_s1 + $0x8] sm:$0xff] (!%p190_p2)  ;;  %vm248_vm2 = vcmask (!%p190_p2), 64512   ;;  %vm545_vm3 = vcmask (!%p190_p2), 1031168  }
   0x9   : > { %1827 = vmatprep.mubr.msk.f32.mxu1 (!%p190_p2), %vm1917_vm0, %v1916_v1  ;;  %s1920_s27 = smov (!%p190_p2), 110   ;;  %s1921_s28 = smov (!%p190_p2), 109   ;;  %v1804_v6 = vld [vmem:[#allocation2] ss:$0 sm:$0xff] (!%p190_p2)  ;;  %1906 = vset.pattern.permute.xlu0 (!%p190_p2), %v1926_v7  ;;  %vm706_vm4 = vcmask (!%p190_p2), 900096   ;;  %v1783_v22 = vld [vmem:[%s2082_s1 + $0x10] sm:$0xff] (!%p190_p2) }
   0xa   : > { %s1922_s29 = smov (!%p190_p2), 108   ;;  %s1923_s30 = smov (!%p190_p2), 92   ;;  %1907 = vset.pattern.permute.xlu1 (!%p190_p2), %v1926_v7  ;;  %v227_v18 = vld [vmem:[%s2082_s1] sm:$0xff] (!%p190_p2)  ;;  %v1786_v26 = vld [vmem:[%s2082_s1 + $0x18] sm:$0xff] (!%p190_p2)  ;;  %vm867_vm5 = vcmask (!%p190_p2), 891904   ;;  %v1792_v34 = vld [vmem:[%s2082_s1 + $0x28] sm:$0xff] (!%p190_p2) }
   0xb   : > { %s1924_s6 = smov (!%p190_p2), 91   ;;  %s1925_s7 = smov (!%p190_p2), 90   ;;  %v1789_v29 = vld [vmem:[%s2082_s1 + $0x20] sm:$0xff] (!%p190_p2)  ;;  %vm1028_vm6 = vcmask (!%p190_p2), 883712   ;;  %v1795_v41 = vld [vmem:[%s2082_s1 + $0x30] sm:$0xff] (!%p190_p2)  ;;  %vm1189_vm7 = vcmask (!%p190_p2), 752640  }
   0xc   : > { %v1798_v44 = vld [vmem:[%s2082_s1 + $0x38] sm:$0xff] (!%p190_p2)  ;;  %v1801_v48 = vld [vmem:[%s2082_s1 + $0x40] sm:$0xff] (!%p190_p2)  ;;  %vm1350_vm8 = vcmask (!%p190_p2), 744448   ;;  %vm1511_vm9 = vcmask (!%p190_p2), 736256   ;;  %vm1714_vm11 = vcmask (!%p190_p2), 556032  }
   0xf   : > { %s2088_s21 = smov (!%p217_p3, %s1771_s21), 1 }
  0x10   : > { %s1886_s3 = smul.u32 24, %s2088_s21 }
  0x12   : > { %s221_s24 = scalar_lea.vmem %s2081_s0, %s1886_s3  ;;  %s226_s9 = scalar_lea.vmem %s2086_s5, %s1886_s3 }
  0x13   : > { %v229_v2 = vld [vmem:[%s221_s24 + $0x8] sm:$0xff]  ;;  %v228_v3 = vld [vmem:[%s221_s24] sm:$0xff]  ;;  %v230_v4 = vld [vmem:[%s221_s24 + $0x10] sm:$0xff] }
  0x14   : > { %238 = vrot.lane.b32.xlu0 %v229_v2, %s1918_s25  ;;  %236 = vrot.lane.b32.xlu1 %v228_v3, %s1918_s25 }
  0x18   : > { %240 = vrot.lane.b32.xlu0 %v230_v4, %s1918_s25  ;;  %541 = vrot.lane.b32.xlu1 %v229_v2, %s1919_s26 }
  0x1c   : > { %543 = vrot.lane.b32.xlu0 %v230_v4, %s1919_s26  ;;  %539 = vrot.lane.b32.xlu1 %v228_v3, %s1919_s26 }
  0x20   : > { %702 = vrot.lane.b32.xlu0 %v229_v2, %s1920_s27  ;;  %704 = vrot.lane.b32.xlu1 %v230_v4, %s1920_s27 }
  0x24   : > { %700 = vrot.lane.b32.xlu0 %v228_v3, %s1920_s27  ;;  %863 = vrot.lane.b32.xlu1 %v229_v2, %s1921_s28 }
  0x28   : > { %865 = vrot.lane.b32.xlu0 %v230_v4, %s1921_s28  ;;  %861 = vrot.lane.b32.xlu1 %v228_v3, %s1921_s28 }
  0x2c   : > { %1024 = vrot.lane.b32.xlu0 %v229_v2, %s1922_s29  ;;  %1026 = vrot.lane.b32.xlu1 %v230_v4, %s1922_s29 }
  0x30   : > { %1022 = vrot.lane.b32.xlu0 %v228_v3, %s1922_s29  ;;  %1185 = vrot.lane.b32.xlu1 %v229_v2, %s1923_s30 }
  0x34   : > { %1187 = vrot.lane.b32.xlu0 %v230_v4, %s1923_s30  ;;  %1183 = vrot.lane.b32.xlu1 %v228_v3, %s1923_s30 }
  0x38   : > { %1346 = vrot.lane.b32.xlu0 %v229_v2, %s1924_s6  ;;  %1348 = vrot.lane.b32.xlu1 %v230_v4, %s1924_s6 }
  0x3c   : > { %1344 = vrot.lane.b32.xlu0 %v228_v3, %s1924_s6  ;;  %1507 = vrot.lane.b32.xlu1 %v229_v2, %s1925_s7 }
  0x40   : > { %1509 = vrot.lane.b32.xlu0 %v230_v4, %s1925_s7  ;;  %1505 = vrot.lane.b32.xlu1 %v228_v3, %s1925_s7 }
  0x44   : > { %1667 = vperm.xlu0 %1906, %v1664_v5   ;;  %1683 = vperm.xlu1 %1907, %v1804_v6  }
  0x86   : > { %v239_v8 = vpop.permute.xlu0 %238  ;;  %v237_v9 = vpop.permute.xlu1 %236 }
  0x87   : > { %v243_v14 = vsel %vm242_vm1, %v237_v9, %v239_v8 }
  0x8a   : > { %v241_v10 = vpop.permute.xlu0 %240  ;;  %v542_v11 = vpop.permute.xlu1 %541 }
  0x8b   : > { %1826 = vmatpush3.msra.mxu1 %v241_v10  ;;  %v244_v12 = vsel %vm242_vm1, %v239_v8, %v241_v10 }
  0x8c   : > { %252 = vmatprep.subr.mxu0 %v244_v12  ;;  %1828 = vmatmul.mubr.msk.f32.vlgmr.msra.gmra.mrb[0].mxu1 %vm248_vm2, %v1778_v13 }
  0x8d   : > { %253 = vmatpush1.msra.mxu0 %v243_v14  ;;  %1830 = vmatprep.subr.mxu1 %v1916_v1 }
  0x8e   : > { %1779 = vmatmul.mubr.msk.f32.vlgmr.msra.gmra.mrb[0].mxu0 %vm248_vm2, %v1778_v13  ;;  %396 = vmatprep.subr.mxu0 %v229_v2  ;;  %v544_v15 = vpop.permute.xlu0 %543  ;;  %v540_v16 = vpop.permute.xlu1 %539  ;;  %v1694_v13 = vlaneseq }
  0x8f   : > { %397 = vmatpush1.msra.mxu0 %v228_v3  ;;  %1831 = vmatpush3.msra.mxu1 %v230_v4  ;;  %v547_v17 = vsel %vm545_vm3, %v542_v11, %v544_v15  ;;  %v546_v21 = vsel %vm545_vm3, %v540_v16, %v542_v11 }
  0x90   : > { %554 = vmatprep.subr.mxu0 %v547_v17  ;;  %1832 = vmatprep.mubr.msk.f32.mxu1 %vm1917_vm0, %v1916_v1  ;;  %v1695_v17 = vshrl.u32 %v1694_v13, 7 }
  0x91   : > { %1835 = vmatprep.subr.mxu1 %v1916_v1  ;;  %1833 = vmatmul.mubr.msk.f32.vlgmr.msra.gmra.mrb[2].mxu1 %vm248_vm2, %v227_v18 }
  0x92   : > { %1836 = vmatpush3.msra.mxu1 %v544_v15  ;;  %v703_v19 = vpop.permute.xlu0 %702  ;;  %460 = vmatprep.mubr.f32.mxu0 %v1916_v1  ;;  %v705_v20 = vpop.permute.xlu1 %704 }
  0x93   : > { %1837 = vmatprep.mubr.msk.f32.mxu1 %vm1917_vm0, %v1916_v1  ;;  %1840 = vmatprep.subr.mxu1 %v1916_v1  ;;  %v708_v23 = vsel %vm706_vm4, %v703_v19, %v705_v20 }
  0x95   : > { %1838 = vmatmul.mubr.msk.f32.vlgmr.msra.gmra.mrb[4].mxu1 %vm248_vm2, %v1783_v22 }
  0x96   : > { %1781 = vmatmul.mubr.msk.f32.vlgmr.msra.gmra.mrb[0].mxu0 %vm248_vm2, %v227_v18  ;;  %v701_v24 = vpop.permute.xlu0 %700  ;;  %1841 = vmatpush3.msra.mxu1 %v705_v20  ;;  %v864_v25 = vpop.permute.xlu1 %863  ;;  %v1704_v20 = vsub.s32 2, %v1695_v17 }
  0x97   : > { %555 = vmatpush1.msra.mxu0 %v546_v21  ;;  %618 = vmatprep.mubr.f32.mxu0 %v1916_v1  ;;  %v707_v30 = vsel %vm706_vm4, %v701_v24, %v703_v19 }
  0x98   : > { %715 = vmatprep.subr.mxu0 %v708_v23  ;;  %1842 = vmatprep.mubr.msk.f32.mxu1 %vm1917_vm0, %v1916_v1 }
  0x99   : > { %1845 = vmatprep.subr.mxu1 %v1916_v1  ;;  %1843 = vmatmul.mubr.msk.f32.vlgmr.msra.gmra.mrb[6].mxu1 %vm248_vm2, %v1786_v26 }
  0x9a   : > { %v866_v27 = vpop.permute.xlu0 %865  ;;  %v862_v28 = vpop.permute.xlu1 %861  ;;  %1847 = vmatprep.mubr.msk.f32.mxu1 %vm1917_vm0, %v1916_v1 }
  0x9b   : > { %1846 = vmatpush3.msra.mxu1 %v866_v27  ;;  %v869_v31 = vsel %vm867_vm5, %v864_v25, %v866_v27  ;;  %v868_v37 = vsel %vm867_vm5, %v862_v28, %v864_v25 }
  0x9c   : > { %1850 = vmatprep.subr.mxu1 %v1916_v1 }
  0x9d   : > { %1848 = vmatmul.mubr.msk.f32.vlgmr.msra.gmra.mrb[8].mxu1 %vm248_vm2, %v1789_v29 }
  0x9e   : > { %1784 = vmatmul.mubr.msk.f32.vlgmr.msra.gmra.mrb[0].mxu0 %vm248_vm2, %v1783_v22  ;;  %v1025_v32 = vpop.permute.xlu0 %1024  ;;  %v1027_v33 = vpop.permute.xlu1 %1026  ;;  %1852 = vmatprep.mubr.msk.f32.mxu1 %vm1917_vm0, %v1916_v1  ;;  %v1692_v22 = vld [vmem:[%s2085_s4] sm:$0x7] }
  0x9f   : > { %716 = vmatpush1.msra.mxu0 %v707_v30  ;;  %779 = vmatprep.mubr.f32.mxu0 %v1916_v1  ;;  %v1030_v38 = vsel %vm1028_vm6, %v1025_v32, %v1027_v33  ;;  %v1696_v30 = vsub.s32 0, %v1695_v17 }
  0xa0   : > { %876 = vmatprep.subr.mxu0 %v869_v31  ;;  %1851 = vmatpush3.msra.mxu1 %v1027_v33  ;;  %v1700_v31 = vsub.s32 1, %v1695_v17 }
  0xa1   : > { %1853 = vmatmul.mubr.msk.f32.vlgmr.msra.gmra.mrb[10].mxu1 %vm248_vm2, %v1792_v34  ;;  %1855 = vmatprep.subr.mxu1 %v1916_v1 }
  0xa2   : > { %v1023_v35 = vpop.permute.xlu0 %1022  ;;  %v1186_v36 = vpop.permute.xlu1 %1185  ;;  %1857 = vmatprep.mubr.msk.f32.mxu1 %vm1917_vm0, %v1916_v1 }
  0xa3   : > { %v1029_v45 = vsel %vm1028_vm6, %v1023_v35, %v1025_v32  ;;  %v1697_v35 = vrot.slane %v1692_v22, %v1696_v30 }
  0xa6   : > { %1787 = vmatmul.mubr.msk.f32.vlgmr.msra.gmra.mrb[0].mxu0 %vm248_vm2, %v1786_v26  ;;  %v1188_v39 = vpop.permute.xlu0 %1187  ;;  %v1184_v40 = vpop.permute.xlu1 %1183  ;;  %v1705_v26 = vrot.slane %v1692_v22, %v1704_v20 }
  0xa7   : > { %877 = vmatpush1.msra.mxu0 %v868_v37  ;;  %940 = vmatprep.mubr.f32.mxu0 %v1916_v1  ;;  %v1191_v46 = vsel %vm1189_vm7, %v1186_v36, %v1188_v39  ;;  %v1190_v50 = vsel %vm1189_vm7, %v1184_v40, %v1186_v36 }
  0xa8   : > { %1037 = vmatprep.subr.mxu0 %v1030_v38  ;;  %1856 = vmatpush3.msra.mxu1 %v1188_v39  ;;  %v1701_v38 = vrot.slane %v1692_v22, %v1700_v31 }
  0xa9   : > { %1858 = vmatmul.mubr.msk.f32.vlgmr.msra.gmra.mrb[12].mxu1 %vm248_vm2, %v1795_v41  ;;  %1860 = vmatprep.subr.mxu1 %v1916_v1 }
  0xaa   : > { %v1347_v42 = vpop.permute.xlu0 %1346  ;;  %v1349_v43 = vpop.permute.xlu1 %1348  ;;  %1862 = vmatprep.mubr.msk.f32.mxu1 %vm1917_vm0, %v1916_v1 }
  0xab   : > { %1861 = vmatpush3.msra.mxu1 %v1349_v43  ;;  %v1352_v51 = vsel %vm1350_vm8, %v1347_v42, %v1349_v43 }
  0xac   : > { %1865 = vmatprep.subr.mxu1 %v1916_v1 }
  0xad   : > { %1863 = vmatmul.mubr.msk.f32.vlgmr.msra.gmra.mrb[14].mxu1 %vm248_vm2, %v1798_v44 }
  0xae   : > { %1790 = vmatmul.mubr.msk.f32.vlgmr.msra.gmra.mrb[0].mxu0 %vm248_vm2, %v1789_v29  ;;  %v1345_v47 = vpop.permute.xlu0 %1344  ;;  %1867 = vmatprep.mubr.msk.f32.mxu1 %vm1917_vm0, %v1916_v1  ;;  %v1508_v52 = vpop.permute.xlu1 %1507 }
  0xaf   : > { %1038 = vmatpush1.msra.mxu0 %v1029_v45  ;;  %1101 = vmatprep.mubr.f32.mxu0 %v1916_v1  ;;  %v1351_v53 = vsel %vm1350_vm8, %v1345_v47, %v1347_v42 }
  0xb0   : > { %1198 = vmatprep.subr.mxu0 %v1191_v46 }
  0xb2   : > { %v1510_v49 = vpop.permute.xlu0 %1509  ;;  %v1506_v55 = vpop.permute.xlu1 %1505 }
  0xb3   : > { %1866 = vmatpush3.msra.mxu1 %v1510_v49  ;;  %v1513_v54 = vsel %vm1511_vm9, %v1508_v52, %v1510_v49  ;;  %v1512_v56 = vsel %vm1511_vm9, %v1506_v55, %v1508_v52 }
  0xb4   : > { %1868 = vmatmul.mubr.msk.f32.vlgmr.msra.gmra.mrb[16].mxu1 %vm248_vm2, %v1801_v48 }
  0xb6   : > { %1793 = vmatmul.mubr.msk.f32.vlgmr.msra.gmra.mrb[0].mxu0 %vm248_vm2, %v1792_v34 }
  0xb7   : > { %1199 = vmatpush1.msra.mxu0 %v1190_v50  ;;  %1262 = vmatprep.mubr.f32.mxu0 %v1916_v1 }
  0xb8   : > { %1359 = vmatprep.subr.mxu0 %v1352_v51 }
  0xbe   : > { %1796 = vmatmul.mubr.msk.f32.vlgmr.msra.gmra.mrb[0].mxu0 %vm248_vm2, %v1795_v41 }
  0xbf   : > { %1360 = vmatpush1.msra.mxu0 %v1351_v53  ;;  %1423 = vmatprep.mubr.f32.mxu0 %v1916_v1 }
  0xc0   : > { %1520 = vmatprep.subr.mxu0 %v1513_v54 }
  0xc3   : > { %v1668_v19 = vpop.permute.xlu0 %1667  ;;  %v1684_v24 = vpop.permute.xlu1 %1683 }
  0xc6   : > { %1799 = vmatmul.mubr.msk.f32.vlgmr.msra.gmra.mrb[0].mxu0 %vm248_vm2, %v1798_v44 }
  0xc7   : > { %1521 = vmatpush1.msra.mxu0 %v1512_v56  ;;  %1584 = vmatprep.mubr.f32.mxu0 %v1916_v1 }
  0xce   : > { %1802 = vmatmul.mubr.msk.f32.vlgmr.msra.gmra.mrb[0].mxu0 %vm248_vm2, %v1801_v48 }
 0x15f   : > { %v389_v57 = vpop.f32.mrb[0].mxu1 }
 0x160   : > { %v1829_v58 = vpop.f32.mrb[1].mxu1 }
 0x164   : > { %v533_v59 = vpop.f32.mrb[2].mxu1 }
 0x165   : > { %v534_v60 = vadd.f32 %v533_v59, %v389_v57  ;;  %v1834_v61 = vpop.f32.mrb[3].mxu1 }
 0x168   : > { %v691_v62 = vpop.f32.mrb[4].mxu1 }
 0x169   : > { %v697_v63 = vadd.f32 %v691_v62, %v534_v60  ;;  %v1839_v0 = vpop.f32.mrb[5].mxu1 }
 0x16c   : > { %v852_v2 = vpop.f32.mrb[6].mxu1 }
 0x16d   : > { %v858_v3 = vadd.f32 %v852_v2, %v697_v63  ;;  %v1844_v4 = vpop.f32.mrb[7].mxu1 }
 0x170   : > { %v1013_v5 = vpop.f32.mrb[8].mxu1 }
 0x171   : > { %v1019_v6 = vadd.f32 %v1013_v5, %v858_v3  ;;  %v1849_v7 = vpop.f32.mrb[9].mxu1 }
 0x174   : > { %v1174_v8 = vpop.f32.mrb[10].mxu1 }
 0x175   : > { %v1180_v9 = vadd.f32 %v1174_v8, %v1019_v6  ;;  %v1854_v10 = vpop.f32.mrb[11].mxu1 }
 0x17c   : > { %v1335_v1 = vpop.f32.mrb[12].mxu1 }
 0x17d   : > { %v1341_v11 = vadd.f32 %v1335_v1, %v1180_v9  ;;  %v1859_v12 = vpop.f32.mrb[13].mxu1 }
 0x180   : > { %v1496_v14 = vpop.f32.mrb[14].mxu1 }
 0x181   : > { %v1502_v15 = vadd.f32 %v1496_v14, %v1341_v11  ;;  %v1864_v16 = vpop.f32.mrb[15].mxu1 }
 0x187   : > { %v1657_v18 = vpop.f32.mrb[16].mxu1 }
 0x188   : > { %v1663_v21 = vadd.f32 %v1657_v18, %v1502_v15  ;;  %v1869_v23 = vpop.f32.mrb[17].mxu1 }
 0x18a   : > { %v1672_v25 = vadd.f32 %v1668_v19, %v1663_v21 }
 0x18c   : > { %vm1675_vm10 = vcmp.ge.f32.partialorder %v1672_v25, 0.0  ;;  %v1688_v27 = vmul.f32 %v1684_v24, %v1672_v25 }
 0x18e   : > { %v1691_v28 = vsel %vm1675_vm10, %v1672_v25, %v1688_v27 }
 0x18f   : > { %v1711_v29 = vmul.f32 %v1705_v26, %v1691_v28 }
 0x191   : > { %1715 = vst.msk [vmem:[%s226_s9 + $0x10] sm:$0xff] %vm1714_vm11, %v1711_v29 }
 0x1a1   : > { %v1586_v32 = vpop.f32.mrb[0].mxu0 }
 0x1a2   : > { %v1670_v33 = vadd.f32 %v1668_v19, %v1586_v32  ;;  %v1588_v34 = vpop.f32.mrb[1].mxu0 }
 0x1a3   : > { %v1671_v36 = vadd.f32 %v1668_v19, %v1588_v34 }
 0x1a4   : > { %vm1673_vm12 = vcmp.ge.f32.partialorder %v1670_v33, 0.0  ;;  %v1686_v37 = vmul.f32 %v1684_v24, %v1670_v33 }
 0x1a5   : > { %vm1674_vm13 = vcmp.ge.f32.partialorder %v1671_v36, 0.0  ;;  %v1687_v39 = vmul.f32 %v1684_v24, %v1671_v36 }
 0x1a6   : > { %v1689_v40 = vsel %vm1673_vm12, %v1670_v33, %v1686_v37 }
 0x1a7   : > { %v1709_v41 = vmul.f32 %v1697_v35, %v1689_v40  ;;  %v1690_v42 = vsel %vm1674_vm13, %v1671_v36, %v1687_v39 }
 0x1a8   : > { %v1710_v43 = vmul.f32 %v1701_v38, %v1690_v42 }
 0x1a9   : > { %1712 = vst [vmem:[%s226_s9] sm:$0xff] %v1709_v41 }
 0x1aa   : > { %1713 = vst [vmem:[%s226_s9 + $0x8] sm:$0xff] %v1710_v43 }
 0x1ab PF: > { %s17_s20 = sadd.s32 1, %s1914_s20  }
 0x1ac   : > { %p14_p4 = scmp.ge.s32.totalorder %s17_s20, 4  }
 0x1ae   :  { %16 = sbr.rel (!%p14_p4) target bundleno = 3 (0x3), region = 78 }

// kernel: lka_block_forward.9
= control target key start
LH: loop header
LB: loop body
LE: loop exit
PB: predicated region body
PF: predicated region fallthrough
CT: control target
= control target key end

     0   :  { %s2054_s20 = smov 0   ;;  %s2238_s0 = inlined_call_operand.vmem [shape: f32[2,4,362], index: 0, kind: input, shape index: {}]   ;;  %s2239_s1 = inlined_call_operand.vmem [shape: f32[9,8,4], index: 1, kind: input, shape index: {}]   ;;  %s2240_s2 = inlined_call_operand.vmem [shape: f32[8,1], index: 2, kind: input, shape index: {}]   ;;  %s2241_s3 = inlined_call_operand.<no memory space> [shape: f32[1,1], index: 3, kind: input, shape index: {}]   ;;  %s2242_s4 = inlined_call_operand.vmem [shape: f32[1,324], index: 4, kind: input, shape index: {}]   ;;  %s2243_s5 = inlined_call_operand.vmem [shape: f32[2,8,324], index: 5, kind: output, shape index: {}]  }
   0x1   :  { %v10_v0 = vstv %s2241_s3 }
   0x2   :  { %11 = vst [vmem:[#allocation2] sm:$0x1] %v10_v0 }
   0x3 LB: > { %s1836_s21 = sadd.s32 4294967295, %s2008_s20   ;;  %p1840_p0 = scmp.ge.s32.totalorder %s2008_s20, 1  ;;  %s2008_s20 = sphi %s2054_s20, %s17_s20  }
   0x4   : > { %p189_p1 = scmp.lt.s32.totalorder %s2008_s20, 3 }
   0x6   : > { %p190_p2 = pnand %p1840_p0, %p189_p1 }
   0x7   : > { %p217_p3 = scmp.lt.s32.totalorder (!%p190_p2), %s1836_s21, 1  ;;  %v2010_v1 = vmov (!%p190_p2), 0.0   ;;  %vm2011_vm0 = vmmov (!%p190_p2), 0   ;;  %s2012_s25 = smov (!%p190_p2), 127   ;;  %v1729_v12 = vld [vmem:[%s2240_s2] sm:$0xff] (!%p190_p2)  ;;  %v2020_v14 = vmov (!%p190_p2), 0  }
   0x8   : > { %193 = sbr.rel (%p190_p2) target bundleno = 429 (0x1ad), region = 40  ;;  %1917 = vmatprep.subr.mxu1 (!%p190_p2), %v2010_v1  ;;  %319 = vmatprep.mubr.f32.mxu0 (!%p190_p2), %v2010_v1  ;;  %s2013_s26 = smov (!%p190_p2), 126   ;;  %vm248_vm1 = vcmask (!%p190_p2), 1043456   ;;  %vm241_vm2 = vcmask (!%p190_p2), 1039360   ;;  %v1843_v20 = vld [vmem:[%s2239_s1 + $0x8] sm:$0xff] (!%p190_p2)  ;;  %vm244_vm3 = vcmask (!%p190_p2), 31744  }
   0x9   : > { %1919 = vmatprep.mubr.msk.f32.mxu1 (!%p190_p2), %vm2011_vm0, %v2010_v1  ;;  %s2014_s27 = smov (!%p190_p2), 110   ;;  %s2015_s28 = smov (!%p190_p2), 109   ;;  %v1896_v13 = vld [vmem:[#allocation2] ss:$0 sm:$0xff] (!%p190_p2)  ;;  %1999 = vset.pattern.permute.xlu0 (!%p190_p2), %v2020_v14  ;;  %vm559_vm4 = vcmask (!%p190_p2), 1031168   ;;  %vm728_vm5 = vcmask (!%p190_p2), 900096  }
   0xa   : > { %s2016_s29 = smov (!%p190_p2), 108   ;;  %s2017_s30 = smov (!%p190_p2), 92   ;;  %2000 = vset.pattern.permute.xlu1 (!%p190_p2), %v2020_v14  ;;  %v227_v26 = vld [vmem:[%s2239_s1] sm:$0xff] (!%p190_p2)  ;;  %v1854_v31 = vld [vmem:[%s2239_s1 + $0x10] sm:$0xff] (!%p190_p2)  ;;  %v1860_v33 = vld [vmem:[%s2239_s1 + $0x18] sm:$0xff] (!%p190_p2)  ;;  %vm897_vm6 = vcmask (!%p190_p2), 891904  }
   0xb   : > { %s2018_s6 = smov (!%p190_p2), 91   ;;  %s2019_s7 = smov (!%p190_p2), 90   ;;  %v1866_v36 = vld [vmem:[%s2239_s1 + $0x20] sm:$0xff] (!%p190_p2)  ;;  %v1872_v41 = vld [vmem:[%s2239_s1 + $0x28] sm:$0xff] (!%p190_p2)  ;;  %vm1066_vm7 = vcmask (!%p190_p2), 883712   ;;  %v1878_v48 = vld [vmem:[%s2239_s1 + $0x30] sm:$0xff] (!%p190_p2) }
   0xc   : > { %vm1235_vm8 = vcmask (!%p190_p2), 752640   ;;  %v1884_v51 = vld [vmem:[%s2239_s1 + $0x38] sm:$0xff] (!%p190_p2)  ;;  %v1890_v55 = vld [vmem:[%s2239_s1 + $0x40] sm:$0xff] (!%p190_p2)  ;;  %vm1404_vm9 = vcmask (!%p190_p2), 744448   ;;  %vm1573_vm10 = vcmask (!%p190_p2), 736256   ;;  %vm1779_vm12 = vcmask (!%p190_p2), 556032  }
   0xf   : > { %s2245_s21 = smov (!%p217_p3, %s1836_s21), 1 }
  0x10   : > { %s1978_s3 = smul.u32 12, %s2245_s21 }
  0x12   : > { %s2070_s24 = scalar_lea.vmem %s2238_s0, %s1978_s3 }
  0x13   : > { %v2075_v2 = vld [vmem:[%s2070_s24] sm:$0xff]  ;;  %v2084_v4 = vld [vmem:[%s2070_s24 + $0x8] sm:$0xf] }
  0x14   : > { %235 = vrot.lane.b32.xlu1 %v2075_v2, %s2012_s25  ;;  %v2080_v3 = vcombine.high %v2075_v2, %v2075_v2  ;;  %v549_v5 = vld [vmem:[%s2070_s24 + $0x8] sm:$0xf] }
  0x15   : > { %v718_v6 = vld [vmem:[%s2070_s24 + $0x8] sm:$0xf] }
  0x16   : > { %237 = vrot.lane.b32.xlu0 %v2080_v3, %s2012_s25  ;;  %v887_v7 = vld [vmem:[%s2070_s24 + $0x8] sm:$0xf] }
  0x17   : > { %v1056_v8 = vld [vmem:[%s2070_s24 + $0x8] sm:$0xf] }
  0x18   : > { %555 = vrot.lane.b32.xlu1 %v2080_v3, %s2013_s26  ;;  %v1225_v9 = vld [vmem:[%s2070_s24 + $0x8] sm:$0xf] }
  0x19   : > { %v1394_v10 = vld [vmem:[%s2070_s24 + $0x8] sm:$0xf] }
  0x1a   : > { %239 = vrot.lane.b32.xlu0 %v2084_v4, %s2012_s25  ;;  %v1563_v11 = vld [vmem:[%s2070_s24 + $0x8] sm:$0xf] }
  0x1c   : > { %553 = vrot.lane.b32.xlu1 %v2075_v2, %s2013_s26 }
  0x1e   : > { %557 = vrot.lane.b32.xlu0 %v549_v5, %s2013_s26 }
  0x20   : > { %726 = vrot.lane.b32.xlu1 %v718_v6, %s2014_s27 }
  0x22   : > { %724 = vrot.lane.b32.xlu0 %v2080_v3, %s2014_s27 }
  0x24   : > { %893 = vrot.lane.b32.xlu1 %v2080_v3, %s2015_s28 }
  0x26   : > { %722 = vrot.lane.b32.xlu0 %v2075_v2, %s2014_s27 }
  0x28   : > { %891 = vrot.lane.b32.xlu1 %v2075_v2, %s2015_s28 }
  0x2a   : > { %895 = vrot.lane.b32.xlu0 %v887_v7, %s2015_s28 }
  0x2c   : > { %1064 = vrot.lane.b32.xlu1 %v1056_v8, %s2016_s29 }
  0x2e   : > { %1062 = vrot.lane.b32.xlu0 %v2080_v3, %s2016_s29 }
  0x30   : > { %1231 = vrot.lane.b32.xlu1 %v2080_v3, %s2017_s30 }
  0x32   : > { %1060 = vrot.lane.b32.xlu0 %v2075_v2, %s2016_s29 }
  0x34   : > { %1229 = vrot.lane.b32.xlu1 %v2075_v2, %s2017_s30 }
  0x36   : > { %1233 = vrot.lane.b32.xlu0 %v1225_v9, %s2017_s30 }
  0x38   : > { %1402 = vrot.lane.b32.xlu1 %v1394_v10, %s2018_s6 }
  0x3a   : > { %1400 = vrot.lane.b32.xlu0 %v2080_v3, %s2018_s6 }
  0x3c   : > { %1569 = vrot.lane.b32.xlu1 %v2080_v3, %s2019_s7 }
  0x3e   : > { %1398 = vrot.lane.b32.xlu0 %v2075_v2, %s2018_s6  ;;  %s1979_s6 = smul.u32 24, %s2245_s21 }
  0x40   : > { %1567 = vrot.lane.b32.xlu1 %v2075_v2, %s2019_s7  ;;  %s226_s9 = scalar_lea.vmem %s2243_s5, %s1979_s6 }
  0x42   : > { %1571 = vrot.lane.b32.xlu0 %v1563_v11, %s2019_s7 }
  0x44   : > { %1748 = vperm.xlu1 %2000, %v1896_v13  }
  0x46   : > { %1732 = vperm.xlu0 %1999, %v1729_v12  }
  0x86   : > { %v236_v15 = vpop.permute.xlu1 %235 }
  0x88   : > { %v238_v16 = vpop.permute.xlu0 %237 }
  0x89   : > { %v242_v21 = vsel %vm241_vm2, %v236_v15, %v238_v16 }
  0x8a   : > { %v556_v17 = vpop.permute.xlu1 %555 }
  0x8c   : > { %v240_v18 = vpop.permute.xlu0 %239 }
  0x8d   : > { %1918 = vmatpush3.msk.msra.mxu1 %vm248_vm1, %v240_v18  ;;  %v243_v19 = vsel %vm241_vm2, %v238_v16, %v240_v18 }
  0x8e   : > { %1844 = vmatprep.subr.msk.mxu0 %vm248_vm1, %v243_v19  ;;  %v554_v22 = vpop.permute.xlu1 %553  ;;  %1920 = vmatmul.mubr.msk.f32.vlgmr.msra.gmra.mrb[0].mxu1 %vm244_vm3, %v1843_v20 }
  0x8f   : > { %1845 = vmatpush1.msk.msra.mxu0 %vm248_vm1, %v242_v21  ;;  %1922 = vmatprep.subr.mxu1 %v2010_v1  ;;  %v560_v28 = vsel %vm559_vm4, %v554_v22, %v556_v17 }
  0x90   : > { %1846 = vmatmul.mubr.msk.f32.vlgmr.msra.gmra.mrb[0].mxu0 %vm244_vm3, %v1843_v20  ;;  %1849 = vmatprep.subr.msk.mxu0 %vm248_vm1, %v2080_v3  ;;  %v558_v23 = vpop.permute.xlu0 %557  ;;  %v1759_v20 = vlaneseq }
  0x91   : > { %1850 = vmatpush1.msk.msra.mxu0 %vm248_vm1, %v2075_v2  ;;  %v561_v24 = vsel %vm559_vm4, %v556_v17, %v558_v23  ;;  %1923 = vmatpush3.msk.msra.mxu1 %vm248_vm1, %v2084_v4 }
  0x92   : > { %1855 = vmatprep.subr.msk.mxu0 %vm248_vm1, %v561_v24  ;;  %1924 = vmatprep.mubr.msk.f32.mxu1 %vm2011_vm0, %v2010_v1  ;;  %v727_v25 = vpop.permute.xlu1 %726  ;;  %v1760_v24 = vshrl.u32 %v1759_v20, 7 }
  0x93   : > { %1927 = vmatprep.subr.mxu1 %v2010_v1  ;;  %469 = vmatprep.mubr.f32.mxu0 %v2010_v1 }
  0x94   : > { %1925 = vmatmul.mubr.msk.f32.vlgmr.msra.gmra.mrb[2].mxu1 %vm244_vm3, %v227_v26  ;;  %v725_v27 = vpop.permute.xlu0 %724 }
  0x95   : > { %1928 = vmatpush3.msk.msra.mxu1 %vm248_vm1, %v558_v23  ;;  %1929 = vmatprep.mubr.msk.f32.mxu1 %vm2011_vm0, %v2010_v1  ;;  %v730_v30 = vsel %vm728_vm5, %v725_v27, %v727_v25 }
  0x96   : > { %1932 = vmatprep.subr.mxu1 %v2010_v1  ;;  %v894_v29 = vpop.permute.xlu1 %893 }
  0x98   : > { %1851 = vmatmul.mubr.msk.f32.vlgmr.msra.gmra.mrb[0].mxu0 %vm244_vm3, %v227_v26  ;;  %v723_v32 = vpop.permute.xlu0 %722  ;;  %1930 = vmatmul.mubr.msk.f32.vlgmr.msra.gmra.mrb[4].mxu1 %vm244_vm3, %v1854_v31 }
  0x99   : > { %1856 = vmatpush1.msk.msra.mxu0 %vm248_vm1, %v560_v28  ;;  %635 = vmatprep.mubr.f32.mxu0 %v2010_v1  ;;  %v729_v37 = vsel %vm728_vm5, %v723_v32, %v725_v27  ;;  %v1769_v27 = vsub.s32 2, %v1760_v24 }
  0x9a   : > { %1861 = vmatprep.subr.msk.mxu0 %vm248_vm1, %v730_v30  ;;  %1933 = vmatpush3.msk.msra.mxu1 %vm248_vm1, %v727_v25  ;;  %v892_v34 = vpop.permute.xlu1 %891 }
  0x9b   : > { %1934 = vmatprep.mubr.msk.f32.mxu1 %vm2011_vm0, %v2010_v1  ;;  %1937 = vmatprep.subr.mxu1 %v2010_v1  ;;  %v898_v44 = vsel %vm897_vm6, %v892_v34, %v894_v29 }
  0x9c   : > { %v896_v35 = vpop.permute.xlu0 %895  ;;  %1935 = vmatmul.mubr.msk.f32.vlgmr.msra.gmra.mrb[6].mxu1 %vm244_vm3, %v1860_v33 }
  0x9d   : > { %1938 = vmatpush3.msk.msra.mxu1 %vm248_vm1, %v896_v35  ;;  %1939 = vmatprep.mubr.msk.f32.mxu1 %vm2011_vm0, %v2010_v1  ;;  %v899_v39 = vsel %vm897_vm6, %v894_v29, %v896_v35  ;;  %v1757_v29 = vld [vmem:[%s2242_s4] sm:$0x7] }
  0x9e   : > { %v1065_v38 = vpop.permute.xlu1 %1064  ;;  %1942 = vmatprep.subr.mxu1 %v2010_v1 }
  0xa0   : > { %1857 = vmatmul.mubr.msk.f32.vlgmr.msra.gmra.mrb[0].mxu0 %vm244_vm3, %v1854_v31  ;;  %v1063_v40 = vpop.permute.xlu0 %1062  ;;  %1940 = vmatmul.mubr.msk.f32.vlgmr.msra.gmra.mrb[8].mxu1 %vm244_vm3, %v1866_v36 }
  0xa1   : > { %1862 = vmatpush1.msk.msra.mxu0 %vm248_vm1, %v729_v37  ;;  %804 = vmatprep.mubr.f32.mxu0 %v2010_v1  ;;  %v1068_v46 = vsel %vm1066_vm7, %v1063_v40, %v1065_v38  ;;  %v1761_v37 = vsub.s32 0, %v1760_v24 }
  0xa2   : > { %1867 = vmatprep.subr.msk.mxu0 %vm248_vm1, %v899_v39  ;;  %v1232_v42 = vpop.permute.xlu1 %1231  ;;  %1943 = vmatpush3.msk.msra.mxu1 %vm248_vm1, %v1065_v38  ;;  %v1765_v38 = vsub.s32 1, %v1760_v24 }
  0xa3   : > { %1944 = vmatprep.mubr.msk.f32.mxu1 %vm2011_vm0, %v2010_v1  ;;  %1947 = vmatprep.subr.mxu1 %v2010_v1 }
  0xa4   : > { %v1061_v43 = vpop.permute.xlu0 %1060  ;;  %1945 = vmatmul.mubr.msk.f32.vlgmr.msra.gmra.mrb[10].mxu1 %vm244_vm3, %v1872_v41 }
  0xa5   : > { %1949 = vmatprep.mubr.msk.f32.mxu1 %vm2011_vm0, %v2010_v1  ;;  %v1067_v52 = vsel %vm1066_vm7, %v1061_v43, %v1063_v40 }
  0xa6   : > { %v1230_v45 = vpop.permute.xlu1 %1229 }
  0xa7   : > { %v1236_v57 = vsel %vm1235_vm8, %v1230_v45, %v1232_v42  ;;  %v1766_v45 = vrot.slane %v1757_v29, %v1765_v38 }
  0xa8   : > { %1863 = vmatmul.mubr.msk.f32.vlgmr.msra.gmra.mrb[0].mxu0 %vm244_vm3, %v1860_v33  ;;  %v1234_v47 = vpop.permute.xlu0 %1233  ;;  %v1770_v33 = vrot.slane %v1757_v29, %v1769_v27 }
  0xa9   : > { %1868 = vmatpush1.msk.msra.mxu0 %vm248_vm1, %v898_v44  ;;  %973 = vmatprep.mubr.f32.mxu0 %v2010_v1  ;;  %v1237_v53 = vsel %vm1235_vm8, %v1232_v42, %v1234_v47  ;;  %v1762_v42 = vrot.slane %v1757_v29, %v1761_v37 }
  0xaa   : > { %1873 = vmatprep.subr.msk.mxu0 %vm248_vm1, %v1068_v46  ;;  %1948 = vmatpush3.msk.msra.mxu1 %vm248_vm1, %v1234_v47  ;;  %v1403_v49 = vpop.permute.xlu1 %1402 }
  0xab   : > { %1950 = vmatmul.mubr.msk.f32.vlgmr.msra.gmra.mrb[12].mxu1 %vm244_vm3, %v1878_v48  ;;  %1952 = vmatprep.subr.mxu1 %v2010_v1 }
  0xac   : > { %v1401_v50 = vpop.permute.xlu0 %1400  ;;  %1953 = vmatpush3.msk.msra.mxu1 %vm248_vm1, %v1403_v49  ;;  %1954 = vmatprep.mubr.msk.f32.mxu1 %vm2011_vm0, %v2010_v1 }
  0xad   : > { %1957 = vmatprep.subr.mxu1 %v2010_v1  ;;  %v1406_v58 = vsel %vm1404_vm9, %v1401_v50, %v1403_v49 }
  0xae   : > { %v1570_v59 = vpop.permute.xlu1 %1569 }
  0xaf   : > { %1955 = vmatmul.mubr.msk.f32.vlgmr.msra.gmra.mrb[14].mxu1 %vm244_vm3, %v1884_v51 }
  0xb0   : > { %1869 = vmatmul.mubr.msk.f32.vlgmr.msra.gmra.mrb[0].mxu0 %vm244_vm3, %v1866_v36  ;;  %v1399_v54 = vpop.permute.xlu0 %1398  ;;  %1959 = vmatprep.mubr.msk.f32.mxu1 %vm2011_vm0, %v2010_v1 }
  0xb1   : > { %1874 = vmatpush1.msk.msra.mxu0 %vm248_vm1, %v1067_v52  ;;  %1142 = vmatprep.mubr.f32.mxu0 %v2010_v1  ;;  %v1405_v60 = vsel %vm1404_vm9, %v1399_v54, %v1401_v50 }
  0xb2   : > { %1879 = vmatprep.subr.msk.mxu0 %vm248_vm1, %v1237_v53  ;;  %v1568_v62 = vpop.permute.xlu1 %1567 }
  0xb3   : > { %v1574_v63 = vsel %vm1573_vm10, %v1568_v62, %v1570_v59 }
  0xb4   : > { %v1572_v56 = vpop.permute.xlu0 %1571 }
  0xb5   : > { %1958 = vmatpush3.msk.msra.mxu1 %vm248_vm1, %v1572_v56  ;;  %v1575_v61 = vsel %vm1573_vm10, %v1570_v59, %v1572_v56 }
  0xb6   : > { %1960 = vmatmul.mubr.msk.f32.vlgmr.msra.gmra.mrb[16].mxu1 %vm244_vm3, %v1890_v55 }
  0xb8   : > { %1875 = vmatmul.mubr.msk.f32.vlgmr.msra.gmra.mrb[0].mxu0 %vm244_vm3, %v1872_v41 }
  0xb9   : > { %1880 = vmatpush1.msk.msra.mxu0 %vm248_vm1, %v1236_v57  ;;  %1311 = vmatprep.mubr.f32.mxu0 %v2010_v1 }
  0xba   : > { %1885 = vmatprep.subr.msk.mxu0 %vm248_vm1, %v1406_v58 }
  0xc0   : > { %1881 = vmatmul.mubr.msk.f32.vlgmr.msra.gmra.mrb[0].mxu0 %vm244_vm3, %v1878_v48 }
  0xc1   : > { %1886 = vmatpush1.msk.msra.mxu0 %vm248_vm1, %v1405_v60  ;;  %1480 = vmatprep.mubr.f32.mxu0 %v2010_v1 }
  0xc2   : > { %1891 = vmatprep.subr.msk.mxu0 %vm248_vm1, %v1575_v61 }
  0xc3   : > { %v1749_v31 = vpop.permute.xlu1 %1748 }
  0xc5   : > { %v1733_v26 = vpop.permute.xlu0 %1732 }
  0xc8   : > { %1887 = vmatmul.mubr.msk.f32.vlgmr.msra.gmra.mrb[0].mxu0 %vm244_vm3, %v1884_v51 }
  0xc9   : > { %1892 = vmatpush1.msk.msra.mxu0 %vm248_vm1, %v1574_v63  ;;  %1649 = vmatprep.mubr.f32.mxu0 %v2010_v1 }
  0xd0   : > { %1893 = vmatmul.mubr.msk.f32.vlgmr.msra.gmra.mrb[0].mxu0 %vm244_vm3, %v1890_v55 }
 0x161   : > { %v392_v0 = vpop.f32.mrb[0].mxu1 }
 0x162   : > { %v1921_v2 = vpop.f32.mrb[1].mxu1 }
 0x167   : > { %v542_v3 = vpop.f32.mrb[2].mxu1 }
 0x168   : > { %v543_v4 = vadd.f32 %v542_v3, %v392_v0  ;;  %v1926_v5 = vpop.f32.mrb[3].mxu1 }
 0x16b   : > { %v708_v6 = vpop.f32.mrb[4].mxu1 }
 0x16c   : > { %v714_v7 = vadd.f32 %v708_v6, %v543_v4  ;;  %v1931_v8 = vpop.f32.mrb[5].mxu1 }
 0x16f   : > { %v877_v9 = vpop.f32.mrb[6].mxu1 }
 0x170   : > { %v883_v10 = vadd.f32 %v877_v9, %v714_v7  ;;  %v1936_v11 = vpop.f32.mrb[7].mxu1 }
 0x173   : > { %v1046_v12 = vpop.f32.mrb[8].mxu1 }
 0x174   : > { %v1052_v13 = vadd.f32 %v1046_v12, %v883_v10  ;;  %v1941_v14 = vpop.f32.mrb[9].mxu1 }
 0x177   : > { %v1215_v15 = vpop.f32.mrb[10].mxu1 }
 0x178   : > { %v1221_v16 = vadd.f32 %v1215_v15, %v1052_v13  ;;  %v1946_v17 = vpop.f32.mrb[11].mxu1 }
 0x17e   : > { %v1384_v1 = vpop.f32.mrb[12].mxu1 }
 0x17f   : > { %v1390_v18 = vadd.f32 %v1384_v1, %v1221_v16  ;;  %v1951_v19 = vpop.f32.mrb[13].mxu1 }
 0x182   : > { %v1553_v21 = vpop.f32.mrb[14].mxu1 }
 0x183   : > { %v1559_v22 = vadd.f32 %v1553_v21, %v1390_v18  ;;  %v1956_v23 = vpop.f32.mrb[15].mxu1 }
 0x189   : > { %v1722_v25 = vpop.f32.mrb[16].mxu1 }
 0x18a   : > { %v1728_v28 = vadd.f32 %v1722_v25, %v1559_v22  ;;  %v1961_v30 = vpop.f32.mrb[17].mxu1 }
 0x18c   : > { %v1737_v32 = vadd.f32 %v1733_v26, %v1728_v28 }
 0x18e   : > { %vm1740_vm11 = vcmp.ge.f32.partialorder %v1737_v32, 0.0  ;;  %v1753_v34 = vmul.f32 %v1749_v31, %v1737_v32 }
 0x190   : > { %v1756_v35 = vsel %vm1740_vm11, %v1737_v32, %v1753_v34 }
 0x191   : > { %v1776_v36 = vmul.f32 %v1770_v33, %v1756_v35 }
 0x193   : > { %1780 = vst.msk [vmem:[%s226_s9 + $0x10] sm:$0xff] %vm1779_vm12, %v1776_v36 }
 0x1a3   : > { %v1651_v39 = vpop.f32.mrb[0].mxu0 }
 0x1a4   : > { %v1735_v40 = vadd.f32 %v1733_v26, %v1651_v39  ;;  %v1653_v41 = vpop.f32.mrb[1].mxu0 }
 0x1a5   : > { %v1736_v43 = vadd.f32 %v1733_v26, %v1653_v41 }
 0x1a6   : > { %vm1738_vm13 = vcmp.ge.f32.partialorder %v1735_v40, 0.0  ;;  %v1751_v44 = vmul.f32 %v1749_v31, %v1735_v40 }
 0x1a7   : > { %vm1739_vm14 = vcmp.ge.f32.partialorder %v1736_v43, 0.0  ;;  %v1752_v46 = vmul.f32 %v1749_v31, %v1736_v43 }
 0x1a8   : > { %v1754_v47 = vsel %vm1738_vm13, %v1735_v40, %v1751_v44 }
 0x1a9   : > { %v1774_v48 = vmul.f32 %v1762_v42, %v1754_v47  ;;  %v1755_v49 = vsel %vm1739_vm14, %v1736_v43, %v1752_v46 }
 0x1aa   : > { %v1775_v50 = vmul.f32 %v1766_v45, %v1755_v49 }
 0x1ab   : > { %1777 = vst [vmem:[%s226_s9] sm:$0xff] %v1774_v48 }
 0x1ac   : > { %1778 = vst [vmem:[%s226_s9 + $0x8] sm:$0xff] %v1775_v50 }
 0x1ad PF: > { %s17_s20 = sadd.s32 1, %s2008_s20  }
 0x1ae   : > { %p14_p4 = scmp.ge.s32.totalorder %s17_s20, 4  }
 0x1b0   :  { %16 = sbr.rel (!%p14_p4) target bundleno = 3 (0x3), region = 78 }

// kernel: lka_block_forward.12
= control target key start
LH: loop header
LB: loop body
LE: loop exit
PB: predicated region body
PF: predicated region fallthrough
CT: control target
= control target key end

     0   :  { %s1371_s12 = smov 0   ;;  %s1373_s13 = smov 0   ;;  %s1908_s0 = inlined_call_operand.vmem [shape: f32[2,8,484], index: 0, kind: input, shape index: {}]   ;;  %s1909_s1 = inlined_call_operand.vmem [shape: f32[8,25], index: 1, kind: input, shape index: {}]   ;;  %s1910_s2 = inlined_call_operand.vmem [shape: f32[8,1], index: 2, kind: input, shape index: {}]   ;;  %s1911_s3 = inlined_call_operand.vmem [shape: f32[2,8,400], index: 3, kind: output, shape index: {}]  }
   0x1   :  { %s1375_s14 = smov 0  }
   0x2 LB: > { %s25_s15 = sadd.s32 1, %s1296_s13  ;;  %p1171_p0 = scmp.ge.s32.totalorder %s1300_s14, 1  ;;  %s1300_s14 = sphi %s1375_s14, %s13_s14   ;;  %s1296_s13 = sphi %s1373_s13, %s1913_s13   ;;  %s1292_s12 = sphi %s1371_s12, %s1912_s12  }
   0x3   : > { %p27_p1 = scmp.ge.s32.totalorder %s25_s15, 2  ;;  %p175_p2 = scmp.lt.s32.totalorder %s1300_s14, 3 }
   0x5   : > { %s1915_s15 = smov (%p27_p1, %s25_s15), 0  ;;  %p176_p3 = pnand %p1171_p0, %p175_p2 }
   0x6   : > { %v1394_v0 = vld [vmem:[%s1909_s1] sm:$0xff] (!%p176_p3)  ;;  %v1302_v1 = vmov (!%p176_p3), 1   ;;  %v1303_v2 = vmov (!%p176_p3), 2   ;;  %v1304_v3 = vmov (!%p176_p3), 3   ;;  %v1305_v4 = vmov (!%p176_p3), 4   ;;  %p215_p4 = scmp.lt.s32.totalorder (!%p176_p3), %s1292_s12, 1 }
   0x7   : > { %179 = sbr.rel (%p176_p3) target bundleno = 673 (0x2a1), region = 32  ;;  %1253 = vset.pattern.permute.xlu0 (!%p176_p3), %v1302_v1  ;;  %1254 = vset.pattern.permute.xlu1 (!%p176_p3), %v1303_v2  ;;  %v1306_v5 = vmov (!%p176_p3), 5   ;;  %v1307_v6 = vmov (!%p176_p3), 6   ;;  %v1308_v7 = vmov (!%p176_p3), 7   ;;  %v1309_v8 = vmov (!%p176_p3), 8   ;;  %s1314_s22 = smov (!%p176_p3), 127  }
   0x8   : > { %260 = vperm.xlu0 (!%p176_p3), %1253, %v1394_v0   ;;  %292 = vperm.xlu1 (!%p176_p3), %1254, %v1394_v0   ;;  %v1310_v9 = vmov (!%p176_p3), 9   ;;  %v1311_v10 = vmov (!%p176_p3), 10   ;;  %v1312_v11 = vmov (!%p176_p3), 11   ;;  %v1313_v12 = vmov (!%p176_p3), 12   ;;  %s1315_s23 = smov (!%p176_p3), 126   ;;  %s1316_s24 = smov (!%p176_p3), 125  }
   0x9   : > { %s1317_s25 = smov (!%p176_p3), 124   ;;  %s1318_s26 = smov (!%p176_p3), 108   ;;  %v1325_v54 = vmov (!%p176_p3), 13   ;;  %v1326_v56 = vmov (!%p176_p3), 14   ;;  %v1327_v57 = vmov (!%p176_p3), 16   ;;  %v1328_v60 = vmov (!%p176_p3), 19  }
   0xa   : > { %s1319_s27 = smov (!%p176_p3), 107   ;;  %s1320_s28 = smov (!%p176_p3), 106   ;;  %v1329_v62 = vmov (!%p176_p3), 22   ;;  %v1330_v1 = vmov (!%p176_p3), 0   ;;  %vm471_vm0 = vcmask (!%p176_p3), 867328   ;;  %vm503_vm1 = vcmask (!%p176_p3), 859136  }
   0xb   : > { %s1321_s29 = smov (!%p176_p3), 105   ;;  %s1322_s30 = smov (!%p176_p3), 104   ;;  %vm279_vm2 = vcmask (!%p176_p3), 1039360   ;;  %vm311_vm3 = vcmask (!%p176_p3), 1031168   ;;  %vm343_vm4 = vcmask (!%p176_p3), 1022976   ;;  %vm375_vm5 = vcmask (!%p176_p3), 1014784  }
   0xc   : > { %1255 = vset.pattern.permute.xlu0 (!%p176_p3), %v1304_v3  ;;  %s1323_s4 = smov (!%p176_p3), 88   ;;  %s1324_s5 = smov (!%p176_p3), 87   ;;  %1266 = vset.pattern.permute.xlu1 (!%p176_p3), %v1326_v56  ;;  %vm407_vm6 = vcmask (!%p176_p3), 883712   ;;  %vm439_vm7 = vcmask (!%p176_p3), 875520   ;;  %vm535_vm8 = vcmask (!%p176_p3), 850944   ;;  %vm567_vm9 = vcmask (!%p176_p3), 719872  }
   0xd   : > { %324 = vperm.xlu0 (!%p176_p3), %1255, %v1394_v0   ;;  %s1331_s6 = smov (!%p176_p3), 86   ;;  %s1332_s7 = smov (!%p176_p3), 85   ;;  %vm599_vm10 = vcmask (!%p176_p3), 711680   ;;  %vm631_vm11 = vcmask (!%p176_p3), 703488   ;;  %vm663_vm12 = vcmask (!%p176_p3), 695296   ;;  %vm695_vm13 = vcmask (!%p176_p3), 687104  }
   0xe   : > { %s1917_s12 = smov (!%p215_p4, %s1292_s12), 1  ;;  %s1340_s8 = smov 84   ;;  %vm727_vm14 = vcmask 556032   ;;  %vm759_vm15 = vcmask 547840  }
   0xf   : > { %s1178_s18 = sshll.u32 %s1917_s12, 5  ;;  %s1341_s9 = smov 68  }
  0x10   : > { %s223_s21 = scalar_lea.vmem %s1908_s0, %s1178_s18  ;;  %s1342_s10 = smov 67  }
  0x11   : > { %1256 = vset.pattern.permute.xlu0 %v1305_v4  ;;  %v1417_v13 = vld [vmem:[%s223_s21 + $0x18] sm:$0xff]  ;;  %v1419_v14 = vld [vmem:[%s223_s21] sm:$0xff]  ;;  %v1423_v19 = vld [vmem:[%s223_s21 + $0x8] sm:$0xff]  ;;  %s1343_s11 = smov 66   ;;  %s1344_s16 = smov 65  }
  0x12   : > { %356 = vperm.xlu0 %1256, %v1394_v0   ;;  %v1427_v23 = vld [vmem:[%s223_s21 + $0x10] sm:$0xff]  ;;  %s1345_s17 = smov 64   ;;  %s1346_s19 = smov 48  }
  0x13   : > { %s1347_s20 = smov 47   ;;  %s1348_s21 = smov 46  }
  0x16   : > { %1257 = vset.pattern.permute.xlu0 %v1306_v5 }
  0x17   : > { %388 = vperm.xlu0 %1257, %v1394_v0  }
  0x1b   : > { %1258 = vset.pattern.permute.xlu0 %v1307_v6 }
  0x1c   : > { %420 = vperm.xlu0 %1258, %v1394_v0  }
  0x20   : > { %1259 = vset.pattern.permute.xlu0 %v1308_v7 }
  0x21   : > { %452 = vperm.xlu0 %1259, %v1394_v0  }
  0x25   : > { %1260 = vset.pattern.permute.xlu0 %v1309_v8 }
  0x26   : > { %484 = vperm.xlu0 %1260, %v1394_v0  }
  0x2a   : > { %1261 = vset.pattern.permute.xlu0 %v1310_v9 }
  0x2b   : > { %516 = vperm.xlu0 %1261, %v1394_v0  }
  0x2f   : > { %1262 = vset.pattern.permute.xlu0 %v1311_v10 }
  0x30   : > { %548 = vperm.xlu0 %1262, %v1394_v0  }
  0x34   : > { %1263 = vset.pattern.permute.xlu0 %v1312_v11 }
  0x35   : > { %580 = vperm.xlu0 %1263, %v1394_v0  }
  0x39   : > { %1264 = vset.pattern.permute.xlu0 %v1313_v12 }
  0x87   : > { %v261_v15 = vpop.permute.xlu0 %260  ;;  %v293_v16 = vpop.permute.xlu1 %292 }
  0x88   : > { %v266_v17 = vmul.f32 %v261_v15, %v1417_v13  ;;  %v263_v18 = vmul.f32 %v261_v15, %v1419_v14  ;;  %v295_v20 = vmul.f32 %v293_v16, %v1419_v14  ;;  %v264_v22 = vmul.f32 %v261_v15, %v1423_v19 }
  0x89   : > { %v297_v24 = vmul.f32 %v293_v16, %v1427_v23  ;;  %v265_v25 = vmul.f32 %v261_v15, %v1427_v23  ;;  %v296_v28 = vmul.f32 %v293_v16, %v1423_v19  ;;  %v298_v31 = vmul.f32 %v293_v16, %v1417_v13 }
  0x8a   : > { %277 = vrot.lane.b32.xlu0 %v266_v17, %s1314_s22  ;;  %271 = vrot.lane.b32.xlu1 %v263_v18, %s1314_s22 }
  0x8c   : > { %v325_v21 = vpop.permute.xlu0 %324 }
  0x8d   : > { %v329_v27 = vmul.f32 %v325_v21, %v1427_v23  ;;  %v327_v34 = vmul.f32 %v325_v21, %v1419_v14  ;;  %v328_v37 = vmul.f32 %v325_v21, %v1423_v19  ;;  %v330_v39 = vmul.f32 %v325_v21, %v1417_v13 }
  0x8e   : > { %303 = vrot.lane.b32.xlu0 %v295_v20, %s1315_s23  ;;  %273 = vrot.lane.b32.xlu1 %v264_v22, %s1314_s22 }
  0x91   : > { %v357_v26 = vpop.permute.xlu0 %356 }
  0x92   : > { %307 = vrot.lane.b32.xlu0 %v297_v24, %s1315_s23  ;;  %275 = vrot.lane.b32.xlu1 %v265_v25, %s1314_s22  ;;  %v361_v30 = vmul.f32 %v357_v26, %v1427_v23  ;;  %v359_v42 = vmul.f32 %v357_v26, %v1419_v14  ;;  %v360_v45 = vmul.f32 %v357_v26, %v1423_v19 }
  0x93   : > { %v362_v48 = vmul.f32 %v357_v26, %v1417_v13 }
  0x96   : > { %v389_v29 = vpop.permute.xlu0 %388  ;;  %339 = vrot.lane.b32.xlu0 %v329_v27, %s1316_s24  ;;  %305 = vrot.lane.b32.xlu1 %v296_v28, %s1315_s23 }
  0x97   : > { %v393_v33 = vmul.f32 %v389_v29, %v1427_v23  ;;  %v391_v50 = vmul.f32 %v389_v29, %v1419_v14  ;;  %v392_v52 = vmul.f32 %v389_v29, %v1423_v19  ;;  %v394_v53 = vmul.f32 %v389_v29, %v1417_v13 }
  0x9a   : > { %371 = vrot.lane.b32.xlu0 %v361_v30, %s1317_s25  ;;  %309 = vrot.lane.b32.xlu1 %v298_v31, %s1315_s23 }
  0x9b   : > { %v421_v32 = vpop.permute.xlu0 %420 }
  0x9c   : > { %v425_v36 = vmul.f32 %v421_v32, %v1427_v23  ;;  %v423_v55 = vmul.f32 %v421_v32, %v1419_v14  ;;  %v424_v58 = vmul.f32 %v421_v32, %v1423_v19  ;;  %v426_v59 = vmul.f32 %v421_v32, %v1417_v13 }
  0x9e   : > { %403 = vrot.lane.b32.xlu0 %v393_v33, %s1318_s26  ;;  %335 = vrot.lane.b32.xlu1 %v327_v34, %s1316_s24 }
  0xa0   : > { %v1439_v35 = vpop.permute.xlu0 %452 }
  0xa1   : > { %v457_v38 = vmul.f32 %v1439_v35, %v1427_v23  ;;  %v455_v61 = vmul.f32 %v1439_v35, %v1419_v14  ;;  %v456_v63 = vmul.f32 %v1439_v35, %v1423_v19  ;;  %v458_v2 = vmul.f32 %v1439_v35, %v1417_v13 }
  0xa2   : > { %435 = vrot.lane.b32.xlu0 %v425_v36, %s1319_s27  ;;  %337 = vrot.lane.b32.xlu1 %v328_v37, %s1316_s24 }
  0xa5   : > { %v1447_v40 = vpop.permute.xlu0 %484 }
  0xa6   : > { %467 = vrot.lane.b32.xlu0 %v457_v38, %s1320_s28  ;;  %341 = vrot.lane.b32.xlu1 %v330_v39, %s1316_s24  ;;  %v489_v41 = vmul.f32 %v1447_v40, %v1427_v23  ;;  %v487_v3 = vmul.f32 %v1447_v40, %v1419_v14  ;;  %v488_v4 = vmul.f32 %v1447_v40, %v1423_v19  ;;  %s1349_s24 = smov 45  }
  0xa7   : > { %v490_v5 = vmul.f32 %v1447_v40, %v1417_v13 }
  0xaa   : > { %v1453_v43 = vpop.permute.xlu0 %516  ;;  %499 = vrot.lane.b32.xlu0 %v489_v41, %s1321_s29  ;;  %367 = vrot.lane.b32.xlu1 %v359_v42, %s1317_s25 }
  0xab   : > { %v521_v44 = vmul.f32 %v1453_v43, %v1427_v23  ;;  %v519_v6 = vmul.f32 %v1453_v43, %v1419_v14  ;;  %v520_v7 = vmul.f32 %v1453_v43, %v1423_v19  ;;  %v522_v8 = vmul.f32 %v1453_v43, %v1417_v13 }
  0xae   : > { %531 = vrot.lane.b32.xlu0 %v521_v44, %s1322_s30  ;;  %369 = vrot.lane.b32.xlu1 %v360_v45, %s1317_s25 }
  0xaf   : > { %v549_v46 = vpop.permute.xlu0 %548 }
  0xb0   : > { %v553_v47 = vmul.f32 %v549_v46, %v1427_v23  ;;  %v551_v9 = vmul.f32 %v549_v46, %v1419_v14  ;;  %v552_v10 = vmul.f32 %v549_v46, %v1423_v19  ;;  %v554_v11 = vmul.f32 %v549_v46, %v1417_v13 }
  0xb2   : > { %563 = vrot.lane.b32.xlu0 %v553_v47, %s1323_s4  ;;  %373 = vrot.lane.b32.xlu1 %v362_v48, %s1317_s25  ;;  %s1350_s25 = smov 44  }
  0xb4   : > { %v1466_v49 = vpop.permute.xlu0 %580 }
  0xb5   : > { %v585_v51 = vmul.f32 %v1466_v49, %v1427_v23  ;;  %v583_v16 = vmul.f32 %v1466_v49, %v1419_v14  ;;  %v584_v20 = vmul.f32 %v1466_v49, %v1423_v19  ;;  %v586_v24 = vmul.f32 %v1466_v49, %v1417_v13 }
  0xb6   : > { %399 = vrot.lane.b32.xlu1 %v391_v50, %s1318_s26 }
  0xb7   : > { %595 = vrot.lane.b32.xlu0 %v585_v51, %s1324_s5 }
  0xba   : > { %401 = vrot.lane.b32.xlu1 %v392_v52, %s1318_s26 }
  0xbb   : > { %612 = vperm.xlu0 %1264, %v1394_v0  }
  0xbe   : > { %405 = vrot.lane.b32.xlu1 %v394_v53, %s1318_s26 }
  0xbf   : > { %1265 = vset.pattern.permute.xlu0 %v1325_v54 }
  0xc0   : > { %644 = vperm.xlu0 %1265, %v1394_v0  }
  0xc2   : > { %431 = vrot.lane.b32.xlu1 %v423_v55, %s1319_s27 }
  0xc4   : > { %1268 = vset.pattern.permute.xlu0 %v1327_v57 }
  0xc5   : > { %740 = vperm.xlu0 %1268, %v1394_v0  }
  0xc6   : > { %433 = vrot.lane.b32.xlu1 %v424_v58, %s1319_s27 }
  0xc9   : > { %1271 = vset.pattern.permute.xlu0 %v1328_v60  ;;  %v1333_v60 = vmov 15  }
  0xca   : > { %836 = vperm.xlu0 %1271, %v1394_v0   ;;  %437 = vrot.lane.b32.xlu1 %v426_v59, %s1319_s27 }
  0xce   : > { %1274 = vset.pattern.permute.xlu0 %v1329_v62  ;;  %463 = vrot.lane.b32.xlu1 %v455_v61, %s1320_s28 }
  0xcf   : > { %932 = vperm.xlu0 %1274, %v1394_v0  }
  0xd2   : > { %465 = vrot.lane.b32.xlu1 %v456_v63, %s1320_s28  ;;  %v1334_v63 = vmov 17  }
  0xd3   : > { %1275 = vset.pattern.permute.xlu0 %v1330_v1 }
  0xd4   : > { %248 = vperm.xlu0 %1275, %v1394_v0  }
  0xd6   : > { %469 = vrot.lane.b32.xlu1 %v458_v2, %s1320_s28  ;;  %s1882_s28 = scalar_lea.vmem %s1911_s3, %s1178_s18 }
  0xda   : > { %495 = vrot.lane.b32.xlu1 %v487_v3, %s1321_s29 }
  0xde   : > { %497 = vrot.lane.b32.xlu1 %v488_v4, %s1321_s29 }
  0xe2   : > { %501 = vrot.lane.b32.xlu1 %v490_v5, %s1321_s29 }
  0xe6   : > { %527 = vrot.lane.b32.xlu1 %v519_v6, %s1322_s30  ;;  %v1335_v6 = vmov 18  }
  0xea   : > { %529 = vrot.lane.b32.xlu1 %v520_v7, %s1322_s30 }
  0xee   : > { %533 = vrot.lane.b32.xlu1 %v522_v8, %s1322_s30 }
  0xf2   : > { %559 = vrot.lane.b32.xlu1 %v551_v9, %s1323_s4 }
  0xf6   : > { %561 = vrot.lane.b32.xlu1 %v552_v10, %s1323_s4 }
  0xfa   : > { %565 = vrot.lane.b32.xlu1 %v554_v11, %s1323_s4 }
  0xfc   : > { %v1522_v12 = vpop.permute.xlu0 %277  ;;  %v1524_v15 = vpop.permute.xlu1 %271 }
  0xfe   : > { %591 = vrot.lane.b32.xlu1 %v583_v16, %s1324_s5 }
 0x100   : > { %v1529_v17 = vpop.permute.xlu0 %303  ;;  %v1531_v18 = vpop.permute.xlu1 %273 }
 0x101   : > { %v280_v16 = vsel %vm279_vm2, %v1524_v15, %v1531_v18 }
 0x102   : > { %593 = vrot.lane.b32.xlu1 %v584_v20, %s1324_s5 }
 0x104   : > { %v1536_v21 = vpop.permute.xlu0 %307  ;;  %v1538_v22 = vpop.permute.xlu1 %275 }
 0x105   : > { %v281_v20 = vsel %vm279_vm2, %v1531_v18, %v1538_v22 }
 0x106   : > { %597 = vrot.lane.b32.xlu1 %v586_v24, %s1324_s5  ;;  %v282_v24 = vsel %vm279_vm2, %v1538_v22, %v1522_v12  ;;  %vm855_vm2 = vcmask 523264  }
 0x108   : > { %v1543_v25 = vpop.permute.xlu0 %339  ;;  %v1545_v26 = vpop.permute.xlu1 %305 }
 0x109   : > { %v312_v15 = vsel %vm311_vm3, %v1529_v17, %v1545_v26  ;;  %v313_v18 = vsel %vm311_vm3, %v1545_v26, %v1536_v21 }
 0x10c   : > { %v1547_v27 = vpop.permute.xlu0 %371  ;;  %v1549_v28 = vpop.permute.xlu1 %309 }
 0x10d   : > { %v314_v22 = vsel %vm311_vm3, %v1536_v21, %v1549_v28  ;;  %vm887_vm3 = vcmask 392192  }
 0x110   : > { %v1551_v29 = vpop.permute.xlu1 %335  ;;  %v1553_v30 = vpop.permute.xlu0 %403 }
 0x114   : > { %v1555_v31 = vpop.permute.xlu1 %337  ;;  %v1557_v32 = vpop.permute.xlu0 %435 }
 0x115   : > { %v344_v17 = vsel %vm343_vm4, %v1551_v29, %v1555_v31  ;;  %v345_v26 = vsel %vm343_vm4, %v1555_v31, %v1543_v25 }
 0x118   : > { %v1559_v33 = vpop.permute.xlu1 %341  ;;  %v1563_v35 = vpop.permute.xlu0 %467 }
 0x119   : > { %v346_v21 = vsel %vm343_vm4, %v1543_v25, %v1559_v33  ;;  %vm919_vm4 = vcmask 384000  }
 0x11c   : > { %v1561_v34 = vpop.permute.xlu1 %367  ;;  %v1567_v37 = vpop.permute.xlu0 %499 }
 0x120   : > { %v1565_v36 = vpop.permute.xlu1 %369  ;;  %v1573_v40 = vpop.permute.xlu0 %531 }
 0x121   : > { %v377_v29 = vsel %vm375_vm5, %v1565_v36, %v1547_v27 }
 0x124   : > { %v1569_v38 = vpop.permute.xlu1 %373  ;;  %v1577_v42 = vpop.permute.xlu0 %563 }
 0x125   : > { %v378_v31 = vsel %vm375_vm5, %v1547_v27, %v1569_v38 }
 0x128   : > { %v1571_v39 = vpop.permute.xlu1 %399 }
 0x129   : > { %v1583_v45 = vpop.permute.xlu0 %595 }
 0x12c   : > { %v1575_v41 = vpop.permute.xlu1 %401 }
 0x12d   : > { %v408_v25 = vsel %vm407_vm6, %v1571_v39, %v1575_v41  ;;  %v1337_v39 = vmov 21  }
 0x130   : > { %v1579_v43 = vpop.permute.xlu1 %405 }
 0x134   : > { %v1581_v44 = vpop.permute.xlu1 %431 }
 0x138   : > { %v1585_v46 = vpop.permute.xlu1 %433 }
 0x13a   : > { %v1587_v47 = vpop.permute.xlu0 %612 }
 0x13b   : > { %v617_v48 = vmul.f32 %v1587_v47, %v1427_v23  ;;  %v615_v49 = vmul.f32 %v1587_v47, %v1419_v14  ;;  %v616_v51 = vmul.f32 %v1587_v47, %v1423_v19 }
 0x13c   : > { %v1593_v50 = vpop.permute.xlu1 %437 }
 0x13d   : > { %627 = vrot.lane.b32.xlu0 %v617_v48, %s1331_s6  ;;  %623 = vrot.lane.b32.xlu1 %v615_v49, %s1331_s6 }
 0x13f   : > { %v1599_v52 = vpop.permute.xlu0 %644 }
 0x140   : > { %v1601_v53 = vpop.permute.xlu1 %463  ;;  %v647_v54 = vmul.f32 %v1599_v52, %v1419_v14  ;;  %v649_v55 = vmul.f32 %v1599_v52, %v1427_v23 }
 0x141   : > { %625 = vrot.lane.b32.xlu1 %v616_v51, %s1331_s6 }
 0x142   : > { %655 = vrot.lane.b32.xlu0 %v647_v54, %s1332_s7 }
 0x144   : > { %v1609_v56 = vpop.permute.xlu1 %465  ;;  %v1611_v57 = vpop.permute.xlu0 %740 }
 0x145   : > { %676 = vperm.xlu1 %1266, %v1394_v0  }
 0x146   : > { %659 = vrot.lane.b32.xlu0 %v649_v55, %s1332_s7 }
 0x148   : > { %v1615_v58 = vpop.permute.xlu1 %469 }
 0x149   : > { %v1620_v59 = vsel %vm471_vm0, %v1563_v35, %v1615_v58  ;;  %1267 = vset.pattern.permute.xlu1 %v1333_v60  ;;  %v1622_v61 = vpop.permute.xlu0 %836 }
 0x14a   : > { %708 = vperm.xlu1 %1267, %v1394_v0  }
 0x14c   : > { %v496_v62 = vpop.permute.xlu1 %495 }
 0x14e   : > { %1269 = vset.pattern.permute.xlu1 %v1334_v63  ;;  %v1625_v1 = vpop.permute.xlu0 %932 }
 0x14f   : > { %772 = vperm.xlu1 %1269, %v1394_v0  }
 0x150   : > { %v498_v2 = vpop.permute.xlu1 %497 }
 0x151   : > { %v1629_v3 = vsel %vm503_vm1, %v496_v62, %v498_v2  ;;  %v1633_v4 = vsel %vm503_vm1, %v498_v2, %v1567_v37  ;;  %v1336_v2 = vmov 20  }
 0x153   : > { %v249_v5 = vpop.permute.xlu0 %248  ;;  %1270 = vset.pattern.permute.xlu1 %v1335_v6 }
 0x154   : > { %v251_v7 = vmul.f32 %v249_v5, %v1419_v14  ;;  %v252_v8 = vmul.f32 %v249_v5, %v1423_v19  ;;  %v253_v9 = vmul.f32 %v249_v5, %v1427_v23  ;;  %v254_v10 = vmul.f32 %v249_v5, %v1417_v13  ;;  %804 = vperm.xlu1 %1270, %v1394_v0   ;;  %v1640_v11 = vpop.permute.xlu1 %501 }
 0x155   : > { %v506_v48 = vsel %vm503_vm1, %v1567_v37, %v1640_v11  ;;  %vm823_vm1 = vcmask 531456  }
 0x156   : > { %v287_v49 = vadd.f32 %v280_v16, %v251_v7  ;;  %v288_v51 = vadd.f32 %v281_v20, %v252_v8  ;;  %v289_v54 = vadd.f32 %v282_v24, %v253_v9  ;;  %v290_v55 = vadd.f32 %v1522_v12, %v254_v10 }
 0x157   : > { %v376_v8 = vsel %vm375_vm5, %v1561_v34, %v1565_v36  ;;  %v409_v34 = vsel %vm407_vm6, %v1575_v41, %v1553_v30  ;;  %v410_v36 = vsel %vm407_vm6, %v1553_v30, %v1579_v43  ;;  %v440_v41 = vsel %vm439_vm7, %v1581_v44, %v1585_v46 }
 0x158   : > { %v319_v60 = vadd.f32 %v312_v15, %v287_v49  ;;  %v320_v37 = vadd.f32 %v313_v18, %v288_v51  ;;  %v321_v62 = vadd.f32 %v314_v22, %v289_v54  ;;  %v322_v63 = vadd.f32 %v1549_v28, %v290_v55  ;;  %1272 = vset.pattern.permute.xlu1 %v1336_v2  ;;  %v528_v12 = vpop.permute.xlu1 %527 }
 0x159   : > { %868 = vperm.xlu1 %1272, %v1394_v0   ;;  %v441_v30 = vsel %vm439_vm7, %v1585_v46, %v1557_v32  ;;  %v442_v55 = vsel %vm439_vm7, %v1557_v32, %v1593_v50  ;;  %v473_v44 = vsel %vm471_vm0, %v1609_v56, %v1563_v35  ;;  %v1338_v2 = vmov 23  }
 0x15a   : > { %v351_v5 = vadd.f32 %v344_v17, %v319_v60  ;;  %v352_v6 = vadd.f32 %v345_v26, %v320_v37  ;;  %v353_v28 = vadd.f32 %v346_v21, %v321_v62  ;;  %v354_v7 = vadd.f32 %v1559_v33, %v322_v63 }
 0x15b   : > { %v472_v37 = vsel %vm471_vm0, %v1601_v53, %v1609_v56  ;;  %vm791_vm0 = vcmask 539648   ;;  %vm951_vm5 = vcmask 375808   ;;  %vm983_vm6 = vcmask 367616  }
 0x15c   : > { %v385_v9 = vadd.f32 %v378_v31, %v353_v28  ;;  %v386_v10 = vadd.f32 %v1569_v38, %v354_v7  ;;  %v383_v33 = vadd.f32 %v376_v8, %v351_v5  ;;  %v384_v16 = vadd.f32 %v377_v29, %v352_v6  ;;  %v530_v20 = vpop.permute.xlu1 %529 }
 0x15d   : > { %v536_v27 = vsel %vm535_vm8, %v528_v12, %v530_v20  ;;  %v537_v24 = vsel %vm535_vm8, %v530_v20, %v1573_v40  ;;  %1273 = vset.pattern.permute.xlu1 %v1337_v39  ;;  %v648_v7 = vmul.f32 %v1599_v52, %v1423_v19  ;;  %vm1040_vm7 = vcmask 130048  }
 0x15e   : > { %v417_v49 = vadd.f32 %v410_v36, %v385_v9  ;;  %v418_v38 = vadd.f32 %v1579_v43, %v386_v10  ;;  %v415_v51 = vadd.f32 %v408_v25, %v383_v33  ;;  %v416_v54 = vadd.f32 %v409_v34, %v384_v16  ;;  %900 = vperm.xlu1 %1273, %v1394_v0  }
 0x15f   : > { %v650_v25 = vmul.f32 %v1599_v52, %v1417_v13 }
 0x160   : > { %v449_v15 = vadd.f32 %v442_v55, %v417_v49  ;;  %v450_v18 = vadd.f32 %v1593_v50, %v418_v38  ;;  %v447_v43 = vadd.f32 %v440_v41, %v415_v51  ;;  %v448_v22 = vadd.f32 %v441_v30, %v416_v54  ;;  %v534_v60 = vpop.permute.xlu1 %533 }
 0x161   : > { %v538_v46 = vsel %vm535_vm8, %v1573_v40, %v534_v60  ;;  %vm1015_vm8 = vcmask 359424  }
 0x162   : > { %v481_v62 = vadd.f32 %v1620_v59, %v449_v15  ;;  %v482_v32 = vadd.f32 %v1615_v58, %v450_v18  ;;  %v479_v63 = vadd.f32 %v472_v37, %v447_v43  ;;  %v480_v50 = vadd.f32 %v473_v44, %v448_v22  ;;  %1276 = vset.pattern.permute.xlu1 %v1338_v2 }
 0x163   : > { %964 = vperm.xlu1 %1276, %v1394_v0   ;;  %v1339_v58 = vmov 24   ;;  %v744_v44 = vmul.f32 %v1611_v57, %v1423_v19 }
 0x164   : > { %v513_v12 = vadd.f32 %v506_v48, %v481_v62  ;;  %v514_v53 = vadd.f32 %v1640_v11, %v482_v32  ;;  %v511_v17 = vadd.f32 %v1629_v3, %v479_v63  ;;  %v512_v35 = vadd.f32 %v1633_v4, %v480_v50  ;;  %v560_v56 = vpop.permute.xlu1 %559 }
 0x165   : > { %v618_v4 = vmul.f32 %v1587_v47, %v1417_v13  ;;  %v746_v63 = vmul.f32 %v1611_v57, %v1417_v13  ;;  %v745_v50 = vmul.f32 %v1611_v57, %v1427_v23 }
 0x166   : > { %v543_v40 = vadd.f32 %v536_v27, %v511_v17  ;;  %v544_v26 = vadd.f32 %v537_v24, %v512_v35  ;;  %v545_v59 = vadd.f32 %v538_v46, %v513_v12  ;;  %v546_v21 = vadd.f32 %v534_v60, %v514_v53 }
 0x167   : > { %1277 = vset.pattern.permute.xlu1 %v1339_v58  ;;  %v743_v46 = vmul.f32 %v1611_v57, %v1419_v14 }
 0x168   : > { %996 = vperm.xlu1 %1277, %v1394_v0   ;;  %v562_v5 = vpop.permute.xlu1 %561 }
 0x169   : > { %v568_v6 = vsel %vm567_vm9, %v560_v56, %v562_v5  ;;  %v569_v11 = vsel %vm567_vm9, %v562_v5, %v1577_v42  ;;  %v840_v5 = vmul.f32 %v1622_v61, %v1423_v19 }
 0x16a   : > { %v575_v48 = vadd.f32 %v568_v6, %v543_v40  ;;  %v576_v3 = vadd.f32 %v569_v11, %v544_v26  ;;  %v839_v11 = vmul.f32 %v1622_v61, %v1419_v14 }
 0x16c   : > { %629 = vrot.lane.b32.xlu1 %v618_v4, %s1331_s6  ;;  %v566_v28 = vpop.permute.xlu1 %565 }
 0x16d   : > { %v570_v0 = vsel %vm567_vm9, %v1577_v42, %v566_v28  ;;  %v578_v8 = vadd.f32 %v566_v28, %v546_v21 }
 0x16e   : > { %v577_v29 = vadd.f32 %v570_v0, %v545_v59 }
 0x170   : > { %v592_v31 = vpop.permute.xlu1 %591  ;;  %657 = vrot.lane.b32.xlu1 %v648_v7, %s1332_s7 }
 0x174   : > { %v594_v9 = vpop.permute.xlu1 %593  ;;  %661 = vrot.lane.b32.xlu1 %v650_v25, %s1332_s7 }
 0x175   : > { %v600_v47 = vsel %vm599_vm10, %v592_v31, %v594_v9  ;;  %v601_v10 = vsel %vm599_vm10, %v594_v9, %v1583_v45  ;;  %v841_v9 = vmul.f32 %v1622_v61, %v1427_v23 }
 0x176   : > { %v607_v33 = vadd.f32 %v600_v47, %v575_v48  ;;  %v608_v16 = vadd.f32 %v601_v10, %v576_v3 }
 0x178   : > { %v598_v20 = vpop.permute.xlu1 %597 }
 0x179   : > { %v602_v42 = vsel %vm599_vm10, %v1583_v45, %v598_v20  ;;  %v1741_v34 = vadd.f32 %v598_v20, %v578_v8 }
 0x17a   : > { %v1743_v36 = vadd.f32 %v602_v42, %v577_v29  ;;  %v842_v29 = vmul.f32 %v1622_v61, %v1417_v13 }
 0x1af   : > { %v624_v27 = vpop.permute.xlu1 %623  ;;  %v1745_v24 = vpop.permute.xlu0 %627 }
 0x1b3   : > { %v626_v52 = vpop.permute.xlu1 %625 }
 0x1b4   : > { %v632_v39 = vsel %vm631_vm11, %v624_v27, %v626_v52  ;;  %v633_v49 = vsel %vm631_vm11, %v626_v52, %v1745_v24  ;;  %v656_v59 = vpop.permute.xlu0 %655  ;;  %v936_v52 = vmul.f32 %v1625_v1, %v1423_v19 }
 0x1b5   : > { %v1750_v38 = vadd.f32 %v632_v39, %v607_v33  ;;  %v1752_v51 = vadd.f32 %v633_v49, %v608_v16  ;;  %v935_v39 = vmul.f32 %v1625_v1, %v1419_v14  ;;  %v938_v49 = vmul.f32 %v1625_v1, %v1417_v13 }
 0x1b8   : > { %v660_v28 = vpop.permute.xlu0 %659 }
 0x1c4   : > { %v677_v54 = vpop.permute.xlu1 %676 }
 0x1c5   : > { %v680_v45 = vmul.f32 %v677_v54, %v1423_v19  ;;  %v679_v41 = vmul.f32 %v677_v54, %v1419_v14  ;;  %v682_v30 = vmul.f32 %v677_v54, %v1417_v13  ;;  %v681_v55 = vmul.f32 %v677_v54, %v1427_v23  ;;  %v1027_v54 = vld [vmem:[%s1910_s2] sm:$0xff] }
 0x1c7   : > { %689 = vrot.lane.b32.xlu1 %v680_v45, %s1340_s8  ;;  %687 = vrot.lane.b32.xlu0 %v679_v41, %s1340_s8 }
 0x1c9   : > { %v709_v15 = vpop.permute.xlu1 %708 }
 0x1ca   : > { %v712_v18 = vmul.f32 %v709_v15, %v1423_v19  ;;  %v711_v43 = vmul.f32 %v709_v15, %v1419_v14  ;;  %v714_v60 = vmul.f32 %v709_v15, %v1417_v13  ;;  %v713_v37 = vmul.f32 %v709_v15, %v1427_v23 }
 0x1cb   : > { %693 = vrot.lane.b32.xlu1 %v682_v30, %s1340_s8  ;;  %691 = vrot.lane.b32.xlu0 %v681_v55, %s1340_s8 }
 0x1ce   : > { %v773_v22 = vpop.permute.xlu1 %772 }
 0x1cf   : > { %721 = vrot.lane.b32.xlu1 %v712_v18, %s1341_s9  ;;  %719 = vrot.lane.b32.xlu0 %v711_v43, %s1341_s9  ;;  %v776_v2 = vmul.f32 %v773_v22, %v1423_v19  ;;  %v775_v12 = vmul.f32 %v773_v22, %v1419_v14  ;;  %v778_v17 = vmul.f32 %v773_v22, %v1417_v13 }
 0x1d0   : > { %v777_v35 = vmul.f32 %v773_v22, %v1427_v23 }
 0x1d3   : > { %725 = vrot.lane.b32.xlu1 %v714_v60, %s1341_s9  ;;  %723 = vrot.lane.b32.xlu0 %v713_v37, %s1341_s9  ;;  %v805_v62 = vpop.permute.xlu1 %804 }
 0x1d4   : > { %v808_v40 = vmul.f32 %v805_v62, %v1423_v19  ;;  %v807_v57 = vmul.f32 %v805_v62, %v1419_v14  ;;  %v810_v21 = vmul.f32 %v805_v62, %v1417_v13  ;;  %v809_v58 = vmul.f32 %v805_v62, %v1427_v23 }
 0x1d7   : > { %753 = vrot.lane.b32.xlu1 %v744_v44, %s1342_s10  ;;  %751 = vrot.lane.b32.xlu0 %v743_v46, %s1342_s10 }
 0x1d8   : > { %v869_v32 = vpop.permute.xlu1 %868 }
 0x1d9   : > { %v872_v47 = vmul.f32 %v869_v32, %v1423_v19  ;;  %v871_v33 = vmul.f32 %v869_v32, %v1419_v14  ;;  %v874_v42 = vmul.f32 %v869_v32, %v1417_v13 }
 0x1db   : > { %757 = vrot.lane.b32.xlu1 %v746_v63, %s1342_s10  ;;  %755 = vrot.lane.b32.xlu0 %v745_v50, %s1342_s10 }
 0x1dd   : > { %v901_v53 = vpop.permute.xlu1 %900 }
 0x1de   : > { %v903_v61 = vmul.f32 %v901_v53, %v1419_v14  ;;  %v906_v27 = vmul.f32 %v901_v53, %v1417_v13 }
 0x1df   : > { %785 = vrot.lane.b32.xlu1 %v776_v2, %s1343_s11  ;;  %783 = vrot.lane.b32.xlu0 %v775_v12, %s1343_s11 }
 0x1e2   : > { %v1774_v56 = vpop.permute.xlu1 %964 }
 0x1e3   : > { %789 = vrot.lane.b32.xlu1 %v778_v17, %s1343_s11  ;;  %787 = vrot.lane.b32.xlu0 %v777_v35, %s1343_s11  ;;  %v968_v45 = vmul.f32 %v1774_v56, %v1423_v19  ;;  %v969_v41 = vmul.f32 %v1774_v56, %v1427_v23 }
 0x1e7   : > { %817 = vrot.lane.b32.xlu1 %v808_v40, %s1344_s16  ;;  %815 = vrot.lane.b32.xlu0 %v807_v57, %s1344_s16  ;;  %v1778_v26 = vpop.permute.xlu1 %996 }
 0x1e8   : > { %v999_v30 = vmul.f32 %v1778_v26, %v1419_v14  ;;  %v1000_v55 = vmul.f32 %v1778_v26, %v1423_v19  ;;  %v1001_v15 = vmul.f32 %v1778_v26, %v1427_v23  ;;  %v1002_v18 = vmul.f32 %v1778_v26, %v1417_v13 }
 0x1eb   : > { %821 = vrot.lane.b32.xlu1 %v810_v21, %s1344_s16  ;;  %819 = vrot.lane.b32.xlu0 %v809_v58, %s1344_s16  ;;  %v630_v6 = vpop.permute.xlu1 %629 }
 0x1ec   : > { %v634_v48 = vsel %vm631_vm11, %v1745_v24, %v630_v6  ;;  %v1789_v3 = vadd.f32 %v630_v6, %v1741_v34  ;;  %v873_v34 = vmul.f32 %v869_v32, %v1427_v23  ;;  %v905_v24 = vmul.f32 %v901_v53, %v1427_v23 }
 0x1ed   : > { %v641_v4 = vadd.f32 %v634_v48, %v1743_v36  ;;  %v904_v36 = vmul.f32 %v901_v53, %v1423_v19 }
 0x1ef   : > { %849 = vrot.lane.b32.xlu1 %v840_v5, %s1345_s17  ;;  %847 = vrot.lane.b32.xlu0 %v839_v11, %s1345_s17  ;;  %v658_v7 = vpop.permute.xlu1 %657 }
 0x1f0   : > { %v664_v0 = vsel %vm663_vm12, %v656_v59, %v658_v7  ;;  %v665_v8 = vsel %vm663_vm12, %v658_v7, %v660_v28 }
 0x1f1   : > { %v671_v31 = vadd.f32 %v664_v0, %v1750_v38  ;;  %v1798_v25 = vadd.f32 %v665_v8, %v1752_v51  ;;  %v937_v38 = vmul.f32 %v1625_v1, %v1427_v23  ;;  %v967_v51 = vmul.f32 %v1774_v56, %v1419_v14 }
 0x1f2   : > { %v970_v1 = vmul.f32 %v1774_v56, %v1417_v13 }
 0x1f3   : > { %853 = vrot.lane.b32.xlu1 %v842_v29, %s1345_s17  ;;  %851 = vrot.lane.b32.xlu0 %v841_v9, %s1345_s17  ;;  %v662_v10 = vpop.permute.xlu1 %661 }
 0x1f4   : > { %v666_v16 = vsel %vm663_vm12, %v660_v28, %v662_v10  ;;  %v674_v37 = vadd.f32 %v662_v10, %v1789_v3 }
 0x1f5   : > { %v673_v20 = vadd.f32 %v666_v16, %v641_v4 }
 0x1f7   : > { %881 = vrot.lane.b32.xlu1 %v872_v47, %s1346_s19  ;;  %879 = vrot.lane.b32.xlu0 %v871_v33, %s1346_s19 }
 0x1fb   : > { %885 = vrot.lane.b32.xlu1 %v874_v42, %s1346_s19  ;;  %883 = vrot.lane.b32.xlu0 %v873_v34, %s1346_s19 }
 0x1ff   : > { %913 = vrot.lane.b32.xlu1 %v904_v36, %s1347_s20  ;;  %911 = vrot.lane.b32.xlu0 %v903_v61, %s1347_s20 }
 0x203   : > { %917 = vrot.lane.b32.xlu1 %v906_v27, %s1347_s20  ;;  %915 = vrot.lane.b32.xlu0 %v905_v24, %s1347_s20 }
 0x207   : > { %945 = vrot.lane.b32.xlu1 %v936_v52, %s1348_s21  ;;  %943 = vrot.lane.b32.xlu0 %v935_v39, %s1348_s21 }
 0x20b   : > { %949 = vrot.lane.b32.xlu1 %v938_v49, %s1348_s21  ;;  %947 = vrot.lane.b32.xlu0 %v937_v38, %s1348_s21 }
 0x20f   : > { %1030 = vperm.xlu0 %1275, %v1027_v54   ;;  %975 = vrot.lane.b32.xlu1 %v967_v51, %s1349_s24 }
 0x213   : > { %977 = vrot.lane.b32.xlu1 %v968_v45, %s1349_s24  ;;  %979 = vrot.lane.b32.xlu0 %v969_v41, %s1349_s24 }
 0x217   : > { %981 = vrot.lane.b32.xlu1 %v970_v1, %s1349_s24  ;;  %1007 = vrot.lane.b32.xlu0 %v999_v30, %s1350_s25 }
 0x21b   : > { %1009 = vrot.lane.b32.xlu1 %v1000_v55, %s1350_s25  ;;  %1011 = vrot.lane.b32.xlu0 %v1001_v15, %s1350_s25 }
 0x21f   : > { %1013 = vrot.lane.b32.xlu1 %v1002_v18, %s1350_s25 }
 0x239   : > { %v688_v43 = vpop.permute.xlu0 %687  ;;  %v690_v14 = vpop.permute.xlu1 %689 }
 0x23a   : > { %v696_v22 = vsel %vm695_vm13, %v688_v43, %v690_v14 }
 0x23b   : > { %v703_v60 = vadd.f32 %v696_v22, %v671_v31 }
 0x23d   : > { %v692_v19 = vpop.permute.xlu0 %691  ;;  %v694_v44 = vpop.permute.xlu1 %693 }
 0x23e   : > { %v697_v46 = vsel %vm695_vm13, %v690_v14, %v692_v19  ;;  %v698_v23 = vsel %vm695_vm13, %v692_v19, %v694_v44  ;;  %v706_v62 = vadd.f32 %v694_v44, %v674_v37 }
 0x23f   : > { %v704_v32 = vadd.f32 %v697_v46, %v1798_v25  ;;  %v705_v63 = vadd.f32 %v698_v23, %v673_v20 }
 0x241   : > { %v720_v13 = vpop.permute.xlu0 %719  ;;  %v722_v50 = vpop.permute.xlu1 %721 }
 0x242   : > { %v728_v2 = vsel %vm727_vm14, %v720_v13, %v722_v50 }
 0x243   : > { %v735_v12 = vadd.f32 %v728_v2, %v703_v60 }
 0x245   : > { %v724_v53 = vpop.permute.xlu0 %723  ;;  %v726_v17 = vpop.permute.xlu1 %725 }
 0x246   : > { %v729_v35 = vsel %vm727_vm14, %v722_v50, %v724_v53  ;;  %v730_v56 = vsel %vm727_vm14, %v724_v53, %v726_v17  ;;  %v738_v24 = vadd.f32 %v726_v17, %v706_v62 }
 0x247   : > { %v736_v40 = vadd.f32 %v729_v35, %v704_v32  ;;  %v737_v57 = vadd.f32 %v730_v56, %v705_v63 }
 0x249   : > { %v752_v26 = vpop.permute.xlu0 %751  ;;  %v754_v59 = vpop.permute.xlu1 %753 }
 0x24a   : > { %v760_v51 = vsel %vm759_vm15, %v752_v26, %v754_v59 }
 0x24b   : > { %v767_v1 = vadd.f32 %v760_v51, %v735_v12 }
 0x24d   : > { %v756_v21 = vpop.permute.xlu0 %755  ;;  %v758_v58 = vpop.permute.xlu1 %757 }
 0x24e   : > { %v761_v5 = vsel %vm759_vm15, %v754_v59, %v756_v21  ;;  %v770_v39 = vadd.f32 %v758_v58, %v738_v24  ;;  %v762_v55 = vsel %vm759_vm15, %v756_v21, %v758_v58 }
 0x24f   : > { %v768_v6 = vadd.f32 %v761_v5, %v736_v40  ;;  %v769_v44 = vadd.f32 %v762_v55, %v737_v57 }
 0x251   : > { %v784_v11 = vpop.permute.xlu0 %783  ;;  %v786_v48 = vpop.permute.xlu1 %785 }
 0x252   : > { %v792_v41 = vsel %vm791_vm0, %v784_v11, %v786_v48 }
 0x253   : > { %v799_v43 = vadd.f32 %v792_v41, %v767_v1 }
 0x255   : > { %v788_v3 = vpop.permute.xlu0 %787  ;;  %v790_v4 = vpop.permute.xlu1 %789 }
 0x256   : > { %v802_v49 = vadd.f32 %v790_v4, %v770_v39  ;;  %v793_v60 = vsel %vm791_vm0, %v786_v48, %v788_v3  ;;  %v794_v37 = vsel %vm791_vm0, %v788_v3, %v790_v4 }
 0x257   : > { %v800_v50 = vadd.f32 %v793_v60, %v768_v6  ;;  %v801_v2 = vadd.f32 %v794_v37, %v769_v44 }
 0x259   : > { %v816_v28 = vpop.permute.xlu0 %815  ;;  %v818_v7 = vpop.permute.xlu1 %817 }
 0x25a   : > { %v824_v15 = vsel %vm823_vm1, %v816_v28, %v818_v7 }
 0x25b   : > { %v831_v46 = vadd.f32 %v824_v15, %v799_v43 }
 0x25d   : > { %v820_v0 = vpop.permute.xlu0 %819  ;;  %v822_v8 = vpop.permute.xlu1 %821 }
 0x25e   : > { %v834_v45 = vadd.f32 %v822_v8, %v802_v49  ;;  %v825_v62 = vsel %vm823_vm1, %v818_v7, %v820_v0  ;;  %v826_v32 = vsel %vm823_vm1, %v820_v0, %v822_v8 }
 0x25f   : > { %v832_v57 = vadd.f32 %v825_v62, %v800_v50  ;;  %v833_v26 = vadd.f32 %v826_v32, %v801_v2 }
 0x261   : > { %v848_v29 = vpop.permute.xlu0 %847  ;;  %v850_v31 = vpop.permute.xlu1 %849 }
 0x262   : > { %v856_v19 = vsel %vm855_vm2, %v848_v29, %v850_v31 }
 0x263   : > { %v863_v12 = vadd.f32 %v856_v19, %v831_v46 }
 0x265   : > { %v854_v25 = vpop.permute.xlu1 %853  ;;  %v852_v9 = vpop.permute.xlu0 %851 }
 0x266   : > { %v866_v30 = vadd.f32 %v854_v25, %v834_v45  ;;  %v857_v35 = vsel %vm855_vm2, %v850_v31, %v852_v9  ;;  %v858_v56 = vsel %vm855_vm2, %v852_v9, %v854_v25 }
 0x267   : > { %v864_v48 = vadd.f32 %v857_v35, %v832_v57  ;;  %v865_v3 = vadd.f32 %v858_v56, %v833_v26 }
 0x269   : > { %v882_v47 = vpop.permute.xlu1 %881  ;;  %v880_v10 = vpop.permute.xlu0 %879 }
 0x26a   : > { %v888_v63 = vsel %vm887_vm3, %v880_v10, %v882_v47 }
 0x26b   : > { %v895_v59 = vadd.f32 %v888_v63, %v863_v12 }
 0x26d   : > { %v886_v33 = vpop.permute.xlu1 %885  ;;  %v884_v20 = vpop.permute.xlu0 %883 }
 0x26e   : > { %v898_v14 = vadd.f32 %v886_v33, %v866_v30  ;;  %v889_v58 = vsel %vm887_vm3, %v882_v47, %v884_v20  ;;  %v890_v5 = vsel %vm887_vm3, %v884_v20, %v886_v33 }
 0x26f   : > { %v896_v31 = vadd.f32 %v889_v58, %v864_v48  ;;  %v897_v25 = vadd.f32 %v890_v5, %v865_v3 }
 0x271   : > { %v1841_v16 = vpop.permute.xlu1 %913  ;;  %v912_v34 = vpop.permute.xlu0 %911 }
 0x272   : > { %v920_v40 = vsel %vm919_vm4, %v912_v34, %v1841_v16 }
 0x273   : > { %v927_v4 = vadd.f32 %v920_v40, %v895_v59 }
 0x275   : > { %v1843_v42 = vpop.permute.xlu1 %917  ;;  %v916_v27 = vpop.permute.xlu0 %915 }
 0x276   : > { %v930_v23 = vadd.f32 %v1843_v42, %v898_v14  ;;  %v921_v0 = vsel %vm919_vm4, %v1841_v16, %v916_v27  ;;  %v922_v8 = vsel %vm919_vm4, %v916_v27, %v1843_v42 }
 0x277   : > { %v928_v16 = vadd.f32 %v921_v0, %v896_v31  ;;  %v929_v20 = vadd.f32 %v922_v8, %v897_v25 }
 0x279   : > { %v1845_v36 = vpop.permute.xlu1 %945  ;;  %v944_v38 = vpop.permute.xlu0 %943 }
 0x27a   : > { %v952_v6 = vsel %vm951_vm5, %v944_v38, %v1845_v36 }
 0x27b   : > { %v959_v9 = vadd.f32 %v952_v6, %v927_v4 }
 0x27d   : > { %v1847_v61 = vpop.permute.xlu1 %949  ;;  %v948_v22 = vpop.permute.xlu0 %947 }
 0x27e   : > { %v962_v53 = vadd.f32 %v1847_v61, %v930_v23  ;;  %v953_v10 = vsel %vm951_vm5, %v1845_v36, %v948_v22  ;;  %v954_v33 = vsel %vm951_vm5, %v948_v22, %v1847_v61 }
 0x27f   : > { %v960_v36 = vadd.f32 %v953_v10, %v928_v16  ;;  %v961_v39 = vadd.f32 %v954_v33, %v929_v20 }
 0x281   : > { %v976_v52 = vpop.permute.xlu1 %975 }
 0x285   : > { %v1850_v54 = vpop.permute.xlu1 %977 }
 0x286   : > { %v984_v29 = vsel %vm983_vm6, %v976_v52, %v1850_v54 }
 0x287   : > { %v991_v42 = vadd.f32 %v984_v29, %v959_v9 }
 0x289   : > { %v982_v18 = vpop.permute.xlu1 %981 }
 0x28a   : > { %v994_v21 = vadd.f32 %v982_v18, %v962_v53 }
 0x28d   : > { %v1010_v13 = vpop.permute.xlu1 %1009 }
 0x28e   : > { %v1031_v17 = vpop.permute.xlu0 %1030 }
 0x291   : > { %v1014_v11 = vpop.permute.xlu1 %1013 }
 0x292   : > { %v1026_v28 = vadd.f32 %v1014_v11, %v994_v21  ;;  %v980_v7 = vpop.permute.xlu0 %979 }
 0x293   : > { %v985_v27 = vsel %vm983_vm6, %v1850_v54, %v980_v7  ;;  %v986_v24 = vsel %vm983_vm6, %v980_v7, %v982_v18 }
 0x294   : > { %v1036_v47 = vadd.f32 %v1031_v17, %v1026_v28  ;;  %v992_v61 = vadd.f32 %v985_v27, %v960_v36  ;;  %v993_v38 = vadd.f32 %v986_v24, %v961_v39 }
 0x296   : > { %1041 = vst.msk [vmem:[%s1882_s28 + $0x18] sm:$0xff] %vm1040_vm7, %v1036_v47  ;;  %v1008_v34 = vpop.permute.xlu0 %1007 }
 0x297   : > { %v1016_v52 = vsel %vm1015_vm8, %v1008_v34, %v1010_v13 }
 0x298   : > { %v1023_v49 = vadd.f32 %v1016_v52, %v991_v42 }
 0x29a   : > { %v1033_v51 = vadd.f32 %v1031_v17, %v1023_v49  ;;  %v1012_v45 = vpop.permute.xlu0 %1011 }
 0x29b   : > { %v1017_v41 = vsel %vm1015_vm8, %v1010_v13, %v1012_v45  ;;  %v1018_v1 = vsel %vm1015_vm8, %v1012_v45, %v1014_v11 }
 0x29c   : > { %1037 = vst [vmem:[%s1882_s28] sm:$0xff] %v1033_v51  ;;  %v1024_v30 = vadd.f32 %v1017_v41, %v992_v61  ;;  %v1025_v54 = vadd.f32 %v1018_v1, %v993_v38 }
 0x29e   : > { %v1034_v55 = vadd.f32 %v1031_v17, %v1024_v30  ;;  %v1035_v15 = vadd.f32 %v1031_v17, %v1025_v54 }
 0x2a0   : > { %1038 = vst [vmem:[%s1882_s28 + $0x8] sm:$0xff] %v1034_v55  ;;  %1039 = vst [vmem:[%s1882_s28 + $0x10] sm:$0xff] %v1035_v15 }
 0x2a1 PF: > { %s13_s14 = sadd.s32 1, %s1300_s14   ;;  %s1912_s12 = smov %s1296_s13 }
 0x2a2   : > { %p10_p5 = scmp.ge.s32.totalorder %s13_s14, 4   ;;  %s1913_s13 = smov %s1915_s15 }
 0x2a4   :  { %12 = sbr.rel (!%p10_p5) target bundleno = 2 (0x2), region = 68 }

// kernel: lka_block_forward.14
= control target key start
LH: loop header
LB: loop body
LE: loop exit
PB: predicated region body
PF: predicated region fallthrough
CT: control target
= control target key end

     0   :  { %s845_s27 = smov 0   ;;  %s847_s28 = smov 0   ;;  %s907_s0 = inlined_call_operand.vmem [shape: f32[2,8,256], index: 0, kind: input, shape index: {}]   ;;  %s908_s1 = inlined_call_operand.vmem [shape: f32[2,8,256], index: 1, kind: input, shape index: {}]   ;;  %s909_s2 = inlined_call_operand.vmem [shape: f32[2,8,256], index: 2, kind: input, shape index: {}, may-alias: {2,8}]   ;;  %s910_s3 = inlined_call_operand.vmem [shape: f32[8,8], index: 3, kind: input, shape index: {}]   ;;  %s911_s4 = inlined_call_operand.vmem [shape: f32[8,1], index: 4, kind: input, shape index: {}]   ;;  %s912_s5 = inlined_call_operand.vmem [shape: f32[8,8], index: 5, kind: input, shape index: {}]   ;;  %s913_s6 = inlined_call_operand.vmem [shape: f32[8,1], index: 6, kind: input, shape index: {}]   ;;  %s914_s7 = inlined_call_operand.vmem [shape: f32[8,1], index: 7, kind: input, shape index: {}]   ;;  %s915_s8 = inlined_call_operand.vmem [shape: f32[2,8,256], index: 8, kind: output, shape index: {}, may-alias: {2,8}]  }
   0x1   :  { %s849_s29 = smov 0  }
   0x2 LB: > { %s30_s30 = sadd.s32 1, %s792_s28  ;;  %p729_p0 = scmp.ge.s32.totalorder %s796_s29, 1  ;;  %s796_s29 = sphi %s849_s29, %s18_s29   ;;  %s792_s28 = sphi %s847_s28, %s917_s28   ;;  %s788_s27 = sphi %s845_s27, %s916_s27  }
   0x3   : > { %p32_p1 = scmp.ge.s32.totalorder %s30_s30, 2  ;;  %p317_p2 = scmp.lt.s32.totalorder %s796_s29, 3 }
   0x5   : > { %s919_s30 = smov (%p32_p1, %s30_s30), 0  ;;  %p318_p3 = pnand %p729_p0, %p317_p2 }
   0x6   : > { %p378_p4 = scmp.lt.s32.totalorder (!%p318_p3), %s788_s27, 1  ;;  %v420_v0 = vld [vmem:[%s911_s4] sm:$0xff] (!%p318_p3)  ;;  %v798_v1 = vmov (!%p318_p3), 0.0   ;;  %v799_v2 = vmov (!%p318_p3), 0   ;;  %vm426_vm0 = vcmask (!%p318_p3), 64512  }
   0x7   : > { %321 = sbr.rel (%p318_p3) target bundleno = 461 (0x1cd), region = 52  ;;  %494 = vmatprep.mubr.f32.mxu0 (!%p318_p3), %v798_v1  ;;  %772 = vset.pattern.permute.xlu0 (!%p318_p3), %v799_v2  ;;  %v506_v3 = vld [vmem:[%s913_s6] sm:$0xff] (!%p318_p3) }
   0x8   : > { %423 = vperm.xlu0 (!%p318_p3), %772, %v420_v0   ;;  %579 = vmatprep.mubr.f32.mxu1 (!%p318_p3), %v798_v1  ;;  %v417_v6 = vld [vmem:[%s910_s3] sm:$0xff] (!%p318_p3) }
   0x9   : > { %773 = vset.pattern.permute.xlu1 (!%p318_p3), %v799_v2  ;;  %v588_v7 = vld [vmem:[%s914_s7] sm:$0xff] (!%p318_p3) }
   0xa   : > { %593 = vperm.xlu1 (!%p318_p3), %773, %v588_v7   ;;  %v505_v17 = vld [vmem:[%s912_s5] sm:$0xff] (!%p318_p3) }
   0xc   : > { %509 = vperm.xlu0 (!%p318_p3), %772, %v506_v3  }
   0xe   : > { %s921_s27 = smov (!%p378_p4, %s788_s27), 1 }
   0xf   : > { %s869_s13 = sshll.u32 %s921_s27, 4 }
  0x10   : > { %s385_s16 = scalar_lea.vmem %s907_s0, %s869_s13  ;;  %s395_s23 = scalar_lea.vmem %s908_s1, %s869_s13 }
  0x11   : > { %v419_v4 = vld [vmem:[%s385_s16 + $0x8] sm:$0xff]  ;;  %v418_v5 = vld [vmem:[%s385_s16] sm:$0xff]  ;;  %s405_s9 = scalar_lea.vmem %s909_s2, %s869_s13  ;;  %s415_s12 = scalar_lea.vmem %s915_s8, %s869_s13 }
  0x12   : > { %430 = vmatprep.subr.mxu0 %v419_v4  ;;  %v502_v12 = vld [vmem:[%s395_s23 + $0x8] sm:$0xff]  ;;  %v501_v14 = vld [vmem:[%s395_s23] sm:$0xff] }
  0x13   : > { %431 = vmatpush1.msra.mxu0 %v418_v5  ;;  %v586_v20 = vld [vmem:[%s405_s9] sm:$0xff]  ;;  %v587_v23 = vld [vmem:[%s405_s9 + $0x8] sm:$0xff] }
  0x14   : > { %738 = vmatmul.mubr.msk.f32.vlgmr.msra.gmra.mrb[0].mxu0 %vm426_vm0, %v417_v6 }
  0x87   : > { %v424_v8 = vpop.permute.xlu0 %423 }
  0x89   : > { %v594_v25 = vpop.permute.xlu1 %593 }
  0x8b   : > { %v510_v18 = vpop.permute.xlu0 %509 }
  0xe7   : > { %v496_v9 = vpop.f32.mrb[0].mxu0 }
  0xe8   : > { %v497_v10 = vadd.f32 %v496_v9, %v424_v8  ;;  %v498_v11 = vpop.f32.mrb[1].mxu0 }
  0xe9   : > { %v499_v13 = vadd.f32 %v498_v11, %v424_v8 }
  0xea   : > { %v503_v16 = vmul.f32 %v501_v14, %v497_v10 }
  0xeb   : > { %v504_v15 = vmul.f32 %v502_v12, %v499_v13 }
  0xed   : > { %515 = vmatprep.subr.mxu1 %v504_v15 }
  0xee   : > { %516 = vmatpush1.msra.mxu1 %v503_v16 }
  0xef   : > { %739 = vmatmul.mubr.msk.f32.vlgmr.msra.gmra.mrb[0].mxu1 %vm426_vm0, %v505_v17 }
 0x1c2   : > { %v581_v19 = vpop.f32.mrb[0].mxu1 }
 0x1c3   : > { %v582_v21 = vadd.f32 %v581_v19, %v510_v18  ;;  %v583_v22 = vpop.f32.mrb[1].mxu1 }
 0x1c4   : > { %v584_v24 = vadd.f32 %v583_v22, %v510_v18 }
 0x1c5   : > { %v589_v26 = vadd.f32 %v586_v20, %v582_v21 }
 0x1c6   : > { %v590_v27 = vadd.f32 %v587_v23, %v584_v24 }
 0x1c7   : > { %v596_v28 = vmul.f32 %v594_v25, %v589_v26 }
 0x1c8   : > { %v597_v29 = vmul.f32 %v594_v25, %v590_v27 }
 0x1c9   : > { %v598_v30 = vadd.f32 %v596_v28, %v586_v20 }
 0x1ca   : > { %v599_v31 = vadd.f32 %v597_v29, %v587_v23 }
 0x1cb   : > { %600 = vst [vmem:[%s415_s12] sm:$0xff] %v598_v30 }
 0x1cc   : > { %601 = vst [vmem:[%s415_s12 + $0x8] sm:$0xff] %v599_v31 }
 0x1cd PF: > { %s18_s29 = sadd.s32 1, %s796_s29   ;;  %s916_s27 = smov %s792_s28 }
 0x1ce   : > { %p15_p5 = scmp.ge.s32.totalorder %s18_s29, 4   ;;  %s917_s28 = smov %s919_s30 }
 0x1d0   :  { %17 = sbr.rel (!%p15_p5) target bundleno = 2 (0x2), region = 88 }

// kernel: lka_block_forward.15
= control target key start
LH: loop header
LB: loop body
LE: loop exit
PB: predicated region body
PF: predicated region fallthrough
CT: control target
= control target key end

     0   :  { %s530_s12 = smov 0   ;;  %s532_s13 = smov 0   ;;  %s595_s0 = inlined_call_operand.vmem [shape: f32[2,8,256], index: 0, kind: input, shape index: {}]   ;;  %s596_s1 = inlined_call_operand.vmem [shape: f32[32,8], index: 1, kind: input, shape index: {}]   ;;  %s597_s2 = inlined_call_operand.vmem [shape: f32[32,1], index: 2, kind: input, shape index: {}]   ;;  %s598_s3 = inlined_call_operand.vmem [shape: f32[2,32,256], index: 3, kind: output, shape index: {}]  }
   0x1   :  { %s534_s14 = smov 0  }
   0x2 LB: > { %s25_s15 = sadd.s32 1, %s502_s13  ;;  %p441_p0 = scmp.ge.s32.totalorder %s506_s14, 1  ;;  %s506_s14 = sphi %s534_s14, %s13_s14   ;;  %s502_s13 = sphi %s532_s13, %s600_s13   ;;  %s498_s12 = sphi %s530_s12, %s599_s12  }
   0x3   : > { %p27_p1 = scmp.ge.s32.totalorder %s25_s15, 2  ;;  %p158_p2 = scmp.lt.s32.totalorder %s506_s14, 3 }
   0x5   : > { %s602_s15 = smov (%p27_p1, %s25_s15), 0  ;;  %p159_p3 = pnand %p441_p0, %p158_p2 }
   0x6   : > { %p191_p4 = scmp.lt.s32.totalorder (!%p159_p3), %s498_s12, 1  ;;  %v508_v0 = vmov (!%p159_p3), 0.0   ;;  %v218_v1 = vld [vmem:[%s597_s2 + $0x10] sm:$0xff] (!%p159_p3)  ;;  %v216_v2 = vld [vmem:[%s597_s2] sm:$0xff] (!%p159_p3)  ;;  %v509_v3 = vmov (!%p159_p3), 0   ;;  %vm240_vm0 = vcmask (!%p159_p3), 64512  }
   0x7   : > { %162 = sbr.rel (%p159_p3) target bundleno = 240 (0xf0), region = 32  ;;  %317 = vmatprep.mubr.f32.mxu0 (!%p159_p3), %v508_v0  ;;  %329 = vmatprep.mubr.f32.mxu1 (!%p159_p3), %v508_v0  ;;  %v210_v4 = vld [vmem:[%s596_s1] sm:$0xff] (!%p159_p3)  ;;  %v212_v7 = vld [vmem:[%s596_s1 + $0x10] sm:$0xff] (!%p159_p3)  ;;  %v219_v8 = vld [vmem:[%s597_s2 + $0x18] sm:$0xff] (!%p159_p3) }
   0x8   : > { %483 = vset.pattern.permute.xlu1 (!%p159_p3), %v509_v3  ;;  %482 = vset.pattern.permute.xlu0 (!%p159_p3), %v509_v3  ;;  %v217_v9 = vld [vmem:[%s597_s2 + $0x8] sm:$0xff] (!%p159_p3)  ;;  %v213_v11 = vld [vmem:[%s596_s1 + $0x18] sm:$0xff] (!%p159_p3) }
   0x9   : > { %232 = vperm.xlu1 (!%p159_p3), %483, %v218_v1   ;;  %222 = vperm.xlu0 (!%p159_p3), %482, %v216_v2   ;;  %v211_v10 = vld [vmem:[%s596_s1 + $0x8] sm:$0xff] (!%p159_p3) }
   0xd   : > { %237 = vperm.xlu1 (!%p159_p3), %483, %v219_v8   ;;  %227 = vperm.xlu0 (!%p159_p3), %482, %v217_v9  }
   0xe   : > { %s604_s12 = smov (!%p191_p4, %s498_s12), 1 }
   0xf   : > { %s452_s20 = sshll.u32 %s604_s12, 4  ;;  %s453_s9 = sshll.u32 %s604_s12, 6 }
  0x10   : > { %s198_s23 = scalar_lea.vmem %s595_s0, %s452_s20  ;;  %s208_s16 = scalar_lea.vmem %s598_s3, %s453_s9 }
  0x11   : > { %v215_v5 = vld [vmem:[%s198_s23 + $0x8] sm:$0xff]  ;;  %v214_v6 = vld [vmem:[%s198_s23] sm:$0xff] }
  0x12   : > { %253 = vmatprep.subr.mxu0 %v215_v5  ;;  %454 = vmatprep.subr.mxu1 %v215_v5 }
  0x13   : > { %254 = vmatpush1.msra.mxu0 %v214_v6  ;;  %455 = vmatpush1.msra.mxu1 %v214_v6 }
  0x14   : > { %446 = vmatmul.mubr.msk.f32.vlgmr.msra.gmra.mrb[0].mxu0 %vm240_vm0, %v210_v4  ;;  %448 = vmatmul.mubr.msk.f32.vlgmr.msra.gmra.mrb[0].mxu1 %vm240_vm0, %v212_v7 }
  0x15   : > { %323 = vmatprep.mubr.f32.mxu0 %v508_v0  ;;  %335 = vmatprep.mubr.f32.mxu1 %v508_v0 }
  0x18   : > { %447 = vmatmul.mubr.msk.f32.gmra.mrb[2].mxu0 %vm240_vm0, %v211_v10  ;;  %449 = vmatmul.mubr.msk.f32.gmra.mrb[2].mxu1 %vm240_vm0, %v213_v11 }
  0x88   : > { %v233_v12 = vpop.permute.xlu1 %232  ;;  %v223_v13 = vpop.permute.xlu0 %222 }
  0x8c   : > { %v238_v22 = vpop.permute.xlu1 %237  ;;  %v228_v23 = vpop.permute.xlu0 %227 }
  0xe7   : > { %v319_v14 = vpop.f32.mrb[0].mxu0  ;;  %v331_v15 = vpop.f32.mrb[0].mxu1 }
  0xe8   : > { %v320_v16 = vadd.f32 %v319_v14, %v223_v13  ;;  %v332_v17 = vadd.f32 %v331_v15, %v233_v12  ;;  %v321_v18 = vpop.f32.mrb[1].mxu0  ;;  %v333_v19 = vpop.f32.mrb[1].mxu1 }
  0xe9   : > { %v322_v20 = vadd.f32 %v321_v18, %v223_v13  ;;  %v334_v21 = vadd.f32 %v333_v19, %v233_v12 }
  0xea   : > { %342 = vst [vmem:[%s208_s16] sm:$0xff] %v320_v16  ;;  %346 = vst [vmem:[%s208_s16 + $0x20] sm:$0xff] %v332_v17 }
  0xeb   : > { %343 = vst [vmem:[%s208_s16 + $0x8] sm:$0xff] %v322_v20  ;;  %347 = vst [vmem:[%s208_s16 + $0x28] sm:$0xff] %v334_v21  ;;  %v325_v24 = vpop.f32.mrb[2].mxu0  ;;  %v337_v25 = vpop.f32.mrb[2].mxu1 }
  0xec   : > { %v326_v26 = vadd.f32 %v325_v24, %v228_v23  ;;  %v338_v27 = vadd.f32 %v337_v25, %v238_v22  ;;  %v327_v28 = vpop.f32.mrb[3].mxu0  ;;  %v339_v29 = vpop.f32.mrb[3].mxu1 }
  0xed   : > { %v328_v30 = vadd.f32 %v327_v28, %v228_v23  ;;  %v340_v31 = vadd.f32 %v339_v29, %v238_v22 }
  0xee   : > { %344 = vst [vmem:[%s208_s16 + $0x10] sm:$0xff] %v326_v26  ;;  %348 = vst [vmem:[%s208_s16 + $0x30] sm:$0xff] %v338_v27 }
  0xef   : > { %345 = vst [vmem:[%s208_s16 + $0x18] sm:$0xff] %v328_v30  ;;  %349 = vst [vmem:[%s208_s16 + $0x38] sm:$0xff] %v340_v31 }
  0xf0 PF: > { %s13_s14 = sadd.s32 1, %s506_s14   ;;  %s599_s12 = smov %s502_s13 }
  0xf1   : > { %p10_p5 = scmp.ge.s32.totalorder %s13_s14, 4   ;;  %s600_s13 = smov %s602_s15 }
  0xf3   :  { %12 = sbr.rel (!%p10_p5) target bundleno = 2 (0x2), region = 62 }

// kernel: lka_block_forward.13
= control target key start
LH: loop header
LB: loop body
LE: loop exit
PB: predicated region body
PF: predicated region fallthrough
CT: control target
= control target key end

     0   :  { %s4385_s12 = smov 0   ;;  %s4387_s13 = smov 0   ;;  %s7498_s0 = inlined_call_operand.vmem [shape: f32[2,8,1786], index: 0, kind: input, shape index: {}]   ;;  %s7499_s1 = inlined_call_operand.vmem [shape: f32[8,49], index: 1, kind: input, shape index: {}]   ;;  %s7500_s2 = inlined_call_operand.vmem [shape: f32[8,1], index: 2, kind: input, shape index: {}]   ;;  %s7501_s3 = inlined_call_operand.vmem [shape: f32[2,8,1156], index: 3, kind: output, shape index: {}]  }
   0x1   :  { %s4389_s14 = smov 0  }
   0x2 LB: > { %s25_s15 = sadd.s32 1, %s4262_s13  ;;  %p4031_p0 = scmp.ge.s32.totalorder %s4266_s14, 1  ;;  %s4266_s14 = sphi %s4389_s14, %s13_s14   ;;  %s4262_s13 = sphi %s4387_s13, %s8758_s13   ;;  %s4258_s12 = sphi %s4385_s12, %s8757_s12  }
   0x3   : > { %p27_p1 = scmp.ge.s32.totalorder %s25_s15, 2  ;;  %p175_p2 = scmp.lt.s32.totalorder %s4266_s14, 3 }
   0x5   : > { %s8760_s15 = smov (%p27_p1, %s25_s15), 0  ;;  %p176_p3 = pnand %p4031_p0, %p175_p2 }
   0x7   : > { %179 = sbr.rel (%p176_p3) target bundleno = 6021 (0x1785), region = 32 }
   0xe   : > { %v4408_v0 = vld [vmem:[%s7499_s1] sm:$0xff]  ;;  %v7502_v1 = vmov 0   ;;  %v4269_v2 = vmov 2   ;;  %v4270_v3 = vmov 1   ;;  %v4271_v4 = vmov 3   ;;  %p215_p4 = scmp.lt.s32.totalorder %s4258_s12, 1 }
   0xf   : > { %4159 = vset.pattern.permute.xlu0 %v7502_v1  ;;  %4161 = vset.pattern.permute.xlu1 %v4269_v2  ;;  %v4272_v5 = vmov 4   ;;  %v4273_v6 = vmov 5   ;;  %v4274_v7 = vmov 6   ;;  %v4275_v8 = vmov 7   ;;  %s4276_s22 = smov 125   ;;  %s4277_s23 = smov 122  }
  0x10   : > { %254 = vperm.xlu0 %4159, %v4408_v0   ;;  %352 = vperm.xlu1 %4161, %v4408_v0   ;;  %s8762_s12 = smov (!%p215_p4, %s4258_s12), 1  ;;  %s4278_s24 = smov 119   ;;  %vm321_vm0 = vcmask 1022976   ;;  %vm395_vm1 = vcmask 998400   ;;  %vm469_vm2 = vcmask 973824   ;;  %vm543_vm3 = vcmask 949248  }
  0x11   : > { %s4036_s18 = smul.u32 112, %s8762_s12  ;;  %s4279_s25 = smov 116   ;;  %vm617_vm4 = vcmask 924672   ;;  %vm7853_vm5 = vcmask 900096   ;;  %vm7850_vm6 = vcmask 211968   ;;  %vm7851_vm7 = vcmask 187392  }
  0x12   : > { %s4280_s26 = smov 113   ;;  %s4281_s27 = smov 110   ;;  %vm7852_vm8 = vcmask 162816   ;;  %vm987_vm9 = vcmask 138240   ;;  %vm7854_vm10 = vcmask 113664   ;;  %vm7831_vm11 = vcmask 89088  }
  0x13   : > { %s4428_s21 = scalar_lea.vmem %s7498_s0, %s4036_s18  ;;  %s4283_s28 = smov 26   ;;  %vm7820_vm12 = vcmask 64512   ;;  %vm7796_vm13 = vcmask 424960   ;;  %vm7805_vm14 = vcmask 400384   ;;  %vm7797_vm15 = vcmask 375808  }
  0x14   : > { %4160 = vset.pattern.permute.xlu0 %v4270_v3  ;;  %v4431_v10 = vld [vmem:[%s4428_s21 + $0x18] sm:$0xff]  ;;  %v4434_v12 = vld [vmem:[%s4428_s21] sm:$0xff]  ;;  %v4441_v15 = vld [vmem:[%s4428_s21 + $0x8] sm:$0xff]  ;;  %s4285_s29 = smov 23   ;;  %s4287_s30 = smov 20  }
  0x15   : > { %278 = vperm.xlu0 %4160, %v4408_v0   ;;  %v4444_v16 = vld [vmem:[%s4428_s21 + $0x28] sm:$0xff]  ;;  %v4451_v19 = vld [vmem:[%s4428_s21 + $0x10] sm:$0xff]  ;;  %v4454_v20 = vld [vmem:[%s4428_s21 + $0x38] sm:$0xff]  ;;  %s4289_s4 = smov 17   ;;  %s4291_s5 = smov 14  }
  0x16   : > { %v4461_v23 = vld [vmem:[%s4428_s21 + $0x20] sm:$0xff]  ;;  %v4464_v24 = vld [vmem:[%s4428_s21 + $0x48] sm:$0xff]  ;;  %v4472_v29 = vld [vmem:[%s4428_s21 + $0x30] sm:$0xff]  ;;  %s4293_s6 = smov 11   ;;  %s4295_s7 = smov 8  }
  0x17   : > { %v4477_v31 = vld [vmem:[%s4428_s21 + $0x40] sm:$0xff]  ;;  %s4297_s8 = smov 52   ;;  %s4299_s9 = smov 49  }
  0x18   : > { %s4301_s10 = smov 46   ;;  %s4303_s17 = smov 43  }
  0x19   : > { %4162 = vset.pattern.permute.xlu0 %v4271_v4  ;;  %s4305_s18 = smov 40   ;;  %s4307_s19 = smov 37  }
  0x1a   : > { %426 = vperm.xlu0 %4162, %v4408_v0   ;;  %s4309_s20 = smov 34   ;;  %s4339_s11 = smov 2  }
  0x1b   : > { %s4341_s16 = smov 127  }
  0x1e   : > { %4163 = vset.pattern.permute.xlu0 %v4272_v5 }
  0x1f   : > { %500 = vperm.xlu0 %4163, %v4408_v0  }
  0x23   : > { %4164 = vset.pattern.permute.xlu0 %v4273_v6 }
  0x24   : > { %574 = vperm.xlu0 %4164, %v4408_v0  }
  0x28   : > { %4165 = vset.pattern.permute.xlu0 %v4274_v7 }
  0x29   : > { %648 = vperm.xlu0 %4165, %v4408_v0  }
  0x2d   : > { %4166 = vset.pattern.permute.xlu0 %v4275_v8 }
  0x8f   : > { %v4423_v9 = vpop.permute.xlu0 %254  ;;  %v353_v25 = vpop.permute.xlu1 %352 }
  0x90   : > { %v355_v28 = vmul.f32 %v353_v25, %v4434_v12  ;;  %v357_v32 = vmul.f32 %v353_v25, %v4451_v19  ;;  %v359_v34 = vmul.f32 %v353_v25, %v4461_v23  ;;  %v356_v35 = vmul.f32 %v353_v25, %v4441_v15 }
  0x91   : > { %v361_v36 = vmul.f32 %v353_v25, %v4472_v29  ;;  %v358_v37 = vmul.f32 %v353_v25, %v4431_v10  ;;  %v363_v39 = vmul.f32 %v353_v25, %v4477_v31  ;;  %v360_v40 = vmul.f32 %v353_v25, %v4444_v16 }
  0x92   : > { %v362_v42 = vmul.f32 %v353_v25, %v4454_v20  ;;  %v364_v44 = vmul.f32 %v353_v25, %v4464_v24 }
  0x94   : > { %v279_v11 = vpop.permute.xlu0 %278 }
  0x95   : > { %v284_v13 = vmul.f32 %v279_v11, %v4431_v10  ;;  %v281_v14 = vmul.f32 %v279_v11, %v4434_v12  ;;  %v286_v17 = vmul.f32 %v279_v11, %v4444_v16  ;;  %v282_v18 = vmul.f32 %v279_v11, %v4441_v15 }
  0x96   : > { %v288_v21 = vmul.f32 %v279_v11, %v4454_v20  ;;  %v283_v22 = vmul.f32 %v279_v11, %v4451_v19  ;;  %v290_v26 = vmul.f32 %v279_v11, %v4464_v24  ;;  %v285_v27 = vmul.f32 %v279_v11, %v4461_v23 }
  0x97   : > { %307 = vrot.lane.b32.xlu0 %v284_v13, %s4276_s22  ;;  %301 = vrot.lane.b32.xlu1 %v281_v14, %s4276_s22  ;;  %v287_v30 = vmul.f32 %v279_v11, %v4472_v29  ;;  %v289_v33 = vmul.f32 %v279_v11, %v4477_v31 }
  0x99   : > { %v427_v38 = vpop.permute.xlu0 %426 }
  0x9a   : > { %v431_v41 = vmul.f32 %v427_v38, %v4451_v19  ;;  %v433_v43 = vmul.f32 %v427_v38, %v4461_v23  ;;  %v435_v45 = vmul.f32 %v427_v38, %v4472_v29  ;;  %v429_v46 = vmul.f32 %v427_v38, %v4434_v12 }
  0x9b   : > { %311 = vrot.lane.b32.xlu0 %v286_v17, %s4276_s22  ;;  %303 = vrot.lane.b32.xlu1 %v282_v18, %s4276_s22  ;;  %v437_v48 = vmul.f32 %v427_v38, %v4477_v31  ;;  %v430_v49 = vmul.f32 %v427_v38, %v4441_v15  ;;  %v432_v51 = vmul.f32 %v427_v38, %v4431_v10 }
  0x9c   : > { %v434_v53 = vmul.f32 %v427_v38, %v4444_v16  ;;  %v436_v55 = vmul.f32 %v427_v38, %v4454_v20  ;;  %v438_v58 = vmul.f32 %v427_v38, %v4464_v24 }
  0x9e   : > { %v501_v47 = vpop.permute.xlu0 %500 }
  0x9f   : > { %315 = vrot.lane.b32.xlu0 %v288_v21, %s4276_s22  ;;  %305 = vrot.lane.b32.xlu1 %v283_v22, %s4276_s22  ;;  %v505_v50 = vmul.f32 %v501_v47, %v4451_v19  ;;  %v507_v52 = vmul.f32 %v501_v47, %v4461_v23  ;;  %v509_v54 = vmul.f32 %v501_v47, %v4472_v29 }
  0xa0   : > { %v511_v57 = vmul.f32 %v501_v47, %v4477_v31  ;;  %v503_v60 = vmul.f32 %v501_v47, %v4434_v12  ;;  %v504_v62 = vmul.f32 %v501_v47, %v4441_v15  ;;  %v506_v2 = vmul.f32 %v501_v47, %v4431_v10 }
  0xa1   : > { %v508_v5 = vmul.f32 %v501_v47, %v4444_v16  ;;  %v510_v7 = vmul.f32 %v501_v47, %v4454_v20  ;;  %v512_v11 = vmul.f32 %v501_v47, %v4464_v24 }
  0xa3   : > { %319 = vrot.lane.b32.xlu0 %v290_v26, %s4276_s22  ;;  %309 = vrot.lane.b32.xlu1 %v285_v27, %s4276_s22  ;;  %v575_v56 = vpop.permute.xlu0 %574 }
  0xa4   : > { %v579_v59 = vmul.f32 %v575_v56, %v4451_v19  ;;  %v581_v61 = vmul.f32 %v575_v56, %v4461_v23  ;;  %v583_v63 = vmul.f32 %v575_v56, %v4472_v29  ;;  %v585_v4 = vmul.f32 %v575_v56, %v4477_v31 }
  0xa5   : > { %v577_v14 = vmul.f32 %v575_v56, %v4434_v12  ;;  %v578_v18 = vmul.f32 %v575_v56, %v4441_v15  ;;  %v580_v21 = vmul.f32 %v575_v56, %v4431_v10  ;;  %v582_v22 = vmul.f32 %v575_v56, %v4444_v16 }
  0xa6   : > { %v584_v25 = vmul.f32 %v575_v56, %v4454_v20  ;;  %v586_v26 = vmul.f32 %v575_v56, %v4464_v24 }
  0xa7   : > { %375 = vrot.lane.b32.xlu0 %v355_v28, %s4277_s23  ;;  %313 = vrot.lane.b32.xlu1 %v287_v30, %s4276_s22  ;;  %v4282_v30 = vmov 8  }
  0xa8   : > { %v649_v3 = vpop.permute.xlu0 %648 }
  0xa9   : > { %v653_v6 = vmul.f32 %v649_v3, %v4451_v19  ;;  %v655_v8 = vmul.f32 %v649_v3, %v4461_v23  ;;  %v657_v13 = vmul.f32 %v649_v3, %v4472_v29  ;;  %v659_v17 = vmul.f32 %v649_v3, %v4477_v31 }
  0xaa   : > { %v651_v28 = vmul.f32 %v649_v3, %v4434_v12 }
  0xab   : > { %379 = vrot.lane.b32.xlu0 %v357_v32, %s4277_s23  ;;  %317 = vrot.lane.b32.xlu1 %v289_v33, %s4276_s22  ;;  %v652_v33 = vmul.f32 %v649_v3, %v4441_v15  ;;  %s4311_s22 = smov 78  }
  0xaf   : > { %383 = vrot.lane.b32.xlu0 %v359_v34, %s4277_s23  ;;  %377 = vrot.lane.b32.xlu1 %v356_v35, %s4277_s23  ;;  %v654_v35 = vmul.f32 %v649_v3, %v4431_v10 }
  0xb3   : > { %387 = vrot.lane.b32.xlu0 %v361_v36, %s4277_s23  ;;  %381 = vrot.lane.b32.xlu1 %v358_v37, %s4277_s23  ;;  %v656_v37 = vmul.f32 %v649_v3, %v4444_v16 }
  0xb7   : > { %391 = vrot.lane.b32.xlu0 %v363_v39, %s4277_s23  ;;  %385 = vrot.lane.b32.xlu1 %v360_v40, %s4277_s23  ;;  %v658_v39 = vmul.f32 %v649_v3, %v4454_v20 }
  0xbb   : > { %453 = vrot.lane.b32.xlu0 %v431_v41, %s4278_s24  ;;  %389 = vrot.lane.b32.xlu1 %v362_v42, %s4277_s23  ;;  %v660_v41 = vmul.f32 %v649_v3, %v4464_v24 }
  0xbf   : > { %457 = vrot.lane.b32.xlu0 %v433_v43, %s4278_s24  ;;  %393 = vrot.lane.b32.xlu1 %v364_v44, %s4277_s23  ;;  %s4313_s23 = smov 75  }
  0xc3   : > { %461 = vrot.lane.b32.xlu0 %v435_v45, %s4278_s24  ;;  %449 = vrot.lane.b32.xlu1 %v429_v46, %s4278_s24 }
  0xc7   : > { %465 = vrot.lane.b32.xlu0 %v437_v48, %s4278_s24  ;;  %451 = vrot.lane.b32.xlu1 %v430_v49, %s4278_s24 }
  0xcb   : > { %527 = vrot.lane.b32.xlu0 %v505_v50, %s4279_s25  ;;  %455 = vrot.lane.b32.xlu1 %v432_v51, %s4278_s24 }
  0xcf   : > { %531 = vrot.lane.b32.xlu0 %v507_v52, %s4279_s25  ;;  %459 = vrot.lane.b32.xlu1 %v434_v53, %s4278_s24 }
  0xd3   : > { %535 = vrot.lane.b32.xlu0 %v509_v54, %s4279_s25  ;;  %463 = vrot.lane.b32.xlu1 %v436_v55, %s4278_s24 }
  0xd7   : > { %539 = vrot.lane.b32.xlu0 %v511_v57, %s4279_s25  ;;  %467 = vrot.lane.b32.xlu1 %v438_v58, %s4278_s24  ;;  %s4315_s24 = smov 72  }
  0xdb   : > { %601 = vrot.lane.b32.xlu0 %v579_v59, %s4280_s26  ;;  %523 = vrot.lane.b32.xlu1 %v503_v60, %s4279_s25 }
  0xdf   : > { %605 = vrot.lane.b32.xlu0 %v581_v61, %s4280_s26  ;;  %525 = vrot.lane.b32.xlu1 %v504_v62, %s4279_s25 }
  0xe3   : > { %609 = vrot.lane.b32.xlu0 %v583_v63, %s4280_s26  ;;  %529 = vrot.lane.b32.xlu1 %v506_v2, %s4279_s25 }
  0xe7   : > { %613 = vrot.lane.b32.xlu0 %v585_v4, %s4280_s26  ;;  %533 = vrot.lane.b32.xlu1 %v508_v5, %s4279_s25 }
  0xeb   : > { %675 = vrot.lane.b32.xlu0 %v653_v6, %s4281_s27  ;;  %537 = vrot.lane.b32.xlu1 %v510_v7, %s4279_s25 }
  0xef   : > { %679 = vrot.lane.b32.xlu0 %v655_v8, %s4281_s27  ;;  %541 = vrot.lane.b32.xlu1 %v512_v11, %s4279_s25  ;;  %s4317_s25 = smov 69  }
  0xf3   : > { %683 = vrot.lane.b32.xlu0 %v657_v13, %s4281_s27  ;;  %597 = vrot.lane.b32.xlu1 %v577_v14, %s4280_s26  ;;  %v4284_v13 = vmov 9  }
  0xf7   : > { %687 = vrot.lane.b32.xlu0 %v659_v17, %s4281_s27  ;;  %599 = vrot.lane.b32.xlu1 %v578_v18, %s4280_s26 }
  0xfb   : > { %722 = vperm.xlu0 %4166, %v4408_v0   ;;  %603 = vrot.lane.b32.xlu1 %v580_v21, %s4280_s26 }
  0xff   : > { %607 = vrot.lane.b32.xlu1 %v582_v22, %s4280_s26  ;;  %4167 = vset.pattern.permute.xlu0 %v4282_v30 }
 0x103   : > { %611 = vrot.lane.b32.xlu1 %v584_v25, %s4280_s26 }
 0x107   : > { %615 = vrot.lane.b32.xlu1 %v586_v26, %s4280_s26  ;;  %s4319_s26 = smov 66  }
 0x109   : > { %v4559_v27 = vpop.permute.xlu0 %307 }
 0x10a   : > { %7855 = vst [vmem:[#allocation2_spill] sm:$0xff] %v4559_v27  ;;  %v4851_v27 = vld [vmem:[%s4428_s21 + $0x40] sm:$0xff] }
 0x10b   : > { %671 = vrot.lane.b32.xlu1 %v651_v28, %s4281_s27 }
 0x10d   : > { %v4563_v32 = vpop.permute.xlu0 %311 }
 0x10f   : > { %673 = vrot.lane.b32.xlu1 %v652_v33, %s4281_s27 }
 0x111   : > { %v4567_v34 = vpop.permute.xlu0 %315 }
 0x113   : > { %677 = vrot.lane.b32.xlu1 %v654_v35, %s4281_s27 }
 0x115   : > { %v4571_v36 = vpop.permute.xlu0 %319 }
 0x116   : > { %7856 = vst [vmem:[#allocation3_spill] sm:$0xff] %v4571_v36 }
 0x117   : > { %681 = vrot.lane.b32.xlu1 %v656_v37, %s4281_s27 }
 0x119   : > { %v4575_v38 = vpop.permute.xlu0 %375 }
 0x11a   : > { %7857 = vst [vmem:[#allocation4_spill] sm:$0xff] %v4575_v38 }
 0x11b   : > { %685 = vrot.lane.b32.xlu1 %v658_v39, %s4281_s27 }
 0x11d   : > { %v4579_v40 = vpop.permute.xlu0 %379 }
 0x11e   : > { %7858 = vst [vmem:[#allocation5_spill] sm:$0xff] %v4579_v40 }
 0x11f   : > { %689 = vrot.lane.b32.xlu1 %v660_v41, %s4281_s27  ;;  %s4321_s27 = smov 63  }
 0x121   : > { %v4583_v42 = vpop.permute.xlu0 %383 }
 0x122   : > { %7859 = vst [vmem:[#allocation6_spill] sm:$0xff] %v4583_v42 }
 0x125   : > { %v4585_v43 = vpop.permute.xlu0 %387 }
 0x129   : > { %v4587_v44 = vpop.permute.xlu0 %391 }
 0x12d   : > { %v4589_v45 = vpop.permute.xlu0 %453 }
 0x12e   : > { %7860 = vst [vmem:[#allocation7_spill] sm:$0xff] %v4589_v45 }
 0x131   : > { %v4591_v46 = vpop.permute.xlu0 %457 }
 0x132   : > { %7861 = vst [vmem:[#allocation8_spill] sm:$0xff] %v4591_v46 }
 0x135   : > { %v4593_v47 = vpop.permute.xlu0 %461 }
 0x139   : > { %v4595_v48 = vpop.permute.xlu0 %465 }
 0x13d   : > { %v4597_v49 = vpop.permute.xlu0 %527 }
 0x13e   : > { %7862 = vst [vmem:[#allocation9_spill] sm:$0xff] %v4597_v49 }
 0x141   : > { %v4599_v50 = vpop.permute.xlu0 %531 }
 0x142   : > { %7863 = vst [vmem:[#allocation10_spill] sm:$0xff] %v4599_v50 }
 0x145   : > { %v4601_v51 = vpop.permute.xlu0 %535 }
 0x149   : > { %v4603_v52 = vpop.permute.xlu0 %539 }
 0x14d   : > { %v4605_v53 = vpop.permute.xlu0 %601 }
 0x14e   : > { %7864 = vst [vmem:[#allocation11_spill] sm:$0xff] %v4605_v53 }
 0x151   : > { %v4607_v54 = vpop.permute.xlu0 %605 }
 0x152   : > { %7865 = vst [vmem:[#allocation12_spill] sm:$0xff] %v4607_v54 }
 0x155   : > { %v4609_v55 = vpop.permute.xlu0 %609 }
 0x159   : > { %v4611_v56 = vpop.permute.xlu0 %613 }
 0x15d   : > { %v4613_v57 = vpop.permute.xlu0 %675 }
 0x15e   : > { %7866 = vst [vmem:[#allocation13_spill] sm:$0xff] %v4613_v57 }
 0x161   : > { %v4615_v58 = vpop.permute.xlu0 %679 }
 0x162   : > { %7867 = vst [vmem:[#allocation14_spill] sm:$0xff] %v4615_v58 }
 0x165   : > { %v4617_v59 = vpop.permute.xlu0 %683 }
 0x169   : > { %v4619_v60 = vpop.permute.xlu0 %687 }
 0x17a   : > { %v723_v61 = vpop.permute.xlu0 %722 }
 0x17b   : > { %v727_v62 = vmul.f32 %v723_v61, %v4451_v19  ;;  %v725_v63 = vmul.f32 %v723_v61, %v4434_v12  ;;  %v729_v2 = vmul.f32 %v723_v61, %v4461_v23  ;;  %v726_v3 = vmul.f32 %v723_v61, %v4441_v15 }
 0x17c   : > { %v731_v4 = vmul.f32 %v723_v61, %v4472_v29  ;;  %v728_v5 = vmul.f32 %v723_v61, %v4431_v10  ;;  %v733_v6 = vmul.f32 %v723_v61, %v4477_v31  ;;  %v730_v7 = vmul.f32 %v723_v61, %v4444_v16 }
 0x17d   : > { %749 = vrot.lane.b32.xlu0 %v727_v62, %s4283_s28  ;;  %745 = vrot.lane.b32.xlu1 %v725_v63, %s4283_s28  ;;  %v732_v8 = vmul.f32 %v723_v61, %v4454_v20  ;;  %v734_v11 = vmul.f32 %v723_v61, %v4464_v24  ;;  %v4286_v62 = vmov 10  }
 0x181   : > { %753 = vrot.lane.b32.xlu0 %v729_v2, %s4283_s28  ;;  %747 = vrot.lane.b32.xlu1 %v726_v3, %s4283_s28 }
 0x185   : > { %757 = vrot.lane.b32.xlu0 %v731_v4, %s4283_s28  ;;  %751 = vrot.lane.b32.xlu1 %v728_v5, %s4283_s28 }
 0x189   : > { %761 = vrot.lane.b32.xlu0 %v733_v6, %s4283_s28  ;;  %755 = vrot.lane.b32.xlu1 %v730_v7, %s4283_s28 }
 0x18d   : > { %796 = vperm.xlu0 %4167, %v4408_v0   ;;  %759 = vrot.lane.b32.xlu1 %v732_v8, %s4283_s28  ;;  %v4661_v8 = vpop.permute.xlu1 %301 }
 0x18e   : > { %7872 = vst [vmem:[#allocation19_spill] sm:$0xff] %v4661_v8 }
 0x191   : > { %763 = vrot.lane.b32.xlu1 %v734_v11, %s4283_s28  ;;  %4168 = vset.pattern.permute.xlu0 %v4284_v13  ;;  %s4323_s28 = smov 60  }
 0x1ef   : > { %v4632_v14 = vpop.permute.xlu0 %749 }
 0x1f0   : > { %7868 = vst [vmem:[#allocation15_spill] sm:$0xff] %v4632_v14 }
 0x1f3   : > { %v4634_v17 = vpop.permute.xlu0 %753 }
 0x1f4   : > { %7869 = vst [vmem:[#allocation16_spill] sm:$0xff] %v4634_v17 }
 0x1f7   : > { %v4636_v18 = vpop.permute.xlu0 %757 }
 0x1fb   : > { %v4638_v21 = vpop.permute.xlu0 %761 }
 0x20c   : > { %v797_v22 = vpop.permute.xlu0 %796 }
 0x20d   : > { %v801_v25 = vmul.f32 %v797_v22, %v4451_v19  ;;  %v799_v26 = vmul.f32 %v797_v22, %v4434_v12  ;;  %v803_v28 = vmul.f32 %v797_v22, %v4461_v23  ;;  %v800_v30 = vmul.f32 %v797_v22, %v4441_v15 }
 0x20e   : > { %v805_v33 = vmul.f32 %v797_v22, %v4472_v29  ;;  %v802_v35 = vmul.f32 %v797_v22, %v4431_v10  ;;  %v807_v37 = vmul.f32 %v797_v22, %v4477_v31  ;;  %v804_v39 = vmul.f32 %v797_v22, %v4444_v16 }
 0x20f   : > { %823 = vrot.lane.b32.xlu0 %v801_v25, %s4285_s29  ;;  %819 = vrot.lane.b32.xlu1 %v799_v26, %s4285_s29  ;;  %v806_v41 = vmul.f32 %v797_v22, %v4454_v20  ;;  %v808_v61 = vmul.f32 %v797_v22, %v4464_v24  ;;  %v4667_v26 = vpop.permute.xlu1 %303 }
 0x210   : > { %7873 = vst [vmem:[#allocation20_spill] sm:$0xff] %v4667_v26 }
 0x213   : > { %827 = vrot.lane.b32.xlu0 %v803_v28, %s4285_s29  ;;  %821 = vrot.lane.b32.xlu1 %v800_v30, %s4285_s29 }
 0x217   : > { %831 = vrot.lane.b32.xlu0 %v805_v33, %s4285_s29  ;;  %825 = vrot.lane.b32.xlu1 %v802_v35, %s4285_s29  ;;  %v4671_v33 = vpop.permute.xlu1 %305 }
 0x218   : > { %7874 = vst [vmem:[#allocation21_spill] sm:$0xff] %v4671_v33 }
 0x21b   : > { %835 = vrot.lane.b32.xlu0 %v807_v37, %s4285_s29  ;;  %829 = vrot.lane.b32.xlu1 %v804_v39, %s4285_s29  ;;  %v4676_v39 = vpop.permute.xlu1 %309 }
 0x21c   : > { %7875 = vst [vmem:[#allocation22_spill] sm:$0xff] %v4676_v39 }
 0x21f   : > { %870 = vperm.xlu0 %4168, %v4408_v0   ;;  %833 = vrot.lane.b32.xlu1 %v806_v41, %s4285_s29  ;;  %v4288_v41 = vmov 11  }
 0x223   : > { %837 = vrot.lane.b32.xlu1 %v808_v61, %s4285_s29  ;;  %4169 = vset.pattern.permute.xlu0 %v4286_v62  ;;  %s4325_s29 = smov 104  }
 0x281   : > { %v4651_v63 = vpop.permute.xlu0 %823 }
 0x282   : > { %7870 = vst [vmem:[#allocation17_spill] sm:$0xff] %v4651_v63 }
 0x285   : > { %v4653_v2 = vpop.permute.xlu0 %827 }
 0x286   : > { %7871 = vst [vmem:[#allocation18_spill] sm:$0xff] %v4653_v2 }
 0x289   : > { %v4655_v3 = vpop.permute.xlu0 %831 }
 0x28d   : > { %v4657_v4 = vpop.permute.xlu0 %835 }
 0x29e   : > { %v871_v5 = vpop.permute.xlu0 %870 }
 0x29f   : > { %v875_v6 = vmul.f32 %v871_v5, %v4451_v19  ;;  %v873_v7 = vmul.f32 %v871_v5, %v4434_v12  ;;  %v877_v11 = vmul.f32 %v871_v5, %v4461_v23  ;;  %v874_v13 = vmul.f32 %v871_v5, %v4441_v15 }
 0x2a0   : > { %v879_v22 = vmul.f32 %v871_v5, %v4472_v29  ;;  %v876_v25 = vmul.f32 %v871_v5, %v4431_v10  ;;  %v881_v28 = vmul.f32 %v871_v5, %v4477_v31  ;;  %v878_v30 = vmul.f32 %v871_v5, %v4444_v16 }
 0x2a1   : > { %897 = vrot.lane.b32.xlu0 %v875_v6, %s4287_s30  ;;  %893 = vrot.lane.b32.xlu1 %v873_v7, %s4287_s30  ;;  %v880_v35 = vmul.f32 %v871_v5, %v4454_v20  ;;  %v882_v37 = vmul.f32 %v871_v5, %v4464_v24  ;;  %v4684_v7 = vpop.permute.xlu1 %313 }
 0x2a5   : > { %901 = vrot.lane.b32.xlu0 %v877_v11, %s4287_s30  ;;  %895 = vrot.lane.b32.xlu1 %v874_v13, %s4287_s30  ;;  %v4688_v13 = vpop.permute.xlu1 %317 }
 0x2a9   : > { %905 = vrot.lane.b32.xlu0 %v879_v22, %s4287_s30  ;;  %899 = vrot.lane.b32.xlu1 %v876_v25, %s4287_s30 }
 0x2ad   : > { %909 = vrot.lane.b32.xlu0 %v881_v28, %s4287_s30  ;;  %903 = vrot.lane.b32.xlu1 %v878_v30, %s4287_s30  ;;  %v4692_v28 = vpop.permute.xlu1 %377 }
 0x2ae   : > { %7879 = vst [vmem:[#allocation26_spill] sm:$0xff] %v4692_v28  ;;  %v4857_v28 = vld [vmem:[%s4428_s21 + $0x50] sm:$0xff] }
 0x2b1   : > { %944 = vperm.xlu0 %4169, %v4408_v0   ;;  %907 = vrot.lane.b32.xlu1 %v880_v35, %s4287_s30  ;;  %v4698_v1 = vpop.permute.xlu1 %381 }
 0x2b2   : > { %7880 = vst [vmem:[#allocation27_spill] sm:$0xff] %v4698_v1 }
 0x2b5   : > { %911 = vrot.lane.b32.xlu1 %v882_v37, %s4287_s30  ;;  %4170 = vset.pattern.permute.xlu0 %v4288_v41  ;;  %s4327_s30 = smov 101  }
 0x313   : > { %v4678_v61 = vpop.permute.xlu0 %897 }
 0x314   : > { %7876 = vst [vmem:[#allocation23_spill] sm:$0xff] %v4678_v61 }
 0x317   : > { %v4680_v62 = vpop.permute.xlu0 %901 }
 0x318   : > { %7877 = vst [vmem:[#allocation24_spill] sm:$0xff] %v4680_v62 }
 0x31b   : > { %v4682_v6 = vpop.permute.xlu0 %905 }
 0x31f   : > { %v4686_v11 = vpop.permute.xlu0 %909 }
 0x320   : > { %7878 = vst [vmem:[#allocation25_spill] sm:$0xff] %v4686_v11 }
 0x330   : > { %v945_v22 = vpop.permute.xlu0 %944 }
 0x331   : > { %v949_v5 = vmul.f32 %v945_v22, %v4451_v19  ;;  %v947_v25 = vmul.f32 %v945_v22, %v4434_v12  ;;  %v951_v30 = vmul.f32 %v945_v22, %v4461_v23  ;;  %v948_v35 = vmul.f32 %v945_v22, %v4441_v15 }
 0x332   : > { %v953_v37 = vmul.f32 %v945_v22, %v4472_v29  ;;  %v950_v41 = vmul.f32 %v945_v22, %v4431_v10  ;;  %v955_v38 = vmul.f32 %v945_v22, %v4477_v31  ;;  %v954_v8 = vmul.f32 %v945_v22, %v4454_v20 }
 0x333   : > { %971 = vrot.lane.b32.xlu0 %v949_v5, %s4289_s4  ;;  %967 = vrot.lane.b32.xlu1 %v947_v25, %s4289_s4  ;;  %v952_v5 = vmul.f32 %v945_v22, %v4444_v16  ;;  %v4702_v25 = vpop.permute.xlu1 %385 }
 0x337   : > { %975 = vrot.lane.b32.xlu0 %v951_v30, %s4289_s4  ;;  %969 = vrot.lane.b32.xlu1 %v948_v35, %s4289_s4  ;;  %v956_v30 = vmul.f32 %v945_v22, %v4464_v24  ;;  %v4707_v35 = vpop.permute.xlu1 %389 }
 0x33b   : > { %979 = vrot.lane.b32.xlu0 %v953_v37, %s4289_s4  ;;  %973 = vrot.lane.b32.xlu1 %v950_v41, %s4289_s4  ;;  %v4290_v37 = vmov 12  }
 0x33f   : > { %983 = vrot.lane.b32.xlu0 %v955_v38, %s4289_s4  ;;  %977 = vrot.lane.b32.xlu1 %v952_v5, %s4289_s4  ;;  %v4715_v5 = vpop.permute.xlu1 %393 }
 0x340   : > { %7884 = vst [vmem:[#allocation31_spill] sm:$0xff] %v4715_v5 }
 0x343   : > { %1018 = vperm.xlu0 %4170, %v4408_v0   ;;  %981 = vrot.lane.b32.xlu1 %v954_v8, %s4289_s4  ;;  %v4719_v61 = vpop.permute.xlu1 %449 }
 0x344   : > { %7886 = vst [vmem:[#allocation33_spill] sm:$0xff] %v4719_v61 }
 0x347   : > { %985 = vrot.lane.b32.xlu1 %v956_v30, %s4289_s4  ;;  %4171 = vset.pattern.permute.xlu0 %v4290_v37  ;;  %v4723_v30 = vpop.permute.xlu1 %451  ;;  %s4329_s4 = smov 98  }
 0x348   : > { %7887 = vst [vmem:[#allocation34_spill] sm:$0xff] %v4723_v30 }
 0x34b   : > { %v4729_v63 = vpop.permute.xlu1 %455 }
 0x34c   : > { %7888 = vst [vmem:[#allocation35_spill] sm:$0xff] %v4729_v63 }
 0x3a5   : > { %v4709_v41 = vpop.permute.xlu0 %971 }
 0x3a6   : > { %7881 = vst [vmem:[#allocation28_spill] sm:$0xff] %v4709_v41 }
 0x3a9   : > { %v4711_v62 = vpop.permute.xlu0 %975 }
 0x3aa   : > { %7882 = vst [vmem:[#allocation29_spill] sm:$0xff] %v4711_v62 }
 0x3ad   : > { %v4713_v38 = vpop.permute.xlu0 %979 }
 0x3ae   : > { %7883 = vst [vmem:[#allocation30_spill] sm:$0xff] %v4713_v38 }
 0x3b1   : > { %v4717_v2 = vpop.permute.xlu0 %983 }
 0x3b2   : > { %7885 = vst [vmem:[#allocation32_spill] sm:$0xff] %v4717_v2 }
 0x3c2   : > { %v1019_v8 = vpop.permute.xlu0 %1018 }
 0x3c3   : > { %v1023_v22 = vmul.f32 %v1019_v8, %v4451_v19  ;;  %v1021_v17 = vmul.f32 %v1019_v8, %v4434_v12  ;;  %v1025_v37 = vmul.f32 %v1019_v8, %v4461_v23  ;;  %v1022_v62 = vmul.f32 %v1019_v8, %v4441_v15 }
 0x3c4   : > { %v1027_v41 = vmul.f32 %v1019_v8, %v4472_v29  ;;  %v1024_v61 = vmul.f32 %v1019_v8, %v4431_v10  ;;  %v1029_v58 = vmul.f32 %v1019_v8, %v4477_v31  ;;  %v1028_v14 = vmul.f32 %v1019_v8, %v4454_v20 }
 0x3c5   : > { %1045 = vrot.lane.b32.xlu0 %v1023_v22, %s4291_s5  ;;  %1041 = vrot.lane.b32.xlu1 %v1021_v17, %s4291_s5  ;;  %v1026_v17 = vmul.f32 %v1019_v8, %v4444_v16  ;;  %v4733_v22 = vpop.permute.xlu1 %459 }
 0x3c9   : > { %1049 = vrot.lane.b32.xlu0 %v1025_v37, %s4291_s5  ;;  %1043 = vrot.lane.b32.xlu1 %v1022_v62, %s4291_s5  ;;  %v1030_v62 = vmul.f32 %v1019_v8, %v4464_v24  ;;  %v4738_v37 = vpop.permute.xlu1 %463 }
 0x3cd   : > { %1053 = vrot.lane.b32.xlu0 %v1027_v41, %s4291_s5  ;;  %1047 = vrot.lane.b32.xlu1 %v1024_v61, %s4291_s5  ;;  %v4292_v41 = vmov 13  }
 0x3d1   : > { %1057 = vrot.lane.b32.xlu0 %v1029_v58, %s4291_s5  ;;  %1051 = vrot.lane.b32.xlu1 %v1026_v17, %s4291_s5  ;;  %v4746_v17 = vpop.permute.xlu1 %467 }
 0x3d2   : > { %7892 = vst [vmem:[#allocation39_spill] sm:$0xff] %v4746_v17 }
 0x3d5   : > { %1092 = vperm.xlu0 %4171, %v4408_v0   ;;  %1055 = vrot.lane.b32.xlu1 %v1028_v14, %s4291_s5  ;;  %v4750_v50 = vpop.permute.xlu1 %523 }
 0x3d6   : > { %7894 = vst [vmem:[#allocation41_spill] sm:$0xff] %v4750_v50 }
 0x3d9   : > { %1059 = vrot.lane.b32.xlu1 %v1030_v62, %s4291_s5  ;;  %4172 = vset.pattern.permute.xlu0 %v4292_v41  ;;  %v4754_v62 = vpop.permute.xlu1 %525  ;;  %s4331_s5 = smov 95  }
 0x3da   : > { %7895 = vst [vmem:[#allocation42_spill] sm:$0xff] %v4754_v62 }
 0x3dd   : > { %v4760_v46 = vpop.permute.xlu1 %529 }
 0x3de   : > { %7896 = vst [vmem:[#allocation43_spill] sm:$0xff] %v4760_v46 }
 0x437   : > { %v4740_v61 = vpop.permute.xlu0 %1045 }
 0x438   : > { %7889 = vst [vmem:[#allocation36_spill] sm:$0xff] %v4740_v61 }
 0x43b   : > { %v4742_v54 = vpop.permute.xlu0 %1049 }
 0x43c   : > { %7890 = vst [vmem:[#allocation37_spill] sm:$0xff] %v4742_v54 }
 0x43f   : > { %v4744_v58 = vpop.permute.xlu0 %1053 }
 0x440   : > { %7891 = vst [vmem:[#allocation38_spill] sm:$0xff] %v4744_v58 }
 0x443   : > { %v4748_v57 = vpop.permute.xlu0 %1057 }
 0x444   : > { %7893 = vst [vmem:[#allocation40_spill] sm:$0xff] %v4748_v57 }
 0x454   : > { %v1093_v14 = vpop.permute.xlu0 %1092 }
 0x455   : > { %v1097_v8 = vmul.f32 %v1093_v14, %v4451_v19  ;;  %v1095_v53 = vmul.f32 %v1093_v14, %v4434_v12  ;;  %v1099_v41 = vmul.f32 %v1093_v14, %v4461_v23  ;;  %v1096_v54 = vmul.f32 %v1093_v14, %v4441_v15 }
 0x456   : > { %v1101_v61 = vmul.f32 %v1093_v14, %v4472_v29  ;;  %v1098_v50 = vmul.f32 %v1093_v14, %v4431_v10  ;;  %v1103_v63 = vmul.f32 %v1093_v14, %v4477_v31  ;;  %v1102_v62 = vmul.f32 %v1093_v14, %v4454_v20 }
 0x457   : > { %1119 = vrot.lane.b32.xlu0 %v1097_v8, %s4293_s6  ;;  %1115 = vrot.lane.b32.xlu1 %v1095_v53, %s4293_s6  ;;  %v1100_v53 = vmul.f32 %v1093_v14, %v4444_v16  ;;  %v4764_v8 = vpop.permute.xlu1 %533 }
 0x45b   : > { %1123 = vrot.lane.b32.xlu0 %v1099_v41, %s4293_s6  ;;  %1117 = vrot.lane.b32.xlu1 %v1096_v54, %s4293_s6  ;;  %v1104_v54 = vmul.f32 %v1093_v14, %v4464_v24  ;;  %v4769_v41 = vpop.permute.xlu1 %537 }
 0x45f   : > { %1127 = vrot.lane.b32.xlu0 %v1101_v61, %s4293_s6  ;;  %1121 = vrot.lane.b32.xlu1 %v1098_v50, %s4293_s6  ;;  %v4294_v61 = vmov 14  }
 0x463   : > { %1131 = vrot.lane.b32.xlu0 %v1103_v63, %s4293_s6  ;;  %1125 = vrot.lane.b32.xlu1 %v1100_v53, %s4293_s6  ;;  %v4777_v53 = vpop.permute.xlu1 %541 }
 0x464   : > { %7900 = vst [vmem:[#allocation47_spill] sm:$0xff] %v4777_v53 }
 0x467   : > { %1166 = vperm.xlu0 %4172, %v4408_v0   ;;  %1129 = vrot.lane.b32.xlu1 %v1102_v62, %s4293_s6  ;;  %v4781_v42 = vpop.permute.xlu1 %597 }
 0x468   : > { %7902 = vst [vmem:[#allocation49_spill] sm:$0xff] %v4781_v42 }
 0x46b   : > { %1133 = vrot.lane.b32.xlu1 %v1104_v54, %s4293_s6  ;;  %4173 = vset.pattern.permute.xlu0 %v4294_v61  ;;  %v4785_v54 = vpop.permute.xlu1 %599 }
 0x46c   : > { %7903 = vst [vmem:[#allocation50_spill] sm:$0xff] %v4785_v54 }
 0x46f   : > { %v4791_v30 = vpop.permute.xlu1 %603 }
 0x470   : > { %7904 = vst [vmem:[#allocation51_spill] sm:$0xff] %v4791_v30 }
 0x4c9   : > { %v4771_v50 = vpop.permute.xlu0 %1119 }
 0x4ca   : > { %7897 = vst [vmem:[#allocation44_spill] sm:$0xff] %v4771_v50 }
 0x4cd   : > { %v4773_v46 = vpop.permute.xlu0 %1123 }
 0x4ce   : > { %7898 = vst [vmem:[#allocation45_spill] sm:$0xff] %v4773_v46 }
 0x4d1   : > { %v4775_v63 = vpop.permute.xlu0 %1127 }
 0x4d2   : > { %7899 = vst [vmem:[#allocation46_spill] sm:$0xff] %v4775_v63 }
 0x4d5   : > { %v4779_v49 = vpop.permute.xlu0 %1131 }
 0x4d6   : > { %7901 = vst [vmem:[#allocation48_spill] sm:$0xff] %v4779_v49 }
 0x4e6   : > { %v1167_v62 = vpop.permute.xlu0 %1166 }
 0x4e7   : > { %v1171_v14 = vmul.f32 %v1167_v62, %v4451_v19  ;;  %v1169_v1 = vmul.f32 %v1167_v62, %v4434_v12  ;;  %v1173_v61 = vmul.f32 %v1167_v62, %v4461_v23  ;;  %v1170_v46 = vmul.f32 %v1167_v62, %v4441_v15  ;;  %v4795_v19 = vpop.permute.xlu1 %607 }
 0x4e8   : > { %v1175_v50 = vmul.f32 %v1167_v62, %v4472_v29  ;;  %v1172_v42 = vmul.f32 %v1167_v62, %v4431_v10  ;;  %v1177_v12 = vmul.f32 %v1167_v62, %v4477_v31  ;;  %v1176_v15 = vmul.f32 %v1167_v62, %v4454_v20 }
 0x4e9   : > { %1193 = vrot.lane.b32.xlu0 %v1171_v14, %s4295_s7  ;;  %1189 = vrot.lane.b32.xlu1 %v1169_v1, %s4295_s7  ;;  %v1174_v1 = vmul.f32 %v1167_v62, %v4444_v16  ;;  %v1178_v10 = vmul.f32 %v1167_v62, %v4464_v24  ;;  %v4296_v29 = vmov 15   ;;  %v4813_v24 = vld [vmem:[%s4428_s21 + $0x18] sm:$0xff] }
 0x4eb   : > { %v4800_v23 = vpop.permute.xlu1 %611 }
 0x4ed   : > { %1197 = vrot.lane.b32.xlu0 %v1173_v61, %s4295_s7  ;;  %1191 = vrot.lane.b32.xlu1 %v1170_v46, %s4295_s7 }
 0x4ef   : > { %v4808_v46 = vpop.permute.xlu1 %615 }
 0x4f0   : > { %7908 = vst [vmem:[#allocation55_spill] sm:$0xff] %v4808_v46 }
 0x4f1   : > { %1201 = vrot.lane.b32.xlu0 %v1175_v50, %s4295_s7  ;;  %1195 = vrot.lane.b32.xlu1 %v1172_v42, %s4295_s7  ;;  %v4816_v50 = vld [vmem:[%s4428_s21 + $0x8] sm:$0xff] }
 0x4f3   : > { %v4818_v62 = vpop.permute.xlu1 %671 }
 0x4f4   : > { %7910 = vst [vmem:[#allocation57_spill] sm:$0xff] %v4818_v62 }
 0x4f5   : > { %1205 = vrot.lane.b32.xlu0 %v1177_v12, %s4295_s7  ;;  %1199 = vrot.lane.b32.xlu1 %v1174_v1, %s4295_s7  ;;  %v4823_v1 = vld [vmem:[%s4428_s21 + $0x28] sm:$0xff] }
 0x4f9   : > { %1250 = vperm.xlu0 %4173, %v4408_v0   ;;  %1203 = vrot.lane.b32.xlu1 %v1176_v15, %s4295_s7  ;;  %v4826_v15 = vld [vmem:[%s4428_s21 + $0x10] sm:$0xff] }
 0x4fd   : > { %1207 = vrot.lane.b32.xlu1 %v1178_v10, %s4295_s7  ;;  %4174 = vset.pattern.permute.xlu0 %v4296_v29  ;;  %v4828_v10 = vpop.permute.xlu1 %673  ;;  %s4363_s7 = smov 13  }
 0x4fe   : > { %7911 = vst [vmem:[#allocation58_spill] sm:$0xff] %v4828_v10 }
 0x501   : > { %v4846_v10 = vpop.permute.xlu1 %677 }
 0x502   : > { %7912 = vst [vmem:[#allocation59_spill] sm:$0xff] %v4846_v10  ;;  %v4298_v10 = vmov 16  }
 0x55b   : > { %v4802_v16 = vpop.permute.xlu0 %1193 }
 0x55c   : > { %7905 = vst [vmem:[#allocation52_spill] sm:$0xff] %v4802_v16  ;;  %v4836_v16 = vld [vmem:[%s4428_s21 + $0x20] sm:$0xff] }
 0x55f   : > { %v4804_v31 = vpop.permute.xlu0 %1197 }
 0x560   : > { %7906 = vst [vmem:[#allocation53_spill] sm:$0xff] %v4804_v31  ;;  %v4833_v31 = vld [vmem:[%s4428_s21 + $0x38] sm:$0xff] }
 0x563   : > { %v4806_v42 = vpop.permute.xlu0 %1201 }
 0x564   : > { %7907 = vst [vmem:[#allocation54_spill] sm:$0xff] %v4806_v42 }
 0x567   : > { %v4810_v20 = vpop.permute.xlu0 %1205 }
 0x568   : > { %7909 = vst [vmem:[#allocation56_spill] sm:$0xff] %v4810_v20 }
 0x578   : > { %v1251_v14 = vpop.permute.xlu0 %1250 }
 0x579   : > { %v1255_v61 = vmul.f32 %v1251_v14, %v4813_v24  ;;  %v1253_v12 = vmul.f32 %v1251_v14, %v4816_v50  ;;  %v1257_v29 = vmul.f32 %v1251_v14, %v4823_v1  ;;  %v1254_v62 = vmul.f32 %v1251_v14, %v4826_v15 }
 0x57a   : > { %v1259_v30 = vmul.f32 %v1251_v14, %v4833_v31  ;;  %v1256_v54 = vmul.f32 %v1251_v14, %v4836_v16 }
 0x57b   : > { %1277 = vrot.lane.b32.xlu0 %v1255_v61, %s4297_s8  ;;  %1273 = vrot.lane.b32.xlu1 %v1253_v12, %s4297_s8  ;;  %v4841_v61 = vld [vmem:[%s4428_s21 + $0x48] sm:$0xff]  ;;  %v4844_v12 = vld [vmem:[%s4428_s21 + $0x30] sm:$0xff] }
 0x57c   : > { %v1261_v45 = vmul.f32 %v1251_v14, %v4841_v61  ;;  %v1258_v39 = vmul.f32 %v1251_v14, %v4844_v12 }
 0x57f   : > { %1281 = vrot.lane.b32.xlu0 %v1257_v29, %s4297_s8  ;;  %1275 = vrot.lane.b32.xlu1 %v1254_v62, %s4297_s8  ;;  %v4853_v62 = vpop.permute.xlu1 %681  ;;  %v1260_v29 = vmul.f32 %v1251_v14, %v4851_v27 }
 0x583   : > { %1285 = vrot.lane.b32.xlu0 %v1259_v30, %s4297_s8  ;;  %1279 = vrot.lane.b32.xlu1 %v1256_v54, %s4297_s8  ;;  %v1262_v30 = vmul.f32 %v1251_v14, %v4857_v28  ;;  %v4861_v54 = vpop.permute.xlu1 %685 }
 0x587   : > { %1289 = vrot.lane.b32.xlu0 %v1261_v45, %s4297_s8  ;;  %1283 = vrot.lane.b32.xlu1 %v1258_v39, %s4297_s8  ;;  %v4869_v26 = vpop.permute.xlu1 %689 }
 0x588   : > { %7916 = vst [vmem:[#allocation63_spill] sm:$0xff] %v4869_v26 }
 0x58b   : > { %1324 = vperm.xlu0 %4174, %v4408_v0   ;;  %1287 = vrot.lane.b32.xlu1 %v1260_v29, %s4297_s8  ;;  %v4873_v20 = vpop.permute.xlu1 %745 }
 0x58c   : > { %7918 = vst [vmem:[#allocation65_spill] sm:$0xff] %v4873_v20 }
 0x58f   : > { %1291 = vrot.lane.b32.xlu1 %v1262_v30, %s4297_s8  ;;  %4175 = vset.pattern.permute.xlu0 %v4298_v10  ;;  %v4877_v10 = vpop.permute.xlu1 %747  ;;  %s4333_s8 = smov 92  }
 0x590   : > { %7919 = vst [vmem:[#allocation66_spill] sm:$0xff] %v4877_v10 }
 0x5ed   : > { %v4863_v40 = vpop.permute.xlu0 %1277 }
 0x5ee   : > { %7913 = vst [vmem:[#allocation60_spill] sm:$0xff] %v4863_v40 }
 0x5f1   : > { %v4865_v45 = vpop.permute.xlu0 %1281 }
 0x5f2   : > { %7914 = vst [vmem:[#allocation61_spill] sm:$0xff] %v4865_v45 }
 0x5f5   : > { %v4867_v39 = vpop.permute.xlu0 %1285 }
 0x5f6   : > { %7915 = vst [vmem:[#allocation62_spill] sm:$0xff] %v4867_v39 }
 0x5f9   : > { %v4871_v33 = vpop.permute.xlu0 %1289 }
 0x5fa   : > { %7917 = vst [vmem:[#allocation64_spill] sm:$0xff] %v4871_v33  ;;  %v4883_v33 = vpop.permute.xlu1 %751 }
 0x5fb   : > { %7920 = vst [vmem:[#allocation67_spill] sm:$0xff] %v4883_v33 }
 0x60a   : > { %v1325_v29 = vpop.permute.xlu0 %1324 }
 0x60b   : > { %v1329_v14 = vmul.f32 %v1325_v29, %v4813_v24  ;;  %v1327_v42 = vmul.f32 %v1325_v29, %v4816_v50  ;;  %v1331_v30 = vmul.f32 %v1325_v29, %v4823_v1  ;;  %v1328_v45 = vmul.f32 %v1325_v29, %v4826_v15 }
 0x60c   : > { %v1333_v40 = vmul.f32 %v1325_v29, %v4833_v31  ;;  %v1330_v20 = vmul.f32 %v1325_v29, %v4836_v16  ;;  %v1335_v39 = vmul.f32 %v1325_v29, %v4841_v61  ;;  %v1334_v10 = vmul.f32 %v1325_v29, %v4851_v27 }
 0x60d   : > { %1351 = vrot.lane.b32.xlu0 %v1329_v14, %s4299_s9  ;;  %1347 = vrot.lane.b32.xlu1 %v1327_v42, %s4299_s9  ;;  %v1332_v42 = vmul.f32 %v1325_v29, %v4844_v12  ;;  %v4887_v14 = vpop.permute.xlu1 %755 }
 0x611   : > { %1355 = vrot.lane.b32.xlu0 %v1331_v30, %s4299_s9  ;;  %1349 = vrot.lane.b32.xlu1 %v1328_v45, %s4299_s9  ;;  %v1336_v45 = vmul.f32 %v1325_v29, %v4857_v28  ;;  %v4892_v30 = vpop.permute.xlu1 %759 }
 0x615   : > { %1359 = vrot.lane.b32.xlu0 %v1333_v40, %s4299_s9  ;;  %1353 = vrot.lane.b32.xlu1 %v1330_v20, %s4299_s9  ;;  %v4300_v40 = vmov 17  }
 0x619   : > { %1363 = vrot.lane.b32.xlu0 %v1335_v39, %s4299_s9  ;;  %1357 = vrot.lane.b32.xlu1 %v1332_v42, %s4299_s9  ;;  %v4900_v42 = vpop.permute.xlu1 %763 }
 0x61a   : > { %7924 = vst [vmem:[#allocation71_spill] sm:$0xff] %v4900_v42 }
 0x61d   : > { %1398 = vperm.xlu0 %4175, %v4408_v0   ;;  %1361 = vrot.lane.b32.xlu1 %v1334_v10, %s4299_s9  ;;  %v4904_v63 = vpop.permute.xlu1 %819 }
 0x61e   : > { %7926 = vst [vmem:[#allocation73_spill] sm:$0xff] %v4904_v63 }
 0x621   : > { %1365 = vrot.lane.b32.xlu1 %v1336_v45, %s4299_s9  ;;  %4176 = vset.pattern.permute.xlu0 %v4300_v40  ;;  %v4908_v45 = vpop.permute.xlu1 %821  ;;  %s4335_s9 = smov 89  }
 0x622   : > { %7927 = vst [vmem:[#allocation74_spill] sm:$0xff] %v4908_v45 }
 0x67f   : > { %v4894_v20 = vpop.permute.xlu0 %1351 }
 0x680   : > { %7921 = vst [vmem:[#allocation68_spill] sm:$0xff] %v4894_v20 }
 0x683   : > { %v4896_v33 = vpop.permute.xlu0 %1355 }
 0x684   : > { %7922 = vst [vmem:[#allocation69_spill] sm:$0xff] %v4896_v33 }
 0x687   : > { %v4898_v39 = vpop.permute.xlu0 %1359 }
 0x688   : > { %7923 = vst [vmem:[#allocation70_spill] sm:$0xff] %v4898_v39 }
 0x68b   : > { %v4902_v49 = vpop.permute.xlu0 %1363 }
 0x68c   : > { %7925 = vst [vmem:[#allocation72_spill] sm:$0xff] %v4902_v49  ;;  %v4914_v49 = vpop.permute.xlu1 %825 }
 0x68d   : > { %7928 = vst [vmem:[#allocation75_spill] sm:$0xff] %v4914_v49 }
 0x69c   : > { %v1399_v0 = vpop.permute.xlu0 %1398 }
 0x69d   : > { %v1403_v29 = vmul.f32 %v1399_v0, %v4813_v24  ;;  %v1401_v10 = vmul.f32 %v1399_v0, %v4816_v50  ;;  %v1405_v40 = vmul.f32 %v1399_v0, %v4823_v1  ;;  %v1402_v33 = vmul.f32 %v1399_v0, %v4826_v15 }
 0x69e   : > { %v1407_v20 = vmul.f32 %v1399_v0, %v4833_v31  ;;  %v1404_v63 = vmul.f32 %v1399_v0, %v4836_v16  ;;  %v1409_v39 = vmul.f32 %v1399_v0, %v4841_v61  ;;  %v1408_v45 = vmul.f32 %v1399_v0, %v4851_v27 }
 0x69f   : > { %1425 = vrot.lane.b32.xlu0 %v1403_v29, %s4301_s10  ;;  %1421 = vrot.lane.b32.xlu1 %v1401_v10, %s4301_s10  ;;  %v1406_v29 = vmul.f32 %v1399_v0, %v4844_v12  ;;  %v4918_v10 = vpop.permute.xlu1 %829 }
 0x6a3   : > { %1429 = vrot.lane.b32.xlu0 %v1405_v40, %s4301_s10  ;;  %1423 = vrot.lane.b32.xlu1 %v1402_v33, %s4301_s10  ;;  %v4924_v33 = vld [vmem:[%s7499_s1] sm:$0xff]  ;;  %v4302_v40 = vmov 18  }
 0x6a7   : > { %1433 = vrot.lane.b32.xlu0 %v1407_v20, %s4301_s10  ;;  %1427 = vrot.lane.b32.xlu1 %v1404_v63, %s4301_s10  ;;  %v1410_v63 = vmul.f32 %v1399_v0, %v4857_v28  ;;  %v4928_v20 = vpop.permute.xlu1 %833 }
 0x6ab   : > { %1437 = vrot.lane.b32.xlu0 %v1409_v39, %s4301_s10  ;;  %1431 = vrot.lane.b32.xlu1 %v1406_v29, %s4301_s10  ;;  %v4936_v57 = vpop.permute.xlu1 %837 }
 0x6ac   : > { %7932 = vst [vmem:[#allocation79_spill] sm:$0xff] %v4936_v57 }
 0x6af   : > { %1472 = vperm.xlu0 %4176, %v4924_v33   ;;  %1435 = vrot.lane.b32.xlu1 %v1408_v45, %s4301_s10  ;;  %v4940_v2 = vpop.permute.xlu1 %893 }
 0x6b0   : > { %7934 = vst [vmem:[#allocation81_spill] sm:$0xff] %v4940_v2 }
 0x6b3   : > { %1439 = vrot.lane.b32.xlu1 %v1410_v63, %s4301_s10  ;;  %4177 = vset.pattern.permute.xlu0 %v4302_v40  ;;  %v4944_v63 = vpop.permute.xlu1 %895  ;;  %s4337_s10 = smov 86  }
 0x6b4   : > { %7935 = vst [vmem:[#allocation82_spill] sm:$0xff] %v4944_v63 }
 0x711   : > { %v4930_v39 = vpop.permute.xlu0 %1425 }
 0x712   : > { %7929 = vst [vmem:[#allocation76_spill] sm:$0xff] %v4930_v39 }
 0x715   : > { %v4932_v29 = vpop.permute.xlu0 %1429 }
 0x716   : > { %7930 = vst [vmem:[#allocation77_spill] sm:$0xff] %v4932_v29 }
 0x719   : > { %v4934_v49 = vpop.permute.xlu0 %1433 }
 0x71a   : > { %7931 = vst [vmem:[#allocation78_spill] sm:$0xff] %v4934_v49 }
 0x71d   : > { %v4938_v58 = vpop.permute.xlu0 %1437 }
 0x71e   : > { %7933 = vst [vmem:[#allocation80_spill] sm:$0xff] %v4938_v58  ;;  %v4950_v58 = vpop.permute.xlu1 %899 }
 0x71f   : > { %7936 = vst [vmem:[#allocation83_spill] sm:$0xff] %v4950_v58 }
 0x72e   : > { %v1473_v45 = vpop.permute.xlu0 %1472 }
 0x72f   : > { %v1477_v0 = vmul.f32 %v1473_v45, %v4813_v24  ;;  %v1475_v38 = vmul.f32 %v1473_v45, %v4816_v50  ;;  %v1479_v40 = vmul.f32 %v1473_v45, %v4823_v1  ;;  %v1476_v29 = vmul.f32 %v1473_v45, %v4826_v15 }
 0x730   : > { %v1481_v39 = vmul.f32 %v1473_v45, %v4833_v31  ;;  %v1478_v2 = vmul.f32 %v1473_v45, %v4836_v16  ;;  %v1483_v49 = vmul.f32 %v1473_v45, %v4841_v61  ;;  %v1482_v63 = vmul.f32 %v1473_v45, %v4851_v27 }
 0x731   : > { %1499 = vrot.lane.b32.xlu0 %v1477_v0, %s4303_s17  ;;  %1495 = vrot.lane.b32.xlu1 %v1475_v38, %s4303_s17  ;;  %v1480_v38 = vmul.f32 %v1473_v45, %v4844_v12  ;;  %v4954_v0 = vpop.permute.xlu1 %903 }
 0x732   : > { %7937 = vst [vmem:[#allocation84_spill] sm:$0xff] %v4954_v0 }
 0x735   : > { %1503 = vrot.lane.b32.xlu0 %v1479_v40, %s4303_s17  ;;  %1497 = vrot.lane.b32.xlu1 %v1476_v29, %s4303_s17  ;;  %v1484_v29 = vmul.f32 %v1473_v45, %v4857_v28  ;;  %v4959_v40 = vpop.permute.xlu1 %907 }
 0x736   : > { %7938 = vst [vmem:[#allocation85_spill] sm:$0xff] %v4959_v40 }
 0x739   : > { %1507 = vrot.lane.b32.xlu0 %v1481_v39, %s4303_s17  ;;  %1501 = vrot.lane.b32.xlu1 %v1478_v2, %s4303_s17  ;;  %v4304_v39 = vmov 19  }
 0x73d   : > { %1511 = vrot.lane.b32.xlu0 %v1483_v49, %s4303_s17  ;;  %1505 = vrot.lane.b32.xlu1 %v1480_v38, %s4303_s17  ;;  %v4967_v38 = vpop.permute.xlu1 %911 }
 0x73e   : > { %7942 = vst [vmem:[#allocation89_spill] sm:$0xff] %v4967_v38 }
 0x741   : > { %1546 = vperm.xlu0 %4177, %v4924_v33   ;;  %1509 = vrot.lane.b32.xlu1 %v1482_v63, %s4303_s17  ;;  %v4971_v0 = vpop.permute.xlu1 %967 }
 0x742   : > { %7944 = vst [vmem:[#allocation91_spill] sm:$0xff] %v4971_v0 }
 0x745   : > { %1513 = vrot.lane.b32.xlu1 %v1484_v29, %s4303_s17  ;;  %4178 = vset.pattern.permute.xlu0 %v4304_v39  ;;  %v4975_v29 = vpop.permute.xlu1 %969  ;;  %s4343_s17 = smov 124  }
 0x746   : > { %7945 = vst [vmem:[#allocation92_spill] sm:$0xff] %v4975_v29 }
 0x7a3   : > { %v4961_v2 = vpop.permute.xlu0 %1499 }
 0x7a4   : > { %7939 = vst [vmem:[#allocation86_spill] sm:$0xff] %v4961_v2 }
 0x7a7   : > { %v4963_v58 = vpop.permute.xlu0 %1503 }
 0x7a8   : > { %7940 = vst [vmem:[#allocation87_spill] sm:$0xff] %v4963_v58 }
 0x7ab   : > { %v4965_v49 = vpop.permute.xlu0 %1507 }
 0x7ac   : > { %7941 = vst [vmem:[#allocation88_spill] sm:$0xff] %v4965_v49 }
 0x7af   : > { %v4969_v11 = vpop.permute.xlu0 %1511 }
 0x7b0   : > { %7943 = vst [vmem:[#allocation90_spill] sm:$0xff] %v4969_v11  ;;  %v4981_v11 = vpop.permute.xlu1 %973 }
 0x7b1   : > { %7946 = vst [vmem:[#allocation93_spill] sm:$0xff] %v4981_v11 }
 0x7c0   : > { %v1547_v63 = vpop.permute.xlu0 %1546 }
 0x7c1   : > { %v1551_v45 = vmul.f32 %v1547_v63, %v4813_v24  ;;  %v1549_v40 = vmul.f32 %v1547_v63, %v4816_v50  ;;  %v1553_v39 = vmul.f32 %v1547_v63, %v4823_v1  ;;  %v1550_v58 = vmul.f32 %v1547_v63, %v4826_v15 }
 0x7c2   : > { %v1555_v2 = vmul.f32 %v1547_v63, %v4833_v31  ;;  %v1552_v0 = vmul.f32 %v1547_v63, %v4836_v16  ;;  %v1557_v49 = vmul.f32 %v1547_v63, %v4841_v61  ;;  %v1556_v29 = vmul.f32 %v1547_v63, %v4851_v27 }
 0x7c3   : > { %1573 = vrot.lane.b32.xlu0 %v1551_v45, %s4305_s18  ;;  %1569 = vrot.lane.b32.xlu1 %v1549_v40, %s4305_s18  ;;  %v1554_v40 = vmul.f32 %v1547_v63, %v4844_v12  ;;  %v4985_v45 = vpop.permute.xlu1 %977 }
 0x7c4   : > { %7947 = vst [vmem:[#allocation94_spill] sm:$0xff] %v4985_v45 }
 0x7c7   : > { %1577 = vrot.lane.b32.xlu0 %v1553_v39, %s4305_s18  ;;  %1571 = vrot.lane.b32.xlu1 %v1550_v58, %s4305_s18  ;;  %v1558_v58 = vmul.f32 %v1547_v63, %v4857_v28  ;;  %v4990_v39 = vpop.permute.xlu1 %981 }
 0x7c8   : > { %7948 = vst [vmem:[#allocation95_spill] sm:$0xff] %v4990_v39 }
 0x7cb   : > { %1581 = vrot.lane.b32.xlu0 %v1555_v2, %s4305_s18  ;;  %1575 = vrot.lane.b32.xlu1 %v1552_v0, %s4305_s18  ;;  %v4306_v2 = vmov 20  }
 0x7cf   : > { %1585 = vrot.lane.b32.xlu0 %v1557_v49, %s4305_s18  ;;  %1579 = vrot.lane.b32.xlu1 %v1554_v40, %s4305_s18  ;;  %v4998_v40 = vpop.permute.xlu1 %985 }
 0x7d0   : > { %7952 = vst [vmem:[#allocation99_spill] sm:$0xff] %v4998_v40 }
 0x7d3   : > { %1620 = vperm.xlu0 %4178, %v4924_v33   ;;  %1583 = vrot.lane.b32.xlu1 %v1556_v29, %s4305_s18  ;;  %v5002_v38 = vpop.permute.xlu1 %1041 }
 0x7d4   : > { %7954 = vst [vmem:[#allocation101_spill] sm:$0xff] %v5002_v38 }
 0x7d7   : > { %1587 = vrot.lane.b32.xlu1 %v1558_v58, %s4305_s18  ;;  %4179 = vset.pattern.permute.xlu0 %v4306_v2  ;;  %v5006_v58 = vpop.permute.xlu1 %1043  ;;  %s4345_s18 = smov 121  }
 0x7d8   : > { %7955 = vst [vmem:[#allocation102_spill] sm:$0xff] %v5006_v58 }
 0x835   : > { %v4992_v0 = vpop.permute.xlu0 %1573 }
 0x836   : > { %7949 = vst [vmem:[#allocation96_spill] sm:$0xff] %v4992_v0 }
 0x839   : > { %v4994_v11 = vpop.permute.xlu0 %1577 }
 0x83a   : > { %7950 = vst [vmem:[#allocation97_spill] sm:$0xff] %v4994_v11 }
 0x83d   : > { %v4996_v49 = vpop.permute.xlu0 %1581 }
 0x83e   : > { %7951 = vst [vmem:[#allocation98_spill] sm:$0xff] %v4996_v49 }
 0x841   : > { %v5000_v45 = vpop.permute.xlu0 %1585 }
 0x842   : > { %7953 = vst [vmem:[#allocation100_spill] sm:$0xff] %v5000_v45  ;;  %v5012_v45 = vpop.permute.xlu1 %1047 }
 0x843   : > { %7956 = vst [vmem:[#allocation103_spill] sm:$0xff] %v5012_v45 }
 0x852   : > { %v1621_v29 = vpop.permute.xlu0 %1620 }
 0x853   : > { %v1625_v63 = vmul.f32 %v1621_v29, %v4813_v24  ;;  %v1623_v39 = vmul.f32 %v1621_v29, %v4816_v50  ;;  %v1627_v2 = vmul.f32 %v1621_v29, %v4823_v1  ;;  %v1624_v11 = vmul.f32 %v1621_v29, %v4826_v15 }
 0x854   : > { %v1629_v0 = vmul.f32 %v1621_v29, %v4833_v31  ;;  %v1626_v38 = vmul.f32 %v1621_v29, %v4836_v16  ;;  %v1631_v49 = vmul.f32 %v1621_v29, %v4841_v61  ;;  %v1630_v58 = vmul.f32 %v1621_v29, %v4851_v27 }
 0x855   : > { %1647 = vrot.lane.b32.xlu0 %v1625_v63, %s4307_s19  ;;  %1643 = vrot.lane.b32.xlu1 %v1623_v39, %s4307_s19  ;;  %v1628_v39 = vmul.f32 %v1621_v29, %v4844_v12  ;;  %v5016_v63 = vpop.permute.xlu1 %1051 }
 0x856   : > { %7957 = vst [vmem:[#allocation104_spill] sm:$0xff] %v5016_v63 }
 0x859   : > { %1651 = vrot.lane.b32.xlu0 %v1627_v2, %s4307_s19  ;;  %1645 = vrot.lane.b32.xlu1 %v1624_v11, %s4307_s19  ;;  %v1632_v11 = vmul.f32 %v1621_v29, %v4857_v28  ;;  %v5021_v2 = vpop.permute.xlu1 %1055 }
 0x85a   : > { %7958 = vst [vmem:[#allocation105_spill] sm:$0xff] %v5021_v2 }
 0x85d   : > { %1655 = vrot.lane.b32.xlu0 %v1629_v0, %s4307_s19  ;;  %1649 = vrot.lane.b32.xlu1 %v1626_v38, %s4307_s19  ;;  %v4308_v0 = vmov 21  }
 0x861   : > { %1659 = vrot.lane.b32.xlu0 %v1631_v49, %s4307_s19  ;;  %1653 = vrot.lane.b32.xlu1 %v1628_v39, %s4307_s19  ;;  %v5029_v39 = vpop.permute.xlu1 %1059 }
 0x862   : > { %7962 = vst [vmem:[#allocation109_spill] sm:$0xff] %v5029_v39 }
 0x865   : > { %1694 = vperm.xlu0 %4179, %v4924_v33   ;;  %1657 = vrot.lane.b32.xlu1 %v1630_v58, %s4307_s19  ;;  %v5033_v40 = vpop.permute.xlu1 %1115 }
 0x866   : > { %7964 = vst [vmem:[#allocation111_spill] sm:$0xff] %v5033_v40 }
 0x869   : > { %1661 = vrot.lane.b32.xlu1 %v1632_v11, %s4307_s19  ;;  %4180 = vset.pattern.permute.xlu0 %v4308_v0  ;;  %v5037_v11 = vpop.permute.xlu1 %1117  ;;  %s4347_s19 = smov 118  }
 0x86a   : > { %7965 = vst [vmem:[#allocation112_spill] sm:$0xff] %v5037_v11 }
 0x8c7   : > { %v5023_v38 = vpop.permute.xlu0 %1647 }
 0x8c8   : > { %7959 = vst [vmem:[#allocation106_spill] sm:$0xff] %v5023_v38 }
 0x8cb   : > { %v5025_v45 = vpop.permute.xlu0 %1651 }
 0x8cc   : > { %7960 = vst [vmem:[#allocation107_spill] sm:$0xff] %v5025_v45 }
 0x8cf   : > { %v5027_v49 = vpop.permute.xlu0 %1655 }
 0x8d0   : > { %7961 = vst [vmem:[#allocation108_spill] sm:$0xff] %v5027_v49 }
 0x8d3   : > { %v5031_v63 = vpop.permute.xlu0 %1659 }
 0x8d4   : > { %7963 = vst [vmem:[#allocation110_spill] sm:$0xff] %v5031_v63  ;;  %v5043_v63 = vpop.permute.xlu1 %1121 }
 0x8d5   : > { %7966 = vst [vmem:[#allocation113_spill] sm:$0xff] %v5043_v63 }
 0x8e4   : > { %v1695_v58 = vpop.permute.xlu0 %1694 }
 0x8e5   : > { %v1699_v29 = vmul.f32 %v1695_v58, %v4813_v24  ;;  %v1697_v2 = vmul.f32 %v1695_v58, %v4816_v50  ;;  %v1701_v0 = vmul.f32 %v1695_v58, %v4823_v1  ;;  %v1698_v45 = vmul.f32 %v1695_v58, %v4826_v15 }
 0x8e6   : > { %v1703_v38 = vmul.f32 %v1695_v58, %v4833_v31  ;;  %v1700_v40 = vmul.f32 %v1695_v58, %v4836_v16  ;;  %v1705_v50 = vmul.f32 %v1695_v58, %v4841_v61  ;;  %v1704_v11 = vmul.f32 %v1695_v58, %v4851_v27 }
 0x8e7   : > { %1721 = vrot.lane.b32.xlu0 %v1699_v29, %s4309_s20  ;;  %1717 = vrot.lane.b32.xlu1 %v1697_v2, %s4309_s20  ;;  %v1702_v2 = vmul.f32 %v1695_v58, %v4844_v12  ;;  %v5047_v29 = vpop.permute.xlu1 %1125 }
 0x8e8   : > { %7967 = vst [vmem:[#allocation114_spill] sm:$0xff] %v5047_v29 }
 0x8eb   : > { %1725 = vrot.lane.b32.xlu0 %v1701_v0, %s4309_s20  ;;  %1719 = vrot.lane.b32.xlu1 %v1698_v45, %s4309_s20  ;;  %v1706_v45 = vmul.f32 %v1695_v58, %v4857_v28  ;;  %v5052_v0 = vpop.permute.xlu1 %1129 }
 0x8ec   : > { %7968 = vst [vmem:[#allocation115_spill] sm:$0xff] %v5052_v0 }
 0x8ef   : > { %1729 = vrot.lane.b32.xlu0 %v1703_v38, %s4309_s20  ;;  %1723 = vrot.lane.b32.xlu1 %v1700_v40, %s4309_s20  ;;  %v4310_v38 = vmov 22  }
 0x8f3   : > { %1733 = vrot.lane.b32.xlu0 %v1705_v50, %s4309_s20  ;;  %1727 = vrot.lane.b32.xlu1 %v1702_v2, %s4309_s20  ;;  %v5060_v2 = vpop.permute.xlu1 %1133 }
 0x8f4   : > { %7972 = vst [vmem:[#allocation119_spill] sm:$0xff] %v5060_v2 }
 0x8f7   : > { %1778 = vperm.xlu0 %4180, %v4924_v33   ;;  %1731 = vrot.lane.b32.xlu1 %v1704_v11, %s4309_s20  ;;  %v5064_v29 = vpop.permute.xlu1 %1189 }
 0x8f8   : > { %7974 = vst [vmem:[#allocation121_spill] sm:$0xff] %v5064_v29 }
 0x8fb   : > { %1735 = vrot.lane.b32.xlu1 %v1706_v45, %s4309_s20  ;;  %4181 = vset.pattern.permute.xlu0 %v4310_v38  ;;  %v5068_v45 = vpop.permute.xlu1 %1191  ;;  %s4349_s20 = smov 115  }
 0x8fc   : > { %7975 = vst [vmem:[#allocation122_spill] sm:$0xff] %v5068_v45 }
 0x959   : > { %v5054_v40 = vpop.permute.xlu0 %1721 }
 0x95a   : > { %7969 = vst [vmem:[#allocation116_spill] sm:$0xff] %v5054_v40 }
 0x95d   : > { %v5056_v63 = vpop.permute.xlu0 %1725 }
 0x95e   : > { %7970 = vst [vmem:[#allocation117_spill] sm:$0xff] %v5056_v63 }
 0x961   : > { %v5058_v50 = vpop.permute.xlu0 %1729 }
 0x962   : > { %7971 = vst [vmem:[#allocation118_spill] sm:$0xff] %v5058_v50 }
 0x965   : > { %v5062_v49 = vpop.permute.xlu0 %1733 }
 0x966   : > { %7973 = vst [vmem:[#allocation120_spill] sm:$0xff] %v5062_v49  ;;  %v5074_v49 = vpop.permute.xlu1 %1195 }
 0x967   : > { %7976 = vst [vmem:[#allocation123_spill] sm:$0xff] %v5074_v49 }
 0x96a   : > { %v5078_v45 = vpop.permute.xlu1 %1199 }
 0x96b   : > { %7977 = vst [vmem:[#allocation124_spill] sm:$0xff] %v5078_v45 }
 0x96e   : > { %v5086_v49 = vpop.permute.xlu1 %1203 }
 0x96f   : > { %7978 = vst [vmem:[#allocation125_spill] sm:$0xff] %v5086_v49 }
 0x972   : > { %v5094_v45 = vpop.permute.xlu1 %1207 }
 0x973   : > { %7982 = vst [vmem:[#allocation129_spill] sm:$0xff] %v5094_v45 }
 0x976   : > { %v1779_v11 = vpop.permute.xlu0 %1778  ;;  %v5098_v39 = vpop.permute.xlu1 %1273 }
 0x977   : > { %v1783_v58 = vmul.f32 %v1779_v11, %v4836_v16  ;;  %v1781_v0 = vmul.f32 %v1779_v11, %v4826_v15  ;;  %v1785_v38 = vmul.f32 %v1779_v11, %v4844_v12  ;;  %v1782_v63 = vmul.f32 %v1779_v11, %v4813_v24  ;;  %7984 = vst [vmem:[#allocation131_spill] sm:$0xff] %v5098_v39 }
 0x978   : > { %v1787_v40 = vmul.f32 %v1779_v11, %v4851_v27  ;;  %v1784_v29 = vmul.f32 %v1779_v11, %v4823_v1  ;;  %v1788_v50 = vmul.f32 %v1779_v11, %v4841_v61 }
 0x979   : > { %1805 = vrot.lane.b32.xlu0 %v1783_v58, %s4311_s22  ;;  %1801 = vrot.lane.b32.xlu1 %v1781_v0, %s4311_s22  ;;  %v1789_v58 = vmul.f32 %v1779_v11, %v4857_v28  ;;  %v1786_v0 = vmul.f32 %v1779_v11, %v4833_v31 }
 0x97d   : > { %1809 = vrot.lane.b32.xlu0 %v1785_v38, %s4311_s22  ;;  %1803 = vrot.lane.b32.xlu1 %v1782_v63, %s4311_s22  ;;  %v5082_v38 = vld [vmem:[%s4428_s21 + $0x58] sm:$0xff] }
 0x97e   : > { %v1790_v63 = vmul.f32 %v1779_v11, %v5082_v38 }
 0x981   : > { %1813 = vrot.lane.b32.xlu0 %v1787_v40, %s4311_s22  ;;  %1807 = vrot.lane.b32.xlu1 %v1784_v29, %s4311_s22  ;;  %v4312_v29 = vmov 23  }
 0x985   : > { %1817 = vrot.lane.b32.xlu0 %v1789_v58, %s4311_s22  ;;  %1811 = vrot.lane.b32.xlu1 %v1786_v0, %s4311_s22 }
 0x989   : > { %1852 = vperm.xlu0 %4181, %v4924_v33   ;;  %1815 = vrot.lane.b32.xlu1 %v1788_v50, %s4311_s22 }
 0x98d   : > { %1819 = vrot.lane.b32.xlu1 %v1790_v63, %s4311_s22  ;;  %4182 = vset.pattern.permute.xlu0 %v4312_v29  ;;  %v5102_v63 = vpop.permute.xlu1 %1275  ;;  %s4351_s22 = smov 112  }
 0x98e   : > { %7985 = vst [vmem:[#allocation132_spill] sm:$0xff] %v5102_v63 }
 0x9eb   : > { %v5088_v40 = vpop.permute.xlu0 %1805 }
 0x9ec   : > { %7979 = vst [vmem:[#allocation126_spill] sm:$0xff] %v5088_v40 }
 0x9ef   : > { %v5090_v58 = vpop.permute.xlu0 %1809 }
 0x9f0   : > { %7980 = vst [vmem:[#allocation127_spill] sm:$0xff] %v5090_v58 }
 0x9f3   : > { %v5092_v0 = vpop.permute.xlu0 %1813 }
 0x9f4   : > { %7981 = vst [vmem:[#allocation128_spill] sm:$0xff] %v5092_v0 }
 0x9f7   : > { %v5096_v2 = vpop.permute.xlu0 %1817 }
 0x9f8   : > { %7983 = vst [vmem:[#allocation130_spill] sm:$0xff] %v5096_v2  ;;  %v5108_v2 = vpop.permute.xlu1 %1279 }
 0x9f9   : > { %7986 = vst [vmem:[#allocation133_spill] sm:$0xff] %v5108_v2 }
 0xa08   : > { %v1853_v50 = vpop.permute.xlu0 %1852 }
 0xa09   : > { %v1857_v11 = vmul.f32 %v1853_v50, %v4836_v16  ;;  %v1855_v49 = vmul.f32 %v1853_v50, %v4826_v15  ;;  %v1859_v29 = vmul.f32 %v1853_v50, %v4844_v12  ;;  %v1856_v58 = vmul.f32 %v1853_v50, %v4813_v24 }
 0xa0a   : > { %v1861_v40 = vmul.f32 %v1853_v50, %v4851_v27  ;;  %v1858_v39 = vmul.f32 %v1853_v50, %v4823_v1  ;;  %v1863_v0 = vmul.f32 %v1853_v50, %v4857_v28  ;;  %v1862_v63 = vmul.f32 %v1853_v50, %v4841_v61 }
 0xa0b   : > { %1879 = vrot.lane.b32.xlu0 %v1857_v11, %s4313_s23  ;;  %1875 = vrot.lane.b32.xlu1 %v1855_v49, %s4313_s23  ;;  %v1860_v49 = vmul.f32 %v1853_v50, %v4833_v31  ;;  %v5112_v11 = vpop.permute.xlu1 %1283 }
 0xa0c   : > { %7987 = vst [vmem:[#allocation134_spill] sm:$0xff] %v5112_v11 }
 0xa0f   : > { %1883 = vrot.lane.b32.xlu0 %v1859_v29, %s4313_s23  ;;  %1877 = vrot.lane.b32.xlu1 %v1856_v58, %s4313_s23  ;;  %v1864_v58 = vmul.f32 %v1853_v50, %v5082_v38  ;;  %v5117_v29 = vpop.permute.xlu1 %1287 }
 0xa10   : > { %7988 = vst [vmem:[#allocation135_spill] sm:$0xff] %v5117_v29 }
 0xa13   : > { %1887 = vrot.lane.b32.xlu0 %v1861_v40, %s4313_s23  ;;  %1881 = vrot.lane.b32.xlu1 %v1858_v39, %s4313_s23  ;;  %v4314_v40 = vmov 24  }
 0xa17   : > { %1891 = vrot.lane.b32.xlu0 %v1863_v0, %s4313_s23  ;;  %1885 = vrot.lane.b32.xlu1 %v1860_v49, %s4313_s23  ;;  %v5125_v49 = vpop.permute.xlu1 %1291 }
 0xa18   : > { %7992 = vst [vmem:[#allocation139_spill] sm:$0xff] %v5125_v49 }
 0xa1b   : > { %1926 = vperm.xlu0 %4182, %v4924_v33   ;;  %1889 = vrot.lane.b32.xlu1 %v1862_v63, %s4313_s23  ;;  %v5129_v45 = vpop.permute.xlu1 %1347 }
 0xa1c   : > { %7994 = vst [vmem:[#allocation141_spill] sm:$0xff] %v5129_v45 }
 0xa1f   : > { %1893 = vrot.lane.b32.xlu1 %v1864_v58, %s4313_s23  ;;  %4183 = vset.pattern.permute.xlu0 %v4314_v40  ;;  %v5133_v58 = vpop.permute.xlu1 %1349 }
 0xa20   : > { %7995 = vst [vmem:[#allocation142_spill] sm:$0xff] %v5133_v58 }
 0xa7d   : > { %v5119_v39 = vpop.permute.xlu0 %1879 }
 0xa7e   : > { %7989 = vst [vmem:[#allocation136_spill] sm:$0xff] %v5119_v39 }
 0xa81   : > { %v5121_v2 = vpop.permute.xlu0 %1883 }
 0xa82   : > { %7990 = vst [vmem:[#allocation137_spill] sm:$0xff] %v5121_v2 }
 0xa85   : > { %v5123_v0 = vpop.permute.xlu0 %1887 }
 0xa86   : > { %7991 = vst [vmem:[#allocation138_spill] sm:$0xff] %v5123_v0 }
 0xa89   : > { %v5127_v11 = vpop.permute.xlu0 %1891 }
 0xa8a   : > { %7993 = vst [vmem:[#allocation140_spill] sm:$0xff] %v5127_v11  ;;  %v5139_v11 = vpop.permute.xlu1 %1353 }
 0xa8b   : > { %7996 = vst [vmem:[#allocation143_spill] sm:$0xff] %v5139_v11 }
 0xa9a   : > { %v1927_v63 = vpop.permute.xlu0 %1926 }
 0xa9b   : > { %v1931_v50 = vmul.f32 %v1927_v63, %v4836_v16  ;;  %v1929_v29 = vmul.f32 %v1927_v63, %v4826_v15  ;;  %v1933_v40 = vmul.f32 %v1927_v63, %v4844_v12  ;;  %v1930_v2 = vmul.f32 %v1927_v63, %v4813_v24 }
 0xa9c   : > { %v1935_v39 = vmul.f32 %v1927_v63, %v4851_v27  ;;  %v1932_v45 = vmul.f32 %v1927_v63, %v4823_v1  ;;  %v1937_v0 = vmul.f32 %v1927_v63, %v4857_v28  ;;  %v1936_v58 = vmul.f32 %v1927_v63, %v4841_v61 }
 0xa9d   : > { %1953 = vrot.lane.b32.xlu0 %v1931_v50, %s4315_s24  ;;  %1949 = vrot.lane.b32.xlu1 %v1929_v29, %s4315_s24  ;;  %v1934_v29 = vmul.f32 %v1927_v63, %v4833_v31  ;;  %v5143_v50 = vpop.permute.xlu1 %1357 }
 0xa9e   : > { %7997 = vst [vmem:[#allocation144_spill] sm:$0xff] %v5143_v50 }
 0xaa1   : > { %1957 = vrot.lane.b32.xlu0 %v1933_v40, %s4315_s24  ;;  %1951 = vrot.lane.b32.xlu1 %v1930_v2, %s4315_s24  ;;  %v1938_v2 = vmul.f32 %v1927_v63, %v5082_v38  ;;  %v5148_v40 = vpop.permute.xlu1 %1361 }
 0xaa2   : > { %7998 = vst [vmem:[#allocation145_spill] sm:$0xff] %v5148_v40 }
 0xaa5   : > { %1961 = vrot.lane.b32.xlu0 %v1935_v39, %s4315_s24  ;;  %1955 = vrot.lane.b32.xlu1 %v1932_v45, %s4315_s24  ;;  %v4316_v39 = vmov 25  }
 0xaa9   : > { %1965 = vrot.lane.b32.xlu0 %v1937_v0, %s4315_s24  ;;  %1959 = vrot.lane.b32.xlu1 %v1934_v29, %s4315_s24  ;;  %v5156_v29 = vpop.permute.xlu1 %1365 }
 0xaaa   : > { %8002 = vst [vmem:[#allocation149_spill] sm:$0xff] %v5156_v29 }
 0xaad   : > { %2000 = vperm.xlu0 %4183, %v4924_v33   ;;  %1963 = vrot.lane.b32.xlu1 %v1936_v58, %s4315_s24  ;;  %v5160_v49 = vpop.permute.xlu1 %1421 }
 0xaae   : > { %8004 = vst [vmem:[#allocation151_spill] sm:$0xff] %v5160_v49 }
 0xab1   : > { %1967 = vrot.lane.b32.xlu1 %v1938_v2, %s4315_s24  ;;  %4184 = vset.pattern.permute.xlu0 %v4316_v39  ;;  %v5164_v2 = vpop.permute.xlu1 %1423 }
 0xab2   : > { %8005 = vst [vmem:[#allocation152_spill] sm:$0xff] %v5164_v2 }
 0xb0f   : > { %v5150_v45 = vpop.permute.xlu0 %1953 }
 0xb10   : > { %7999 = vst [vmem:[#allocation146_spill] sm:$0xff] %v5150_v45 }
 0xb13   : > { %v5152_v11 = vpop.permute.xlu0 %1957 }
 0xb14   : > { %8000 = vst [vmem:[#allocation147_spill] sm:$0xff] %v5152_v11 }
 0xb17   : > { %v5154_v0 = vpop.permute.xlu0 %1961 }
 0xb18   : > { %8001 = vst [vmem:[#allocation148_spill] sm:$0xff] %v5154_v0 }
 0xb1b   : > { %v5158_v50 = vpop.permute.xlu0 %1965 }
 0xb1c   : > { %8003 = vst [vmem:[#allocation150_spill] sm:$0xff] %v5158_v50  ;;  %v5170_v50 = vpop.permute.xlu1 %1427 }
 0xb1d   : > { %8006 = vst [vmem:[#allocation153_spill] sm:$0xff] %v5170_v50 }
 0xb2c   : > { %v2001_v58 = vpop.permute.xlu0 %2000 }
 0xb2d   : > { %v2005_v63 = vmul.f32 %v2001_v58, %v4836_v16  ;;  %v2003_v40 = vmul.f32 %v2001_v58, %v4826_v15  ;;  %v2007_v39 = vmul.f32 %v2001_v58, %v4844_v12  ;;  %v2004_v11 = vmul.f32 %v2001_v58, %v4813_v24 }
 0xb2e   : > { %v2009_v45 = vmul.f32 %v2001_v58, %v4851_v27  ;;  %v2006_v49 = vmul.f32 %v2001_v58, %v4823_v1  ;;  %v2011_v0 = vmul.f32 %v2001_v58, %v4857_v28  ;;  %v2010_v2 = vmul.f32 %v2001_v58, %v4841_v61 }
 0xb2f   : > { %2027 = vrot.lane.b32.xlu0 %v2005_v63, %s4317_s25  ;;  %2023 = vrot.lane.b32.xlu1 %v2003_v40, %s4317_s25  ;;  %v2008_v40 = vmul.f32 %v2001_v58, %v4833_v31  ;;  %v5174_v63 = vpop.permute.xlu1 %1431 }
 0xb30   : > { %8007 = vst [vmem:[#allocation154_spill] sm:$0xff] %v5174_v63 }
 0xb33   : > { %2031 = vrot.lane.b32.xlu0 %v2007_v39, %s4317_s25  ;;  %2025 = vrot.lane.b32.xlu1 %v2004_v11, %s4317_s25  ;;  %v2012_v11 = vmul.f32 %v2001_v58, %v5082_v38  ;;  %v5179_v39 = vpop.permute.xlu1 %1435 }
 0xb34   : > { %8008 = vst [vmem:[#allocation155_spill] sm:$0xff] %v5179_v39 }
 0xb37   : > { %2035 = vrot.lane.b32.xlu0 %v2009_v45, %s4317_s25  ;;  %2029 = vrot.lane.b32.xlu1 %v2006_v49, %s4317_s25  ;;  %v4318_v45 = vmov 26  }
 0xb3b   : > { %2039 = vrot.lane.b32.xlu0 %v2011_v0, %s4317_s25  ;;  %2033 = vrot.lane.b32.xlu1 %v2008_v40, %s4317_s25  ;;  %v5187_v40 = vpop.permute.xlu1 %1439 }
 0xb3c   : > { %8012 = vst [vmem:[#allocation159_spill] sm:$0xff] %v5187_v40 }
 0xb3f   : > { %2074 = vperm.xlu0 %4184, %v4924_v33   ;;  %2037 = vrot.lane.b32.xlu1 %v2010_v2, %s4317_s25  ;;  %v5191_v29 = vpop.permute.xlu1 %1495 }
 0xb40   : > { %8014 = vst [vmem:[#allocation161_spill] sm:$0xff] %v5191_v29 }
 0xb43   : > { %2041 = vrot.lane.b32.xlu1 %v2012_v11, %s4317_s25  ;;  %4185 = vset.pattern.permute.xlu0 %v4318_v45  ;;  %v5195_v11 = vpop.permute.xlu1 %1497  ;;  %s4353_s25 = smov 28  }
 0xb44   : > { %8015 = vst [vmem:[#allocation162_spill] sm:$0xff] %v5195_v11 }
 0xba1   : > { %v5181_v49 = vpop.permute.xlu0 %2027 }
 0xba2   : > { %8009 = vst [vmem:[#allocation156_spill] sm:$0xff] %v5181_v49 }
 0xba5   : > { %v5183_v50 = vpop.permute.xlu0 %2031 }
 0xba6   : > { %8010 = vst [vmem:[#allocation157_spill] sm:$0xff] %v5183_v50 }
 0xba9   : > { %v5185_v0 = vpop.permute.xlu0 %2035 }
 0xbaa   : > { %8011 = vst [vmem:[#allocation158_spill] sm:$0xff] %v5185_v0 }
 0xbad   : > { %v5189_v63 = vpop.permute.xlu0 %2039 }
 0xbae   : > { %8013 = vst [vmem:[#allocation160_spill] sm:$0xff] %v5189_v63  ;;  %v5201_v63 = vpop.permute.xlu1 %1501 }
 0xbaf   : > { %8016 = vst [vmem:[#allocation163_spill] sm:$0xff] %v5201_v63 }
 0xbbe   : > { %v2075_v2 = vpop.permute.xlu0 %2074 }
 0xbbf   : > { %v2079_v58 = vmul.f32 %v2075_v2, %v4836_v16  ;;  %v2077_v39 = vmul.f32 %v2075_v2, %v4826_v15  ;;  %v2081_v45 = vmul.f32 %v2075_v2, %v4844_v12  ;;  %v2078_v50 = vmul.f32 %v2075_v2, %v4813_v24 }
 0xbc0   : > { %v2083_v49 = vmul.f32 %v2075_v2, %v4851_v27  ;;  %v2080_v29 = vmul.f32 %v2075_v2, %v4823_v1  ;;  %v2085_v0 = vmul.f32 %v2075_v2, %v4857_v28  ;;  %v2084_v11 = vmul.f32 %v2075_v2, %v4841_v61 }
 0xbc1   : > { %2101 = vrot.lane.b32.xlu0 %v2079_v58, %s4319_s26  ;;  %2097 = vrot.lane.b32.xlu1 %v2077_v39, %s4319_s26  ;;  %v2082_v39 = vmul.f32 %v2075_v2, %v4833_v31  ;;  %v5205_v58 = vpop.permute.xlu1 %1505 }
 0xbc2   : > { %8017 = vst [vmem:[#allocation164_spill] sm:$0xff] %v5205_v58 }
 0xbc5   : > { %2105 = vrot.lane.b32.xlu0 %v2081_v45, %s4319_s26  ;;  %2099 = vrot.lane.b32.xlu1 %v2078_v50, %s4319_s26  ;;  %v2086_v50 = vmul.f32 %v2075_v2, %v5082_v38  ;;  %v5210_v45 = vpop.permute.xlu1 %1509 }
 0xbc6   : > { %8018 = vst [vmem:[#allocation165_spill] sm:$0xff] %v5210_v45 }
 0xbc9   : > { %2109 = vrot.lane.b32.xlu0 %v2083_v49, %s4319_s26  ;;  %2103 = vrot.lane.b32.xlu1 %v2080_v29, %s4319_s26  ;;  %v4320_v49 = vmov 27  }
 0xbcd   : > { %2113 = vrot.lane.b32.xlu0 %v2085_v0, %s4319_s26  ;;  %2107 = vrot.lane.b32.xlu1 %v2082_v39, %s4319_s26  ;;  %v5218_v39 = vpop.permute.xlu1 %1513 }
 0xbce   : > { %8022 = vst [vmem:[#allocation169_spill] sm:$0xff] %v5218_v39 }
 0xbd1   : > { %2148 = vperm.xlu0 %4185, %v4924_v33   ;;  %2111 = vrot.lane.b32.xlu1 %v2084_v11, %s4319_s26  ;;  %v5222_v40 = vpop.permute.xlu1 %1569 }
 0xbd2   : > { %8024 = vst [vmem:[#allocation171_spill] sm:$0xff] %v5222_v40 }
 0xbd5   : > { %2115 = vrot.lane.b32.xlu1 %v2086_v50, %s4319_s26  ;;  %4186 = vset.pattern.permute.xlu0 %v4320_v49  ;;  %v5226_v50 = vpop.permute.xlu1 %1571  ;;  %s4356_s26 = smov 25  }
 0xbd6   : > { %8025 = vst [vmem:[#allocation172_spill] sm:$0xff] %v5226_v50 }
 0xc33   : > { %v5212_v29 = vpop.permute.xlu0 %2101 }
 0xc34   : > { %8019 = vst [vmem:[#allocation166_spill] sm:$0xff] %v5212_v29 }
 0xc37   : > { %v5214_v63 = vpop.permute.xlu0 %2105 }
 0xc38   : > { %8020 = vst [vmem:[#allocation167_spill] sm:$0xff] %v5214_v63 }
 0xc3b   : > { %v5216_v0 = vpop.permute.xlu0 %2109 }
 0xc3c   : > { %8021 = vst [vmem:[#allocation168_spill] sm:$0xff] %v5216_v0 }
 0xc3f   : > { %v5220_v58 = vpop.permute.xlu0 %2113 }
 0xc40   : > { %8023 = vst [vmem:[#allocation170_spill] sm:$0xff] %v5220_v58  ;;  %v5232_v58 = vpop.permute.xlu1 %1575 }
 0xc41   : > { %8026 = vst [vmem:[#allocation173_spill] sm:$0xff] %v5232_v58 }
 0xc50   : > { %v2149_v11 = vpop.permute.xlu0 %2148 }
 0xc51   : > { %v2153_v2 = vmul.f32 %v2149_v11, %v4836_v16  ;;  %v2151_v45 = vmul.f32 %v2149_v11, %v4826_v15  ;;  %v2155_v49 = vmul.f32 %v2149_v11, %v4844_v12  ;;  %v2152_v63 = vmul.f32 %v2149_v11, %v4813_v24 }
 0xc52   : > { %v2157_v29 = vmul.f32 %v2149_v11, %v4851_v27  ;;  %v2154_v40 = vmul.f32 %v2149_v11, %v4823_v1  ;;  %v2159_v0 = vmul.f32 %v2149_v11, %v4857_v28  ;;  %v2158_v50 = vmul.f32 %v2149_v11, %v4841_v61 }
 0xc53   : > { %2175 = vrot.lane.b32.xlu0 %v2153_v2, %s4321_s27  ;;  %2171 = vrot.lane.b32.xlu1 %v2151_v45, %s4321_s27  ;;  %v2156_v45 = vmul.f32 %v2149_v11, %v4833_v31  ;;  %v5236_v2 = vpop.permute.xlu1 %1579 }
 0xc54   : > { %8027 = vst [vmem:[#allocation174_spill] sm:$0xff] %v5236_v2 }
 0xc57   : > { %2179 = vrot.lane.b32.xlu0 %v2155_v49, %s4321_s27  ;;  %2173 = vrot.lane.b32.xlu1 %v2152_v63, %s4321_s27  ;;  %v2160_v63 = vmul.f32 %v2149_v11, %v5082_v38  ;;  %v5241_v49 = vpop.permute.xlu1 %1583 }
 0xc58   : > { %8028 = vst [vmem:[#allocation175_spill] sm:$0xff] %v5241_v49 }
 0xc5b   : > { %2183 = vrot.lane.b32.xlu0 %v2157_v29, %s4321_s27  ;;  %2177 = vrot.lane.b32.xlu1 %v2154_v40, %s4321_s27  ;;  %v4322_v29 = vmov 28  }
 0xc5f   : > { %2187 = vrot.lane.b32.xlu0 %v2159_v0, %s4321_s27  ;;  %2181 = vrot.lane.b32.xlu1 %v2156_v45, %s4321_s27  ;;  %v5249_v45 = vpop.permute.xlu1 %1587 }
 0xc60   : > { %8032 = vst [vmem:[#allocation179_spill] sm:$0xff] %v5249_v45 }
 0xc63   : > { %2222 = vperm.xlu0 %4186, %v4924_v33   ;;  %2185 = vrot.lane.b32.xlu1 %v2158_v50, %s4321_s27  ;;  %v5253_v39 = vpop.permute.xlu1 %1643 }
 0xc64   : > { %8034 = vst [vmem:[#allocation181_spill] sm:$0xff] %v5253_v39 }
 0xc67   : > { %2189 = vrot.lane.b32.xlu1 %v2160_v63, %s4321_s27  ;;  %4187 = vset.pattern.permute.xlu0 %v4322_v29  ;;  %v5257_v63 = vpop.permute.xlu1 %1645 }
 0xc68   : > { %8035 = vst [vmem:[#allocation182_spill] sm:$0xff] %v5257_v63 }
 0xcc5   : > { %v5243_v40 = vpop.permute.xlu0 %2175 }
 0xcc6   : > { %8029 = vst [vmem:[#allocation176_spill] sm:$0xff] %v5243_v40 }
 0xcc9   : > { %v5245_v58 = vpop.permute.xlu0 %2179 }
 0xcca   : > { %8030 = vst [vmem:[#allocation177_spill] sm:$0xff] %v5245_v58 }
 0xccd   : > { %v5247_v0 = vpop.permute.xlu0 %2183 }
 0xcce   : > { %8031 = vst [vmem:[#allocation178_spill] sm:$0xff] %v5247_v0  ;;  %v5320_v0 = vld [vmem:[%s4428_s21 + $0x50] sm:$0xff] }
 0xcd1   : > { %v5251_v2 = vpop.permute.xlu0 %2187 }
 0xcd2   : > { %8033 = vst [vmem:[#allocation180_spill] sm:$0xff] %v5251_v2  ;;  %v5263_v2 = vpop.permute.xlu1 %1649 }
 0xcd3   : > { %8036 = vst [vmem:[#allocation183_spill] sm:$0xff] %v5263_v2  ;;  %v5308_v2 = vld [vmem:[%s4428_s21 + $0x30] sm:$0xff] }
 0xce2   : > { %v2223_v50 = vpop.permute.xlu0 %2222 }
 0xce3   : > { %v2227_v11 = vmul.f32 %v2223_v50, %v4836_v16  ;;  %v2225_v49 = vmul.f32 %v2223_v50, %v4826_v15  ;;  %v2229_v29 = vmul.f32 %v2223_v50, %v4844_v12  ;;  %v2226_v58 = vmul.f32 %v2223_v50, %v4813_v24  ;;  %v5267_v12 = vpop.permute.xlu1 %1653 }
 0xce4   : > { %v2231_v40 = vmul.f32 %v2223_v50, %v4851_v27  ;;  %v2228_v39 = vmul.f32 %v2223_v50, %v4823_v1  ;;  %v2233_v16 = vmul.f32 %v2223_v50, %v4857_v28  ;;  %v2230_v15 = vmul.f32 %v2223_v50, %v4833_v31  ;;  %8037 = vst [vmem:[#allocation184_spill] sm:$0xff] %v5267_v12 }
 0xce5   : > { %2249 = vrot.lane.b32.xlu0 %v2227_v11, %s4323_s28  ;;  %2245 = vrot.lane.b32.xlu1 %v2225_v49, %s4323_s28  ;;  %v2232_v24 = vmul.f32 %v2223_v50, %v4841_v61  ;;  %v2234_v27 = vmul.f32 %v2223_v50, %v5082_v38  ;;  %v4324_v28 = vmov 29   ;;  %v5288_v50 = vld [vmem:[%s4428_s21 + $0x18] sm:$0xff] }
 0xce7   : > { %v5272_v1 = vpop.permute.xlu1 %1657 }
 0xce8   : > { %8038 = vst [vmem:[#allocation185_spill] sm:$0xff] %v5272_v1 }
 0xce9   : > { %2253 = vrot.lane.b32.xlu0 %v2229_v29, %s4323_s28  ;;  %2247 = vrot.lane.b32.xlu1 %v2226_v58, %s4323_s28 }
 0xceb   : > { %v5280_v49 = vpop.permute.xlu1 %1661 }
 0xcec   : > { %8042 = vst [vmem:[#allocation189_spill] sm:$0xff] %v5280_v49  ;;  %v5326_v49 = vld [vmem:[%s4428_s21 + $0x60] sm:$0xff] }
 0xced   : > { %2257 = vrot.lane.b32.xlu0 %v2231_v40, %s4323_s28  ;;  %2251 = vrot.lane.b32.xlu1 %v2228_v39, %s4323_s28  ;;  %v5285_v40 = vld [vmem:[%s4428_s21 + $0x28] sm:$0xff] }
 0xcef   : > { %v5290_v11 = vpop.permute.xlu1 %1717 }
 0xcf0   : > { %8044 = vst [vmem:[#allocation191_spill] sm:$0xff] %v5290_v11 }
 0xcf1   : > { %2261 = vrot.lane.b32.xlu0 %v2233_v16, %s4323_s28  ;;  %2255 = vrot.lane.b32.xlu1 %v2230_v15, %s4323_s28 }
 0xcf5   : > { %2306 = vperm.xlu0 %4187, %v4924_v33   ;;  %2259 = vrot.lane.b32.xlu1 %v2232_v24, %s4323_s28  ;;  %v5295_v24 = vld [vmem:[%s4428_s21 + $0x38] sm:$0xff] }
 0xcf9   : > { %2263 = vrot.lane.b32.xlu1 %v2234_v27, %s4323_s28  ;;  %4188 = vset.pattern.permute.xlu0 %v4324_v28  ;;  %v5298_v27 = vld [vmem:[%s4428_s21 + $0x20] sm:$0xff]  ;;  %v5300_v28 = vpop.permute.xlu1 %1719 }
 0xcfa   : > { %8045 = vst [vmem:[#allocation192_spill] sm:$0xff] %v5300_v28 }
 0xd57   : > { %v5274_v31 = vpop.permute.xlu0 %2249 }
 0xd58   : > { %8039 = vst [vmem:[#allocation186_spill] sm:$0xff] %v5274_v31  ;;  %v5305_v31 = vld [vmem:[%s4428_s21 + $0x48] sm:$0xff] }
 0xd5b   : > { %v5276_v58 = vpop.permute.xlu0 %2253 }
 0xd5c   : > { %8040 = vst [vmem:[#allocation187_spill] sm:$0xff] %v5276_v58 }
 0xd5f   : > { %v5278_v39 = vpop.permute.xlu0 %2257 }
 0xd60   : > { %8041 = vst [vmem:[#allocation188_spill] sm:$0xff] %v5278_v39 }
 0xd63   : > { %v5282_v61 = vpop.permute.xlu0 %2261 }
 0xd64   : > { %8043 = vst [vmem:[#allocation190_spill] sm:$0xff] %v5282_v61 }
 0xd74   : > { %v2307_v29 = vpop.permute.xlu0 %2306 }
 0xd75   : > { %v2311_v16 = vmul.f32 %v2307_v29, %v5285_v40  ;;  %v2309_v15 = vmul.f32 %v2307_v29, %v5288_v50  ;;  %v2313_v58 = vmul.f32 %v2307_v29, %v5295_v24  ;;  %v2310_v11 = vmul.f32 %v2307_v29, %v5298_v27 }
 0xd76   : > { %v2315_v63 = vmul.f32 %v2307_v29, %v5305_v31  ;;  %v2312_v61 = vmul.f32 %v2307_v29, %v5308_v2  ;;  %v2317_v28 = vmul.f32 %v2307_v29, %v5082_v38 }
 0xd77   : > { %2333 = vrot.lane.b32.xlu0 %v2311_v16, %s4325_s29  ;;  %2329 = vrot.lane.b32.xlu1 %v2309_v15, %s4325_s29  ;;  %v5313_v16 = vld [vmem:[%s4428_s21 + $0x40] sm:$0xff]  ;;  %v5315_v15 = vpop.permute.xlu1 %1723 }
 0xd78   : > { %8046 = vst [vmem:[#allocation193_spill] sm:$0xff] %v5315_v15  ;;  %v2314_v39 = vmul.f32 %v2307_v29, %v5313_v16  ;;  %v4326_v15 = vmov 30  }
 0xd7b   : > { %2337 = vrot.lane.b32.xlu0 %v2313_v58, %s4325_s29  ;;  %2331 = vrot.lane.b32.xlu1 %v2310_v11, %s4325_s29  ;;  %v5322_v58 = vpop.permute.xlu1 %1727  ;;  %v2316_v11 = vmul.f32 %v2307_v29, %v5320_v0 }
 0xd7c   : > { %8047 = vst [vmem:[#allocation194_spill] sm:$0xff] %v5322_v58 }
 0xd7f   : > { %2341 = vrot.lane.b32.xlu0 %v2315_v63, %s4325_s29  ;;  %2335 = vrot.lane.b32.xlu1 %v2312_v61, %s4325_s29  ;;  %v2318_v63 = vmul.f32 %v2307_v29, %v5326_v49  ;;  %v5330_v61 = vpop.permute.xlu1 %1731 }
 0xd80   : > { %8048 = vst [vmem:[#allocation195_spill] sm:$0xff] %v5330_v61 }
 0xd83   : > { %2345 = vrot.lane.b32.xlu0 %v2317_v28, %s4325_s29  ;;  %2339 = vrot.lane.b32.xlu1 %v2314_v39, %s4325_s29  ;;  %v5338_v58 = vpop.permute.xlu1 %1735 }
 0xd84   : > { %8052 = vst [vmem:[#allocation199_spill] sm:$0xff] %v5338_v58 }
 0xd87   : > { %2380 = vperm.xlu0 %4188, %v4924_v33   ;;  %2343 = vrot.lane.b32.xlu1 %v2316_v11, %s4325_s29  ;;  %v5342_v45 = vpop.permute.xlu1 %1801 }
 0xd88   : > { %8054 = vst [vmem:[#allocation201_spill] sm:$0xff] %v5342_v45 }
 0xd8b   : > { %2347 = vrot.lane.b32.xlu1 %v2318_v63, %s4325_s29  ;;  %4189 = vset.pattern.permute.xlu0 %v4326_v15  ;;  %v5346_v15 = vpop.permute.xlu1 %1803  ;;  %s4360_s29 = smov 22  }
 0xd8c   : > { %8055 = vst [vmem:[#allocation202_spill] sm:$0xff] %v5346_v15 }
 0xde9   : > { %v5332_v1 = vpop.permute.xlu0 %2333 }
 0xdea   : > { %8049 = vst [vmem:[#allocation196_spill] sm:$0xff] %v5332_v1 }
 0xded   : > { %v5334_v28 = vpop.permute.xlu0 %2337 }
 0xdee   : > { %8050 = vst [vmem:[#allocation197_spill] sm:$0xff] %v5334_v28 }
 0xdf1   : > { %v5336_v39 = vpop.permute.xlu0 %2341 }
 0xdf2   : > { %8051 = vst [vmem:[#allocation198_spill] sm:$0xff] %v5336_v39 }
 0xdf5   : > { %v5340_v12 = vpop.permute.xlu0 %2345 }
 0xdf6   : > { %8053 = vst [vmem:[#allocation200_spill] sm:$0xff] %v5340_v12  ;;  %v5352_v12 = vpop.permute.xlu1 %1807 }
 0xdf7   : > { %8056 = vst [vmem:[#allocation203_spill] sm:$0xff] %v5352_v12 }
 0xe06   : > { %v2381_v11 = vpop.permute.xlu0 %2380 }
 0xe07   : > { %v2385_v29 = vmul.f32 %v2381_v11, %v5285_v40  ;;  %v2383_v61 = vmul.f32 %v2381_v11, %v5288_v50  ;;  %v2387_v63 = vmul.f32 %v2381_v11, %v5295_v24  ;;  %v2384_v28 = vmul.f32 %v2381_v11, %v5298_v27 }
 0xe08   : > { %v2389_v1 = vmul.f32 %v2381_v11, %v5305_v31  ;;  %v2386_v45 = vmul.f32 %v2381_v11, %v5308_v2  ;;  %v2391_v39 = vmul.f32 %v2381_v11, %v5082_v38  ;;  %v2390_v15 = vmul.f32 %v2381_v11, %v5320_v0 }
 0xe09   : > { %2407 = vrot.lane.b32.xlu0 %v2385_v29, %s4327_s30  ;;  %2403 = vrot.lane.b32.xlu1 %v2383_v61, %s4327_s30  ;;  %v2388_v61 = vmul.f32 %v2381_v11, %v5313_v16  ;;  %v5356_v29 = vpop.permute.xlu1 %1811 }
 0xe0a   : > { %8057 = vst [vmem:[#allocation204_spill] sm:$0xff] %v5356_v29 }
 0xe0d   : > { %2411 = vrot.lane.b32.xlu0 %v2387_v63, %s4327_s30  ;;  %2405 = vrot.lane.b32.xlu1 %v2384_v28, %s4327_s30  ;;  %v2392_v28 = vmul.f32 %v2381_v11, %v5326_v49  ;;  %v5361_v63 = vpop.permute.xlu1 %1815 }
 0xe0e   : > { %8058 = vst [vmem:[#allocation205_spill] sm:$0xff] %v5361_v63 }
 0xe11   : > { %2415 = vrot.lane.b32.xlu0 %v2389_v1, %s4327_s30  ;;  %2409 = vrot.lane.b32.xlu1 %v2386_v45, %s4327_s30  ;;  %v4328_v1 = vmov 31  }
 0xe15   : > { %2419 = vrot.lane.b32.xlu0 %v2391_v39, %s4327_s30  ;;  %2413 = vrot.lane.b32.xlu1 %v2388_v61, %s4327_s30  ;;  %v5369_v61 = vpop.permute.xlu1 %1819 }
 0xe16   : > { %8062 = vst [vmem:[#allocation209_spill] sm:$0xff] %v5369_v61 }
 0xe19   : > { %2454 = vperm.xlu0 %4189, %v4924_v33   ;;  %2417 = vrot.lane.b32.xlu1 %v2390_v15, %s4327_s30  ;;  %v5373_v58 = vpop.permute.xlu1 %1875 }
 0xe1a   : > { %8064 = vst [vmem:[#allocation211_spill] sm:$0xff] %v5373_v58 }
 0xe1d   : > { %2421 = vrot.lane.b32.xlu1 %v2392_v28, %s4327_s30  ;;  %4190 = vset.pattern.permute.xlu0 %v4328_v1  ;;  %v5377_v28 = vpop.permute.xlu1 %1877  ;;  %s4361_s30 = smov 19  }
 0xe1e   : > { %8065 = vst [vmem:[#allocation212_spill] sm:$0xff] %v5377_v28 }
 0xe7b   : > { %v5363_v45 = vpop.permute.xlu0 %2407 }
 0xe7c   : > { %8059 = vst [vmem:[#allocation206_spill] sm:$0xff] %v5363_v45 }
 0xe7f   : > { %v5365_v12 = vpop.permute.xlu0 %2411 }
 0xe80   : > { %8060 = vst [vmem:[#allocation207_spill] sm:$0xff] %v5365_v12 }
 0xe83   : > { %v5367_v39 = vpop.permute.xlu0 %2415 }
 0xe84   : > { %8061 = vst [vmem:[#allocation208_spill] sm:$0xff] %v5367_v39 }
 0xe87   : > { %v5371_v29 = vpop.permute.xlu0 %2419 }
 0xe88   : > { %8063 = vst [vmem:[#allocation210_spill] sm:$0xff] %v5371_v29  ;;  %v5383_v29 = vpop.permute.xlu1 %1881 }
 0xe89   : > { %8066 = vst [vmem:[#allocation213_spill] sm:$0xff] %v5383_v29 }
 0xe98   : > { %v2455_v15 = vpop.permute.xlu0 %2454 }
 0xe99   : > { %v2459_v11 = vmul.f32 %v2455_v15, %v5285_v40  ;;  %v2457_v63 = vmul.f32 %v2455_v15, %v5288_v50  ;;  %v2461_v1 = vmul.f32 %v2455_v15, %v5295_v24  ;;  %v2458_v12 = vmul.f32 %v2455_v15, %v5298_v27 }
 0xe9a   : > { %v2463_v45 = vmul.f32 %v2455_v15, %v5305_v31  ;;  %v2460_v58 = vmul.f32 %v2455_v15, %v5308_v2  ;;  %v2465_v39 = vmul.f32 %v2455_v15, %v5082_v38  ;;  %v2464_v28 = vmul.f32 %v2455_v15, %v5320_v0 }
 0xe9b   : > { %2481 = vrot.lane.b32.xlu0 %v2459_v11, %s4329_s4  ;;  %2477 = vrot.lane.b32.xlu1 %v2457_v63, %s4329_s4  ;;  %v2462_v63 = vmul.f32 %v2455_v15, %v5313_v16  ;;  %v5387_v11 = vpop.permute.xlu1 %1885 }
 0xe9c   : > { %8067 = vst [vmem:[#allocation214_spill] sm:$0xff] %v5387_v11 }
 0xe9f   : > { %2485 = vrot.lane.b32.xlu0 %v2461_v1, %s4329_s4  ;;  %2479 = vrot.lane.b32.xlu1 %v2458_v12, %s4329_s4  ;;  %v2466_v12 = vmul.f32 %v2455_v15, %v5326_v49  ;;  %v5392_v1 = vpop.permute.xlu1 %1889 }
 0xea0   : > { %8068 = vst [vmem:[#allocation215_spill] sm:$0xff] %v5392_v1 }
 0xea3   : > { %2489 = vrot.lane.b32.xlu0 %v2463_v45, %s4329_s4  ;;  %2483 = vrot.lane.b32.xlu1 %v2460_v58, %s4329_s4  ;;  %v4330_v45 = vmov 32  }
 0xea7   : > { %2493 = vrot.lane.b32.xlu0 %v2465_v39, %s4329_s4  ;;  %2487 = vrot.lane.b32.xlu1 %v2462_v63, %s4329_s4  ;;  %v5400_v63 = vpop.permute.xlu1 %1893 }
 0xea8   : > { %8072 = vst [vmem:[#allocation219_spill] sm:$0xff] %v5400_v63 }
 0xeab   : > { %2528 = vperm.xlu0 %4190, %v4924_v33   ;;  %2491 = vrot.lane.b32.xlu1 %v2464_v28, %s4329_s4  ;;  %v5404_v61 = vpop.permute.xlu1 %1949 }
 0xeac   : > { %8074 = vst [vmem:[#allocation221_spill] sm:$0xff] %v5404_v61 }
 0xeaf   : > { %2495 = vrot.lane.b32.xlu1 %v2466_v12, %s4329_s4  ;;  %4191 = vset.pattern.permute.xlu0 %v4330_v45  ;;  %v5408_v12 = vpop.permute.xlu1 %1951  ;;  %s4362_s4 = smov 16  }
 0xeb0   : > { %8075 = vst [vmem:[#allocation222_spill] sm:$0xff] %v5408_v12 }
 0xf0d   : > { %v5394_v58 = vpop.permute.xlu0 %2481 }
 0xf0e   : > { %8069 = vst [vmem:[#allocation216_spill] sm:$0xff] %v5394_v58 }
 0xf11   : > { %v5396_v29 = vpop.permute.xlu0 %2485 }
 0xf12   : > { %8070 = vst [vmem:[#allocation217_spill] sm:$0xff] %v5396_v29 }
 0xf15   : > { %v5398_v39 = vpop.permute.xlu0 %2489 }
 0xf16   : > { %8071 = vst [vmem:[#allocation218_spill] sm:$0xff] %v5398_v39 }
 0xf19   : > { %v5402_v11 = vpop.permute.xlu0 %2493 }
 0xf1a   : > { %8073 = vst [vmem:[#allocation220_spill] sm:$0xff] %v5402_v11  ;;  %v5414_v11 = vpop.permute.xlu1 %1955 }
 0xf1b   : > { %8076 = vst [vmem:[#allocation223_spill] sm:$0xff] %v5414_v11 }
 0xf2a   : > { %v2529_v33 = vpop.permute.xlu0 %2528 }
 0xf2b   : > { %v2533_v15 = vmul.f32 %v2529_v33, %v5285_v40  ;;  %v2531_v28 = vmul.f32 %v2529_v33, %v5288_v50  ;;  %v2535_v45 = vmul.f32 %v2529_v33, %v5295_v24  ;;  %v2532_v29 = vmul.f32 %v2529_v33, %v5298_v27 }
 0xf2c   : > { %v2537_v58 = vmul.f32 %v2529_v33, %v5305_v31  ;;  %v2534_v61 = vmul.f32 %v2529_v33, %v5308_v2  ;;  %v2539_v39 = vmul.f32 %v2529_v33, %v5082_v38  ;;  %v2538_v12 = vmul.f32 %v2529_v33, %v5320_v0 }
 0xf2d   : > { %2555 = vrot.lane.b32.xlu0 %v2533_v15, %s4331_s5  ;;  %2551 = vrot.lane.b32.xlu1 %v2531_v28, %s4331_s5  ;;  %v2536_v15 = vmul.f32 %v2529_v33, %v5313_v16  ;;  %v5418_v28 = vpop.permute.xlu1 %1959 }
 0xf2e   : > { %8077 = vst [vmem:[#allocation224_spill] sm:$0xff] %v5418_v28 }
 0xf31   : > { %2559 = vrot.lane.b32.xlu0 %v2535_v45, %s4331_s5  ;;  %2553 = vrot.lane.b32.xlu1 %v2532_v29, %s4331_s5  ;;  %v5424_v29 = vld [vmem:[%s7499_s1] sm:$0xff]  ;;  %v4332_v45 = vmov 33  }
 0xf35   : > { %2563 = vrot.lane.b32.xlu0 %v2537_v58, %s4331_s5  ;;  %2557 = vrot.lane.b32.xlu1 %v2534_v61, %s4331_s5  ;;  %v2540_v61 = vmul.f32 %v2529_v33, %v5326_v49  ;;  %v5428_v58 = vpop.permute.xlu1 %1963 }
 0xf36   : > { %8078 = vst [vmem:[#allocation225_spill] sm:$0xff] %v5428_v58 }
 0xf39   : > { %2567 = vrot.lane.b32.xlu0 %v2539_v39, %s4331_s5  ;;  %2561 = vrot.lane.b32.xlu1 %v2536_v15, %s4331_s5  ;;  %v5436_v28 = vpop.permute.xlu1 %1967 }
 0xf3a   : > { %8082 = vst [vmem:[#allocation229_spill] sm:$0xff] %v5436_v28 }
 0xf3d   : > { %2602 = vperm.xlu0 %4191, %v5424_v29   ;;  %2565 = vrot.lane.b32.xlu1 %v2538_v12, %s4331_s5  ;;  %v5440_v1 = vpop.permute.xlu1 %2023 }
 0xf3e   : > { %8084 = vst [vmem:[#allocation231_spill] sm:$0xff] %v5440_v1 }
 0xf41   : > { %2569 = vrot.lane.b32.xlu1 %v2540_v61, %s4331_s5  ;;  %4192 = vset.pattern.permute.xlu0 %v4332_v45  ;;  %v5444_v61 = vpop.permute.xlu1 %2025 }
 0xf42   : > { %8085 = vst [vmem:[#allocation232_spill] sm:$0xff] %v5444_v61 }
 0xf9f   : > { %v5430_v39 = vpop.permute.xlu0 %2555 }
 0xfa0   : > { %8079 = vst [vmem:[#allocation226_spill] sm:$0xff] %v5430_v39 }
 0xfa3   : > { %v5432_v15 = vpop.permute.xlu0 %2559 }
 0xfa4   : > { %8080 = vst [vmem:[#allocation227_spill] sm:$0xff] %v5432_v15 }
 0xfa7   : > { %v5434_v11 = vpop.permute.xlu0 %2563 }
 0xfa8   : > { %8081 = vst [vmem:[#allocation228_spill] sm:$0xff] %v5434_v11 }
 0xfab   : > { %v5438_v63 = vpop.permute.xlu0 %2567 }
 0xfac   : > { %8083 = vst [vmem:[#allocation230_spill] sm:$0xff] %v5438_v63  ;;  %v5450_v63 = vpop.permute.xlu1 %2029 }
 0xfad   : > { %8086 = vst [vmem:[#allocation233_spill] sm:$0xff] %v5450_v63 }
 0xfbc   : > { %v2603_v12 = vpop.permute.xlu0 %2602 }
 0xfbd   : > { %v2607_v33 = vmul.f32 %v2603_v12, %v5285_v40  ;;  %v2605_v58 = vmul.f32 %v2603_v12, %v5288_v50  ;;  %v2609_v45 = vmul.f32 %v2603_v12, %v5295_v24  ;;  %v2606_v15 = vmul.f32 %v2603_v12, %v5298_v27 }
 0xfbe   : > { %v2611_v39 = vmul.f32 %v2603_v12, %v5305_v31  ;;  %v2608_v1 = vmul.f32 %v2603_v12, %v5308_v2  ;;  %v2613_v11 = vmul.f32 %v2603_v12, %v5082_v38  ;;  %v2612_v61 = vmul.f32 %v2603_v12, %v5320_v0 }
 0xfbf   : > { %2629 = vrot.lane.b32.xlu0 %v2607_v33, %s4333_s8  ;;  %2625 = vrot.lane.b32.xlu1 %v2605_v58, %s4333_s8  ;;  %v2610_v58 = vmul.f32 %v2603_v12, %v5313_v16  ;;  %v5454_v33 = vpop.permute.xlu1 %2033 }
 0xfc0   : > { %8087 = vst [vmem:[#allocation234_spill] sm:$0xff] %v5454_v33 }
 0xfc3   : > { %2633 = vrot.lane.b32.xlu0 %v2609_v45, %s4333_s8  ;;  %2627 = vrot.lane.b32.xlu1 %v2606_v15, %s4333_s8  ;;  %v2614_v15 = vmul.f32 %v2603_v12, %v5326_v49  ;;  %v5459_v45 = vpop.permute.xlu1 %2037 }
 0xfc4   : > { %8088 = vst [vmem:[#allocation235_spill] sm:$0xff] %v5459_v45 }
 0xfc7   : > { %2637 = vrot.lane.b32.xlu0 %v2611_v39, %s4333_s8  ;;  %2631 = vrot.lane.b32.xlu1 %v2608_v1, %s4333_s8  ;;  %v4334_v39 = vmov 34  }
 0xfcb   : > { %2641 = vrot.lane.b32.xlu0 %v2613_v11, %s4333_s8  ;;  %2635 = vrot.lane.b32.xlu1 %v2610_v58, %s4333_s8  ;;  %v5467_v58 = vpop.permute.xlu1 %2041 }
 0xfcc   : > { %8092 = vst [vmem:[#allocation239_spill] sm:$0xff] %v5467_v58 }
 0xfcf   : > { %2676 = vperm.xlu0 %4192, %v5424_v29   ;;  %2639 = vrot.lane.b32.xlu1 %v2612_v61, %s4333_s8  ;;  %v5471_v28 = vpop.permute.xlu1 %2097 }
 0xfd0   : > { %8094 = vst [vmem:[#allocation241_spill] sm:$0xff] %v5471_v28 }
 0xfd3   : > { %2643 = vrot.lane.b32.xlu1 %v2614_v15, %s4333_s8  ;;  %4193 = vset.pattern.permute.xlu0 %v4334_v39  ;;  %v5475_v15 = vpop.permute.xlu1 %2099  ;;  %s4364_s8 = smov 10  }
 0xfd4   : > { %8095 = vst [vmem:[#allocation242_spill] sm:$0xff] %v5475_v15 }
0x1031   : > { %v5461_v1 = vpop.permute.xlu0 %2629 }
0x1032   : > { %8089 = vst [vmem:[#allocation236_spill] sm:$0xff] %v5461_v1 }
0x1035   : > { %v5463_v63 = vpop.permute.xlu0 %2633 }
0x1036   : > { %8090 = vst [vmem:[#allocation237_spill] sm:$0xff] %v5463_v63 }
0x1039   : > { %v5465_v11 = vpop.permute.xlu0 %2637 }
0x103a   : > { %8091 = vst [vmem:[#allocation238_spill] sm:$0xff] %v5465_v11 }
0x103d   : > { %v5469_v33 = vpop.permute.xlu0 %2641 }
0x103e   : > { %8093 = vst [vmem:[#allocation240_spill] sm:$0xff] %v5469_v33  ;;  %v5481_v33 = vpop.permute.xlu1 %2103 }
0x103f   : > { %8096 = vst [vmem:[#allocation243_spill] sm:$0xff] %v5481_v33 }
0x104e   : > { %v2677_v61 = vpop.permute.xlu0 %2676 }
0x104f   : > { %v2681_v12 = vmul.f32 %v2677_v61, %v5285_v40  ;;  %v2679_v45 = vmul.f32 %v2677_v61, %v5288_v50  ;;  %v2683_v39 = vmul.f32 %v2677_v61, %v5295_v24  ;;  %v2680_v63 = vmul.f32 %v2677_v61, %v5298_v27 }
0x1050   : > { %v2685_v1 = vmul.f32 %v2677_v61, %v5305_v31  ;;  %v2682_v28 = vmul.f32 %v2677_v61, %v5308_v2  ;;  %v2687_v11 = vmul.f32 %v2677_v61, %v5082_v38  ;;  %v2686_v15 = vmul.f32 %v2677_v61, %v5320_v0 }
0x1051   : > { %2703 = vrot.lane.b32.xlu0 %v2681_v12, %s4335_s9  ;;  %2699 = vrot.lane.b32.xlu1 %v2679_v45, %s4335_s9  ;;  %v2684_v45 = vmul.f32 %v2677_v61, %v5313_v16  ;;  %v5485_v12 = vpop.permute.xlu1 %2107 }
0x1052   : > { %8097 = vst [vmem:[#allocation244_spill] sm:$0xff] %v5485_v12 }
0x1055   : > { %2707 = vrot.lane.b32.xlu0 %v2683_v39, %s4335_s9  ;;  %2701 = vrot.lane.b32.xlu1 %v2680_v63, %s4335_s9  ;;  %v2688_v63 = vmul.f32 %v2677_v61, %v5326_v49  ;;  %v5490_v39 = vpop.permute.xlu1 %2111 }
0x1056   : > { %8098 = vst [vmem:[#allocation245_spill] sm:$0xff] %v5490_v39 }
0x1059   : > { %2711 = vrot.lane.b32.xlu0 %v2685_v1, %s4335_s9  ;;  %2705 = vrot.lane.b32.xlu1 %v2682_v28, %s4335_s9  ;;  %v4336_v1 = vmov 35   ;;  %v5492_v28 = vpop.permute.xlu1 %2115 }
0x105a   : > { %8099 = vst [vmem:[#allocation246_spill] sm:$0xff] %v5492_v28 }
0x105d   : > { %2715 = vrot.lane.b32.xlu0 %v2687_v11, %s4335_s9  ;;  %2709 = vrot.lane.b32.xlu1 %v2684_v45, %s4335_s9  ;;  %v5494_v33 = vpop.permute.xlu1 %2171 }
0x105e   : > { %8100 = vst [vmem:[#allocation247_spill] sm:$0xff] %v5494_v33 }
0x1061   : > { %2750 = vperm.xlu0 %4193, %v5424_v29   ;;  %2713 = vrot.lane.b32.xlu1 %v2686_v15, %s4335_s9  ;;  %v5496_v11 = vpop.permute.xlu1 %2173 }
0x1062   : > { %8101 = vst [vmem:[#allocation248_spill] sm:$0xff] %v5496_v11 }
0x1065   : > { %2717 = vrot.lane.b32.xlu1 %v2688_v63, %s4335_s9  ;;  %4194 = vset.pattern.permute.xlu0 %v4336_v1  ;;  %v5498_v45 = vpop.permute.xlu1 %2177 }
0x1066   : > { %8102 = vst [vmem:[#allocation249_spill] sm:$0xff] %v5498_v45 }
0x1069   : > { %v5500_v12 = vpop.permute.xlu1 %2181 }
0x106a   : > { %8103 = vst [vmem:[#allocation250_spill] sm:$0xff] %v5500_v12 }
0x106d   : > { %v5504_v15 = vpop.permute.xlu1 %2185 }
0x106e   : > { %8105 = vst [vmem:[#allocation252_spill] sm:$0xff] %v5504_v15 }
0x1071   : > { %v5508_v39 = vpop.permute.xlu1 %2189 }
0x1072   : > { %8107 = vst [vmem:[#allocation254_spill] sm:$0xff] %v5508_v39 }
0x1075   : > { %v5512_v1 = vpop.permute.xlu1 %2245 }
0x1076   : > { %8109 = vst [vmem:[#allocation256_spill] sm:$0xff] %v5512_v1 }
0x1079   : > { %v5516_v33 = vpop.permute.xlu1 %2247 }
0x107a   : > { %8111 = vst [vmem:[#allocation258_spill] sm:$0xff] %v5516_v33 }
0x107d   : > { %v5522_v39 = vpop.permute.xlu1 %2251 }
0x107e   : > { %8112 = vst [vmem:[#allocation259_spill] sm:$0xff] %v5522_v39 }
0x10c3   : > { %v5502_v58 = vpop.permute.xlu0 %2703 }
0x10c4   : > { %8104 = vst [vmem:[#allocation251_spill] sm:$0xff] %v5502_v58 }
0x10c7   : > { %v5506_v61 = vpop.permute.xlu0 %2707 }
0x10c8   : > { %8106 = vst [vmem:[#allocation253_spill] sm:$0xff] %v5506_v61 }
0x10cb   : > { %v5510_v63 = vpop.permute.xlu0 %2711 }
0x10cc   : > { %8108 = vst [vmem:[#allocation255_spill] sm:$0xff] %v5510_v63 }
0x10cf   : > { %v5514_v28 = vpop.permute.xlu0 %2715 }
0x10d0   : > { %8110 = vst [vmem:[#allocation257_spill] sm:$0xff] %v5514_v28  ;;  %v5526_v28 = vpop.permute.xlu1 %2255 }
0x10d1   : > { %8113 = vst [vmem:[#allocation260_spill] sm:$0xff] %v5526_v28 }
0x10d4   : > { %v5531_v15 = vpop.permute.xlu1 %2259 }
0x10d5   : > { %8114 = vst [vmem:[#allocation261_spill] sm:$0xff] %v5531_v15 }
0x10e0   : > { %v2751_v11 = vpop.permute.xlu0 %2750 }
0x10e1   : > { %v2755_v45 = vmul.f32 %v2751_v11, %v5285_v40  ;;  %v2753_v12 = vmul.f32 %v2751_v11, %v5288_v50  ;;  %v2757_v61 = vmul.f32 %v2751_v11, %v5295_v24  ;;  %v2754_v58 = vmul.f32 %v2751_v11, %v5298_v27 }
0x10e2   : > { %v2759_v1 = vmul.f32 %v2751_v11, %v5305_v31  ;;  %v2756_v33 = vmul.f32 %v2751_v11, %v5308_v2  ;;  %v2761_v63 = vmul.f32 %v2751_v11, %v5082_v38 }
0x10e3   : > { %2777 = vrot.lane.b32.xlu0 %v2755_v45, %s4337_s10  ;;  %2773 = vrot.lane.b32.xlu1 %v2753_v12, %s4337_s10  ;;  %v2758_v12 = vmul.f32 %v2751_v11, %v5313_v16  ;;  %v2760_v45 = vmul.f32 %v2751_v11, %v5320_v0 }
0x10e7   : > { %2781 = vrot.lane.b32.xlu0 %v2757_v61, %s4337_s10  ;;  %2775 = vrot.lane.b32.xlu1 %v2754_v58, %s4337_s10  ;;  %v2762_v58 = vmul.f32 %v2751_v11, %v5326_v49  ;;  %v5535_v61 = vpop.permute.xlu1 %2263 }
0x10e8   : > { %8115 = vst [vmem:[#allocation262_spill] sm:$0xff] %v5535_v61 }
0x10eb   : > { %2785 = vrot.lane.b32.xlu0 %v2759_v1, %s4337_s10  ;;  %2779 = vrot.lane.b32.xlu1 %v2756_v33, %s4337_s10  ;;  %v5537_v33 = vpop.permute.xlu1 %2329 }
0x10ec   : > { %8116 = vst [vmem:[#allocation263_spill] sm:$0xff] %v5537_v33 }
0x10ef   : > { %2789 = vrot.lane.b32.xlu0 %v2761_v63, %s4337_s10  ;;  %2783 = vrot.lane.b32.xlu1 %v2758_v12, %s4337_s10  ;;  %v5539_v1 = vpop.permute.xlu1 %2331  ;;  %v4338_v63 = vmov 36  }
0x10f0   : > { %8117 = vst [vmem:[#allocation264_spill] sm:$0xff] %v5539_v1  ;;  %4195 = vset.pattern.permute.xlu1 %v4338_v63 }
0x10f3   : > { %2835 = vperm.xlu0 %4194, %v5424_v29   ;;  %2787 = vrot.lane.b32.xlu1 %v2760_v45, %s4337_s10  ;;  %v5541_v38 = vpop.permute.xlu1 %2335 }
0x10f4   : > { %8118 = vst [vmem:[#allocation265_spill] sm:$0xff] %v5541_v38 }
0x10f7   : > { %2791 = vrot.lane.b32.xlu1 %v2762_v58, %s4337_s10  ;;  %v5543_v12 = vpop.permute.xlu1 %2339 }
0x10f8   : > { %8119 = vst [vmem:[#allocation266_spill] sm:$0xff] %v5543_v12 }
0x10fb   : > { %v5545_v39 = vpop.permute.xlu1 %2343 }
0x10fc   : > { %8120 = vst [vmem:[#allocation267_spill] sm:$0xff] %v5545_v39 }
0x10ff   : > { %v5547_v15 = vpop.permute.xlu1 %2347 }
0x1100   : > { %8121 = vst [vmem:[#allocation268_spill] sm:$0xff] %v5547_v15 }
0x1103   : > { %v5549_v45 = vpop.permute.xlu1 %2403 }
0x1104   : > { %8122 = vst [vmem:[#allocation269_spill] sm:$0xff] %v5549_v45 }
0x1107   : > { %v5551_v11 = vpop.permute.xlu1 %2405 }
0x1108   : > { %8123 = vst [vmem:[#allocation270_spill] sm:$0xff] %v5551_v11 }
0x110b   : > { %v5553_v58 = vpop.permute.xlu1 %2409 }
0x110c   : > { %8124 = vst [vmem:[#allocation271_spill] sm:$0xff] %v5553_v58 }
0x110f   : > { %v5555_v61 = vpop.permute.xlu1 %2413 }
0x1110   : > { %8125 = vst [vmem:[#allocation272_spill] sm:$0xff] %v5555_v61 }
0x1113   : > { %v5557_v33 = vpop.permute.xlu1 %2417 }
0x1114   : > { %8126 = vst [vmem:[#allocation273_spill] sm:$0xff] %v5557_v33 }
0x1117   : > { %v5559_v1 = vpop.permute.xlu1 %2421 }
0x1118   : > { %8127 = vst [vmem:[#allocation274_spill] sm:$0xff] %v5559_v1 }
0x111b   : > { %v5561_v38 = vpop.permute.xlu1 %2477 }
0x111c   : > { %8128 = vst [vmem:[#allocation275_spill] sm:$0xff] %v5561_v38 }
0x111f   : > { %v5563_v63 = vpop.permute.xlu1 %2479 }
0x1120   : > { %8129 = vst [vmem:[#allocation276_spill] sm:$0xff] %v5563_v63 }
0x1123   : > { %v5565_v12 = vpop.permute.xlu1 %2483 }
0x1124   : > { %8130 = vst [vmem:[#allocation277_spill] sm:$0xff] %v5565_v12 }
0x1127   : > { %v5567_v39 = vpop.permute.xlu1 %2487 }
0x1128   : > { %8131 = vst [vmem:[#allocation278_spill] sm:$0xff] %v5567_v39 }
0x112b   : > { %v5569_v15 = vpop.permute.xlu1 %2491 }
0x112c   : > { %8132 = vst [vmem:[#allocation279_spill] sm:$0xff] %v5569_v15 }
0x112f   : > { %v5573_v11 = vpop.permute.xlu1 %2495 }
0x1130   : > { %8134 = vst [vmem:[#allocation281_spill] sm:$0xff] %v5573_v11  ;;  %v5605_v11 = vld [vmem:[%s4428_s21 + $0x68] sm:$0xff] }
0x1133   : > { %v5575_v58 = vpop.permute.xlu1 %2551 }
0x1134   : > { %8135 = vst [vmem:[#allocation282_spill] sm:$0xff] %v5575_v58 }
0x1137   : > { %v5579_v33 = vpop.permute.xlu1 %2553 }
0x1138   : > { %8137 = vst [vmem:[#allocation284_spill] sm:$0xff] %v5579_v33 }
0x113b   : > { %v5583_v38 = vpop.permute.xlu1 %2557 }
0x113c   : > { %8139 = vst [vmem:[#allocation286_spill] sm:$0xff] %v5583_v38 }
0x113f   : > { %v5589_v39 = vpop.permute.xlu1 %2561 }
0x1140   : > { %8141 = vst [vmem:[#allocation288_spill] sm:$0xff] %v5589_v39 }
0x1143   : > { %v5593_v38 = vpop.permute.xlu1 %2565 }
0x1144   : > { %8142 = vst [vmem:[#allocation289_spill] sm:$0xff] %v5593_v38 }
0x1155   : > { %v5571_v45 = vpop.permute.xlu0 %2777 }
0x1156   : > { %8133 = vst [vmem:[#allocation280_spill] sm:$0xff] %v5571_v45 }
0x1159   : > { %v5577_v61 = vpop.permute.xlu0 %2781 }
0x115a   : > { %8136 = vst [vmem:[#allocation283_spill] sm:$0xff] %v5577_v61 }
0x115d   : > { %v5581_v1 = vpop.permute.xlu0 %2785 }
0x115e   : > { %8138 = vst [vmem:[#allocation285_spill] sm:$0xff] %v5581_v1  ;;  %v5598_v1 = vld [vmem:[%s4428_s21 + $0x58] sm:$0xff] }
0x1161   : > { %v5585_v12 = vpop.permute.xlu0 %2789 }
0x1162   : > { %8140 = vst [vmem:[#allocation287_spill] sm:$0xff] %v5585_v12 }
0x1172   : > { %v2836_v63 = vpop.permute.xlu0 %2835 }
0x1173   : > { %v2840_v15 = vmul.f32 %v2836_v63, %v5285_v40  ;;  %v2838_v45 = vmul.f32 %v2836_v63, %v5288_v50  ;;  %v2842_v58 = vmul.f32 %v2836_v63, %v5295_v24  ;;  %v2839_v61 = vmul.f32 %v2836_v63, %v5298_v27 }
0x1174   : > { %v2844_v33 = vmul.f32 %v2836_v63, %v5305_v31  ;;  %v2841_v12 = vmul.f32 %v2836_v63, %v5308_v2  ;;  %v2846_v50 = vmul.f32 %v2836_v63, %v5598_v1 }
0x1175   : > { %2864 = vrot.lane.b32.xlu0 %v2840_v15, %s4339_s11  ;;  %2860 = vrot.lane.b32.xlu1 %v2838_v45, %s4339_s11  ;;  %v2843_v15 = vmul.f32 %v2836_v63, %v5313_v16  ;;  %v5602_v45 = vpop.permute.xlu1 %2569 }
0x1176   : > { %8143 = vst [vmem:[#allocation290_spill] sm:$0xff] %v5602_v45 }
0x1179   : > { %2868 = vrot.lane.b32.xlu0 %v2842_v58, %s4339_s11  ;;  %2862 = vrot.lane.b32.xlu1 %v2839_v61, %s4339_s11  ;;  %v2848_v61 = vmul.f32 %v2836_v63, %v5605_v11  ;;  %v2845_v58 = vmul.f32 %v2836_v63, %v5320_v0  ;;  %v5609_v38 = vpop.permute.xlu1 %2625 }
0x117a   : > { %8144 = vst [vmem:[#allocation291_spill] sm:$0xff] %v5609_v38 }
0x117d   : > { %2872 = vrot.lane.b32.xlu0 %v2844_v33, %s4339_s11  ;;  %2866 = vrot.lane.b32.xlu1 %v2841_v12, %s4339_s11  ;;  %v2847_v33 = vmul.f32 %v2836_v63, %v5326_v49  ;;  %v5612_v12 = vpop.permute.xlu1 %2627 }
0x117e   : > { %8145 = vst [vmem:[#allocation292_spill] sm:$0xff] %v5612_v12 }
0x1181   : > { %2876 = vrot.lane.b32.xlu0 %v2846_v50, %s4339_s11  ;;  %2870 = vrot.lane.b32.xlu1 %v2843_v15, %s4339_s11  ;;  %v5615_v45 = vpop.permute.xlu1 %2631  ;;  %v4340_v15 = vmov 37  }
0x1182   : > { %8146 = vst [vmem:[#allocation293_spill] sm:$0xff] %v5615_v45  ;;  %4196 = vset.pattern.permute.xlu0 %v4340_v15 }
0x1185   : > { %2880 = vrot.lane.b32.xlu0 %v2848_v61, %s4339_s11  ;;  %2874 = vrot.lane.b32.xlu1 %v2845_v58, %s4339_s11  ;;  %v5617_v39 = vpop.permute.xlu1 %2635 }
0x1186   : > { %8147 = vst [vmem:[#allocation294_spill] sm:$0xff] %v5617_v39 }
0x1189   : > { %2878 = vrot.lane.b32.xlu1 %v2847_v33, %s4339_s11  ;;  %v5619_v50 = vpop.permute.xlu1 %2639 }
0x118a   : > { %8148 = vst [vmem:[#allocation295_spill] sm:$0xff] %v5619_v50 }
0x118d   : > { %2914 = vperm.xlu1 %4195, %v5424_v29   ;;  %v5621_v28 = vpop.permute.xlu1 %2643 }
0x118e   : > { %8149 = vst [vmem:[#allocation296_spill] sm:$0xff] %v5621_v28 }
0x1191   : > { %v5623_v38 = vpop.permute.xlu1 %2699 }
0x1192   : > { %8150 = vst [vmem:[#allocation297_spill] sm:$0xff] %v5623_v38 }
0x1195   : > { %v5625_v61 = vpop.permute.xlu1 %2701 }
0x1196   : > { %8151 = vst [vmem:[#allocation298_spill] sm:$0xff] %v5625_v61 }
0x1199   : > { %v5627_v63 = vpop.permute.xlu1 %2705 }
0x119a   : > { %8152 = vst [vmem:[#allocation299_spill] sm:$0xff] %v5627_v63 }
0x119d   : > { %v5629_v58 = vpop.permute.xlu1 %2709 }
0x119e   : > { %8153 = vst [vmem:[#allocation300_spill] sm:$0xff] %v5629_v58 }
0x11a1   : > { %v5631_v33 = vpop.permute.xlu1 %2713 }
0x11a2   : > { %8154 = vst [vmem:[#allocation301_spill] sm:$0xff] %v5631_v33 }
0x11a5   : > { %v5633_v12 = vpop.permute.xlu1 %2717 }
0x11a6   : > { %8155 = vst [vmem:[#allocation302_spill] sm:$0xff] %v5633_v12 }
0x11a9   : > { %v5635_v45 = vpop.permute.xlu1 %2773 }
0x11aa   : > { %8156 = vst [vmem:[#allocation303_spill] sm:$0xff] %v5635_v45 }
0x11ad   : > { %v5637_v39 = vpop.permute.xlu1 %2775 }
0x11ae   : > { %8157 = vst [vmem:[#allocation304_spill] sm:$0xff] %v5637_v39 }
0x11b1   : > { %v5639_v50 = vpop.permute.xlu1 %2779 }
0x11b2   : > { %8158 = vst [vmem:[#allocation305_spill] sm:$0xff] %v5639_v50 }
0x11b5   : > { %v5641_v15 = vpop.permute.xlu1 %2783 }
0x11b6   : > { %8159 = vst [vmem:[#allocation306_spill] sm:$0xff] %v5641_v15 }
0x11b9   : > { %v5643_v28 = vpop.permute.xlu1 %2787 }
0x11ba   : > { %8160 = vst [vmem:[#allocation307_spill] sm:$0xff] %v5643_v28 }
0x11bd   : > { %v5645_v38 = vpop.permute.xlu1 %2791 }
0x11be   : > { %8161 = vst [vmem:[#allocation308_spill] sm:$0xff] %v5645_v38 }
0x11e7   : > { %v5647_v61 = vpop.permute.xlu1 %2860 }
0x11e8   : > { %8162 = vst [vmem:[#allocation309_spill] sm:$0xff] %v5647_v61 }
0x11eb   : > { %v5649_v63 = vpop.permute.xlu1 %2862 }
0x11ec   : > { %8163 = vst [vmem:[#allocation310_spill] sm:$0xff] %v5649_v63 }
0x11ef   : > { %v5651_v58 = vpop.permute.xlu1 %2866 }
0x11f0   : > { %8164 = vst [vmem:[#allocation311_spill] sm:$0xff] %v5651_v58 }
0x11f3   : > { %v5653_v33 = vpop.permute.xlu1 %2870 }
0x11f4   : > { %8165 = vst [vmem:[#allocation312_spill] sm:$0xff] %v5653_v33 }
0x11f7   : > { %v5655_v12 = vpop.permute.xlu1 %2874 }
0x11f8   : > { %8166 = vst [vmem:[#allocation313_spill] sm:$0xff] %v5655_v12 }
0x11fb   : > { %v5657_v45 = vpop.permute.xlu1 %2878 }
0x11fc   : > { %8167 = vst [vmem:[#allocation314_spill] sm:$0xff] %v5657_v45 }
0x120c   : > { %v2915_v39 = vpop.permute.xlu1 %2914 }
0x120d   : > { %v2918_v50 = vmul.f32 %v2915_v39, %v5285_v40  ;;  %v2917_v15 = vmul.f32 %v2915_v39, %v5298_v27  ;;  %v2920_v61 = vmul.f32 %v2915_v39, %v5295_v24  ;;  %v2919_v63 = vmul.f32 %v2915_v39, %v5308_v2 }
0x120e   : > { %v2922_v58 = vmul.f32 %v2915_v39, %v5305_v31  ;;  %v2921_v38 = vmul.f32 %v2915_v39, %v5313_v16  ;;  %v2924_v45 = vmul.f32 %v2915_v39, %v5598_v1  ;;  %v2923_v12 = vmul.f32 %v2915_v39, %v5320_v0 }
0x120f   : > { %2939 = vrot.lane.b32.xlu1 %v2918_v50, %s4341_s16  ;;  %2937 = vrot.lane.b32.xlu0 %v2917_v15, %s4341_s16  ;;  %v2926_v50 = vmul.f32 %v2915_v39, %v5605_v11  ;;  %v2925_v15 = vmul.f32 %v2915_v39, %v5326_v49 }
0x1213   : > { %2943 = vrot.lane.b32.xlu1 %v2920_v61, %s4341_s16  ;;  %2941 = vrot.lane.b32.xlu0 %v2919_v63, %s4341_s16  ;;  %v4342_v61 = vmov 38   ;;  %v5670_v63 = vpop.permute.xlu0 %2864 }
0x1214   : > { %8168 = vst [vmem:[#allocation315_spill] sm:$0xff] %v5670_v63 }
0x1217   : > { %2947 = vrot.lane.b32.xlu1 %v2922_v58, %s4341_s16  ;;  %2945 = vrot.lane.b32.xlu0 %v2921_v38, %s4341_s16  ;;  %v5672_v58 = vpop.permute.xlu0 %2868 }
0x1218   : > { %8169 = vst [vmem:[#allocation316_spill] sm:$0xff] %v5672_v58 }
0x121b   : > { %2951 = vrot.lane.b32.xlu1 %v2924_v45, %s4341_s16  ;;  %2949 = vrot.lane.b32.xlu0 %v2923_v12, %s4341_s16  ;;  %v5674_v38 = vpop.permute.xlu0 %2872 }
0x121c   : > { %8170 = vst [vmem:[#allocation317_spill] sm:$0xff] %v5674_v38 }
0x121f   : > { %2955 = vrot.lane.b32.xlu1 %v2926_v50, %s4341_s16  ;;  %2953 = vrot.lane.b32.xlu0 %v2925_v15, %s4341_s16  ;;  %v5676_v28 = vpop.permute.xlu0 %2876 }
0x1220   : > { %8171 = vst [vmem:[#allocation318_spill] sm:$0xff] %v5676_v28 }
0x1223   : > { %2988 = vperm.xlu0 %4196, %v5424_v29   ;;  %v5678_v45 = vpop.permute.xlu0 %2880 }
0x1224   : > { %8172 = vst [vmem:[#allocation319_spill] sm:$0xff] %v5678_v45 }
0x1227   : > { %4197 = vset.pattern.permute.xlu0 %v4342_v61 }
0x1281   : > { %v5680_v12 = vpop.permute.xlu0 %2937 }
0x1282   : > { %8173 = vst [vmem:[#allocation320_spill] sm:$0xff] %v5680_v12 }
0x1285   : > { %v5682_v33 = vpop.permute.xlu0 %2941 }
0x1286   : > { %8174 = vst [vmem:[#allocation321_spill] sm:$0xff] %v5682_v33 }
0x1289   : > { %v5684_v39 = vpop.permute.xlu0 %2945 }
0x128a   : > { %8175 = vst [vmem:[#allocation322_spill] sm:$0xff] %v5684_v39 }
0x128d   : > { %v5686_v50 = vpop.permute.xlu0 %2949 }
0x128e   : > { %8176 = vst [vmem:[#allocation323_spill] sm:$0xff] %v5686_v50 }
0x1291   : > { %v5688_v15 = vpop.permute.xlu0 %2953 }
0x1292   : > { %8177 = vst [vmem:[#allocation324_spill] sm:$0xff] %v5688_v15 }
0x12a2   : > { %v2989_v61 = vpop.permute.xlu0 %2988 }
0x12a3   : > { %v2993_v63 = vmul.f32 %v2989_v61, %v5308_v2  ;;  %v2991_v58 = vmul.f32 %v2989_v61, %v5298_v27  ;;  %v2995_v45 = vmul.f32 %v2989_v61, %v5313_v16  ;;  %v2992_v12 = vmul.f32 %v2989_v61, %v5285_v40 }
0x12a4   : > { %v2997_v39 = vmul.f32 %v2989_v61, %v5320_v0  ;;  %v2994_v33 = vmul.f32 %v2989_v61, %v5295_v24  ;;  %v2999_v15 = vmul.f32 %v2989_v61, %v5326_v49  ;;  %v2996_v28 = vmul.f32 %v2989_v61, %v5305_v31 }
0x12a5   : > { %3015 = vrot.lane.b32.xlu0 %v2993_v63, %s4343_s17  ;;  %3011 = vrot.lane.b32.xlu1 %v2991_v58, %s4343_s17  ;;  %v2998_v63 = vmul.f32 %v2989_v61, %v5598_v1  ;;  %v3000_v58 = vmul.f32 %v2989_v61, %v5605_v11 }
0x12a9   : > { %3019 = vrot.lane.b32.xlu0 %v2995_v45, %s4343_s17  ;;  %3013 = vrot.lane.b32.xlu1 %v2992_v12, %s4343_s17  ;;  %v4344_v45 = vmov 39  }
0x12ad   : > { %3023 = vrot.lane.b32.xlu0 %v2997_v39, %s4343_s17  ;;  %3017 = vrot.lane.b32.xlu1 %v2994_v33, %s4343_s17 }
0x12b1   : > { %3027 = vrot.lane.b32.xlu0 %v2999_v15, %s4343_s17  ;;  %3021 = vrot.lane.b32.xlu1 %v2996_v28, %s4343_s17 }
0x12b5   : > { %3062 = vperm.xlu0 %4197, %v5424_v29   ;;  %3025 = vrot.lane.b32.xlu1 %v2998_v63, %s4343_s17 }
0x12b9   : > { %3029 = vrot.lane.b32.xlu1 %v3000_v58, %s4343_s17  ;;  %4198 = vset.pattern.permute.xlu0 %v4344_v45 }
0x1317   : > { %v5701_v12 = vpop.permute.xlu0 %3015 }
0x1318   : > { %8178 = vst [vmem:[#allocation325_spill] sm:$0xff] %v5701_v12 }
0x131b   : > { %v5703_v39 = vpop.permute.xlu0 %3019 }
0x131c   : > { %8179 = vst [vmem:[#allocation326_spill] sm:$0xff] %v5703_v39 }
0x131f   : > { %v5705_v33 = vpop.permute.xlu0 %3023 }
0x1320   : > { %8180 = vst [vmem:[#allocation327_spill] sm:$0xff] %v5705_v33 }
0x1323   : > { %v5707_v50 = vpop.permute.xlu0 %3027 }
0x1324   : > { %8181 = vst [vmem:[#allocation328_spill] sm:$0xff] %v5707_v50 }
0x1334   : > { %v3063_v15 = vpop.permute.xlu0 %3062 }
0x1335   : > { %v3067_v28 = vmul.f32 %v3063_v15, %v5308_v2  ;;  %v3065_v38 = vmul.f32 %v3063_v15, %v5298_v27  ;;  %v3069_v61 = vmul.f32 %v3063_v15, %v5313_v16  ;;  %v3066_v63 = vmul.f32 %v3063_v15, %v5285_v40 }
0x1336   : > { %v3071_v58 = vmul.f32 %v3063_v15, %v5320_v0  ;;  %v3068_v45 = vmul.f32 %v3063_v15, %v5295_v24  ;;  %v3073_v39 = vmul.f32 %v3063_v15, %v5326_v49  ;;  %v3070_v12 = vmul.f32 %v3063_v15, %v5305_v31 }
0x1337   : > { %3089 = vrot.lane.b32.xlu0 %v3067_v28, %s4345_s18  ;;  %3085 = vrot.lane.b32.xlu1 %v3065_v38, %s4345_s18  ;;  %v3072_v38 = vmul.f32 %v3063_v15, %v5598_v1  ;;  %v3074_v28 = vmul.f32 %v3063_v15, %v5605_v11 }
0x133b   : > { %3093 = vrot.lane.b32.xlu0 %v3069_v61, %s4345_s18  ;;  %3087 = vrot.lane.b32.xlu1 %v3066_v63, %s4345_s18  ;;  %v4346_v61 = vmov 40  }
0x133f   : > { %3097 = vrot.lane.b32.xlu0 %v3071_v58, %s4345_s18  ;;  %3091 = vrot.lane.b32.xlu1 %v3068_v45, %s4345_s18 }
0x1343   : > { %3101 = vrot.lane.b32.xlu0 %v3073_v39, %s4345_s18  ;;  %3095 = vrot.lane.b32.xlu1 %v3070_v12, %s4345_s18 }
0x1347   : > { %3136 = vperm.xlu0 %4198, %v5424_v29   ;;  %3099 = vrot.lane.b32.xlu1 %v3072_v38, %s4345_s18 }
0x134b   : > { %3103 = vrot.lane.b32.xlu1 %v3074_v28, %s4345_s18  ;;  %4199 = vset.pattern.permute.xlu0 %v4346_v61 }
0x13a9   : > { %v5720_v63 = vpop.permute.xlu0 %3089 }
0x13aa   : > { %8182 = vst [vmem:[#allocation329_spill] sm:$0xff] %v5720_v63 }
0x13ad   : > { %v5722_v58 = vpop.permute.xlu0 %3093 }
0x13ae   : > { %8183 = vst [vmem:[#allocation330_spill] sm:$0xff] %v5722_v58 }
0x13b1   : > { %v5724_v45 = vpop.permute.xlu0 %3097 }
0x13b2   : > { %8184 = vst [vmem:[#allocation331_spill] sm:$0xff] %v5724_v45 }
0x13b5   : > { %v5726_v50 = vpop.permute.xlu0 %3101 }
0x13b6   : > { %8185 = vst [vmem:[#allocation332_spill] sm:$0xff] %v5726_v50 }
0x13c6   : > { %v3137_v39 = vpop.permute.xlu0 %3136 }
0x13c7   : > { %v3141_v12 = vmul.f32 %v3137_v39, %v5308_v2  ;;  %v3139_v33 = vmul.f32 %v3137_v39, %v5298_v27  ;;  %v3143_v15 = vmul.f32 %v3137_v39, %v5313_v16  ;;  %v3140_v38 = vmul.f32 %v3137_v39, %v5285_v40 }
0x13c8   : > { %v3145_v28 = vmul.f32 %v3137_v39, %v5320_v0  ;;  %v3142_v61 = vmul.f32 %v3137_v39, %v5295_v24  ;;  %v3147_v58 = vmul.f32 %v3137_v39, %v5326_v49  ;;  %v3144_v63 = vmul.f32 %v3137_v39, %v5305_v31 }
0x13c9   : > { %3163 = vrot.lane.b32.xlu0 %v3141_v12, %s4347_s19  ;;  %3159 = vrot.lane.b32.xlu1 %v3139_v33, %s4347_s19  ;;  %v3146_v33 = vmul.f32 %v3137_v39, %v5598_v1  ;;  %v3148_v12 = vmul.f32 %v3137_v39, %v5605_v11 }
0x13cd   : > { %3167 = vrot.lane.b32.xlu0 %v3143_v15, %s4347_s19  ;;  %3161 = vrot.lane.b32.xlu1 %v3140_v38, %s4347_s19  ;;  %v4348_v15 = vmov 41  }
0x13d1   : > { %3171 = vrot.lane.b32.xlu0 %v3145_v28, %s4347_s19  ;;  %3165 = vrot.lane.b32.xlu1 %v3142_v61, %s4347_s19  ;;  %v5743_v61 = vpop.permute.xlu1 %2939 }
0x13d2   : > { %8188 = vst [vmem:[#allocation335_spill] sm:$0xff] %v5743_v61 }
0x13d5   : > { %3175 = vrot.lane.b32.xlu0 %v3147_v58, %s4347_s19  ;;  %3169 = vrot.lane.b32.xlu1 %v3144_v63, %s4347_s19  ;;  %v5747_v58 = vpop.permute.xlu1 %2943 }
0x13d6   : > { %8189 = vst [vmem:[#allocation336_spill] sm:$0xff] %v5747_v58 }
0x13d9   : > { %3210 = vperm.xlu0 %4199, %v5424_v29   ;;  %3173 = vrot.lane.b32.xlu1 %v3146_v33, %s4347_s19  ;;  %v5751_v45 = vpop.permute.xlu1 %2947 }
0x13dd   : > { %3177 = vrot.lane.b32.xlu1 %v3148_v12, %s4347_s19  ;;  %4200 = vset.pattern.permute.xlu0 %v4348_v15  ;;  %v5755_v15 = vpop.permute.xlu1 %2951 }
0x143b   : > { %v5739_v38 = vpop.permute.xlu0 %3163 }
0x143c   : > { %8186 = vst [vmem:[#allocation333_spill] sm:$0xff] %v5739_v38 }
0x143f   : > { %v5741_v28 = vpop.permute.xlu0 %3167 }
0x1440   : > { %8187 = vst [vmem:[#allocation334_spill] sm:$0xff] %v5741_v28 }
0x1443   : > { %v5745_v50 = vpop.permute.xlu0 %3171 }
0x1447   : > { %v5749_v63 = vpop.permute.xlu0 %3175 }
0x1448   : > { %8190 = vst [vmem:[#allocation337_spill] sm:$0xff] %v5749_v63  ;;  %v5761_v63 = vpop.permute.xlu1 %2955 }
0x1449   : > { %8191 = vst [vmem:[#allocation338_spill] sm:$0xff] %v5761_v63 }
0x1458   : > { %v3211_v33 = vpop.permute.xlu0 %3210 }
0x1459   : > { %v3215_v39 = vmul.f32 %v3211_v33, %v5308_v2  ;;  %v3213_v12 = vmul.f32 %v3211_v33, %v5298_v27  ;;  %v3217_v28 = vmul.f32 %v3211_v33, %v5313_v16  ;;  %v3214_v38 = vmul.f32 %v3211_v33, %v5285_v40 }
0x145a   : > { %v3219_v58 = vmul.f32 %v3211_v33, %v5320_v0  ;;  %v3216_v61 = vmul.f32 %v3211_v33, %v5295_v24  ;;  %v3221_v2 = vmul.f32 %v3211_v33, %v5326_v49  ;;  %v3218_v27 = vmul.f32 %v3211_v33, %v5305_v31 }
0x145b   : > { %3237 = vrot.lane.b32.xlu0 %v3215_v39, %s4349_s20  ;;  %3233 = vrot.lane.b32.xlu1 %v3213_v12, %s4349_s20  ;;  %v5765_v39 = vpop.permute.xlu1 %3011  ;;  %v3220_v40 = vmul.f32 %v3211_v33, %v5598_v1  ;;  %v3222_v24 = vmul.f32 %v3211_v33, %v5605_v11  ;;  %v4350_v16 = vmov 42   ;;  %v4215_v11 = vld [vmem:[%s4428_s21 + $0x40] sm:$0xff] }
0x145c   : > { %8192 = vst [vmem:[#allocation339_spill] sm:$0xff] %v5765_v39  ;;  %v265_v33 = vmul.f32 %v4215_v11, %v4423_v9  ;;  %v8284_v39 = vld [vmem:[#allocation245_spill] sm:$0xff] }
0x145f   : > { %3241 = vrot.lane.b32.xlu0 %v3217_v28, %s4349_s20  ;;  %3235 = vrot.lane.b32.xlu1 %v3214_v38, %s4349_s20  ;;  %v5769_v0 = vpop.permute.xlu1 %3013  ;;  %v4212_v28 = vld [vmem:[%s4428_s21 + $0x28] sm:$0xff] }
0x1460   : > { %8193 = vst [vmem:[#allocation340_spill] sm:$0xff] %v5769_v0  ;;  %v262_v1 = vmul.f32 %v4212_v28, %v4423_v9  ;;  %v401_v28 = vsel %vm395_vm1, %v4702_v25, %v4585_v43  ;;  %v8302_v0 = vld [vmem:[#allocation272_spill] sm:$0xff] }
0x1463   : > { %3245 = vrot.lane.b32.xlu0 %v3219_v58, %s4349_s20  ;;  %3239 = vrot.lane.b32.xlu1 %v3216_v61, %s4349_s20  ;;  %v5772_v49 = vpop.permute.xlu1 %3017  ;;  %v4214_v58 = vld [vmem:[%s4428_s21 + $0x38] sm:$0xff] }
0x1464   : > { %8194 = vst [vmem:[#allocation341_spill] sm:$0xff] %v5772_v49  ;;  %v264_v12 = vmul.f32 %v4214_v58, %v4423_v9  ;;  %v8298_v49 = vld [vmem:[#allocation266_spill] sm:$0xff] }
0x1467   : > { %3249 = vrot.lane.b32.xlu0 %v3221_v2, %s4349_s20  ;;  %3243 = vrot.lane.b32.xlu1 %v3218_v27, %s4349_s20  ;;  %v5774_v31 = vpop.permute.xlu1 %3021  ;;  %v327_v2 = vsel %vm321_vm0, %v4563_v32, %v4684_v7  ;;  %v328_v27 = vsel %vm321_vm0, %v4684_v7, %v4567_v34  ;;  %v402_v7 = vsel %vm395_vm1, %v4585_v43, %v4707_v35 }
0x1468   : > { %v476_v43 = vsel %vm469_vm2, %v4593_v47, %v4738_v37 }
0x146b   : > { %3284 = vperm.xlu0 %4200, %v5424_v29   ;;  %3247 = vrot.lane.b32.xlu1 %v3220_v40, %s4349_s20  ;;  %v5776_v38 = vpop.permute.xlu1 %3025  ;;  %v4213_v29 = vld [vmem:[%s4428_s21 + $0x30] sm:$0xff]  ;;  %v329_v40 = vsel %vm321_vm0, %v4567_v34, %v4688_v13  ;;  %v403_v34 = vsel %vm395_vm1, %v4707_v35, %v4587_v44  ;;  %v477_v35 = vsel %vm469_vm2, %v4738_v37, %v4595_v48 }
0x146c   : > { %v263_v61 = vmul.f32 %v4213_v29, %v4423_v9  ;;  %v346_v29 = vadd.f32 %v327_v2, %v262_v1  ;;  %v348_v11 = vadd.f32 %v329_v40, %v264_v12  ;;  %v551_v37 = vsel %vm543_vm3, %v4769_v41, %v4603_v52 }
0x146e   : > { %v347_v58 = vadd.f32 %v328_v27, %v263_v61  ;;  %v420_v2 = vadd.f32 %v401_v28, %v346_v29  ;;  %v422_v27 = vadd.f32 %v403_v34, %v348_v11 }
0x146f   : > { %3251 = vrot.lane.b32.xlu1 %v3222_v24, %s4349_s20  ;;  %4201 = vset.pattern.permute.xlu0 %v4350_v16  ;;  %v5795_v24 = vpop.permute.xlu1 %3029  ;;  %v330_v16 = vsel %vm321_vm0, %v4688_v13, %v4571_v36  ;;  %v404_v13 = vsel %vm395_vm1, %v4587_v44, %v4715_v5  ;;  %v475_v36 = vsel %vm469_vm2, %v4733_v22, %v4593_v47  ;;  %v8270_v5 = vld [vmem:[#allocation219_spill] sm:$0xff] }
0x1470   : > { %8195 = vst [vmem:[#allocation342_spill] sm:$0xff] %v5795_v24  ;;  %v349_v1 = vadd.f32 %v330_v16, %v265_v33  ;;  %v421_v12 = vadd.f32 %v402_v7, %v347_v58  ;;  %v478_v44 = vsel %vm469_vm2, %v4595_v48, %v4746_v17  ;;  %v549_v33 = vsel %vm543_vm3, %v4764_v8, %v4601_v51 }
0x1471   : > { %v494_v16 = vadd.f32 %v475_v36, %v420_v2  ;;  %v550_v47 = vsel %vm543_vm3, %v4601_v51, %v4769_v41  ;;  %v496_v29 = vadd.f32 %v477_v35, %v422_v27  ;;  %v552_v48 = vsel %vm543_vm3, %v4603_v52, %v4777_v53 }
0x1472   : > { %v423_v40 = vadd.f32 %v404_v13, %v349_v1  ;;  %v495_v28 = vadd.f32 %v476_v43, %v421_v12  ;;  %v623_v7 = vsel %vm617_vm4, %v4795_v19, %v4609_v55  ;;  %v624_v51 = vsel %vm617_vm4, %v4609_v55, %v4800_v23 }
0x1473   : > { %v5821_v61 = vpop.permute.xlu1 %3085  ;;  %v568_v36 = vadd.f32 %v549_v33, %v494_v16  ;;  %v625_v41 = vsel %vm617_vm4, %v4800_v23, %v4611_v56  ;;  %v570_v11 = vadd.f32 %v551_v37, %v496_v29  ;;  %v626_v52 = vsel %vm617_vm4, %v4611_v56, %v4808_v46 }
0x1474   : > { %8196 = vst [vmem:[#allocation343_spill] sm:$0xff] %v5821_v61  ;;  %v497_v34 = vadd.f32 %v478_v44, %v423_v40  ;;  %v569_v58 = vadd.f32 %v550_v47, %v495_v28  ;;  %v697_v13 = vsel %vm7853_vm5, %v4853_v62, %v4617_v59  ;;  %v698_v55 = vsel %vm7853_vm5, %v4617_v59, %v4861_v54 }
0x1475   : > { %v642_v2 = vadd.f32 %v623_v7, %v568_v36  ;;  %v644_v35 = vadd.f32 %v625_v41, %v570_v11  ;;  %v699_v12 = vsel %vm7853_vm5, %v4861_v54, %v4619_v60  ;;  %v700_v56 = vsel %vm7853_vm5, %v4619_v60, %v4869_v26  ;;  %v8254_v26 = vld [vmem:[#allocation189_spill] sm:$0xff] }
0x1476   : > { %v571_v1 = vadd.f32 %v552_v48, %v497_v34  ;;  %v643_v23 = vadd.f32 %v624_v51, %v569_v58  ;;  %v771_v33 = vsel %vm7850_vm6, %v4887_v14, %v4636_v18  ;;  %v772_v59 = vsel %vm7850_vm6, %v4636_v18, %v4892_v30  ;;  %v8198_v34 = vld [vmem:[#allocation84_spill] sm:$0xff]  ;;  %v8200_v58 = vld [vmem:[#allocation85_spill] sm:$0xff] }
0x1477   : > { %v5856_v43 = vpop.permute.xlu1 %3087  ;;  %v716_v44 = vadd.f32 %v697_v13, %v642_v2  ;;  %v773_v16 = vsel %vm7850_vm6, %v4892_v30, %v4638_v21  ;;  %v774_v54 = vsel %vm7850_vm6, %v4638_v21, %v4900_v42  ;;  %v718_v60 = vadd.f32 %v699_v12, %v644_v35  ;;  %v8203_v2 = vld [vmem:[#allocation30_spill] sm:$0xff] }
0x1478   : > { %8197 = vst [vmem:[#allocation344_spill] sm:$0xff] %v5856_v43  ;;  %v645_v27 = vadd.f32 %v626_v52, %v571_v1  ;;  %v717_v40 = vadd.f32 %v698_v55, %v643_v23  ;;  %v845_v37 = vsel %vm7851_vm7, %v4918_v10, %v4655_v3  ;;  %v846_v18 = vsel %vm7851_vm7, %v4655_v3, %v4928_v20  ;;  %v8201_v52 = vld [vmem:[#allocation25_spill] sm:$0xff]  ;;  %v8204_v55 = vld [vmem:[#allocation94_spill] sm:$0xff] }
0x1479   : > { %v790_v28 = vadd.f32 %v771_v33, %v716_v44  ;;  %v847_v30 = vsel %vm7851_vm7, %v4928_v20, %v4657_v4  ;;  %v792_v48 = vadd.f32 %v773_v16, %v718_v60  ;;  %v848_v7 = vsel %vm7851_vm7, %v4657_v4, %v4936_v57  ;;  %v8202_v1 = vld [vmem:[#allocation89_spill] sm:$0xff]  ;;  %v8206_v44 = vld [vmem:[#allocation32_spill] sm:$0xff]  ;;  %v8208_v16 = vld [vmem:[#allocation38_spill] sm:$0xff] }
0x147a   : > { %v719_v47 = vadd.f32 %v700_v56, %v645_v27  ;;  %v791_v29 = vadd.f32 %v772_v59, %v717_v40  ;;  %v919_v36 = vsel %vm7852_vm8, %v8198_v34, %v4682_v6  ;;  %v920_v11 = vsel %vm7852_vm8, %v4682_v6, %v8200_v58  ;;  %v8205_v56 = vld [vmem:[#allocation95_spill] sm:$0xff]  ;;  %v8244_v57 = vld [vmem:[#allocation98_spill] sm:$0xff] }
0x147b   : > { %v5891_v51 = vpop.permute.xlu1 %3091  ;;  %v864_v3 = vadd.f32 %v845_v37, %v790_v28  ;;  %v866_v20 = vadd.f32 %v847_v30, %v792_v48  ;;  %v921_v13 = vsel %vm7852_vm8, %v8200_v58, %v8201_v52  ;;  %v922_v4 = vsel %vm7852_vm8, %v8201_v52, %v8202_v1  ;;  %v8207_v59 = vld [vmem:[#allocation99_spill] sm:$0xff]  ;;  %v8210_v28 = vld [vmem:[#allocation105_spill] sm:$0xff]  ;;  %v8211_v48 = vld [vmem:[#allocation40_spill] sm:$0xff] }
0x147c   : > { %v793_v21 = vadd.f32 %v774_v54, %v719_v47  ;;  %8199 = vst [vmem:[#allocation84_spill] sm:$0xff] %v5891_v51  ;;  %v865_v41 = vadd.f32 %v846_v18, %v791_v29  ;;  %v993_v23 = vsel %vm987_vm9, %v8204_v55, %v8203_v2  ;;  %v994_v6 = vsel %vm987_vm9, %v8203_v2, %v8205_v56  ;;  %v8209_v54 = vld [vmem:[#allocation104_spill] sm:$0xff]  ;;  %v8214_v52 = vld [vmem:[#allocation114_spill] sm:$0xff]  ;;  %v8215_v2 = vld [vmem:[#allocation115_spill] sm:$0xff] }
0x147d   : > { %v938_v12 = vadd.f32 %v919_v36, %v864_v3  ;;  %v995_v33 = vsel %vm987_vm9, %v8205_v56, %v8206_v44  ;;  %v996_v40 = vsel %vm987_vm9, %v8206_v44, %v8207_v59  ;;  %v1067_v60 = vsel %vm7854_vm10, %v8209_v54, %v8208_v16  ;;  %v8285_v51 = vld [vmem:[#allocation170_spill] sm:$0xff] }
0x147e   : > { %v867_v35 = vadd.f32 %v848_v7, %v793_v21  ;;  %v939_v27 = vadd.f32 %v920_v11, %v865_v41  ;;  %v940_v47 = vadd.f32 %v921_v13, %v866_v20  ;;  %v1068_v29 = vsel %vm7854_vm10, %v8208_v16, %v8210_v28  ;;  %v8212_v7 = vld [vmem:[#allocation109_spill] sm:$0xff]  ;;  %v8213_v20 = vld [vmem:[#allocation46_spill] sm:$0xff] }
0x147f   : > { %v1012_v18 = vadd.f32 %v993_v23, %v938_v12  ;;  %v1069_v21 = vsel %vm7854_vm10, %v8210_v28, %v8211_v48  ;;  %v1070_v36 = vsel %vm7854_vm10, %v8211_v48, %v8212_v7  ;;  %v5926_v3 = vpop.permute.xlu1 %3095  ;;  %v1141_v13 = vsel %vm7831_vm11, %v8214_v52, %v8213_v20  ;;  %v8222_v48 = vld [vmem:[#allocation129_spill] sm:$0xff]  ;;  %v8231_v7 = vld [vmem:[#allocation72_spill] sm:$0xff] }
0x1480   : > { %v941_v37 = vadd.f32 %v922_v4, %v867_v35  ;;  %v1013_v30 = vadd.f32 %v994_v6, %v939_v27  ;;  %v1014_v41 = vadd.f32 %v995_v33, %v940_v47  ;;  %v1142_v23 = vsel %vm7831_vm11, %v8213_v20, %v8215_v2  ;;  %v8216_v35 = vld [vmem:[#allocation48_spill] sm:$0xff]  ;;  %v8217_v27 = vld [vmem:[#allocation119_spill] sm:$0xff]  ;;  %v8218_v33 = vld [vmem:[#allocation54_spill] sm:$0xff] }
0x1481   : > { %v1086_v11 = vadd.f32 %v1067_v60, %v1012_v18  ;;  %v1143_v12 = vsel %vm7831_vm11, %v8215_v2, %v8216_v35  ;;  %v1144_v44 = vsel %vm7831_vm11, %v8216_v35, %v8217_v27  ;;  %v8220_v47 = vld [vmem:[#allocation125_spill] sm:$0xff]  ;;  %v8221_v18 = vld [vmem:[#allocation56_spill] sm:$0xff]  ;;  %vm3105_vm11 = vcmask 990208  }
0x1482   : > { %v1015_v58 = vadd.f32 %v996_v40, %v941_v37  ;;  %v1087_v4 = vadd.f32 %v1068_v29, %v1013_v30  ;;  %v1088_v56 = vadd.f32 %v1069_v21, %v1014_v41  ;;  %v8219_v40 = vld [vmem:[#allocation124_spill] sm:$0xff]  ;;  %v1216_v37 = vsel %vm7820_vm12, %v8218_v33, %v8220_v47  ;;  %v8224_v41 = vld [vmem:[#allocation134_spill] sm:$0xff] }
0x1483   : > { %v1215_v16 = vsel %vm7820_vm12, %v8219_v40, %v8218_v33  ;;  %v1160_v60 = vadd.f32 %v1141_v13, %v1086_v11  ;;  %v1217_v28 = vsel %vm7820_vm12, %v8220_v47, %v8221_v18  ;;  %v1218_v21 = vsel %vm7820_vm12, %v8221_v18, %v8222_v48  ;;  %v8225_v13 = vld [vmem:[#allocation135_spill] sm:$0xff]  ;;  %v8226_v35 = vld [vmem:[#allocation64_spill] sm:$0xff] }
0x1484   : > { %v1089_v6 = vadd.f32 %v1070_v36, %v1015_v58  ;;  %v1161_v29 = vadd.f32 %v1142_v23, %v1087_v4  ;;  %v1162_v30 = vadd.f32 %v1143_v12, %v1088_v56  ;;  %v8223_v36 = vld [vmem:[#allocation62_spill] sm:$0xff]  ;;  %v1301_v33 = vsel %vm7796_vm13, %v8225_v13, %v8226_v35  ;;  %v5961_v4 = vpop.permute.xlu1 %3099  ;;  %v8227_v56 = vld [vmem:[#allocation139_spill] sm:$0xff] }
0x1485   : > { %v1299_v58 = vsel %vm7796_vm13, %v8224_v41, %v8223_v36  ;;  %v1234_v20 = vadd.f32 %v1215_v16, %v1160_v60  ;;  %v1300_v2 = vsel %vm7796_vm13, %v8223_v36, %v8225_v13  ;;  %v1302_v47 = vsel %vm7796_vm13, %v8226_v35, %v8227_v56  ;;  %v8229_v16 = vld [vmem:[#allocation144_spill] sm:$0xff]  ;;  %v8230_v36 = vld [vmem:[#allocation145_spill] sm:$0xff] }
0x1486   : > { %v1163_v11 = vadd.f32 %v1144_v44, %v1089_v6  ;;  %v1235_v23 = vadd.f32 %v1216_v37, %v1161_v29  ;;  %v1236_v12 = vadd.f32 %v1217_v28, %v1162_v30  ;;  %v8228_v44 = vld [vmem:[#allocation70_spill] sm:$0xff]  ;;  %v1375_v37 = vsel %vm7805_vm14, %v8230_v36, %v8231_v7  ;;  %v8232_v29 = vld [vmem:[#allocation149_spill] sm:$0xff] }
0x1487   : > { %v1318_v6 = vadd.f32 %v1299_v58, %v1234_v20  ;;  %v1373_v60 = vsel %vm7805_vm14, %v8229_v16, %v8228_v44  ;;  %v1374_v48 = vsel %vm7805_vm14, %v8228_v44, %v8230_v36  ;;  %v1376_v30 = vsel %vm7805_vm14, %v8231_v7, %v8232_v29  ;;  %v8234_v58 = vld [vmem:[#allocation154_spill] sm:$0xff]  ;;  %v8235_v20 = vld [vmem:[#allocation155_spill] sm:$0xff]  ;;  %v8238_v44 = vld [vmem:[#allocation88_spill] sm:$0xff] }
0x1488   : > { %v1237_v18 = vadd.f32 %v1218_v21, %v1163_v11  ;;  %v1319_v13 = vadd.f32 %v1300_v2, %v1235_v23  ;;  %v1320_v27 = vadd.f32 %v1301_v33, %v1236_v12  ;;  %v8233_v21 = vld [vmem:[#allocation78_spill] sm:$0xff]  ;;  %v8236_v23 = vld [vmem:[#allocation80_spill] sm:$0xff]  ;;  %vm7799_vm13 = vcmask 351232   ;;  %v5993_v56 = vpop.permute.xlu1 %3103 }
0x1489   : > { %v1447_v11 = vsel %vm7797_vm15, %v8234_v58, %v8233_v21  ;;  %v1448_v35 = vsel %vm7797_vm15, %v8233_v21, %v8235_v20  ;;  %v1392_v2 = vadd.f32 %v1373_v60, %v1318_v6  ;;  %v1449_v12 = vsel %vm7797_vm15, %v8235_v20, %v8236_v23  ;;  %v8239_v36 = vld [vmem:[#allocation164_spill] sm:$0xff]  ;;  %8240 = vst [vmem:[#allocation85_spill] sm:$0xff] %v5993_v56  ;;  %v8242_v20 = vld [vmem:[#allocation90_spill] sm:$0xff] }
0x148a   : > { %v1321_v28 = vadd.f32 %v1302_v47, %v1237_v18  ;;  %v1393_v33 = vadd.f32 %v1374_v48, %v1319_v13  ;;  %v1394_v47 = vadd.f32 %v1375_v37, %v1320_v27  ;;  %v8237_v18 = vld [vmem:[#allocation159_spill] sm:$0xff]  ;;  %v1521_v29 = vsel %vm7799_vm13, %v8239_v36, %v8238_v44  ;;  %v8241_v48 = vld [vmem:[#allocation165_spill] sm:$0xff] }
0x148b   : > { %v1450_v7 = vsel %vm7797_vm15, %v8236_v23, %v8237_v18  ;;  %v1466_v21 = vadd.f32 %v1447_v11, %v1392_v2  ;;  %v1522_v60 = vsel %vm7799_vm13, %v8238_v44, %v8241_v48  ;;  %v1523_v27 = vsel %vm7799_vm13, %v8241_v48, %v8242_v20  ;;  %v8243_v37 = vld [vmem:[#allocation169_spill] sm:$0xff]  ;;  %v8246_v11 = vld [vmem:[#allocation175_spill] sm:$0xff]  ;;  %v8251_v48 = vld [vmem:[#allocation184_spill] sm:$0xff] }
0x148c   : > { %v1395_v59 = vadd.f32 %v1376_v30, %v1321_v28  ;;  %v1467_v6 = vadd.f32 %v1448_v35, %v1393_v33  ;;  %v1468_v13 = vadd.f32 %v1449_v12, %v1394_v47  ;;  %v1524_v23 = vsel %vm7799_vm13, %v8242_v20, %v8243_v37  ;;  %v8245_v28 = vld [vmem:[#allocation174_spill] sm:$0xff]  ;;  %v8247_v33 = vld [vmem:[#allocation100_spill] sm:$0xff]  ;;  %v8248_v47 = vld [vmem:[#allocation179_spill] sm:$0xff] }
0x148d   : > { %vm7801_vm15 = vcmask 326656   ;;  %v1540_v1 = vadd.f32 %v1521_v29, %v1466_v21  ;;  %vm7806_vm13 = vcmask 302080   ;;  %v8250_v21 = vld [vmem:[#allocation108_spill] sm:$0xff]  ;;  %v8252_v37 = vld [vmem:[#allocation185_spill] sm:$0xff]  ;;  %vm7809_vm14 = vcmask 637952  }
0x148e   : > { %v1469_v18 = vadd.f32 %v1450_v7, %v1395_v59  ;;  %v1595_v30 = vsel %vm7801_vm15, %v8245_v28, %v8244_v57  ;;  %v1596_v35 = vsel %vm7801_vm15, %v8244_v57, %v8246_v11  ;;  %v1541_v2 = vadd.f32 %v1522_v60, %v1467_v6  ;;  %v6016_v59 = vpop.permute.xlu1 %3159 }
0x148f   : > { %v1597_v12 = vsel %vm7801_vm15, %v8246_v11, %v8247_v33  ;;  %v1598_v44 = vsel %vm7801_vm15, %v8247_v33, %v8248_v47  ;;  %8249 = vst [vmem:[#allocation25_spill] sm:$0xff] %v6016_v59  ;;  %v1542_v29 = vadd.f32 %v1523_v27, %v1468_v13  ;;  %v1669_v20 = vsel %vm7806_vm13, %v8251_v48, %v8250_v21  ;;  %v8253_v11 = vld [vmem:[#allocation110_spill] sm:$0xff] }
0x1490   : > { %v1543_v7 = vadd.f32 %v1524_v23, %v1469_v18  ;;  %v1670_v57 = vsel %vm7806_vm13, %v8250_v21, %v8252_v37  ;;  %v1614_v6 = vadd.f32 %v1595_v30, %v1540_v1  ;;  %v1615_v60 = vadd.f32 %v1596_v35, %v1541_v2  ;;  %v8255_v13 = vld [vmem:[#allocation118_spill] sm:$0xff]  ;;  %v8257_v21 = vld [vmem:[#allocation195_spill] sm:$0xff] }
0x1491   : > { %v1671_v42 = vsel %vm7806_vm13, %v8252_v37, %v8253_v11  ;;  %vm7810_vm15 = vcmask 277504   ;;  %v1616_v33 = vadd.f32 %v1597_v12, %v1542_v29  ;;  %v1672_v18 = vsel %vm7806_vm13, %v8253_v11, %v8254_v26  ;;  %v8256_v27 = vld [vmem:[#allocation194_spill] sm:$0xff]  ;;  %v8258_v37 = vld [vmem:[#allocation120_spill] sm:$0xff]  ;;  %v8259_v2 = vld [vmem:[#allocation199_spill] sm:$0xff] }
0x1492   : > { %v1617_v47 = vadd.f32 %v1598_v44, %v1543_v7  ;;  %v1743_v23 = vsel %vm7810_vm15, %v8256_v27, %v8255_v13  ;;  %v1688_v46 = vadd.f32 %v1669_v20, %v1614_v6  ;;  %v1689_v53 = vadd.f32 %v1670_v57, %v1615_v60  ;;  %v8260_v44 = vld [vmem:[#allocation128_spill] sm:$0xff]  ;;  %v8262_v6 = vld [vmem:[#allocation205_spill] sm:$0xff]  ;;  %v8267_v26 = vld [vmem:[#allocation214_spill] sm:$0xff] }
0x1493   : > { %v1744_v1 = vsel %vm7810_vm15, %v8255_v13, %v8257_v21  ;;  %v1690_v30 = vadd.f32 %v1671_v42, %v1616_v33  ;;  %v1745_v35 = vsel %vm7810_vm15, %v8257_v21, %v8258_v37  ;;  %v1746_v12 = vsel %vm7810_vm15, %v8258_v37, %v8259_v2  ;;  %v8261_v29 = vld [vmem:[#allocation204_spill] sm:$0xff]  ;;  %v6048_v42 = vpop.permute.xlu1 %3161  ;;  %v8264_v33 = vld [vmem:[#allocation130_spill] sm:$0xff]  ;;  %v8265_v21 = vld [vmem:[#allocation209_spill] sm:$0xff] }
0x1494   : > { %v1827_v7 = vsel %vm7809_vm14, %v8261_v29, %v8260_v44  ;;  %v1691_v20 = vadd.f32 %v1672_v18, %v1617_v47  ;;  %v1762_v57 = vadd.f32 %v1743_v23, %v1688_v46  ;;  %v1828_v60 = vsel %vm7809_vm14, %v8260_v44, %v8262_v6  ;;  %8263 = vst [vmem:[#allocation30_spill] sm:$0xff] %v6048_v42  ;;  %v8266_v2 = vld [vmem:[#allocation138_spill] sm:$0xff]  ;;  %v8268_v44 = vld [vmem:[#allocation215_spill] sm:$0xff] }
0x1495   : > { %vm7811_vm13 = vcmask 613376   ;;  %v1763_v11 = vadd.f32 %v1744_v1, %v1689_v53  ;;  %v1829_v13 = vsel %vm7809_vm14, %v8262_v6, %v8264_v33  ;;  %v1830_v37 = vsel %vm7809_vm14, %v8264_v33, %v8265_v21  ;;  %v8269_v1 = vld [vmem:[#allocation140_spill] sm:$0xff]  ;;  %v8288_v42 = vld [vmem:[#allocation246_spill] sm:$0xff] }
0x1496   : > { %v1901_v46 = vsel %vm7811_vm13, %v8267_v26, %v8266_v2  ;;  %v1764_v47 = vadd.f32 %v1745_v35, %v1690_v30  ;;  %v1765_v18 = vadd.f32 %v1746_v12, %v1691_v20  ;;  %v1846_v23 = vadd.f32 %v1827_v7, %v1762_v57  ;;  %v8271_v30 = vld [vmem:[#allocation148_spill] sm:$0xff]  ;;  %v8273_v20 = vld [vmem:[#allocation225_spill] sm:$0xff]  ;;  %v8274_v57 = vld [vmem:[#allocation150_spill] sm:$0xff] }
0x1497   : > { %v1902_v17 = vsel %vm7811_vm13, %v8266_v2, %v8268_v44  ;;  %v1847_v53 = vadd.f32 %v1828_v60, %v1763_v11  ;;  %v1903_v6 = vsel %vm7811_vm13, %v8268_v44, %v8269_v1  ;;  %v1904_v33 = vsel %vm7811_vm13, %v8269_v1, %v8270_v5  ;;  %v8272_v35 = vld [vmem:[#allocation224_spill] sm:$0xff]  ;;  %v8275_v1 = vld [vmem:[#allocation229_spill] sm:$0xff] }
0x1498   : > { %vm7812_vm14 = vcmask 588800   ;;  %v1848_v21 = vadd.f32 %v1829_v13, %v1764_v47  ;;  %v1849_v59 = vadd.f32 %v1830_v37, %v1765_v18  ;;  %v1920_v61 = vadd.f32 %v1901_v46, %v1846_v23  ;;  %v8276_v37 = vld [vmem:[#allocation158_spill] sm:$0xff]  ;;  %v8279_v23 = vld [vmem:[#allocation235_spill] sm:$0xff] }
0x1499   : > { %v1975_v12 = vsel %vm7812_vm14, %v8272_v35, %v8271_v30  ;;  %v1921_v7 = vadd.f32 %v1902_v17, %v1847_v53  ;;  %v1976_v2 = vsel %vm7812_vm14, %v8271_v30, %v8273_v20  ;;  %v1977_v60 = vsel %vm7812_vm14, %v8273_v20, %v8274_v57  ;;  %v8277_v46 = vld [vmem:[#allocation234_spill] sm:$0xff]  ;;  %v6083_v17 = vpop.permute.xlu1 %3165  ;;  %v8280_v30 = vld [vmem:[#allocation160_spill] sm:$0xff] }
0x149a   : > { %vm7816_vm15 = vcmask 564224   ;;  %v1922_v11 = vadd.f32 %v1903_v6, %v1848_v21  ;;  %v1923_v44 = vadd.f32 %v1904_v33, %v1849_v59  ;;  %v1978_v13 = vsel %vm7812_vm14, %v8274_v57, %v8275_v1  ;;  %8278 = vst [vmem:[#allocation94_spill] sm:$0xff] %v6083_v17  ;;  %v8281_v33 = vld [vmem:[#allocation239_spill] sm:$0xff]  ;;  %v8282_v57 = vld [vmem:[#allocation168_spill] sm:$0xff] }
0x149b   : > { %v2049_v47 = vsel %vm7816_vm15, %v8277_v46, %v8276_v37  ;;  %v1994_v18 = vadd.f32 %v1975_v12, %v1920_v61  ;;  %v2050_v53 = vsel %vm7816_vm15, %v8276_v37, %v8279_v23  ;;  %v2051_v21 = vsel %vm7816_vm15, %v8279_v23, %v8280_v30  ;;  %v8283_v1 = vld [vmem:[#allocation244_spill] sm:$0xff] }
0x149c   : > { %vm7817_vm13 = vcmask 539648   ;;  %v1995_v59 = vadd.f32 %v1976_v2, %v1921_v7  ;;  %v1996_v6 = vadd.f32 %v1977_v60, %v1922_v11  ;;  %v2052_v20 = vsel %vm7816_vm15, %v8280_v30, %v8281_v33  ;;  %v8286_v2 = vld [vmem:[#allocation178_spill] sm:$0xff] }
0x149d   : > { %v2123_v5 = vsel %vm7817_vm13, %v8283_v1, %v8282_v57  ;;  %v1997_v61 = vadd.f32 %v1978_v13, %v1923_v44  ;;  %v2068_v12 = vadd.f32 %v2049_v47, %v1994_v18  ;;  %v2124_v37 = vsel %vm7817_vm13, %v8282_v57, %v8284_v39  ;;  %v8287_v60 = vld [vmem:[#allocation250_spill] sm:$0xff]  ;;  %v8289_v47 = vld [vmem:[#allocation252_spill] sm:$0xff] }
0x149e   : > { %vm7822_vm14 = vcmask 515072   ;;  %v2069_v17 = vadd.f32 %v2050_v53, %v1995_v59  ;;  %v2070_v23 = vadd.f32 %v2051_v21, %v1996_v6  ;;  %v2125_v7 = vsel %vm7817_vm13, %v8284_v39, %v8285_v51  ;;  %v8290_v53 = vld [vmem:[#allocation180_spill] sm:$0xff] }
0x149f   : > { %v2197_v11 = vsel %vm7822_vm14, %v8287_v60, %v8286_v2  ;;  %v2071_v30 = vadd.f32 %v2052_v20, %v1997_v61  ;;  %v2142_v33 = vadd.f32 %v2123_v5, %v2068_v12  ;;  %v2126_v44 = vsel %vm7817_vm13, %v8285_v51, %v8288_v42  ;;  %v8291_v21 = vld [vmem:[#allocation188_spill] sm:$0xff]  ;;  %v6118_v20 = vpop.permute.xlu1 %3169  ;;  %v8294_v61 = vld [vmem:[#allocation254_spill] sm:$0xff]  ;;  %v8295_v12 = vld [vmem:[#allocation261_spill] sm:$0xff] }
0x14a0   : > { %vm7823_vm15 = vcmask 490496   ;;  %v2143_v13 = vadd.f32 %v2124_v37, %v2069_v17  ;;  %v2198_v18 = vsel %vm7822_vm14, %v8286_v2, %v8289_v47  ;;  %v2199_v39 = vsel %vm7822_vm14, %v8289_v47, %v8290_v53  ;;  %v8292_v59 = vld [vmem:[#allocation260_spill] sm:$0xff]  ;;  %8293 = vst [vmem:[#allocation95_spill] sm:$0xff] %v6118_v20  ;;  %v8296_v2 = vld [vmem:[#allocation190_spill] sm:$0xff] }
0x14a1   : > { %v2271_v6 = vsel %vm7823_vm15, %v8292_v59, %v8291_v21  ;;  %v2144_v5 = vadd.f32 %v2125_v7, %v2070_v23  ;;  %v2216_v57 = vadd.f32 %v2197_v11, %v2142_v33  ;;  %v2200_v51 = vsel %vm7822_vm14, %v8290_v53, %v8294_v61  ;;  %v8297_v42 = vld [vmem:[#allocation198_spill] sm:$0xff]  ;;  %v8301_v61 = vld [vmem:[#allocation208_spill] sm:$0xff] }
0x14a2   : > { %vm7827_vm13 = vcmask 850944   ;;  %v2145_v17 = vadd.f32 %v2126_v44, %v2071_v30  ;;  %v2272_v37 = vsel %vm7823_vm15, %v8291_v21, %v8295_v12  ;;  %v2273_v47 = vsel %vm7823_vm15, %v8295_v12, %v8296_v2  ;;  %v8299_v53 = vld [vmem:[#allocation262_spill] sm:$0xff]  ;;  %v8300_v44 = vld [vmem:[#allocation267_spill] sm:$0xff] }
0x14a3   : > { %v2355_v43 = vsel %vm7827_vm13, %v8298_v49, %v8297_v42  ;;  %v2217_v23 = vadd.f32 %v2198_v18, %v2143_v13  ;;  %v2218_v33 = vadd.f32 %v2199_v39, %v2144_v5  ;;  %v2290_v7 = vadd.f32 %v2271_v6, %v2216_v57  ;;  %v8303_v13 = vld [vmem:[#allocation200_spill] sm:$0xff]  ;;  %v8305_v5 = vld [vmem:[#allocation273_spill] sm:$0xff]  ;;  %v8306_v57 = vld [vmem:[#allocation218_spill] sm:$0xff] }
0x14a4   : > { %vm7824_vm12 = vcmask 826368   ;;  %v2219_v11 = vadd.f32 %v2200_v51, %v2145_v17  ;;  %v2274_v30 = vsel %vm7823_vm15, %v8296_v2, %v8299_v53  ;;  %v2356_v21 = vsel %vm7827_vm13, %v8297_v42, %v8300_v44  ;;  %v8304_v39 = vld [vmem:[#allocation268_spill] sm:$0xff]  ;;  %v8307_v51 = vld [vmem:[#allocation278_spill] sm:$0xff] }
0x14a5   : > { %v2429_v12 = vsel %vm7824_vm12, %v8302_v0, %v8301_v61  ;;  %v2291_v59 = vadd.f32 %v2272_v37, %v2217_v23  ;;  %v2292_v60 = vadd.f32 %v2273_v47, %v2218_v33  ;;  %v2374_v49 = vadd.f32 %v2355_v43, %v2290_v7  ;;  %v6153_v37 = vpop.permute.xlu1 %3173  ;;  %v8308_v23 = vld [vmem:[#allocation210_spill] sm:$0xff] }
0x14a6   : > { %vm7825_vm14 = vcmask 801792   ;;  %v2357_v18 = vsel %vm7827_vm13, %v8300_v44, %v8303_v13  ;;  %v2358_v6 = vsel %vm7827_vm13, %v8303_v13, %v8304_v39  ;;  %v2430_v42 = vsel %vm7824_vm12, %v8301_v61, %v8305_v5  ;;  %v8309_v7 = vld [vmem:[#allocation274_spill] sm:$0xff]  ;;  %v8310_v13 = vld [vmem:[#allocation228_spill] sm:$0xff] }
0x14a7   : > { %v2503_v17 = vsel %vm7825_vm14, %v8307_v51, %v8306_v57  ;;  %v2293_v43 = vadd.f32 %v2274_v30, %v2219_v11  ;;  %v2375_v2 = vadd.f32 %v2356_v21, %v2291_v59  ;;  %v2448_v47 = vadd.f32 %v2429_v12, %v2374_v49  ;;  %v8311_v61 = vld [vmem:[#allocation288_spill] sm:$0xff]  ;;  %v8312_v11 = vld [vmem:[#allocation279_spill] sm:$0xff]  ;;  %v8314_v21 = vld [vmem:[#allocation281_spill] sm:$0xff] }
0x14a8   : > { %vm7826_vm15 = vcmask 777216   ;;  %v2431_v33 = vsel %vm7824_vm12, %v8305_v5, %v8308_v23  ;;  %v2432_v44 = vsel %vm7824_vm12, %v8308_v23, %v8309_v7  ;;  %v2376_v53 = vadd.f32 %v2357_v18, %v2292_v60  ;;  %v8313_v59 = vld [vmem:[#allocation220_spill] sm:$0xff]  ;;  %v8315_v60 = vld [vmem:[#allocation238_spill] sm:$0xff] }
0x14a9   : > { %v2577_v39 = vsel %vm7826_vm15, %v8311_v61, %v8310_v13  ;;  %v2377_v51 = vadd.f32 %v2358_v6, %v2293_v43  ;;  %v2449_v0 = vadd.f32 %v2430_v42, %v2375_v2  ;;  %v2522_v1 = vadd.f32 %v2503_v17, %v2448_v47  ;;  %v8316_v18 = vld [vmem:[#allocation294_spill] sm:$0xff]  ;;  %v8317_v42 = vld [vmem:[#allocation289_spill] sm:$0xff] }
0x14aa   : > { %v2504_v49 = vsel %vm7825_vm14, %v8306_v57, %v8312_v11  ;;  %v2505_v30 = vsel %vm7825_vm14, %v8312_v11, %v8313_v59  ;;  %v2506_v12 = vsel %vm7825_vm14, %v8313_v59, %v8314_v21  ;;  %vm7829_vm12 = vcmask 752640   ;;  %v8318_v17 = vld [vmem:[#allocation230_spill] sm:$0xff] }
0x14ab   : > { %v2450_v5 = vadd.f32 %v2431_v33, %v2376_v53  ;;  %v2451_v23 = vadd.f32 %v2432_v44, %v2377_v51  ;;  %v2596_v7 = vadd.f32 %v2577_v39, %v2522_v1  ;;  %v2651_v6 = vsel %vm7829_vm12, %v8316_v18, %v8315_v60  ;;  %v8319_v2 = vld [vmem:[#allocation290_spill] sm:$0xff]  ;;  %v6185_v53 = vpop.permute.xlu1 %3177  ;;  %v8321_v33 = vld [vmem:[#allocation255_spill] sm:$0xff]  ;;  %v8322_v44 = vld [vmem:[#allocation300_spill] sm:$0xff] }
0x14ac   : > { %v2578_v57 = vsel %vm7826_vm15, %v8310_v13, %v8317_v42  ;;  %v2579_v43 = vsel %vm7826_vm15, %v8317_v42, %v8318_v17  ;;  %v2580_v47 = vsel %vm7826_vm15, %v8318_v17, %v8319_v2  ;;  %vm7830_vm14 = vcmask 728064   ;;  %8320 = vst [vmem:[#allocation32_spill] sm:$0xff] %v6185_v53  ;;  %v8323_v13 = vld [vmem:[#allocation295_spill] sm:$0xff]  ;;  %v8324_v42 = vld [vmem:[#allocation240_spill] sm:$0xff] }
0x14ad   : > { %v2523_v1 = vadd.f32 %v2504_v49, %v2449_v0  ;;  %v2524_v39 = vadd.f32 %v2505_v30, %v2450_v5  ;;  %v2525_v51 = vadd.f32 %v2506_v12, %v2451_v23  ;;  %v2725_v11 = vsel %vm7830_vm14, %v8322_v44, %v8321_v33  ;;  %v8325_v0 = vld [vmem:[#allocation285_spill] sm:$0xff]  ;;  %v8326_v49 = vld [vmem:[#allocation306_spill] sm:$0xff]  ;;  %v8327_v12 = vld [vmem:[#allocation296_spill] sm:$0xff] }
0x14ae   : > { %v2670_v59 = vadd.f32 %v2651_v6, %v2596_v7  ;;  %v2652_v21 = vsel %vm7829_vm12, %v8315_v60, %v8323_v13  ;;  %v2653_v18 = vsel %vm7829_vm12, %v8323_v13, %v8324_v42  ;;  %vm7832_vm15 = vcmask 703488   ;;  %v8328_v23 = vld [vmem:[#allocation301_spill] sm:$0xff] }
0x14af   : > { %v2597_v17 = vadd.f32 %v2578_v57, %v2523_v1  ;;  %v2598_v2 = vadd.f32 %v2579_v43, %v2524_v39  ;;  %v2599_v61 = vadd.f32 %v2580_v47, %v2525_v51  ;;  %v2799_v30 = vsel %vm7832_vm15, %v8326_v49, %v8325_v0  ;;  %v8331_v47 = vld [vmem:[#allocation257_spill] sm:$0xff]  ;;  %v8333_v51 = vld [vmem:[#allocation312_spill] sm:$0xff] }
0x14b0   : > { %v2654_v7 = vsel %vm7829_vm12, %v8324_v42, %v8327_v12  ;;  %v2744_v5 = vadd.f32 %v2725_v11, %v2670_v59  ;;  %v2726_v60 = vsel %vm7830_vm14, %v8321_v33, %v8328_v23  ;;  %vm7834_vm13 = vcmask 15360   ;;  %v8332_v39 = vld [vmem:[#allocation317_spill] sm:$0xff]  ;;  %v8334_v11 = vld [vmem:[#allocation302_spill] sm:$0xff]  ;;  %v8335_v12 = vld [vmem:[#allocation307_spill] sm:$0xff] }
0x14b1   : > { %v2671_v57 = vadd.f32 %v2652_v21, %v2597_v17  ;;  %v2672_v43 = vadd.f32 %v2653_v18, %v2598_v2  ;;  %v2727_v1 = vsel %vm7830_vm14, %v8328_v23, %v8331_v47  ;;  %v2888_v42 = vsel %vm7834_vm13, %v8333_v51, %v8332_v39  ;;  %v8336_v2 = vld [vmem:[#allocation287_spill] sm:$0xff]  ;;  %v8338_v44 = vld [vmem:[#allocation313_spill] sm:$0xff] }
0x14b2   : > { %v2728_v59 = vsel %vm7830_vm14, %v8331_v47, %v8334_v11  ;;  %v2818_v33 = vadd.f32 %v2799_v30, %v2744_v5  ;;  %vm2957_vm12 = vcmask 1039360   ;;  %v2673_v21 = vadd.f32 %v2654_v7, %v2599_v61  ;;  %v8337_v23 = vld [vmem:[#allocation323_spill] sm:$0xff] }
0x14b3   : > { %v2745_v18 = vadd.f32 %v2726_v60, %v2671_v57  ;;  %v2801_v17 = vsel %vm7832_vm15, %v8335_v12, %v8336_v2  ;;  %v2746_v51 = vadd.f32 %v2727_v1, %v2672_v43  ;;  %v2889_v30 = vsel %vm7834_vm13, %v8332_v39, %v8338_v44  ;;  %v8339_v60 = vld [vmem:[#allocation318_spill] sm:$0xff]  ;;  %v8340_v57 = vld [vmem:[#allocation327_spill] sm:$0xff]  ;;  %v8341_v1 = vld [vmem:[#allocation308_spill] sm:$0xff] }
0x14b4   : > { %v2908_v49 = vadd.f32 %v2888_v42, %v2818_v33  ;;  %vm3031_vm14 = vcmask 1014784   ;;  %v2747_v61 = vadd.f32 %v2728_v59, %v2673_v21  ;;  %v2802_v39 = vsel %vm7832_vm15, %v8336_v2, %v8341_v1  ;;  %v8342_v59 = vld [vmem:[#allocation324_spill] sm:$0xff]  ;;  %v8343_v21 = vld [vmem:[#allocation331_spill] sm:$0xff] }
0x14b5   : > { %v3037_v43 = vsel %vm3031_vm14, %v5774_v31, %v8340_v57  ;;  %v2820_v47 = vadd.f32 %v2801_v17, %v2746_v51  ;;  %v8344_v17 = vld [vmem:[#allocation314_spill] sm:$0xff] }
0x14b6   : > { %v2891_v2 = vsel %vm7834_vm13, %v8339_v60, %v8344_v17 }
0x14cd   : > { %v6205_v6 = vpop.permute.xlu0 %3237  ;;  %v6207_v13 = vpop.permute.xlu1 %3233 }
0x14ce   : > { %8329 = vst [vmem:[#allocation38_spill] sm:$0xff] %v6205_v6  ;;  %8330 = vst [vmem:[#allocation104_spill] sm:$0xff] %v6207_v13  ;;  %v2800_v6 = vsel %vm7832_vm15, %v8325_v0, %v8335_v12  ;;  %v2963_v13 = vsel %vm2957_vm12, %v5751_v45, %v8337_v23  ;;  %v2890_v12 = vsel %vm7834_vm13, %v8338_v44, %v8339_v60  ;;  %vm3179_vm15 = vcmask 965632  }
0x14cf   : > { %v2819_v7 = vadd.f32 %v2800_v6, %v2745_v18  ;;  %v2982_v42 = vadd.f32 %v2963_v13, %v2908_v49  ;;  %v2964_v6 = vsel %vm2957_vm12, %v8337_v23, %v5755_v15  ;;  %v2965_v44 = vsel %vm2957_vm12, %v5755_v15, %v8342_v59 }
0x14d0   : > { %v3111_v18 = vsel %vm3105_vm11, %v5926_v3, %v8343_v21  ;;  %v2910_v51 = vadd.f32 %v2890_v12, %v2820_v47  ;;  %v3038_v23 = vsel %vm3031_vm14, %v8340_v57, %v5776_v38  ;;  %v3185_v12 = vsel %vm3179_vm15, %v6118_v20, %v5745_v50 }
0x14d1   : > { %v6230_v5 = vpop.permute.xlu0 %3241  ;;  %v6232_v0 = vpop.permute.xlu1 %3235  ;;  %v2909_v33 = vadd.f32 %v2889_v30, %v2819_v7  ;;  %v3056_v49 = vadd.f32 %v3037_v43, %v2982_v42  ;;  %v2821_v30 = vadd.f32 %v2802_v39, %v2747_v61  ;;  %v8345_v7 = vld [vmem:[#allocation328_spill] sm:$0xff]  ;;  %v2966_v61 = vsel %vm2957_vm12, %v8342_v59, %v5761_v63 }
0x14d2   : > { %v3039_v15 = vsel %vm3031_vm14, %v5776_v38, %v8345_v7  ;;  %v2984_v1 = vadd.f32 %v2965_v44, %v2910_v51  ;;  %v3112_v57 = vsel %vm3105_vm11, %v8343_v21, %v5961_v4  ;;  %v8346_v39 = vld [vmem:[#allocation332_spill] sm:$0xff]  ;;  %vm3253_vm13 = vcmask 941056   ;;  %v8347_v44 = vld [vmem:[#allocation337_spill] sm:$0xff] }
0x14d3   : > { %v2983_v47 = vadd.f32 %v2964_v6, %v2909_v33  ;;  %v3130_v60 = vadd.f32 %v3111_v18, %v3056_v49  ;;  %v2911_v42 = vadd.f32 %v2891_v2, %v2821_v30  ;;  %v3113_v38 = vsel %vm3105_vm11, %v5961_v4, %v8346_v39  ;;  %v4228_v63 = vld [vmem:[%s4428_s21 + $0x10] sm:$0xff] }
0x14d4   : > { %v3058_v11 = vadd.f32 %v3039_v15, %v2984_v1  ;;  %v3040_v6 = vsel %vm3031_vm14, %v8345_v7, %v5795_v24  ;;  %v3186_v59 = vsel %vm3179_vm15, %v5745_v50, %v6153_v37  ;;  %v3187_v21 = vsel %vm3179_vm15, %v6153_v37, %v8347_v44 }
0x14d5   : > { %v6255_v13 = vpop.permute.xlu1 %3239  ;;  %v3246_v43 = vpop.permute.xlu0 %3245  ;;  %v3057_v17 = vadd.f32 %v3038_v23, %v2983_v47  ;;  %v3204_v20 = vadd.f32 %v3185_v12, %v3130_v60  ;;  %v2985_v1 = vadd.f32 %v2966_v61, %v2911_v42  ;;  %v3114_v49 = vsel %vm3105_vm11, %v8346_v39, %v5993_v56  ;;  %v8365_v56 = vld [vmem:[#allocation34_spill] sm:$0xff] }
0x14d6   : > { %v3132_v51 = vadd.f32 %v3113_v38, %v3058_v11  ;;  %v3188_v37 = vsel %vm3179_vm15, %v8347_v44, %v6185_v53  ;;  %v6317_v44 = vld [vmem:[%s4428_s21 + $0x40] sm:$0xff]  ;;  %v8364_v53 = vld [vmem:[#allocation7_spill] sm:$0xff] }
0x14d7   : > { %v3131_v18 = vadd.f32 %v3112_v57, %v3057_v17  ;;  %v3059_v30 = vadd.f32 %v3040_v6, %v2985_v1  ;;  %v6313_v6 = vld [vmem:[%s4428_s21 + $0x20] sm:$0xff]  ;;  %8349 = vst [vmem:[#allocation40_spill] sm:$0xff] %v6317_v44  ;;  %v471_v24 = vsel %vm469_vm2, %v8365_v56, %v8364_v53 }
0x14d8   : > { %v3206_v50 = vadd.f32 %v3187_v21, %v3132_v51 }
0x14d9   : > { %v6275_v33 = vpop.permute.xlu1 %3243  ;;  %v3205_v23 = vadd.f32 %v3186_v59, %v3131_v18  ;;  %v3250_v7 = vpop.permute.xlu0 %3249  ;;  %v3133_v11 = vadd.f32 %v3114_v49, %v3059_v30  ;;  %v6325_v18 = vld [vmem:[%s4428_s21 + $0x50] sm:$0xff]  ;;  %v6329_v49 = vld [vmem:[%s4428_s21 + $0x38] sm:$0xff] }
0x14da   : > { %v3259_v4 = vsel %vm3253_vm13, %v6275_v33, %v3246_v43  ;;  %8351 = vst [vmem:[#allocation114_spill] sm:$0xff] %v6325_v18  ;;  %8352 = vst [vmem:[#allocation115_spill] sm:$0xff] %v6329_v49 }
0x14db   : > { %v6288_v2 = vadd.f32 %v3259_v4, %v3204_v20  ;;  %v3207_v60 = vadd.f32 %v3188_v37, %v3133_v11  ;;  %v6321_v4 = vld [vmem:[%s4428_s21 + $0x28] sm:$0xff]  ;;  %v6341_v37 = vld [vmem:[%s4428_s21 + $0x58] sm:$0xff] }
0x14dc   : > { %8350 = vst [vmem:[#allocation46_spill] sm:$0xff] %v6321_v4  ;;  %8355 = vst [vmem:[#allocation124_spill] sm:$0xff] %v6341_v37  ;;  %v6351_v11 = vld [vmem:[%s4428_s21 + $0x68] sm:$0xff] }
0x14dd   : > { %v3248_v15 = vpop.permute.xlu1 %3247  ;;  %8357 = vst [vmem:[#allocation56_spill] sm:$0xff] %v6351_v11 }
0x14de   : > { %v3260_v17 = vsel %vm3253_vm13, %v3246_v43, %v3248_v15  ;;  %v3261_v20 = vsel %vm3253_vm13, %v3248_v15, %v3250_v7  ;;  %v6309_v43 = vld [vmem:[%s4428_s21 + $0x30] sm:$0xff] }
0x14df   : > { %v6298_v12 = vadd.f32 %v3260_v17, %v3205_v23  ;;  %v6300_v47 = vadd.f32 %v3261_v20, %v3206_v50  ;;  %v6333_v23 = vld [vmem:[%s4428_s21 + $0x60] sm:$0xff] }
0x14e0   : > { %8353 = vst [vmem:[#allocation48_spill] sm:$0xff] %v6333_v23  ;;  %v6347_v20 = vld [vmem:[%s7499_s1] sm:$0xff] }
0x14e1   : > { %v6302_v42 = vpop.permute.xlu1 %3251  ;;  %8356 = vst [vmem:[#allocation125_spill] sm:$0xff] %v6347_v20 }
0x14e2   : > { %8348 = vst [vmem:[#allocation105_spill] sm:$0xff] %v6302_v42  ;;  %v3262_v61 = vsel %vm3253_vm13, %v3250_v7, %v6302_v42  ;;  %v6337_v7 = vld [vmem:[%s4428_s21 + $0x48] sm:$0xff]  ;;  %v8362_v42 = vld [vmem:[#allocation2_spill] sm:$0xff] }
0x14e3   : > { %v6306_v57 = vadd.f32 %v3262_v61, %v3207_v60  ;;  %8354 = vst [vmem:[#allocation54_spill] sm:$0xff] %v6337_v7  ;;  %v4352_v61 = vmov 43  }
0x14ea   : > { %v3285_v39 = vpop.permute.xlu0 %3284 }
0x14eb   : > { %v3289_v38 = vmul.f32 %v6309_v43, %v3285_v39  ;;  %v3287_v59 = vmul.f32 %v6313_v6, %v3285_v39  ;;  %v3291_v21 = vmul.f32 %v6317_v44, %v3285_v39  ;;  %v3288_v1 = vmul.f32 %v6321_v4, %v3285_v39  ;;  %v8372_v4 = vld [vmem:[#allocation11_spill] sm:$0xff] }
0x14ec   : > { %v3293_v51 = vmul.f32 %v6325_v18, %v3285_v39  ;;  %v3290_v30 = vmul.f32 %v6329_v49, %v3285_v39  ;;  %v3295_v50 = vmul.f32 %v6333_v23, %v3285_v39  ;;  %v3292_v15 = vmul.f32 %v6337_v7, %v3285_v39  ;;  %v8370_v49 = vld [vmem:[#allocation35_spill] sm:$0xff]  ;;  %v8371_v18 = vld [vmem:[#allocation8_spill] sm:$0xff] }
0x14ed   : > { %3311 = vrot.lane.b32.xlu0 %v3289_v38, %s4351_s22  ;;  %3307 = vrot.lane.b32.xlu1 %v3287_v59, %s4351_s22  ;;  %v3294_v17 = vmul.f32 %v6341_v37, %v3285_v39  ;;  %v3296_v60 = vmul.f32 %v6351_v11, %v3285_v39  ;;  %v8358_v38 = vld [vmem:[#allocation21_spill] sm:$0xff]  ;;  %v8359_v59 = vld [vmem:[#allocation20_spill] sm:$0xff]  ;;  %v8369_v37 = vld [vmem:[#allocation42_spill] sm:$0xff] }
0x14ee   : > { %v324_v39 = vsel %vm321_vm0, %v8358_v38, %v8362_v42 }
0x14f1   : > { %3315 = vrot.lane.b32.xlu0 %v3291_v21, %s4351_s22  ;;  %3309 = vrot.lane.b32.xlu1 %v3288_v1, %s4351_s22  ;;  %v323_v21 = vsel %vm321_vm0, %v8359_v59, %v8358_v38  ;;  %v4227_v1 = vld [vmem:[%s4428_s21 + $0x8] sm:$0xff]  ;;  %v4229_v59 = vld [vmem:[%s4428_s21 + $0x18] sm:$0xff]  ;;  %v8367_v38 = vld [vmem:[#allocation6_spill] sm:$0xff] }
0x14f5   : > { %3319 = vrot.lane.b32.xlu0 %v3293_v51, %s4351_s22  ;;  %3313 = vrot.lane.b32.xlu1 %v3290_v30, %s4351_s22  ;;  %v258_v51 = vmul.f32 %v4227_v1, %v4423_v9  ;;  %v8360_v30 = vld [vmem:[#allocation5_spill] sm:$0xff]  ;;  %v259_v1 = vmul.f32 %v4228_v63, %v4423_v9 }
0x14f7   : > { %v343_v56 = vadd.f32 %v324_v39, %v259_v1 }
0x14f9   : > { %3323 = vrot.lane.b32.xlu0 %v3295_v50, %s4351_s22  ;;  %3317 = vrot.lane.b32.xlu1 %v3292_v15, %s4351_s22  ;;  %v8361_v50 = vld [vmem:[#allocation26_spill] sm:$0xff] }
0x14fa   : > { %v397_v15 = vsel %vm395_vm1, %v8361_v50, %v8360_v30  ;;  %v260_v50 = vmul.f32 %v4229_v59, %v4423_v9 }
0x14fd   : > { %3358 = vperm.xlu0 %4201, %v6347_v20   ;;  %3321 = vrot.lane.b32.xlu1 %v3294_v17, %s4351_s22  ;;  %v342_v17 = vadd.f32 %v323_v21, %v258_v51  ;;  %v8366_v51 = vld [vmem:[#allocation27_spill] sm:$0xff] }
0x14fe   : > { %v398_v11 = vsel %vm395_vm1, %v8360_v30, %v8366_v51  ;;  %v399_v20 = vsel %vm395_vm1, %v8366_v51, %v8367_v38  ;;  %v472_v30 = vsel %vm469_vm2, %v8364_v53, %v8370_v49  ;;  %v473_v51 = vsel %vm469_vm2, %v8370_v49, %v8371_v18 }
0x14ff   : > { %v416_v21 = vadd.f32 %v397_v15, %v342_v17  ;;  %v4230_v15 = vld [vmem:[%s4428_s21 + $0x20] sm:$0xff]  ;;  %v417_v1 = vadd.f32 %v398_v11, %v343_v56  ;;  %v8378_v11 = vld [vmem:[#allocation51_spill] sm:$0xff] }
0x1500   : > { %v261_v17 = vmul.f32 %v4230_v15, %v4423_v9  ;;  %v8377_v15 = vld [vmem:[#allocation58_spill] sm:$0xff] }
0x1501   : > { %3325 = vrot.lane.b32.xlu1 %v3296_v60, %s4351_s22  ;;  %4202 = vset.pattern.permute.xlu0 %v4352_v61  ;;  %v8363_v60 = vld [vmem:[#allocation22_spill] sm:$0xff]  ;;  %v490_v59 = vadd.f32 %v471_v24, %v416_v21  ;;  %v8376_v21 = vld [vmem:[#allocation13_spill] sm:$0xff]  ;;  %v491_v56 = vadd.f32 %v472_v30, %v417_v1 }
0x1502   : > { %v325_v61 = vsel %vm321_vm0, %v8362_v42, %v8363_v60  ;;  %v8368_v42 = vld [vmem:[#allocation9_spill] sm:$0xff]  ;;  %v326_v63 = vsel %vm321_vm0, %v8363_v60, %v4563_v32  ;;  %v400_v32 = vsel %vm395_vm1, %v8367_v38, %v4702_v25  ;;  %v8374_v60 = vld [vmem:[#allocation43_spill] sm:$0xff]  ;;  %v474_v25 = vsel %vm469_vm2, %v8371_v18, %v4733_v22  ;;  %v8383_v1 = vld [vmem:[#allocation14_spill] sm:$0xff] }
0x1503   : > { %v545_v7 = vsel %vm543_vm3, %v8369_v37, %v8368_v42  ;;  %v344_v23 = vadd.f32 %v325_v61, %v260_v50  ;;  %v8373_v37 = vld [vmem:[#allocation50_spill] sm:$0xff]  ;;  %v345_v50 = vadd.f32 %v326_v63, %v261_v17  ;;  %v546_v53 = vsel %vm543_vm3, %v8368_v42, %v8374_v60  ;;  %v8379_v42 = vld [vmem:[#allocation12_spill] sm:$0xff] }
0x1504   : > { %v619_v39 = vsel %vm617_vm4, %v8373_v37, %v8372_v4  ;;  %v564_v24 = vadd.f32 %v545_v7, %v490_v59  ;;  %v8375_v61 = vld [vmem:[#allocation10_spill] sm:$0xff]  ;;  %v693_v37 = vsel %vm7853_vm5, %v8377_v15, %v8376_v21  ;;  %v620_v38 = vsel %vm617_vm4, %v8372_v4, %v8378_v11  ;;  %v8380_v59 = vld [vmem:[#allocation15_spill] sm:$0xff] }
0x1505   : > { %v418_v44 = vadd.f32 %v399_v20, %v344_v23  ;;  %v547_v49 = vsel %vm543_vm3, %v8374_v60, %v8375_v61  ;;  %v419_v20 = vadd.f32 %v400_v32, %v345_v50  ;;  %v621_v63 = vsel %vm617_vm4, %v8378_v11, %v8379_v42  ;;  %v8381_v17 = vld [vmem:[#allocation66_spill] sm:$0xff] }
0x1506   : > { %v638_v7 = vadd.f32 %v619_v39, %v564_v24  ;;  %v767_v60 = vsel %vm7850_vm6, %v8381_v17, %v8380_v59  ;;  %v565_v30 = vadd.f32 %v546_v53, %v491_v56  ;;  %v548_v22 = vsel %vm543_vm3, %v8375_v61, %v4764_v8  ;;  %v8382_v39 = vld [vmem:[#allocation59_spill] sm:$0xff]  ;;  %v8384_v24 = vld [vmem:[#allocation17_spill] sm:$0xff]  ;;  %v8385_v50 = vld [vmem:[#allocation74_spill] sm:$0xff] }
0x1507   : > { %v492_v23 = vadd.f32 %v473_v51, %v418_v44  ;;  %v493_v51 = vadd.f32 %v474_v25, %v419_v20  ;;  %v694_v4 = vsel %vm7853_vm5, %v8376_v21, %v8382_v39  ;;  %v695_v32 = vsel %vm7853_vm5, %v8382_v39, %v8383_v1  ;;  %v8386_v56 = vld [vmem:[#allocation67_spill] sm:$0xff]  ;;  %v8389_v20 = vld [vmem:[#allocation82_spill] sm:$0xff] }
0x1508   : > { %v712_v18 = vadd.f32 %v693_v37, %v638_v7  ;;  %v841_v11 = vsel %vm7851_vm7, %v8385_v50, %v8384_v24  ;;  %v639_v53 = vadd.f32 %v620_v38, %v565_v30  ;;  %v622_v8 = vsel %vm617_vm4, %v8379_v42, %v4795_v19  ;;  %v8388_v7 = vld [vmem:[#allocation23_spill] sm:$0xff] }
0x1509   : > { %v566_v44 = vadd.f32 %v547_v49, %v492_v23  ;;  %v567_v61 = vadd.f32 %v548_v22, %v493_v51  ;;  %v768_v21 = vsel %vm7850_vm6, %v8380_v59, %v8386_v56  ;;  %v8387_v23 = vld [vmem:[#allocation16_spill] sm:$0xff]  ;;  %v915_v39 = vsel %vm7852_vm8, %v8389_v20, %v8388_v7  ;;  %v8390_v30 = vld [vmem:[#allocation75_spill] sm:$0xff] }
0x150a   : > { %v786_v37 = vadd.f32 %v767_v60, %v712_v18  ;;  %v769_v25 = vsel %vm7850_vm6, %v8386_v56, %v8387_v23  ;;  %v713_v38 = vadd.f32 %v694_v4, %v639_v53  ;;  %v696_v19 = vsel %vm7853_vm5, %v8383_v1, %v4853_v62  ;;  %v8392_v18 = vld [vmem:[#allocation28_spill] sm:$0xff]  ;;  %v8394_v53 = vld [vmem:[#allocation83_spill] sm:$0xff] }
0x150b   : > { %v640_v49 = vadd.f32 %v621_v63, %v566_v44  ;;  %v641_v60 = vadd.f32 %v622_v8, %v567_v61  ;;  %v842_v59 = vsel %vm7851_vm7, %v8384_v24, %v8390_v30  ;;  %v8391_v44 = vld [vmem:[#allocation18_spill] sm:$0xff]  ;;  %v8393_v51 = vld [vmem:[#allocation92_spill] sm:$0xff]  ;;  %v770_v62 = vsel %vm7850_vm6, %v8387_v23, %v4887_v14 }
0x150c   : > { %v860_v42 = vadd.f32 %v841_v11, %v786_v37  ;;  %v843_v22 = vsel %vm7851_vm7, %v8390_v30, %v8391_v44  ;;  %v989_v56 = vsel %vm987_vm9, %v8393_v51, %v8392_v18  ;;  %v787_v4 = vadd.f32 %v768_v21, %v713_v38  ;;  %v8396_v37 = vld [vmem:[#allocation36_spill] sm:$0xff]  ;;  %v8397_v61 = vld [vmem:[#allocation102_spill] sm:$0xff]  ;;  %v8398_v38 = vld [vmem:[#allocation93_spill] sm:$0xff] }
0x150d   : > { %v714_v63 = vadd.f32 %v695_v32, %v640_v49  ;;  %v715_v11 = vadd.f32 %v696_v19, %v641_v60  ;;  %v916_v24 = vsel %vm7852_vm8, %v8388_v7, %v8394_v53  ;;  %v8395_v49 = vld [vmem:[#allocation24_spill] sm:$0xff]  ;;  %v1063_v30 = vsel %vm7854_vm10, %v8397_v61, %v8396_v37 }
0x150e   : > { %v934_v1 = vadd.f32 %v915_v39, %v860_v42  ;;  %v917_v8 = vsel %vm7852_vm8, %v8394_v53, %v8395_v49  ;;  %v861_v21 = vadd.f32 %v842_v59, %v787_v4  ;;  %v844_v14 = vsel %vm7851_vm7, %v8391_v44, %v4918_v10  ;;  %v8400_v42 = vld [vmem:[#allocation44_spill] sm:$0xff]  ;;  %v8403_v4 = vld [vmem:[#allocation103_spill] sm:$0xff] }
0x150f   : > { %v788_v32 = vadd.f32 %v769_v25, %v714_v63  ;;  %v789_v39 = vadd.f32 %v770_v62, %v715_v11  ;;  %v990_v7 = vsel %vm987_vm9, %v8392_v18, %v8398_v38  ;;  %v8399_v63 = vld [vmem:[#allocation29_spill] sm:$0xff]  ;;  %v8401_v60 = vld [vmem:[#allocation112_spill] sm:$0xff]  ;;  %vm8402_vm6 = vcmask 89088   ;;  %v8406_v11 = vld [vmem:[#allocation122_spill] sm:$0xff] }
0x1510   : > { %v1008_v23 = vadd.f32 %v989_v56, %v934_v1  ;;  %v991_v19 = vsel %vm987_vm9, %v8398_v38, %v8399_v63  ;;  %v1137_v53 = vsel %vm8402_vm6, %v8401_v60, %v8400_v42  ;;  %v935_v59 = vadd.f32 %v916_v24, %v861_v21  ;;  %v8405_v1 = vld [vmem:[#allocation52_spill] sm:$0xff]  ;;  %v8408_v21 = vld [vmem:[#allocation113_spill] sm:$0xff] }
0x1511   : > { %v862_v25 = vadd.f32 %v843_v22, %v788_v32  ;;  %v918_v10 = vsel %vm7852_vm8, %v8395_v49, %v8198_v34  ;;  %v863_v56 = vadd.f32 %v844_v14, %v789_v39  ;;  %v1064_v18 = vsel %vm7854_vm10, %v8396_v37, %v8403_v4  ;;  %v8404_v32 = vld [vmem:[#allocation37_spill] sm:$0xff]  ;;  %vm8410_vm8 = vmmov %vm8402_vm6  ;;  %v8412_v39 = vld [vmem:[#allocation132_spill] sm:$0xff] }
0x1512   : > { %v1082_v44 = vadd.f32 %v1063_v30, %v1008_v23  ;;  %v1065_v62 = vsel %vm7854_vm10, %v8403_v4, %v8404_v32  ;;  %vm8407_vm7 = vcmask 64512   ;;  %v1009_v24 = vadd.f32 %v990_v7, %v935_v59  ;;  %v8411_v23 = vld [vmem:[#allocation60_spill] sm:$0xff]  ;;  %v8414_v59 = vld [vmem:[#allocation123_spill] sm:$0xff] }
0x1513   : > { %v936_v22 = vadd.f32 %v917_v8, %v862_v25  ;;  %v1211_v38 = vsel %vm8407_vm7, %v8406_v11, %v8405_v1  ;;  %v992_v34 = vsel %vm987_vm9, %v8399_v63, %v8204_v55  ;;  %v937_v30 = vadd.f32 %v918_v10, %v863_v56  ;;  %v8409_v25 = vld [vmem:[#allocation45_spill] sm:$0xff]  ;;  %v8418_v56 = vld [vmem:[#allocation142_spill] sm:$0xff] }
0x1514   : > { %v1156_v49 = vadd.f32 %v1137_v53, %v1082_v44  ;;  %v1138_v37 = vsel %vm8402_vm6, %v8400_v42, %v8408_v21  ;;  %v1139_v14 = vsel %vm8410_vm8, %v8408_v21, %v8409_v25  ;;  %vm8413_vm5 = vcmask 424960   ;;  %vm8416_vm6 = vmmov %vm8407_vm7  ;;  %v8417_v44 = vld [vmem:[#allocation68_spill] sm:$0xff] }
0x1515   : > { %v1010_v8 = vadd.f32 %v991_v19, %v936_v22  ;;  %v1295_v4 = vsel %vm8413_vm5, %v8412_v39, %v8411_v23  ;;  %v1083_v7 = vadd.f32 %v1064_v18, %v1009_v24  ;;  %v1066_v55 = vsel %vm7854_vm10, %v8404_v32, %v8209_v54  ;;  %v8415_v22 = vld [vmem:[#allocation53_spill] sm:$0xff] }
0x1516   : > { %v1230_v63 = vadd.f32 %v1211_v38, %v1156_v49  ;;  %v1011_v53 = vadd.f32 %v992_v34, %v937_v30  ;;  %v1212_v42 = vsel %vm8407_vm7, %v8405_v1, %v8414_v59  ;;  %v1213_v10 = vsel %vm8416_vm6, %v8414_v59, %v8415_v22  ;;  %v8421_v24 = vld [vmem:[#allocation133_spill] sm:$0xff]  ;;  %v8425_v49 = vld [vmem:[#allocation76_spill] sm:$0xff] }
0x1517   : > { %v1084_v19 = vadd.f32 %v1065_v62, %v1010_v8  ;;  %vm8419_vm8 = vcmask 400384   ;;  %v1157_v18 = vadd.f32 %v1138_v37, %v1083_v7  ;;  %vm8420_vm5 = vcmask 89088   ;;  %v8423_v8 = vld [vmem:[#allocation61_spill] sm:$0xff]  ;;  %v8426_v30 = vld [vmem:[#allocation152_spill] sm:$0xff]  ;;  %v8429_v7 = vld [vmem:[#allocation143_spill] sm:$0xff] }
0x1518   : > { %v1369_v21 = vsel %vm8419_vm8, %v8418_v56, %v8417_v44  ;;  %v1140_v54 = vsel %vm8420_vm5, %v8409_v25, %v8214_v52  ;;  %v1314_v32 = vadd.f32 %v1295_v4, %v1230_v63  ;;  %v1085_v38 = vadd.f32 %v1066_v55, %v1011_v53  ;;  %v8433_v63 = vld [vmem:[#allocation86_spill] sm:$0xff] }
0x1519   : > { %v1158_v62 = vadd.f32 %v1139_v14, %v1084_v19  ;;  %vm8422_vm10 = vcmask 424960   ;;  %vm8427_vm6 = vcmask 375808   ;;  %v1231_v37 = vadd.f32 %v1212_v42, %v1157_v18  ;;  %v8431_v19 = vld [vmem:[#allocation69_spill] sm:$0xff]  ;;  %v8434_v53 = vld [vmem:[#allocation162_spill] sm:$0xff] }
0x151a   : > { %v1296_v1 = vsel %vm8422_vm10, %v8411_v23, %v8421_v24  ;;  %vm8424_vm7 = vmmov %vm8422_vm10  ;;  %v1443_v59 = vsel %vm8427_vm6, %v8426_v30, %v8425_v49  ;;  %vm8428_vm8 = vcmask 64512   ;;  %v1388_v25 = vadd.f32 %v1369_v21, %v1314_v32  ;;  %v8437_v18 = vld [vmem:[#allocation153_spill] sm:$0xff]  ;;  %v8441_v32 = vld [vmem:[#allocation96_spill] sm:$0xff] }
0x151b   : > { %v1297_v34 = vsel %vm8424_vm7, %v8421_v24, %v8423_v8  ;;  %v1232_v14 = vadd.f32 %v1213_v10, %v1158_v62  ;;  %v1214_v52 = vsel %vm8428_vm8, %v8415_v22, %v8219_v40  ;;  %v1159_v4 = vadd.f32 %v1140_v54, %v1085_v38  ;;  %v8439_v62 = vld [vmem:[#allocation77_spill] sm:$0xff]  ;;  %v8442_v38 = vld [vmem:[#allocation172_spill] sm:$0xff] }
0x151c   : > { %vm8430_vm5 = vcmask 400384   ;;  %vm8435_vm7 = vcmask 351232   ;;  %v1315_v42 = vadd.f32 %v1296_v1, %v1231_v37  ;;  %vm8436_vm6 = vcmask 424960   ;;  %v8445_v37 = vld [vmem:[#allocation163_spill] sm:$0xff] }
0x151d   : > { %v1370_v23 = vsel %vm8430_vm5, %v8417_v44, %v8429_v7  ;;  %vm8432_vm10 = vmmov %vm8430_vm5  ;;  %v1517_v24 = vsel %vm8435_vm7, %v8434_v53, %v8433_v63  ;;  %v1316_v10 = vadd.f32 %v1297_v34, %v1232_v14  ;;  %v1298_v40 = vsel %vm8436_vm6, %v8423_v8, %v8224_v41  ;;  %v8447_v14 = vld [vmem:[#allocation87_spill] sm:$0xff] }
0x151e   : > { %v1371_v55 = vsel %vm8432_vm10, %v8429_v7, %v8431_v19  ;;  %v1462_v22 = vadd.f32 %v1443_v59, %v1388_v25  ;;  %v1233_v21 = vadd.f32 %v1214_v52, %v1159_v4  ;;  %vm8438_vm8 = vcmask 375808   ;;  %v8449_v25 = vld [vmem:[#allocation106_spill] sm:$0xff] }
0x151f   : > { %v1444_v44 = vsel %vm8438_vm8, %v8425_v49, %v8437_v18  ;;  %vm8440_vm5 = vmmov %vm8438_vm8  ;;  %vm8443_vm10 = vcmask 326656   ;;  %v1389_v1 = vadd.f32 %v1370_v23, %v1315_v42  ;;  %v1390_v34 = vadd.f32 %v1371_v55, %v1316_v10  ;;  %v8450_v4 = vld [vmem:[#allocation182_spill] sm:$0xff]  ;;  %v8453_v42 = vld [vmem:[#allocation173_spill] sm:$0xff] }
0x1520   : > { %v1445_v54 = vsel %vm8440_vm5, %v8437_v18, %v8439_v62  ;;  %v1591_v7 = vsel %vm8443_vm10, %v8442_v38, %v8441_v32  ;;  %vm8444_vm7 = vcmask 400384   ;;  %v1536_v8 = vadd.f32 %v1517_v24, %v1462_v22  ;;  %v8455_v10 = vld [vmem:[#allocation97_spill] sm:$0xff]  ;;  %v8457_v22 = vld [vmem:[#allocation116_spill] sm:$0xff] }
0x1521   : > { %v1372_v41 = vsel %vm8444_vm7, %v8431_v19, %v8229_v16  ;;  %v1317_v59 = vadd.f32 %v1298_v40, %v1233_v21  ;;  %vm8446_vm6 = vcmask 351232   ;;  %vm8451_vm5 = vcmask 302080   ;;  %v8458_v21 = vld [vmem:[#allocation192_spill] sm:$0xff] }
0x1522   : > { %v1518_v49 = vsel %vm8446_vm6, %v8433_v63, %v8445_v37  ;;  %vm8448_vm8 = vmmov %vm8446_vm6  ;;  %v1665_v18 = vsel %vm8451_vm5, %v8450_v4, %v8449_v25  ;;  %v1463_v23 = vadd.f32 %v1444_v44, %v1389_v1  ;;  %v1464_v55 = vadd.f32 %v1445_v54, %v1390_v34  ;;  %v8461_v1 = vld [vmem:[#allocation183_spill] sm:$0xff] }
0x1523   : > { %v1519_v52 = vsel %vm8448_vm8, %v8445_v37, %v8447_v14  ;;  %vm8452_vm10 = vcmask 375808   ;;  %v1610_v19 = vadd.f32 %v1591_v7, %v1536_v8  ;;  %v1391_v24 = vadd.f32 %v1372_v41, %v1317_v59  ;;  %v8463_v34 = vld [vmem:[#allocation107_spill] sm:$0xff]  ;;  %v8465_v8 = vld [vmem:[#allocation126_spill] sm:$0xff] }
0x1524   : > { %v1446_v16 = vsel %vm8452_vm10, %v8439_v62, %v8234_v58  ;;  %vm8454_vm7 = vcmask 326656   ;;  %vm8459_vm8 = vcmask 277504   ;;  %v1537_v44 = vadd.f32 %v1518_v49, %v1463_v23  ;;  %v8466_v59 = vld [vmem:[#allocation202_spill] sm:$0xff]  ;;  %v8469_v23 = vld [vmem:[#allocation193_spill] sm:$0xff] }
0x1525   : > { %v1592_v63 = vsel %vm8454_vm7, %v8441_v32, %v8453_v42  ;;  %vm8456_vm6 = vmmov %vm8454_vm7  ;;  %v1739_v37 = vsel %vm8459_vm8, %v8458_v21, %v8457_v22  ;;  %v1538_v54 = vadd.f32 %v1519_v52, %v1464_v55  ;;  %vm8460_vm5 = vcmask 351232   ;;  %v8471_v55 = vld [vmem:[#allocation117_spill] sm:$0xff] }
0x1526   : > { %v1593_v40 = vsel %vm8456_vm6, %v8453_v42, %v8455_v10  ;;  %v1520_v58 = vsel %vm8460_vm5, %v8447_v14, %v8239_v36  ;;  %v1684_v62 = vadd.f32 %v1665_v18, %v1610_v19  ;;  %v1465_v7 = vadd.f32 %v1446_v16, %v1391_v24  ;;  %v8473_v19 = vld [vmem:[#allocation136_spill] sm:$0xff] }
0x1527   : > { %vm8462_vm10 = vcmask 302080   ;;  %vm8467_vm6 = vcmask 637952   ;;  %v1611_v49 = vadd.f32 %v1592_v63, %v1537_v44  ;;  %v1612_v52 = vadd.f32 %v1593_v40, %v1538_v54  ;;  %v8474_v24 = vld [vmem:[#allocation212_spill] sm:$0xff]  ;;  %v8477_v44 = vld [vmem:[#allocation203_spill] sm:$0xff] }
0x1528   : > { %v1666_v32 = vsel %vm8462_vm10, %v8449_v25, %v8461_v1  ;;  %vm8464_vm7 = vmmov %vm8462_vm10  ;;  %v1823_v42 = vsel %vm8467_vm6, %v8466_v59, %v8465_v8  ;;  %vm8468_vm8 = vcmask 326656   ;;  %v1758_v14 = vadd.f32 %v1739_v37, %v1684_v62  ;;  %v8479_v54 = vld [vmem:[#allocation127_spill] sm:$0xff]  ;;  %v8481_v62 = vld [vmem:[#allocation146_spill] sm:$0xff] }
0x1529   : > { %v1667_v41 = vsel %vm8464_vm7, %v8461_v1, %v8463_v34  ;;  %v1594_v36 = vsel %vm8468_vm8, %v8455_v10, %v8245_v28  ;;  %v1539_v18 = vadd.f32 %v1520_v58, %v1465_v7  ;;  %vm8470_vm5 = vcmask 277504   ;;  %v8482_v7 = vld [vmem:[#allocation222_spill] sm:$0xff] }
0x152a   : > { %v1740_v25 = vsel %vm8470_vm5, %v8457_v22, %v8469_v23  ;;  %vm8472_vm10 = vmmov %vm8470_vm5  ;;  %vm8475_vm7 = vcmask 613376   ;;  %v1685_v63 = vadd.f32 %v1666_v32, %v1611_v49  ;;  %v1686_v40 = vadd.f32 %v1667_v41, %v1612_v52  ;;  %v8485_v49 = vld [vmem:[#allocation213_spill] sm:$0xff] }
0x152b   : > { %v1741_v16 = vsel %vm8472_vm10, %v8469_v23, %v8471_v55  ;;  %v1897_v1 = vsel %vm8475_vm7, %v8474_v24, %v8473_v19  ;;  %vm8476_vm6 = vcmask 302080   ;;  %v1842_v10 = vadd.f32 %v1823_v42, %v1758_v14  ;;  %v8487_v52 = vld [vmem:[#allocation137_spill] sm:$0xff]  ;;  %v8489_v14 = vld [vmem:[#allocation156_spill] sm:$0xff] }
0x152c   : > { %v1668_v28 = vsel %vm8476_vm6, %v8463_v34, %v8251_v48  ;;  %v1613_v37 = vadd.f32 %v1594_v36, %v1539_v18  ;;  %vm8478_vm8 = vcmask 637952   ;;  %vm8483_vm10 = vcmask 588800   ;;  %v8490_v18 = vld [vmem:[#allocation232_spill] sm:$0xff] }
0x152d   : > { %v1824_v22 = vsel %vm8478_vm8, %v8465_v8, %v8477_v44  ;;  %vm8480_vm5 = vmmov %vm8478_vm8  ;;  %v1971_v23 = vsel %vm8483_vm10, %v8482_v7, %v8481_v62  ;;  %v1759_v32 = vadd.f32 %v1740_v25, %v1685_v63  ;;  %v1760_v41 = vadd.f32 %v1741_v16, %v1686_v40  ;;  %v8493_v63 = vld [vmem:[#allocation223_spill] sm:$0xff] }
0x152e   : > { %v1825_v58 = vsel %vm8480_vm5, %v8477_v44, %v8479_v54  ;;  %vm8484_vm7 = vcmask 277504   ;;  %v1916_v34 = vadd.f32 %v1897_v1, %v1842_v10  ;;  %v1687_v42 = vadd.f32 %v1668_v28, %v1613_v37  ;;  %v8495_v40 = vld [vmem:[#allocation147_spill] sm:$0xff]  ;;  %v8497_v10 = vld [vmem:[#allocation166_spill] sm:$0xff] }
0x152f   : > { %v1742_v48 = vsel %vm8484_vm7, %v8471_v55, %v8256_v27  ;;  %vm8486_vm6 = vcmask 613376   ;;  %vm8491_vm5 = vcmask 564224   ;;  %v1843_v25 = vadd.f32 %v1824_v22, %v1759_v32  ;;  %v8498_v37 = vld [vmem:[#allocation242_spill] sm:$0xff]  ;;  %v8501_v32 = vld [vmem:[#allocation233_spill] sm:$0xff] }
0x1530   : > { %v1898_v8 = vsel %vm8486_vm6, %v8473_v19, %v8485_v49  ;;  %vm8488_vm8 = vmmov %vm8486_vm6  ;;  %v2045_v44 = vsel %vm8491_vm5, %v8490_v18, %v8489_v14  ;;  %v1844_v16 = vadd.f32 %v1825_v58, %v1760_v41  ;;  %vm8492_vm10 = vcmask 637952   ;;  %v8503_v41 = vld [vmem:[#allocation157_spill] sm:$0xff] }
0x1531   : > { %v1899_v36 = vsel %vm8488_vm8, %v8485_v49, %v8487_v52  ;;  %v1826_v27 = vsel %vm8492_vm10, %v8479_v54, %v8261_v29  ;;  %v1990_v55 = vadd.f32 %v1971_v23, %v1916_v34  ;;  %v1761_v1 = vadd.f32 %v1742_v48, %v1687_v42  ;;  %v8505_v34 = vld [vmem:[#allocation176_spill] sm:$0xff] }
0x1532   : > { %vm8494_vm7 = vcmask 588800   ;;  %vm8499_vm8 = vcmask 539648   ;;  %v1917_v22 = vadd.f32 %v1898_v8, %v1843_v25  ;;  %v1918_v58 = vadd.f32 %v1899_v36, %v1844_v16  ;;  %v8506_v42 = vld [vmem:[#allocation248_spill] sm:$0xff]  ;;  %v8509_v25 = vld [vmem:[#allocation243_spill] sm:$0xff] }
0x1533   : > { %v1972_v19 = vsel %vm8494_vm7, %v8481_v62, %v8493_v63  ;;  %vm8496_vm6 = vmmov %vm8494_vm7  ;;  %v2119_v49 = vsel %vm8499_vm8, %v8498_v37, %v8497_v10  ;;  %vm8500_vm5 = vcmask 613376   ;;  %v2064_v54 = vadd.f32 %v2045_v44, %v1990_v55  ;;  %v8511_v16 = vld [vmem:[#allocation167_spill] sm:$0xff]  ;;  %v8513_v55 = vld [vmem:[#allocation186_spill] sm:$0xff] }
0x1534   : > { %v1973_v28 = vsel %vm8496_vm6, %v8493_v63, %v8495_v40  ;;  %v1900_v29 = vsel %vm8500_vm5, %v8487_v52, %v8267_v26  ;;  %v1845_v23 = vadd.f32 %v1826_v27, %v1761_v1  ;;  %vm8502_vm10 = vcmask 564224   ;;  %v8514_v1 = vld [vmem:[#allocation258_spill] sm:$0xff] }
0x1535   : > { %v2046_v62 = vsel %vm8502_vm10, %v8489_v14, %v8501_v32  ;;  %vm8504_vm7 = vmmov %vm8502_vm10  ;;  %vm8507_vm6 = vcmask 515072   ;;  %v1991_v8 = vadd.f32 %v1972_v19, %v1917_v22  ;;  %v1992_v36 = vadd.f32 %v1973_v28, %v1918_v58  ;;  %v8517_v22 = vld [vmem:[#allocation249_spill] sm:$0xff] }
0x1536   : > { %v2047_v48 = vsel %vm8504_vm7, %v8501_v32, %v8503_v41  ;;  %v2193_v63 = vsel %vm8507_vm6, %v8506_v42, %v8505_v34  ;;  %vm8508_vm8 = vcmask 588800   ;;  %v2138_v52 = vadd.f32 %v2119_v49, %v2064_v54  ;;  %v8519_v58 = vld [vmem:[#allocation177_spill] sm:$0xff]  ;;  %v8521_v54 = vld [vmem:[#allocation196_spill] sm:$0xff] }
0x1537   : > { %v1974_v26 = vsel %vm8508_vm8, %v8495_v40, %v8272_v35  ;;  %v1919_v44 = vadd.f32 %v1900_v29, %v1845_v23  ;;  %vm8510_vm5 = vcmask 539648   ;;  %vm8515_vm7 = vcmask 490496   ;;  %v8522_v23 = vld [vmem:[#allocation264_spill] sm:$0xff] }
0x1538   : > { %v2120_v14 = vsel %vm8510_vm5, %v8497_v10, %v8509_v25  ;;  %vm8512_vm10 = vmmov %vm8510_vm5  ;;  %v2267_v32 = vsel %vm8515_vm7, %v8514_v1, %v8513_v55  ;;  %v2065_v19 = vadd.f32 %v2046_v62, %v1991_v8  ;;  %v2066_v28 = vadd.f32 %v2047_v48, %v1992_v36  ;;  %v8524_v8 = vld [vmem:[#allocation244_spill] sm:$0xff]  ;;  %v8526_v36 = vld [vmem:[#allocation259_spill] sm:$0xff] }
0x1539   : > { %v2121_v27 = vsel %vm8512_vm10, %v8509_v25, %v8511_v16  ;;  %vm8516_vm6 = vcmask 564224   ;;  %v2212_v40 = vadd.f32 %v2193_v63, %v2138_v52  ;;  %v1993_v49 = vadd.f32 %v1974_v26, %v1919_v44  ;;  %v8528_v26 = vld [vmem:[#allocation187_spill] sm:$0xff]  ;;  %v8530_v44 = vld [vmem:[#allocation206_spill] sm:$0xff] }
0x153a   : > { %v2048_v35 = vsel %vm8516_vm6, %v8503_v41, %v8277_v46  ;;  %vm8518_vm8 = vcmask 515072   ;;  %vm8523_vm10 = vcmask 850944   ;;  %v2139_v62 = vadd.f32 %v2120_v14, %v2065_v19  ;;  %v8533_v19 = vld [vmem:[#allocation250_spill] sm:$0xff] }
0x153b   : > { %v2194_v10 = vsel %vm8518_vm8, %v8505_v34, %v8517_v22  ;;  %vm8520_vm5 = vmmov %vm8518_vm8  ;;  %v2351_v25 = vsel %vm8523_vm10, %v8522_v23, %v8521_v54  ;;  %v2140_v48 = vadd.f32 %v2121_v27, %v2066_v28  ;;  %vm8525_vm7 = vcmask 539648  }
0x153c   : > { %v2195_v29 = vsel %vm8520_vm5, %v8517_v22, %v8519_v58  ;;  %v2122_v46 = vsel %vm8525_vm7, %v8511_v16, %v8524_v8  ;;  %v2286_v41 = vadd.f32 %v2267_v32, %v2212_v40  ;;  %v2067_v63 = vadd.f32 %v2048_v35, %v1993_v49  ;;  %v8531_v22 = vld [vmem:[#allocation270_spill] sm:$0xff]  ;;  %v8535_v35 = vld [vmem:[#allocation265_spill] sm:$0xff]  ;;  %v8539_v8 = vld [vmem:[#allocation216_spill] sm:$0xff] }
0x153d   : > { %vm8527_vm6 = vcmask 490496   ;;  %vm8532_vm5 = vcmask 826368   ;;  %v2213_v14 = vadd.f32 %v2194_v10, %v2139_v62  ;;  %v2214_v27 = vadd.f32 %v2195_v29, %v2140_v48  ;;  %v8537_v40 = vld [vmem:[#allocation197_spill] sm:$0xff]  ;;  %v8542_v62 = vld [vmem:[#allocation260_spill] sm:$0xff] }
0x153e   : > { %v2268_v34 = vsel %vm8527_vm6, %v8513_v55, %v8526_v36  ;;  %vm8529_vm8 = vmmov %vm8527_vm6  ;;  %v2425_v23 = vsel %vm8532_vm5, %v8531_v22, %v8530_v44  ;;  %vm8534_vm10 = vcmask 515072   ;;  %v2370_v32 = vadd.f32 %v2351_v25, %v2286_v41  ;;  %v8546_v41 = vld [vmem:[#allocation207_spill] sm:$0xff] }
0x153f   : > { %v2269_v52 = vsel %vm8529_vm8, %v8526_v36, %v8528_v26  ;;  %v2196_v16 = vsel %vm8534_vm10, %v8519_v58, %v8533_v19  ;;  %v2141_v28 = vadd.f32 %v2122_v46, %v2067_v63  ;;  %vm8536_vm7 = vcmask 850944   ;;  %v8540_v36 = vld [vmem:[#allocation276_spill] sm:$0xff]  ;;  %v8544_v46 = vld [vmem:[#allocation271_spill] sm:$0xff]  ;;  %v8548_v19 = vld [vmem:[#allocation226_spill] sm:$0xff] }
0x1540   : > { %v2352_v55 = vsel %vm8536_vm7, %v8521_v54, %v8535_v35  ;;  %vm8538_vm6 = vmmov %vm8536_vm7  ;;  %vm8541_vm8 = vcmask 801792   ;;  %v2287_v10 = vadd.f32 %v2268_v34, %v2213_v14  ;;  %v2288_v29 = vadd.f32 %v2269_v52, %v2214_v27  ;;  %v8551_v14 = vld [vmem:[#allocation266_spill] sm:$0xff] }
0x1541   : > { %v2353_v49 = vsel %vm8538_vm6, %v8535_v35, %v8537_v40  ;;  %v2499_v22 = vsel %vm8541_vm8, %v8540_v36, %v8539_v8  ;;  %vm8543_vm5 = vcmask 490496   ;;  %v2444_v25 = vadd.f32 %v2425_v23, %v2370_v32  ;;  %v8549_v35 = vld [vmem:[#allocation284_spill] sm:$0xff]  ;;  %v8555_v32 = vld [vmem:[#allocation217_spill] sm:$0xff] }
0x1542   : > { %v2270_v58 = vsel %vm8543_vm5, %v8528_v26, %v8542_v62  ;;  %v2215_v48 = vadd.f32 %v2196_v16, %v2141_v28  ;;  %vm8545_vm10 = vcmask 826368   ;;  %vm8550_vm6 = vcmask 777216   ;;  %v8553_v16 = vld [vmem:[#allocation277_spill] sm:$0xff]  ;;  %v8557_v62 = vld [vmem:[#allocation236_spill] sm:$0xff] }
0x1543   : > { %v2426_v54 = vsel %vm8545_vm10, %v8530_v44, %v8544_v46  ;;  %vm8547_vm7 = vmmov %vm8545_vm10  ;;  %v2573_v36 = vsel %vm8550_vm6, %v8549_v35, %v8548_v19  ;;  %v2371_v34 = vadd.f32 %v2352_v55, %v2287_v10  ;;  %v2372_v52 = vadd.f32 %v2353_v49, %v2288_v29  ;;  %v8560_v10 = vld [vmem:[#allocation272_spill] sm:$0xff] }
0x1544   : > { %v2427_v63 = vsel %vm8547_vm7, %v8544_v46, %v8546_v41  ;;  %vm8552_vm8 = vcmask 850944   ;;  %v2518_v23 = vadd.f32 %v2499_v22, %v2444_v25  ;;  %v2289_v27 = vadd.f32 %v2270_v58, %v2215_v48  ;;  %v8558_v46 = vld [vmem:[#allocation292_spill] sm:$0xff]  ;;  %v8562_v58 = vld [vmem:[#allocation286_spill] sm:$0xff]  ;;  %v8564_v25 = vld [vmem:[#allocation227_spill] sm:$0xff] }
0x1545   : > { %v2354_v26 = vsel %vm8552_vm8, %v8537_v40, %v8551_v14  ;;  %vm8554_vm5 = vcmask 801792   ;;  %vm8559_vm7 = vcmask 752640   ;;  %v2445_v55 = vadd.f32 %v2426_v54, %v2371_v34  ;;  %v8566_v14 = vld [vmem:[#allocation251_spill] sm:$0xff]  ;;  %v8569_v34 = vld [vmem:[#allocation278_spill] sm:$0xff] }
0x1546   : > { %v2500_v44 = vsel %vm8554_vm5, %v8539_v8, %v8553_v16  ;;  %vm8556_vm10 = vmmov %vm8554_vm5  ;;  %v2647_v35 = vsel %vm8559_vm7, %v8558_v46, %v8557_v62  ;;  %v2446_v49 = vadd.f32 %v2427_v63, %v2372_v52  ;;  %vm8561_vm6 = vcmask 826368  }
0x1547   : > { %v2501_v28 = vsel %vm8556_vm10, %v8553_v16, %v8555_v32  ;;  %v2428_v40 = vsel %vm8561_vm6, %v8546_v41, %v8560_v10  ;;  %v2592_v22 = vadd.f32 %v2573_v36, %v2518_v23  ;;  %v2373_v29 = vadd.f32 %v2354_v26, %v2289_v27  ;;  %v8567_v16 = vld [vmem:[#allocation298_spill] sm:$0xff]  ;;  %v8571_v26 = vld [vmem:[#allocation293_spill] sm:$0xff]  ;;  %v8575_v10 = vld [vmem:[#allocation280_spill] sm:$0xff] }
0x1548   : > { %vm8563_vm8 = vcmask 777216   ;;  %vm8568_vm10 = vcmask 728064   ;;  %v2519_v54 = vadd.f32 %v2500_v44, %v2445_v55  ;;  %v2520_v63 = vadd.f32 %v2501_v28, %v2446_v49  ;;  %v8573_v23 = vld [vmem:[#allocation237_spill] sm:$0xff]  ;;  %v8578_v55 = vld [vmem:[#allocation288_spill] sm:$0xff] }
0x1549   : > { %v2574_v8 = vsel %vm8563_vm8, %v8548_v19, %v8562_v58  ;;  %vm8565_vm5 = vmmov %vm8563_vm8  ;;  %v2721_v46 = vsel %vm8568_vm10, %v8567_v16, %v8566_v14  ;;  %vm8570_vm7 = vcmask 801792   ;;  %v2666_v36 = vadd.f32 %v2647_v35, %v2592_v22  ;;  %v8582_v22 = vld [vmem:[#allocation253_spill] sm:$0xff] }
0x154a   : > { %v2575_v48 = vsel %vm8565_vm5, %v8562_v58, %v8564_v25  ;;  %v2502_v41 = vsel %vm8570_vm7, %v8555_v32, %v8569_v34  ;;  %v2447_v52 = vadd.f32 %v2428_v40, %v2373_v29  ;;  %vm8572_vm6 = vcmask 752640   ;;  %v8576_v58 = vld [vmem:[#allocation304_spill] sm:$0xff]  ;;  %v8580_v40 = vld [vmem:[#allocation299_spill] sm:$0xff] }
0x154b   : > { %v2648_v19 = vsel %vm8572_vm6, %v8557_v62, %v8571_v26  ;;  %vm8574_vm8 = vmmov %vm8572_vm6  ;;  %vm8577_vm5 = vcmask 703488   ;;  %v2593_v44 = vadd.f32 %v2574_v8, %v2519_v54  ;;  %v2594_v28 = vadd.f32 %v2575_v48, %v2520_v63  ;;  %v8584_v34 = vld [vmem:[#allocation315_spill] sm:$0xff]  ;;  %v8587_v54 = vld [vmem:[#allocation294_spill] sm:$0xff] }
0x154c   : > { %v2649_v27 = vsel %vm8574_vm8, %v8571_v26, %v8573_v23  ;;  %v2795_v16 = vsel %vm8577_vm5, %v8576_v58, %v8575_v10  ;;  %vm8579_vm10 = vcmask 777216   ;;  %v2740_v35 = vadd.f32 %v2721_v46, %v2666_v36  ;;  %v8585_v26 = vld [vmem:[#allocation310_spill] sm:$0xff]  ;;  %v8591_v36 = vld [vmem:[#allocation283_spill] sm:$0xff] }
0x154d   : > { %v2576_v32 = vsel %vm8579_vm10, %v8564_v25, %v8578_v55  ;;  %v2521_v49 = vadd.f32 %v2502_v41, %v2447_v52  ;;  %vm8581_vm7 = vcmask 728064   ;;  %vm8586_vm8 = vcmask 15360   ;;  %v8589_v41 = vld [vmem:[#allocation305_spill] sm:$0xff] }
0x154e   : > { %v2722_v62 = vsel %vm8581_vm7, %v8566_v14, %v8580_v40  ;;  %vm8583_vm6 = vmmov %vm8581_vm7  ;;  %v2884_v58 = vsel %vm8586_vm8, %v8585_v26, %v8584_v34  ;;  %v2667_v8 = vadd.f32 %v2648_v19, %v2593_v44  ;;  %v2668_v48 = vadd.f32 %v2649_v27, %v2594_v28  ;;  %v8593_v55 = vld [vmem:[#allocation321_spill] sm:$0xff]  ;;  %v8595_v44 = vld [vmem:[#allocation300_spill] sm:$0xff] }
0x154f   : > { %v2723_v29 = vsel %vm8583_vm6, %v8580_v40, %v8582_v22  ;;  %vm8588_vm5 = vcmask 752640   ;;  %v2814_v46 = vadd.f32 %v2795_v16, %v2740_v35  ;;  %v2595_v63 = vadd.f32 %v2576_v32, %v2521_v49  ;;  %v8594_v40 = vld [vmem:[#allocation335_spill] sm:$0xff]  ;;  %v8597_v35 = vld [vmem:[#allocation316_spill] sm:$0xff] }
0x1550   : > { %v2650_v25 = vsel %vm8588_vm5, %v8573_v23, %v8587_v54  ;;  %vm8590_vm10 = vcmask 703488   ;;  %v2959_v26 = vsel %vm2957_vm12, %v8594_v40, %v8593_v55  ;;  %v2741_v19 = vadd.f32 %v2722_v62, %v2667_v8  ;;  %v8596_v32 = vld [vmem:[#allocation311_spill] sm:$0xff]  ;;  %vm8598_vm5 = vmmov %vm8586_vm8  ;;  %v8599_v54 = vld [vmem:[#allocation325_spill] sm:$0xff] }
0x1551   : > { %v2796_v14 = vsel %vm8590_vm10, %v8575_v10, %v8589_v41  ;;  %vm8592_vm7 = vmmov %vm8590_vm10  ;;  %v2742_v27 = vadd.f32 %v2723_v29, %v2668_v48  ;;  %v2724_v23 = vsel %vm8583_vm6, %v8582_v22, %v8595_v44  ;;  %v2904_v16 = vadd.f32 %v2884_v58, %v2814_v46  ;;  %v8601_v8 = vld [vmem:[#allocation306_spill] sm:$0xff]  ;;  %v8605_v44 = vld [vmem:[#allocation329_spill] sm:$0xff] }
0x1552   : > { %v2797_v52 = vsel %vm8592_vm7, %v8589_v41, %v8591_v36  ;;  %v2669_v28 = vadd.f32 %v2650_v25, %v2595_v63  ;;  %v2885_v10 = vsel %vm8586_vm8, %v8584_v34, %v8596_v32  ;;  %v2886_v49 = vsel %vm8598_vm5, %v8596_v32, %v8597_v35  ;;  %v8600_v41 = vld [vmem:[#allocation340_spill] sm:$0xff]  ;;  %vm8602_vm10 = vmmov %vm8592_vm7  ;;  %v8604_v46 = vld [vmem:[#allocation322_spill] sm:$0xff] }
0x1553   : > { %v3033_v40 = vsel %vm3031_vm14, %v8600_v41, %v8599_v54  ;;  %v2815_v62 = vadd.f32 %v2796_v14, %v2741_v19  ;;  %v2816_v29 = vadd.f32 %v2797_v52, %v2742_v27  ;;  %v2798_v22 = vsel %vm8602_vm10, %v8591_v36, %v8601_v8  ;;  %v8603_v25 = vld [vmem:[#allocation336_spill] sm:$0xff]  ;;  %vm8608_vm7 = vmmov %vm8598_vm5  ;;  %v8611_v8 = vld [vmem:[#allocation333_spill] sm:$0xff] }
0x1554   : > { %v2978_v58 = vadd.f32 %v2959_v26, %v2904_v16  ;;  %v2743_v48 = vadd.f32 %v2724_v23, %v2669_v28  ;;  %v2960_v34 = vsel %vm2957_vm12, %v8593_v55, %v8603_v25  ;;  %v2961_v63 = vsel %vm2957_vm12, %v8603_v25, %v8604_v46  ;;  %v8606_v32 = vld [vmem:[#allocation344_spill] sm:$0xff]  ;;  %v8609_v23 = vld [vmem:[#allocation341_spill] sm:$0xff]  ;;  %v8610_v16 = vld [vmem:[#allocation326_spill] sm:$0xff] }
0x1555   : > { %v3107_v41 = vsel %vm3105_vm11, %v8606_v32, %v8605_v44  ;;  %v2905_v14 = vadd.f32 %v2885_v10, %v2815_v62  ;;  %v2906_v52 = vadd.f32 %v2886_v49, %v2816_v29  ;;  %v8607_v19 = vld [vmem:[#allocation312_spill] sm:$0xff]  ;;  %v3034_v55 = vsel %vm3031_vm14, %v8599_v54, %v8609_v23  ;;  %v8612_v25 = vld [vmem:[#allocation30_spill] sm:$0xff] }
0x1556   : > { %v2887_v36 = vsel %vm8608_vm7, %v8597_v35, %v8607_v19  ;;  %v3052_v26 = vadd.f32 %v3033_v40, %v2978_v58  ;;  %v2817_v27 = vadd.f32 %v2798_v22, %v2743_v48  ;;  %v3035_v28 = vsel %vm3031_vm14, %v8609_v23, %v8610_v16  ;;  %v8613_v58 = vld [vmem:[#allocation84_spill] sm:$0xff]  ;;  %v8614_v48 = vld [vmem:[#allocation330_spill] sm:$0xff] }
0x1557   : > { %v3181_v32 = vsel %vm3179_vm15, %v8612_v25, %v8611_v8  ;;  %v2979_v10 = vadd.f32 %v2960_v34, %v2905_v14  ;;  %v2962_v49 = vsel %vm2957_vm12, %v8604_v46, %v5751_v45  ;;  %v2980_v35 = vadd.f32 %v2961_v63, %v2906_v52  ;;  %v8615_v23 = vld [vmem:[#allocation38_spill] sm:$0xff] }
0x1558   : > { %v3126_v40 = vadd.f32 %v3107_v41, %v3052_v26  ;;  %v2907_v22 = vadd.f32 %v2887_v36, %v2817_v27  ;;  %v3108_v54 = vsel %vm3105_vm11, %v8605_v44, %v8613_v58  ;;  %v3109_v19 = vsel %vm3105_vm11, %v8613_v58, %v8614_v48  ;;  %v8616_v63 = vld [vmem:[#allocation94_spill] sm:$0xff] }
0x1559   : > { %v3255_v34 = vsel %vm3253_vm13, %v6232_v0, %v8615_v23  ;;  %v3053_v14 = vadd.f32 %v3034_v55, %v2979_v10  ;;  %v3054_v25 = vadd.f32 %v3035_v28, %v2980_v35  ;;  %vm3327_vm6 = vcmask 916480   ;;  %v8617_v52 = vld [vmem:[#allocation334_spill] sm:$0xff] }
0x155a   : > { %v3200_v45 = vadd.f32 %v3181_v32, %v3126_v40  ;;  %v2981_v41 = vadd.f32 %v2962_v49, %v2907_v22  ;;  %v3036_v46 = vsel %vm3031_vm14, %v8610_v16, %v5774_v31  ;;  %v3182_v44 = vsel %vm3179_vm15, %v8611_v8, %v8616_v63  ;;  %v8618_v22 = vld [vmem:[#allocation95_spill] sm:$0xff] }
0x155b   : > { %v3183_v36 = vsel %vm3179_vm15, %v8616_v63, %v8617_v52  ;;  %v3127_v26 = vadd.f32 %v3108_v54, %v3053_v14  ;;  %v3128_v27 = vadd.f32 %v3109_v19, %v3054_v25  ;;  %v3110_v32 = vsel %vm3105_vm11, %v8614_v48, %v5926_v3 }
0x155c   : > { %v3274_v55 = vadd.f32 %v3255_v34, %v3200_v45  ;;  %v3256_v31 = vsel %vm3253_vm13, %v8615_v23, %v6255_v13  ;;  %v3257_v16 = vsel %vm3253_vm13, %v6255_v13, %v6230_v5  ;;  %v3055_v49 = vadd.f32 %v3036_v46, %v2981_v41 }
0x155d   : > { %v3201_v35 = vadd.f32 %v3182_v44, %v3127_v26  ;;  %v3202_v40 = vadd.f32 %v3183_v36, %v3128_v27  ;;  %v3184_v58 = vsel %vm3179_vm15, %v8617_v52, %v8618_v22  ;;  %v3258_v13 = vsel %vm3253_vm13, %v6230_v5, %v6275_v33  ;;  %v8621_v22 = vld [vmem:[#allocation114_spill] sm:$0xff] }
0x155e   : > { %v3129_v54 = vadd.f32 %v3110_v32, %v3055_v49  ;;  %vm8650_vm8 = vcmask 89088   ;;  %vm8652_vm5 = vcmask 64512   ;;  %vm8654_vm10 = vcmask 424960  }
0x155f   : > { %v3312_v62 = vpop.permute.xlu0 %3311  ;;  %v3308_v29 = vpop.permute.xlu1 %3307  ;;  %v3275_v48 = vadd.f32 %v3256_v31, %v3201_v35  ;;  %v3276_v19 = vadd.f32 %v3257_v16, %v3202_v40  ;;  %vm8658_vm7 = vcmask 375808  }
0x1560   : > { %v3203_v14 = vadd.f32 %v3184_v58, %v3129_v54  ;;  %v8622_v54 = vld [vmem:[#allocation115_spill] sm:$0xff] }
0x1562   : > { %v3277_v63 = vadd.f32 %v3258_v13, %v3203_v14 }
0x1563   : > { %v3316_v28 = vpop.permute.xlu0 %3315  ;;  %v3310_v10 = vpop.permute.xlu1 %3309 }
0x1564   : > { %v6837_v8 = vsel %vm3327_vm6, %v3308_v29, %v3310_v10  ;;  %v3329_v25 = vsel %vm3327_vm6, %v3310_v10, %v3312_v62 }
0x1565   : > { %v6840_v3 = vadd.f32 %v3329_v25, %v3274_v55 }
0x1567   : > { %v3314_v23 = vpop.permute.xlu1 %3313  ;;  %v3320_v45 = vpop.permute.xlu0 %3319 }
0x1568   : > { %v3330_v29 = vsel %vm3327_vm6, %v3312_v62, %v3314_v23  ;;  %v3331_v34 = vsel %vm3327_vm6, %v3314_v23, %v3316_v28  ;;  %v8625_v23 = vld [vmem:[#allocation124_spill] sm:$0xff] }
0x1569   : > { %v6850_v41 = vadd.f32 %v3330_v29, %v3275_v48  ;;  %v6852_v46 = vadd.f32 %v3331_v34, %v3276_v19  ;;  %v8624_v19 = vld [vmem:[#allocation54_spill] sm:$0xff]  ;;  %v8626_v29 = vld [vmem:[#allocation125_spill] sm:$0xff]  ;;  %v8627_v34 = vld [vmem:[#allocation56_spill] sm:$0xff] }
0x156b   : > { %v3318_v44 = vpop.permute.xlu1 %3317  ;;  %v3324_v33 = vpop.permute.xlu0 %3323 }
0x156c   : > { %v3332_v52 = vsel %vm3327_vm6, %v3316_v28, %v3318_v44  ;;  %v3333_v36 = vsel %vm3327_vm6, %v3318_v44, %v3320_v45  ;;  %v8628_v44 = vld [vmem:[#allocation20_spill] sm:$0xff] }
0x156d   : > { %v6856_v26 = vadd.f32 %v3332_v52, %v3277_v63  ;;  %v6859_v5 = vadd.f32 %v3333_v36, %v6288_v2  ;;  %v4355_v63 = vmov 44   ;;  %v8629_v52 = vld [vmem:[#allocation19_spill] sm:$0xff] }
0x156e   : > { %4203 = vset.pattern.permute.xlu1 %v4355_v63  ;;  %v322_v36 = vsel %vm321_vm0, %v8629_v52, %v8628_v44  ;;  %vm8639_vm0 = vcmask 900096   ;;  %v8644_v52 = vld [vmem:[#allocation81_spill] sm:$0xff] }
0x156f   : > { %v3322_v62 = vpop.permute.xlu1 %3321 }
0x1570   : > { %v3334_v27 = vsel %vm3327_vm6, %v3320_v45, %v3322_v62  ;;  %v3335_v32 = vsel %vm3327_vm6, %v3322_v62, %v3324_v33  ;;  %v4354_v45 = vmov 45  }
0x1571   : > { %v6864_v55 = vadd.f32 %v3334_v27, %v6298_v12  ;;  %v6867_v10 = vadd.f32 %v3335_v32, %v6300_v47  ;;  %v8619_v12 = vld [vmem:[#allocation40_spill] sm:$0xff]  ;;  %v8620_v47 = vld [vmem:[#allocation46_spill] sm:$0xff] }
0x1572   : > { %v8630_v27 = vld [vmem:[#allocation26_spill] sm:$0xff]  ;;  %v8631_v32 = vld [vmem:[#allocation4_spill] sm:$0xff] }
0x1573   : > { %v6869_v28 = vpop.permute.xlu1 %3325 }
0x1574   : > { %v3336_v31 = vsel %vm3327_vm6, %v3324_v33, %v6869_v28  ;;  %v4231_v33 = vld [vmem:[%s4428_s21] sm:$0xff]  ;;  %vm8660_vm6 = vcmask 351232  }
0x1575   : > { %v6874_v2 = vadd.f32 %v3336_v31, %v6306_v57  ;;  %v8623_v57 = vld [vmem:[#allocation48_spill] sm:$0xff]  ;;  %v257_v62 = vmul.f32 %v4231_v33, %v4423_v9  ;;  %v396_v31 = vsel %vm395_vm1, %v8631_v32, %v8630_v27  ;;  %vm8641_vm1 = vcmask 211968   ;;  %v8647_v32 = vld [vmem:[#allocation101_spill] sm:$0xff] }
0x157c   : > { %v3359_v16 = vpop.permute.xlu0 %3358 }
0x157d   : > { %v3363_v25 = vmul.f32 %v6309_v43, %v3359_v16  ;;  %v3361_v49 = vmul.f32 %v6313_v6, %v3359_v16  ;;  %v3365_v35 = vmul.f32 %v8619_v12, %v3359_v16  ;;  %v3362_v40 = vmul.f32 %v8620_v47, %v3359_v16  ;;  %v8633_v12 = vld [vmem:[#allocation33_spill] sm:$0xff]  ;;  %v8634_v47 = vld [vmem:[#allocation42_spill] sm:$0xff] }
0x157e   : > { %v3367_v58 = vmul.f32 %v8621_v22, %v3359_v16  ;;  %v3364_v48 = vmul.f32 %v8622_v54, %v3359_v16  ;;  %v3369_v43 = vmul.f32 %v8623_v57, %v3359_v16  ;;  %v3366_v6 = vmul.f32 %v8624_v19, %v3359_v16  ;;  %v8636_v54 = vld [vmem:[#allocation50_spill] sm:$0xff]  ;;  %v8638_v19 = vld [vmem:[#allocation57_spill] sm:$0xff] }
0x157f   : > { %3385 = vrot.lane.b32.xlu0 %v3363_v25, %s4353_s25  ;;  %3381 = vrot.lane.b32.xlu1 %v3361_v49, %s4353_s25  ;;  %v3368_v13 = vmul.f32 %v8625_v23, %v3359_v16  ;;  %v3370_v14 = vmul.f32 %v8627_v34, %v3359_v16  ;;  %v341_v25 = vadd.f32 %v322_v36, %v257_v62  ;;  %v8632_v49 = vld [vmem:[#allocation34_spill] sm:$0xff]  ;;  %v8646_v62 = vld [vmem:[#allocation91_spill] sm:$0xff] }
0x1580   : > { %v470_v16 = vsel %vm469_vm2, %v8633_v12, %v8632_v49  ;;  %vm8643_vm2 = vcmask 187392   ;;  %v8651_v12 = vld [vmem:[#allocation121_spill] sm:$0xff] }
0x1583   : > { %3389 = vrot.lane.b32.xlu0 %v3365_v35, %s4353_s25  ;;  %3383 = vrot.lane.b32.xlu1 %v3362_v40, %s4353_s25  ;;  %v415_v35 = vadd.f32 %v396_v31, %v341_v25  ;;  %v8635_v40 = vld [vmem:[#allocation41_spill] sm:$0xff]  ;;  %v8649_v25 = vld [vmem:[#allocation111_spill] sm:$0xff] }
0x1584   : > { %v544_v22 = vsel %vm543_vm3, %v8635_v40, %v8634_v47  ;;  %vm8645_vm3 = vcmask 162816   ;;  %v8655_v40 = vld [vmem:[#allocation141_spill] sm:$0xff] }
0x1585   : > { %v914_v36 = vsel %vm8645_vm3, %v8644_v52, %v8389_v20  ;;  %v1210_v20 = vsel %vm8652_vm5, %v8651_v12, %v8406_v11  ;;  %vm8668_vm3 = vcmask 637952   ;;  %v8671_v52 = vld [vmem:[#allocation221_spill] sm:$0xff]  ;;  %vm8674_vm5 = vcmask 564224  }
0x1587   : > { %3393 = vrot.lane.b32.xlu0 %v3367_v58, %s4353_s25  ;;  %3387 = vrot.lane.b32.xlu1 %v3364_v48, %s4353_s25  ;;  %v489_v58 = vadd.f32 %v470_v16, %v415_v35  ;;  %v8637_v48 = vld [vmem:[#allocation49_spill] sm:$0xff]  ;;  %v8653_v35 = vld [vmem:[#allocation131_spill] sm:$0xff] }
0x1588   : > { %v618_v57 = vsel %vm617_vm4, %v8637_v48, %v8636_v54  ;;  %vm8648_vm4 = vcmask 113664   ;;  %v8659_v48 = vld [vmem:[#allocation161_spill] sm:$0xff] }
0x1589   : > { %v1516_v11 = vsel %vm8660_vm6, %v8659_v48, %v8434_v53  ;;  %vm8683_vm6 = vcmask 850944  }
0x158b   : > { %3397 = vrot.lane.b32.xlu0 %v3369_v43, %s4353_s25  ;;  %3391 = vrot.lane.b32.xlu1 %v3366_v6, %s4353_s25  ;;  %v563_v43 = vadd.f32 %v544_v22, %v489_v58  ;;  %v692_v6 = vsel %vm8639_vm0, %v8638_v19, %v8377_v15  ;;  %v988_v15 = vsel %vm987_vm9, %v8646_v62, %v8393_v51  ;;  %vm8656_vm9 = vcmask 400384   ;;  %v8657_v58 = vld [vmem:[#allocation151_spill] sm:$0xff] }
0x158c   : > { %v1294_v51 = vsel %vm8654_vm10, %v8653_v35, %v8412_v39  ;;  %vm8662_vm0 = vcmask 326656   ;;  %vm8676_vm10 = vcmask 539648  }
0x158d   : > { %v637_v23 = vadd.f32 %v618_v57, %v563_v43  ;;  %v8661_v43 = vld [vmem:[#allocation171_spill] sm:$0xff] }
0x158e   : > { %v1590_v39 = vsel %vm8662_vm0, %v8661_v43, %v8442_v38  ;;  %vm8686_vm0 = vcmask 826368   ;;  %v8697_v43 = vld [vmem:[#allocation297_spill] sm:$0xff] }
0x158f   : > { %3432 = vperm.xlu0 %4202, %v8626_v29   ;;  %3395 = vrot.lane.b32.xlu1 %v3368_v13, %s4353_s25  ;;  %v8640_v13 = vld [vmem:[#allocation65_spill] sm:$0xff] }
0x1590   : > { %v766_v34 = vsel %vm8641_vm1, %v8640_v13, %v8381_v17  ;;  %v1062_v17 = vsel %vm8648_vm4, %v8647_v32, %v8397_v61  ;;  %v1368_v61 = vsel %vm8656_vm9, %v8655_v40, %v8418_v56  ;;  %vm8664_vm1 = vcmask 302080   ;;  %v8665_v13 = vld [vmem:[#allocation191_spill] sm:$0xff] }
0x1591   : > { %vm8670_vm4 = vcmask 613376   ;;  %v8677_v32 = vld [vmem:[#allocation247_spill] sm:$0xff]  ;;  %vm8678_vm9 = vcmask 515072  }
0x1593   : > { %3399 = vrot.lane.b32.xlu1 %v3370_v14, %s4353_s25  ;;  %4204 = vset.pattern.permute.xlu0 %v4354_v45  ;;  %v711_v14 = vadd.f32 %v692_v6, %v637_v23  ;;  %v8642_v45 = vld [vmem:[#allocation73_spill] sm:$0xff] }
0x1594   : > { %v840_v63 = vsel %vm8643_vm2, %v8642_v45, %v8385_v50  ;;  %v1136_v50 = vsel %vm8650_vm8, %v8649_v25, %v8401_v60  ;;  %v1442_v60 = vsel %vm8658_vm7, %v8657_v58, %v8426_v30  ;;  %v8663_v6 = vld [vmem:[#allocation181_spill] sm:$0xff]  ;;  %vm8666_vm2 = vcmask 277504  }
0x1595   : > { %v785_v44 = vadd.f32 %v766_v34, %v711_v14  ;;  %v1664_v56 = vsel %vm8664_vm1, %v8663_v6, %v8450_v4  ;;  %v1738_v30 = vsel %vm8666_vm2, %v8665_v13, %v8458_v21  ;;  %v8667_v14 = vld [vmem:[#allocation201_spill] sm:$0xff]  ;;  %vm8672_vm8 = vcmask 588800   ;;  %v8699_v6 = vld [vmem:[#allocation304_spill] sm:$0xff] }
0x1596   : > { %v1822_v53 = vsel %vm8668_vm3, %v8667_v14, %v8466_v59  ;;  %v1970_v4 = vsel %vm8672_vm8, %v8671_v52, %v8482_v7  ;;  %vm8680_vm7 = vcmask 490496   ;;  %vm8689_vm1 = vcmask 801792   ;;  %v8707_v52 = vld [vmem:[#allocation340_spill] sm:$0xff] }
0x1597   : > { %v859_v33 = vadd.f32 %v840_v63, %v785_v44  ;;  %v8669_v63 = vld [vmem:[#allocation211_spill] sm:$0xff]  ;;  %vm8692_vm2 = vcmask 777216   ;;  %vm8695_vm3 = vcmask 752640   ;;  %vm8701_vm8 = vcmask 703488  }
0x1598   : > { %v1896_v38 = vsel %vm8670_vm4, %v8669_v63, %v8474_v24  ;;  %v2192_v24 = vsel %vm8678_vm9, %v8677_v32, %v8506_v42  ;;  %vm8698_vm4 = vcmask 728064   ;;  %v8706_v63 = vld [vmem:[#allocation320_spill] sm:$0xff]  ;;  %v8712_v32 = vld [vmem:[#allocation25_spill] sm:$0xff]  ;;  %vm3771_vm9 = vcmask 105472  }
0x1599   : > { %v933_v27 = vadd.f32 %v914_v36, %v859_v33  ;;  %v8673_v33 = vld [vmem:[#allocation231_spill] sm:$0xff] }
0x159a   : > { %v2044_v21 = vsel %vm8674_vm5, %v8673_v33, %v8490_v18  ;;  %vm8704_vm5 = vcmask 15360  }
0x159b   : > { %v1007_v31 = vadd.f32 %v988_v15, %v933_v27  ;;  %v8675_v15 = vld [vmem:[#allocation241_spill] sm:$0xff] }
0x159c   : > { %v2118_v59 = vsel %vm8676_vm10, %v8675_v15, %v8498_v37  ;;  %vm3697_vm10 = vcmask 130048  }
0x159d   : > { %v1081_v49 = vadd.f32 %v1062_v17, %v1007_v31  ;;  %v8679_v31 = vld [vmem:[#allocation256_spill] sm:$0xff] }
0x159e   : > { %v2266_v7 = vsel %vm8680_vm7, %v8679_v31, %v8514_v1  ;;  %v8713_v31 = vld [vmem:[#allocation104_spill] sm:$0xff]  ;;  %vm3845_vm7 = vcmask 80896  }
0x159f   : > { %v1155_v16 = vadd.f32 %v1136_v50, %v1081_v49  ;;  %v8681_v50 = vld [vmem:[#allocation264_spill] sm:$0xff]  ;;  %v8682_v49 = vld [vmem:[#allocation263_spill] sm:$0xff] }
0x15a0   : > { %v2350_v18 = vsel %vm8683_vm6, %v8682_v49, %v8681_v50  ;;  %vm3900_vm6 = vcmask 31744  }
0x15a1   : > { %v1229_v47 = vadd.f32 %v1210_v20, %v1155_v16  ;;  %v8684_v20 = vld [vmem:[#allocation270_spill] sm:$0xff]  ;;  %v8685_v16 = vld [vmem:[#allocation269_spill] sm:$0xff] }
0x15a2   : > { %v2424_v37 = vsel %vm8686_vm0, %v8685_v16, %v8684_v20 }
0x15a3   : > { %v1313_v22 = vadd.f32 %v1294_v51, %v1229_v47  ;;  %v8687_v51 = vld [vmem:[#allocation276_spill] sm:$0xff]  ;;  %v8688_v47 = vld [vmem:[#allocation275_spill] sm:$0xff] }
0x15a4   : > { %v2498_v42 = vsel %vm8689_vm1, %v8688_v47, %v8687_v51 }
0x15a5   : > { %v1387_v54 = vadd.f32 %v1368_v61, %v1313_v22  ;;  %v8690_v61 = vld [vmem:[#allocation284_spill] sm:$0xff]  ;;  %v8691_v22 = vld [vmem:[#allocation282_spill] sm:$0xff] }
0x15a6   : > { %v2572_v1 = vsel %vm8692_vm2, %v8691_v22, %v8690_v61 }
0x15a7   : > { %v1461_v57 = vadd.f32 %v1442_v60, %v1387_v54  ;;  %v8693_v60 = vld [vmem:[#allocation292_spill] sm:$0xff]  ;;  %v8694_v54 = vld [vmem:[#allocation291_spill] sm:$0xff] }
0x15a8   : > { %v2646_v48 = vsel %vm8695_vm3, %v8694_v54, %v8693_v60 }
0x15a9   : > { %v1535_v19 = vadd.f32 %v1516_v11, %v1461_v57  ;;  %v8696_v57 = vld [vmem:[#allocation298_spill] sm:$0xff] }
0x15ab   : > { %v1609_v23 = vadd.f32 %v1590_v39, %v1535_v19  ;;  %v2720_v39 = vsel %vm8698_vm4, %v8697_v43, %v8696_v57 }
0x15ad   : > { %v1683_v34 = vadd.f32 %v1664_v56, %v1609_v23  ;;  %v8700_v56 = vld [vmem:[#allocation303_spill] sm:$0xff] }
0x15ae   : > { %v2794_v23 = vsel %vm8701_vm8, %v8700_v56, %v8699_v6  ;;  %v7049_v6 = vld [vmem:[%s4428_s21 + $0x30] sm:$0xff] }
0x15af   : > { %v1757_v45 = vadd.f32 %v1738_v30, %v1683_v34  ;;  %v8702_v30 = vld [vmem:[#allocation310_spill] sm:$0xff]  ;;  %v8703_v34 = vld [vmem:[#allocation309_spill] sm:$0xff] }
0x15b0   : > { %v2883_v14 = vsel %vm8704_vm5, %v8703_v34, %v8702_v30  ;;  %v7067_v30 = vld [vmem:[%s4428_s21 + $0x48] sm:$0xff] }
0x15b1   : > { %v1841_v44 = vadd.f32 %v1822_v53, %v1757_v45  ;;  %v8705_v45 = vld [vmem:[#allocation335_spill] sm:$0xff] }
0x15b3   : > { %v1915_v36 = vadd.f32 %v1896_v38, %v1841_v44  ;;  %v2958_v38 = vsel %vm2957_vm12, %v8706_v63, %v8705_v45  ;;  %vm3401_vm12 = vcmask 228352   ;;  %v8714_v45 = vmov 0   ;;  %v7076_v63 = vld [vmem:[%s4428_s21 + $0x58] sm:$0xff] }
0x15b5   : > { %v1989_v62 = vadd.f32 %v1970_v4, %v1915_v36  ;;  %v8708_v4 = vld [vmem:[#allocation339_spill] sm:$0xff] }
0x15b6   : > { %v3032_v36 = vsel %vm3031_vm14, %v8708_v4, %v8707_v52  ;;  %v7085_v4 = vld [vmem:[%s4428_s21 + $0x38] sm:$0xff]  ;;  %vm8750_vm14 = vmmov %vm8704_vm5 }
0x15b7   : > { %v2063_v27 = vadd.f32 %v2044_v21, %v1989_v62  ;;  %v8709_v21 = vld [vmem:[#allocation344_spill] sm:$0xff]  ;;  %v8710_v62 = vld [vmem:[#allocation343_spill] sm:$0xff] }
0x15b8   : > { %v3106_v15 = vsel %vm3105_vm11, %v8710_v62, %v8709_v21  ;;  %v7097_v62 = vld [vmem:[%s4428_s21 + $0x50] sm:$0xff]  ;;  %vm3475_vm11 = vcmask 203776  }
0x15b9   : > { %v2137_v17 = vadd.f32 %v2118_v59, %v2063_v27  ;;  %v8711_v27 = vld [vmem:[#allocation30_spill] sm:$0xff] }
0x15bb   : > { %v2211_v25 = vadd.f32 %v2192_v24, %v2137_v17  ;;  %v3180_v24 = vsel %vm3179_vm15, %v8712_v32, %v8711_v27  ;;  %vm3623_vm15 = vcmask 154624  }
0x15bd   : > { %v2285_v12 = vadd.f32 %v2266_v7, %v2211_v25  ;;  %v3254_v7 = vsel %vm3253_vm13, %v8713_v31, %v6232_v0  ;;  %vm3549_vm13 = vcmask 179200  }
0x15bf   : > { %v2369_v35 = vadd.f32 %v2350_v18, %v2285_v12 }
0x15c1   : > { %v2443_v40 = vadd.f32 %v2424_v37, %v2369_v35 }
0x15c3   : > { %v2517_v58 = vadd.f32 %v2498_v42, %v2443_v40 }
0x15c5   : > { %v2591_v11 = vadd.f32 %v2572_v1, %v2517_v58 }
0x15c7   : > { %v2665_v19 = vadd.f32 %v2646_v48, %v2591_v11 }
0x15c9   : > { %v2739_v13 = vadd.f32 %v2720_v39, %v2665_v19 }
0x15cb   : > { %v2813_v53 = vadd.f32 %v2794_v23, %v2739_v13  ;;  %v7053_v23 = vld [vmem:[%s4428_s21 + $0x20] sm:$0xff]  ;;  %v4357_v13 = vmov 48  }
0x15cd   : > { %v2903_v44 = vadd.f32 %v2883_v14, %v2813_v53  ;;  %v4358_v14 = vmov 46   ;;  %v4236_v53 = vld [vmem:[%s7499_s1] sm:$0xff] }
0x15cf   : > { %v2977_v33 = vadd.f32 %v2958_v38, %v2903_v44  ;;  %v4359_v38 = vmov 47   ;;  %v7081_v44 = vld [vmem:[%s4428_s21 + $0x68] sm:$0xff] }
0x15d1   : > { %v3051_v59 = vadd.f32 %v3032_v36, %v2977_v33  ;;  %v7092_v33 = vld [vmem:[%s4428_s21 + $0x40] sm:$0xff] }
0x15d3   : > { %v3125_v17 = vadd.f32 %v3106_v15, %v3051_v59  ;;  %v7102_v59 = vld [vmem:[%s4428_s21 + $0x60] sm:$0xff] }
0x15d5   : > { %v3199_v25 = vadd.f32 %v3180_v24, %v3125_v17 }
0x15d7   : > { %v3273_v18 = vadd.f32 %v3254_v7, %v3199_v25 }
0x15d9   : > { %v3347_v12 = vadd.f32 %v6837_v8, %v3273_v18 }
0x15f1   : > { %v3386_v50 = vpop.permute.xlu0 %3385  ;;  %v3382_v49 = vpop.permute.xlu1 %3381 }
0x15f5   : > { %v3390_v20 = vpop.permute.xlu0 %3389  ;;  %v3384_v16 = vpop.permute.xlu1 %3383 }
0x15f6   : > { %v3402_v37 = vsel %vm3401_vm12, %v3382_v49, %v3384_v16  ;;  %v3403_v35 = vsel %vm3401_vm12, %v3384_v16, %v3386_v50 }
0x15f7   : > { %v7012_v51 = vadd.f32 %v3402_v37, %v3347_v12  ;;  %v7015_v47 = vadd.f32 %v3403_v35, %v6840_v3 }
0x15f9   : > { %v3388_v42 = vpop.permute.xlu1 %3387  ;;  %v3394_v61 = vpop.permute.xlu0 %3393 }
0x15fa   : > { %v3404_v0 = vsel %vm3401_vm12, %v3386_v50, %v3388_v42  ;;  %v3405_v40 = vsel %vm3401_vm12, %v3388_v42, %v3390_v20 }
0x15fb   : > { %v7020_v22 = vadd.f32 %v3404_v0, %v6850_v41  ;;  %v7023_v8 = vadd.f32 %v3405_v40, %v6852_v46 }
0x15fd   : > { %v3392_v1 = vpop.permute.xlu1 %3391  ;;  %v3398_v48 = vpop.permute.xlu0 %3397 }
0x15fe   : > { %v3406_v58 = vsel %vm3401_vm12, %v3390_v20, %v3392_v1  ;;  %v3407_v3 = vsel %vm3401_vm12, %v3392_v1, %v3394_v61 }
0x15ff   : > { %v7028_v60 = vadd.f32 %v3406_v58, %v6856_v26  ;;  %v7031_v54 = vadd.f32 %v3407_v3, %v6859_v5 }
0x1601   : > { %v3396_v11 = vpop.permute.xlu1 %3395 }
0x1602   : > { %v3408_v41 = vsel %vm3401_vm12, %v3394_v61, %v3396_v11  ;;  %v3409_v46 = vsel %vm3401_vm12, %v3396_v11, %v3398_v48 }
0x1603   : > { %v7036_v57 = vadd.f32 %v3408_v41, %v6864_v55  ;;  %v7039_v43 = vadd.f32 %v3409_v46, %v6867_v10  ;;  %v7059_v10 = vld [vmem:[%s4428_s21 + $0x28] sm:$0xff] }
0x1605   : > { %v7041_v39 = vpop.permute.xlu1 %3399 }
0x1606   : > { %v3410_v26 = vsel %vm3401_vm12, %v3398_v48, %v7041_v39 }
0x1607   : > { %v7046_v5 = vadd.f32 %v3410_v26, %v6874_v2 }
0x160e   : > { %v3433_v19 = vpop.permute.xlu0 %3432 }
0x160f   : > { %v3437_v56 = vmul.f32 %v7049_v6, %v3433_v19  ;;  %v3435_v55 = vmul.f32 %v7053_v23, %v3433_v19  ;;  %v3436_v2 = vmul.f32 %v7059_v10, %v3433_v19  ;;  %v3440_v34 = vmul.f32 %v7067_v30, %v3433_v19 }
0x1610   : > { %v3444_v52 = vmul.f32 %v7081_v44, %v3433_v19  ;;  %v3438_v36 = vmul.f32 %v7085_v4, %v3433_v19  ;;  %v3439_v21 = vmul.f32 %v7092_v33, %v3433_v19  ;;  %v3441_v15 = vmul.f32 %v7097_v62, %v3433_v19 }
0x1611   : > { %3459 = vrot.lane.b32.xlu0 %v3437_v56, %s4356_s26  ;;  %3455 = vrot.lane.b32.xlu1 %v3435_v55, %s4356_s26  ;;  %v3443_v27 = vmul.f32 %v7102_v59, %v3433_v19 }
0x1615   : > { %3580 = vperm.xlu0 %4204, %v8626_v29   ;;  %3457 = vrot.lane.b32.xlu1 %v3436_v2, %s4356_s26 }
0x1619   : > { %4207 = vset.pattern.permute.xlu0 %v4357_v13  ;;  %3506 = vperm.xlu1 %4203, %v8626_v29  }
0x161a   : > { %3802 = vperm.xlu0 %4207, %v8626_v29   ;;  %v3442_v29 = vmul.f32 %v7076_v63, %v3433_v19 }
0x161d   : > { %4205 = vset.pattern.permute.xlu1 %v4358_v14 }
0x161e   : > { %3465 = vrot.lane.b32.xlu0 %v3440_v34, %s4356_s26  ;;  %3654 = vperm.xlu1 %4205, %v4236_v53  }
0x161f   : > { %4209 = vset.pattern.permute.xlu0 %v8714_v45 }
0x1622   : > { %3469 = vrot.lane.b32.xlu0 %v3442_v29, %s4356_s26  ;;  %4206 = vset.pattern.permute.xlu1 %v4359_v38 }
0x1623   : > { %3728 = vperm.xlu1 %4206, %v4236_v53  }
0x1626   : > { %3473 = vrot.lane.b32.xlu0 %v3444_v52, %s4356_s26 }
0x1627   : > { %3461 = vrot.lane.b32.xlu1 %v3438_v36, %s4356_s26 }
0x1628   : > { %4208 = vset.pattern.permute.xlu1 %v8714_v45 }
0x162b   : > { %3463 = vrot.lane.b32.xlu1 %v3439_v21, %s4356_s26 }
0x162f   : > { %3467 = vrot.lane.b32.xlu1 %v3441_v15, %s4356_s26 }
0x1633   : > { %3471 = vrot.lane.b32.xlu1 %v3443_v27, %s4356_s26 }
0x1683   : > { %v3456_v32 = vpop.permute.xlu1 %3455  ;;  %v3460_v24 = vpop.permute.xlu0 %3459 }
0x1687   : > { %v3458_v17 = vpop.permute.xlu1 %3457 }
0x1688   : > { %v3476_v31 = vsel %vm3475_vm11, %v3456_v32, %v3458_v17  ;;  %v3477_v7 = vsel %vm3475_vm11, %v3458_v17, %v3460_v24 }
0x1689   : > { %v7109_v25 = vadd.f32 %v3476_v31, %v7012_v51  ;;  %v7112_v50 = vadd.f32 %v3477_v7, %v7015_v47 }
0x1694   : > { %v3581_v20 = vpop.permute.xlu0 %3580 }
0x1695   : > { %v3584_v26 = vmul.f32 %v7059_v10, %v3581_v20  ;;  %v3583_v55 = vmul.f32 %v7053_v23, %v3581_v20  ;;  %v3587_v21 = vmul.f32 %v7092_v33, %v3581_v20  ;;  %v3589_v15 = vmul.f32 %v7097_v62, %v3581_v20 }
0x1696   : > { %v3592_v27 = vmul.f32 %v7081_v44, %v3581_v20  ;;  %v3591_v32 = vmul.f32 %v7102_v59, %v3581_v20 }
0x1698   : > { %v3507_v49 = vpop.permute.xlu1 %3506 }
0x1699   : > { %v3510_v18 = vmul.f32 %v7059_v10, %v3507_v49  ;;  %v3509_v12 = vmul.f32 %v7053_v23, %v3507_v49  ;;  %v3512_v37 = vmul.f32 %v7085_v4, %v3507_v49  ;;  %v3511_v35 = vmul.f32 %v7049_v6, %v3507_v49  ;;  %v7122_v42 = vpop.permute.xlu0 %3802 }
0x169a   : > { %v3514_v51 = vmul.f32 %v7067_v30, %v3507_v49  ;;  %v3513_v47 = vmul.f32 %v7092_v33, %v3507_v49  ;;  %v3516_v40 = vmul.f32 %v7076_v63, %v3507_v49  ;;  %v3515_v61 = vmul.f32 %v7097_v62, %v3507_v49 }
0x169b   : > { %3531 = vrot.lane.b32.xlu0 %v3510_v18, %s4360_s29  ;;  %3529 = vrot.lane.b32.xlu1 %v3509_v12, %s4360_s29  ;;  %v3518_v11 = vmul.f32 %v7081_v44, %v3507_v49  ;;  %v3517_v41 = vmul.f32 %v7102_v59, %v3507_v49 }
0x169d   : > { %v7116_v16 = vpop.permute.xlu1 %3654  ;;  %v3466_v3 = vpop.permute.xlu0 %3465 }
0x169e   : > { %v3660_v17 = vmul.f32 %v7085_v4, %v7116_v16  ;;  %v3659_v31 = vmul.f32 %v7049_v6, %v7116_v16  ;;  %v3662_v7 = vmul.f32 %v7067_v30, %v7116_v16  ;;  %v3661_v49 = vmul.f32 %v7092_v33, %v7116_v16 }
0x169f   : > { %3535 = vrot.lane.b32.xlu0 %v3512_v37, %s4360_s29  ;;  %3533 = vrot.lane.b32.xlu1 %v3511_v35, %s4360_s29  ;;  %v3664_v18 = vmul.f32 %v7076_v63, %v7116_v16  ;;  %v3663_v12 = vmul.f32 %v7097_v62, %v7116_v16  ;;  %v3665_v37 = vmul.f32 %v7102_v59, %v7116_v16 }
0x16a1   : > { %v3470_v13 = vpop.permute.xlu0 %3469 }
0x16a2   : > { %v7124_v0 = vpop.permute.xlu1 %3728 }
0x16a3   : > { %3539 = vrot.lane.b32.xlu0 %v3514_v51, %s4360_s29  ;;  %3537 = vrot.lane.b32.xlu1 %v3513_v47, %s4360_s29  ;;  %v3731_v35 = vmul.f32 %v7053_v23, %v7124_v0  ;;  %v3875_v51 = vld [vmem:[%s7500_s2] sm:$0xff]  ;;  %v3732_v47 = vmul.f32 %v7059_v10, %v7124_v0 }
0x16a6   : > { %v3462_v1 = vpop.permute.xlu1 %3461 }
0x16a7   : > { %v3478_v58 = vsel %vm3475_vm11, %v3460_v24, %v3462_v1  ;;  %3543 = vrot.lane.b32.xlu0 %v3516_v40, %s4360_s29  ;;  %3541 = vrot.lane.b32.xlu1 %v3515_v61, %s4360_s29  ;;  %v3657_v24 = vmul.f32 %v7053_v23, %v7116_v16  ;;  %v3733_v40 = vmul.f32 %v7049_v6, %v7124_v0 }
0x16a8   : > { %v7130_v48 = vadd.f32 %v3478_v58, %v7020_v22  ;;  %v3735_v61 = vmul.f32 %v7092_v33, %v7124_v0  ;;  %v3737_v58 = vmul.f32 %v7097_v62, %v7124_v0 }
0x16aa   : > { %v3464_v46 = vpop.permute.xlu1 %3463 }
0x16ab   : > { %v3479_v19 = vsel %vm3475_vm11, %v3462_v1, %v3464_v46  ;;  %v3480_v56 = vsel %vm3475_vm11, %v3464_v46, %v3466_v3  ;;  %3547 = vrot.lane.b32.xlu0 %v3518_v11, %s4360_s29  ;;  %3545 = vrot.lane.b32.xlu1 %v3517_v41, %s4360_s29  ;;  %v3736_v1 = vmul.f32 %v7067_v30, %v7124_v0 }
0x16ac   : > { %v7139_v2 = vadd.f32 %v3479_v19, %v7023_v8  ;;  %v7142_v22 = vadd.f32 %v3480_v56, %v7028_v60  ;;  %v3586_v8 = vmul.f32 %v7085_v4, %v3581_v20  ;;  %v3585_v60 = vmul.f32 %v7049_v6, %v3581_v20 }
0x16ad   : > { %v3739_v11 = vmul.f32 %v7102_v59, %v7124_v0  ;;  %v3805_v41 = vmul.f32 %v7053_v23, %v7122_v42  ;;  %v3740_v46 = vmul.f32 %v7081_v44, %v7124_v0  ;;  %v3807_v19 = vmul.f32 %v7049_v6, %v7122_v42 }
0x16ae   : > { %v3468_v34 = vpop.permute.xlu1 %3467  ;;  %v3808_v56 = vmul.f32 %v7085_v4, %v7122_v42  ;;  %v3809_v23 = vmul.f32 %v7092_v33, %v7122_v42  ;;  %v3812_v6 = vmul.f32 %v7076_v63, %v7122_v42  ;;  %v7230_v33 = vpop.permute.xlu0 %3473 }
0x16af   : > { %v3481_v14 = vsel %vm3475_vm11, %v3466_v3, %v3468_v34  ;;  %v3482_v53 = vsel %vm3475_vm11, %v3468_v34, %v3470_v13  ;;  %3605 = vrot.lane.b32.xlu0 %v3584_v26, %s4361_s30  ;;  %3603 = vrot.lane.b32.xlu1 %v3583_v55, %s4361_s30  ;;  %v3738_v3 = vmul.f32 %v7076_v63, %v7124_v0 }
0x16b0   : > { %v7147_v45 = vadd.f32 %v3481_v14, %v7031_v54  ;;  %v7150_v29 = vadd.f32 %v3482_v53, %v7036_v57  ;;  %v3588_v54 = vmul.f32 %v7067_v30, %v3581_v20  ;;  %v3590_v57 = vmul.f32 %v7076_v63, %v3581_v20 }
0x16b1   : > { %v3666_v20 = vmul.f32 %v7081_v44, %v7116_v16  ;;  %v3806_v26 = vmul.f32 %v7059_v10, %v7122_v42  ;;  %v3811_v55 = vmul.f32 %v7097_v62, %v7122_v42 }
0x16b2   : > { %v7154_v38 = vpop.permute.xlu1 %3471 }
0x16b3   : > { %v3483_v52 = vsel %vm3475_vm11, %v3470_v13, %v7154_v38  ;;  %3609 = vrot.lane.b32.xlu0 %v3586_v8, %s4361_s30  ;;  %3607 = vrot.lane.b32.xlu1 %v3585_v60, %s4361_s30  ;;  %v4243_v8 = vld [vmem:[%s4428_s21 + $0x48] sm:$0xff]  ;;  %s4037_s21 = smul.u32 80, %s8762_s12 }
0x16b4   : > { %v7159_v36 = vadd.f32 %v3483_v52, %v7039_v43  ;;  %v3658_v43 = vmul.f32 %v7059_v10, %v7116_v16  ;;  %v3734_v16 = vmul.f32 %v7085_v4, %v7124_v0  ;;  %v3810_v0 = vmul.f32 %v7067_v30, %v7122_v42  ;;  %v8715_v52 = vld [vmem:[#allocation3_spill] sm:$0xff] }
0x16b5   : > { %v3813_v10 = vmul.f32 %v7102_v59, %v7122_v42  ;;  %v3814_v4 = vmul.f32 %v7081_v44, %v7122_v42  ;;  %v266_v44 = vmul.f32 %v4243_v8, %v4423_v9  ;;  %v8729_v8 = vld [vmem:[#allocation149_spill] sm:$0xff]  ;;  %s7429_s10 = scalar_lea.vmem %s7501_s3, %s4037_s21 }
0x16b7   : > { %3613 = vrot.lane.b32.xlu0 %v3588_v54, %s4361_s30  ;;  %3611 = vrot.lane.b32.xlu1 %v3587_v21, %s4361_s30  ;;  %v350_v54 = vadd.f32 %v8715_v52, %v266_v44 }
0x16bb   : > { %3617 = vrot.lane.b32.xlu0 %v3590_v57, %s4361_s30  ;;  %3615 = vrot.lane.b32.xlu1 %v3589_v15, %s4361_s30 }
0x16bf   : > { %3621 = vrot.lane.b32.xlu0 %v3592_v27, %s4361_s30  ;;  %3619 = vrot.lane.b32.xlu1 %v3591_v32, %s4361_s30  ;;  %v8716_v27 = vld [vmem:[#allocation31_spill] sm:$0xff] }
0x16c0   : > { %v424_v32 = vadd.f32 %v8716_v27, %v350_v54  ;;  %v8730_v54 = vld [vmem:[#allocation159_spill] sm:$0xff] }
0x16c3   : > { %3679 = vrot.lane.b32.xlu0 %v3658_v43, %s4362_s4  ;;  %3677 = vrot.lane.b32.xlu1 %v3657_v24, %s4362_s4 }
0x16c7   : > { %3683 = vrot.lane.b32.xlu0 %v3660_v17, %s4362_s4  ;;  %3681 = vrot.lane.b32.xlu1 %v3659_v31, %s4362_s4  ;;  %v3484_v31 = vsel %vm3475_vm11, %v7154_v38, %v7230_v33 }
0x16cb   : > { %3687 = vrot.lane.b32.xlu0 %v3662_v7, %s4362_s4  ;;  %3685 = vrot.lane.b32.xlu1 %v3661_v49, %s4362_s4 }
0x16cf   : > { %3691 = vrot.lane.b32.xlu0 %v3664_v18, %s4362_s4  ;;  %3689 = vrot.lane.b32.xlu1 %v3663_v12, %s4362_s4  ;;  %v8718_v18 = vld [vmem:[#allocation47_spill] sm:$0xff] }
0x16d3   : > { %3695 = vrot.lane.b32.xlu0 %v3666_v20, %s4362_s4  ;;  %3693 = vrot.lane.b32.xlu1 %v3665_v37, %s4362_s4  ;;  %v8719_v20 = vld [vmem:[#allocation55_spill] sm:$0xff] }
0x16d7   : > { %3878 = vperm.xlu1 %4208, %v3875_v51   ;;  %3751 = vrot.lane.b32.xlu0 %v3731_v35, %s4363_s7  ;;  %v3503_v35 = vadd.f32 %v3484_v31, %v7046_v5 }
0x16db   : > { %3753 = vrot.lane.b32.xlu1 %v3732_v47, %s4363_s7  ;;  %3755 = vrot.lane.b32.xlu0 %v3733_v40, %s4363_s7 }
0x16df   : > { %3757 = vrot.lane.b32.xlu1 %v3734_v16, %s4363_s7  ;;  %3759 = vrot.lane.b32.xlu0 %v3735_v61, %s4363_s7  ;;  %v8720_v16 = vld [vmem:[#allocation63_spill] sm:$0xff] }
0x16e3   : > { %3761 = vrot.lane.b32.xlu1 %v3736_v1, %s4363_s7  ;;  %3763 = vrot.lane.b32.xlu0 %v3737_v58, %s4363_s7 }
0x16e7   : > { %3765 = vrot.lane.b32.xlu1 %v3738_v3, %s4363_s7  ;;  %3767 = vrot.lane.b32.xlu0 %v3739_v11, %s4363_s7  ;;  %v8722_v11 = vld [vmem:[#allocation79_spill] sm:$0xff] }
0x16eb   : > { %3769 = vrot.lane.b32.xlu1 %v3740_v46, %s4363_s7  ;;  %3825 = vrot.lane.b32.xlu0 %v3805_v41, %s4364_s8  ;;  %v8723_v46 = vld [vmem:[#allocation89_spill] sm:$0xff] }
0x16ef   : > { %3827 = vrot.lane.b32.xlu1 %v3806_v26, %s4364_s8  ;;  %3829 = vrot.lane.b32.xlu0 %v3807_v19, %s4364_s8 }
0x16f3   : > { %3831 = vrot.lane.b32.xlu1 %v3808_v56, %s4364_s8  ;;  %3833 = vrot.lane.b32.xlu0 %v3809_v23, %s4364_s8  ;;  %v8724_v23 = vld [vmem:[#allocation99_spill] sm:$0xff] }
0x16f7   : > { %3835 = vrot.lane.b32.xlu1 %v3810_v0, %s4364_s8  ;;  %3837 = vrot.lane.b32.xlu0 %v3811_v55, %s4364_s8 }
0x16fb   : > { %3839 = vrot.lane.b32.xlu1 %v3812_v6, %s4364_s8  ;;  %3841 = vrot.lane.b32.xlu0 %v3813_v10, %s4364_s8 }
0x16ff   : > { %3843 = vrot.lane.b32.xlu1 %v3814_v4, %s4364_s8  ;;  %v8726_v4 = vld [vmem:[#allocation119_spill] sm:$0xff] }
0x170d   : > { %v3532_v30 = vpop.permute.xlu0 %3531  ;;  %v3530_v62 = vpop.permute.xlu1 %3529 }
0x170e   : > { %v3550_v13 = vsel %vm3549_vm13, %v3530_v62, %v3532_v30  ;;  %v8727_v62 = vld [vmem:[#allocation129_spill] sm:$0xff] }
0x170f   : > { %v7234_v34 = vadd.f32 %v3550_v13, %v7109_v25 }
0x1711   : > { %v3536_v63 = vpop.permute.xlu0 %3535  ;;  %v3534_v14 = vpop.permute.xlu1 %3533 }
0x1712   : > { %v3551_v59 = vsel %vm3549_vm13, %v3532_v30, %v3534_v14  ;;  %v3552_v53 = vsel %vm3549_vm13, %v3534_v14, %v3536_v63 }
0x1713   : > { %v7241_v42 = vadd.f32 %v3551_v59, %v7112_v50  ;;  %v7244_v60 = vadd.f32 %v3552_v53, %v7130_v48  ;;  %v8717_v50 = vld [vmem:[#allocation39_spill] sm:$0xff] }
0x1714   : > { %v498_v24 = vadd.f32 %v8717_v50, %v424_v32  ;;  %v8728_v59 = vld [vmem:[#allocation139_spill] sm:$0xff] }
0x1715   : > { %v3540_v21 = vpop.permute.xlu0 %3539  ;;  %v3538_v25 = vpop.permute.xlu1 %3537  ;;  %v8732_v32 = vld [vmem:[#allocation179_spill] sm:$0xff] }
0x1716   : > { %v3553_v57 = vsel %vm3549_vm13, %v3536_v63, %v3538_v25  ;;  %v3554_v15 = vsel %vm3549_vm13, %v3538_v25, %v3540_v21  ;;  %v572_v12 = vadd.f32 %v8718_v18, %v498_v24  ;;  %v8733_v24 = vld [vmem:[#allocation189_spill] sm:$0xff] }
0x1717   : > { %v7251_v43 = vadd.f32 %v3553_v57, %v7139_v2  ;;  %v7254_v9 = vadd.f32 %v3554_v15, %v7142_v22  ;;  %v8731_v57 = vld [vmem:[#allocation169_spill] sm:$0xff] }
0x1718   : > { %v646_v37 = vadd.f32 %v8719_v20, %v572_v12  ;;  %v8735_v18 = vld [vmem:[#allocation209_spill] sm:$0xff] }
0x1719   : > { %v3544_v48 = vpop.permute.xlu0 %3543  ;;  %v3542_v17 = vpop.permute.xlu1 %3541 }
0x171a   : > { %v3555_v7 = vsel %vm3549_vm13, %v3540_v21, %v3542_v17  ;;  %v3556_v49 = vsel %vm3549_vm13, %v3542_v17, %v3544_v48  ;;  %v720_v61 = vadd.f32 %v8720_v16, %v646_v37  ;;  %v8736_v37 = vld [vmem:[#allocation219_spill] sm:$0xff] }
0x171b   : > { %v7264_v2 = vadd.f32 %v3555_v7, %v7147_v45  ;;  %v7267_v22 = vadd.f32 %v3556_v49, %v7150_v29  ;;  %v8721_v29 = vld [vmem:[#allocation71_spill] sm:$0xff] }
0x171c   : > { %v794_v58 = vadd.f32 %v8721_v29, %v720_v61  ;;  %v8734_v7 = vld [vmem:[#allocation199_spill] sm:$0xff] }
0x171d   : > { %v7271_v51 = vpop.permute.xlu0 %3547  ;;  %v3546_v47 = vpop.permute.xlu1 %3545  ;;  %v8738_v61 = vld [vmem:[#allocation239_spill] sm:$0xff] }
0x171e   : > { %v3557_v38 = vsel %vm3549_vm13, %v3544_v48, %v3546_v47  ;;  %v3558_v40 = vsel %vm3549_vm13, %v3546_v47, %v7271_v51  ;;  %v868_v41 = vadd.f32 %v8722_v11, %v794_v58  ;;  %v8739_v58 = vld [vmem:[#allocation246_spill] sm:$0xff] }
0x171f   : > { %v7278_v45 = vadd.f32 %v3557_v38, %v7159_v36  ;;  %v7280_v1 = vadd.f32 %v3558_v40, %v3503_v35  ;;  %v8725_v36 = vld [vmem:[#allocation109_spill] sm:$0xff] }
0x1720   : > { %v942_v26 = vadd.f32 %v8723_v46, %v868_v41  ;;  %v8737_v38 = vld [vmem:[#allocation229_spill] sm:$0xff] }
0x1721   : > { %v7283_v3 = vpop.permute.xlu0 %3605  ;;  %v7285_v5 = vpop.permute.xlu1 %3603 }
0x1722   : > { %v1016_v0 = vadd.f32 %v8724_v23, %v942_v26  ;;  %v8740_v26 = vld [vmem:[#allocation254_spill] sm:$0xff] }
0x1724   : > { %v1090_v55 = vadd.f32 %v8725_v36, %v1016_v0  ;;  %v8741_v0 = vld [vmem:[#allocation262_spill] sm:$0xff] }
0x1725   : > { %v7289_v19 = vpop.permute.xlu0 %3609  ;;  %v7291_v56 = vpop.permute.xlu1 %3607 }
0x1726   : > { %v1164_v30 = vadd.f32 %v8726_v4, %v1090_v55  ;;  %v8742_v4 = vld [vmem:[#allocation268_spill] sm:$0xff] }
0x1728   : > { %v1238_v13 = vadd.f32 %v8727_v62, %v1164_v30 }
0x1729   : > { %v7295_v6 = vpop.permute.xlu0 %3613  ;;  %v7297_v10 = vpop.permute.xlu1 %3611 }
0x172a   : > { %v1322_v53 = vadd.f32 %v8728_v59, %v1238_v13  ;;  %v8743_v13 = vld [vmem:[#allocation274_spill] sm:$0xff] }
0x172c   : > { %v1396_v44 = vadd.f32 %v8729_v8, %v1322_v53  ;;  %v8744_v8 = vld [vmem:[#allocation281_spill] sm:$0xff] }
0x172d   : > { %v7301_v63 = vpop.permute.xlu0 %3617  ;;  %v7303_v14 = vpop.permute.xlu1 %3615 }
0x172e   : > { %v1470_v21 = vadd.f32 %v8730_v54, %v1396_v44  ;;  %v8745_v54 = vld [vmem:[#allocation290_spill] sm:$0xff] }
0x1730   : > { %v1544_v15 = vadd.f32 %v8731_v57, %v1470_v21 }
0x1731   : > { %v7307_v52 = vpop.permute.xlu0 %3621  ;;  %v7310_v25 = vpop.permute.xlu1 %3619 }
0x1732   : > { %v1618_v50 = vadd.f32 %v8732_v32, %v1544_v15  ;;  %v8746_v32 = vld [vmem:[#allocation296_spill] sm:$0xff] }
0x1734   : > { %v1692_v48 = vadd.f32 %v8733_v24, %v1618_v50  ;;  %v8747_v24 = vld [vmem:[#allocation302_spill] sm:$0xff] }
0x1735   : > { %v3680_v27 = vpop.permute.xlu0 %3679  ;;  %v3678_v31 = vpop.permute.xlu1 %3677 }
0x1736   : > { %v1766_v49 = vadd.f32 %v8734_v7, %v1692_v48  ;;  %v8748_v7 = vld [vmem:[#allocation319_spill] sm:$0xff] }
0x1738   : > { %v1850_v12 = vadd.f32 %v8735_v18, %v1766_v49  ;;  %v8749_v49 = vld [vmem:[#allocation314_spill] sm:$0xff] }
0x1739   : > { %v7315_v17 = vpop.permute.xlu0 %3683  ;;  %v7322_v47 = vpop.permute.xlu1 %3681  ;;  %v2892_v18 = vsel %vm8750_vm14, %v8749_v49, %v8748_v7 }
0x173a   : > { %v1924_v35 = vadd.f32 %v8736_v37, %v1850_v12 }
0x173c   : > { %v1998_v40 = vadd.f32 %v8737_v38, %v1924_v35  ;;  %v8751_v35 = vld [vmem:[#allocation308_spill] sm:$0xff] }
0x173d   : > { %v7319_v20 = vpop.permute.xlu0 %3687  ;;  %v7331_v46 = vpop.permute.xlu1 %3685 }
0x173e   : > { %v2072_v29 = vadd.f32 %v8738_v61, %v1998_v40 }
0x1740   : > { %v2146_v11 = vadd.f32 %v8739_v58, %v2072_v29  ;;  %v8752_v29 = vld [vmem:[#allocation338_spill] sm:$0xff] }
0x1741   : > { %v7325_v16 = vpop.permute.xlu0 %3691  ;;  %v7336_v62 = vpop.permute.xlu1 %3689 }
0x1742   : > { %v2220_v23 = vadd.f32 %v8740_v26, %v2146_v11  ;;  %v8753_v26 = vld [vmem:[#allocation342_spill] sm:$0xff] }
0x1744   : > { %v2294_v36 = vadd.f32 %v8741_v0, %v2220_v23 }
0x1745   : > { %v7329_v41 = vpop.permute.xlu0 %3695  ;;  %v7343_v15 = vpop.permute.xlu1 %3693 }
0x1746   : > { %v2378_v30 = vadd.f32 %v8742_v4, %v2294_v36  ;;  %v8754_v36 = vld [vmem:[#allocation85_spill] sm:$0xff] }
0x1748   : > { %v2452_v59 = vadd.f32 %v8743_v13, %v2378_v30  ;;  %v8755_v30 = vld [vmem:[#allocation32_spill] sm:$0xff] }
0x1749   : > { %v3752_v55 = vpop.permute.xlu0 %3751 }
0x174a   : > { %v2526_v44 = vadd.f32 %v8744_v8, %v2452_v59 }
0x174c   : > { %v2600_v21 = vadd.f32 %v8745_v54, %v2526_v44  ;;  %v8756_v44 = vld [vmem:[#allocation105_spill] sm:$0xff] }
0x174d   : > { %v3756_v53 = vpop.permute.xlu0 %3755 }
0x174e   : > { %v2674_v50 = vadd.f32 %v8746_v32, %v2600_v21 }
0x1750   : > { %v2748_v48 = vadd.f32 %v8747_v24, %v2674_v50  ;;  %v3624_v24 = vsel %vm3623_vm15, %v7285_v5, %v7283_v3 }
0x1751   : > { %v7341_v57 = vpop.permute.xlu0 %3759 }
0x1752   : > { %v2822_v38 = vadd.f32 %v8751_v35, %v2748_v48  ;;  %v3625_v48 = vsel %vm3623_vm15, %v7283_v3, %v7291_v56  ;;  %v3643_v35 = vadd.f32 %v3624_v24, %v7234_v34  ;;  %v3627_v3 = vsel %vm3623_vm15, %v7289_v19, %v7297_v10 }
0x1753   : > { %v3644_v5 = vadd.f32 %v3625_v48, %v7241_v42 }
0x1754   : > { %v2912_v40 = vadd.f32 %v2892_v18, %v2822_v38  ;;  %v3698_v18 = vsel %vm3697_vm10, %v3678_v31, %v3680_v27 }
0x1755   : > { %v7350_v12 = vpop.permute.xlu0 %3763  ;;  %v3717_v31 = vadd.f32 %v3698_v18, %v3643_v35 }
0x1756   : > { %v7352_v37 = vpop.permute.xlu1 %3878  ;;  %v2986_v58 = vadd.f32 %v8752_v29, %v2912_v40 }
0x1758   : > { %v3060_v23 = vadd.f32 %v8753_v26, %v2986_v58 }
0x1759   : > { %v7356_v11 = vpop.permute.xlu0 %3767 }
0x175a   : > { %v3754_v61 = vpop.permute.xlu1 %3753  ;;  %v3134_v4 = vadd.f32 %v8754_v36, %v3060_v23 }
0x175b   : > { %v3773_v34 = vsel %vm3771_vm9, %v3754_v61, %v3756_v53 }
0x175c   : > { %v3208_v13 = vadd.f32 %v8755_v30, %v3134_v4 }
0x175d   : > { %v3826_v59 = vpop.permute.xlu0 %3825 }
0x175e   : > { %v3758_v0 = vpop.permute.xlu1 %3757  ;;  %v3282_v54 = vadd.f32 %v8756_v44, %v3208_v13 }
0x1760   : > { %v3356_v21 = vadd.f32 %v6869_v28, %v3282_v54  ;;  %v3626_v28 = vsel %vm3623_vm15, %v7291_v56, %v7289_v19  ;;  %v3629_v56 = vsel %vm3623_vm15, %v7295_v6, %v7303_v14 }
0x1761   : > { %v3830_v7 = vpop.permute.xlu0 %3829  ;;  %v3645_v19 = vadd.f32 %v3626_v28, %v7244_v60  ;;  %v3648_v60 = vadd.f32 %v3629_v56, %v7264_v2  ;;  %v3631_v2 = vsel %vm3623_vm15, %v7301_v63, %v7310_v25 }
0x1762   : > { %v3762_v8 = vpop.permute.xlu1 %3761  ;;  %v3430_v50 = vadd.f32 %v7041_v39, %v3356_v21  ;;  %v3699_v39 = vsel %vm3697_vm10, %v3680_v27, %v7322_v47  ;;  %v3772_v27 = vsel %vm3771_vm9, %v3752_v55, %v3754_v61  ;;  %v3701_v55 = vsel %vm3697_vm10, %v7315_v17, %v7331_v46 }
0x1763   : > { %v3718_v40 = vadd.f32 %v3699_v39, %v3644_v5  ;;  %v3791_v61 = vadd.f32 %v3772_v27, %v3717_v31  ;;  %v3632_v39 = vsel %vm3623_vm15, %v7310_v25, %v7307_v52 }
0x1764   : > { %v3504_v49 = vadd.f32 %v7230_v33, %v3430_v50  ;;  %v3628_v33 = vsel %vm3623_vm15, %v7297_v10, %v7295_v6  ;;  %v3646_v10 = vadd.f32 %v3627_v3, %v7251_v43  ;;  %v3700_v6 = vsel %vm3697_vm10, %v7322_v47, %v7315_v17 }
0x1765   : > { %v3647_v29 = vadd.f32 %v3628_v33, %v7254_v9  ;;  %v3792_v58 = vadd.f32 %v3773_v34, %v3718_v40  ;;  %v3834_v43 = vpop.permute.xlu0 %3833  ;;  %v3774_v9 = vsel %vm3771_vm9, %v3756_v53, %v3758_v0  ;;  %v3775_v47 = vsel %vm3771_vm9, %v3758_v0, %v7341_v57 }
0x1766   : > { %v7363_v32 = vpop.permute.xlu1 %3765  ;;  %v7395_v42 = vadd.f32 %v7271_v51, %v3504_v49  ;;  %v3630_v51 = vsel %vm3623_vm15, %v7303_v14, %v7301_v63  ;;  %v3719_v36 = vadd.f32 %v3700_v6, %v3645_v19  ;;  %v3720_v4 = vadd.f32 %v3701_v55, %v3646_v10 }
0x1767   : > { %v3649_v14 = vadd.f32 %v3630_v51, %v7267_v22  ;;  %v3702_v53 = vsel %vm3697_vm10, %v7331_v46, %v7319_v20  ;;  %v3703_v0 = vsel %vm3697_vm10, %v7319_v20, %v7336_v62  ;;  %v3776_v46 = vsel %vm3771_vm9, %v7341_v57, %v3762_v8 }
0x1768   : > { %v3793_v22 = vadd.f32 %v3774_v9, %v3719_v36  ;;  %v3777_v20 = vsel %vm3771_vm9, %v3762_v8, %v7350_v12  ;;  %v3721_v24 = vadd.f32 %v3702_v53, %v3647_v29  ;;  %v3722_v48 = vadd.f32 %v3703_v0, %v3648_v60 }
0x1769   : > { %v3838_v49 = vpop.permute.xlu0 %3837  ;;  %v3650_v57 = vadd.f32 %v3631_v2, %v7278_v45  ;;  %v3704_v8 = vsel %vm3697_vm10, %v7336_v62, %v7325_v16  ;;  %v3778_v25 = vsel %vm3771_vm9, %v7350_v12, %v7363_v32  ;;  %v3779_v45 = vsel %vm3771_vm9, %v7363_v32, %v7356_v11 }
0x176a   : > { %v7387_v38 = vpop.permute.xlu1 %3769  ;;  %v3795_v35 = vadd.f32 %v3776_v46, %v3721_v24  ;;  %v3796_v5 = vadd.f32 %v3777_v20, %v3722_v48  ;;  %v3652_v40 = vadd.f32 %v7307_v52, %v7395_v42  ;;  %v3651_v12 = vadd.f32 %v3632_v39, %v7280_v1 }
0x176b   : > { %v3706_v32 = vsel %vm3697_vm10, %v7343_v15, %v7329_v41  ;;  %v3780_v52 = vsel %vm3771_vm9, %v7356_v11, %v7387_v38 }
0x176c   : > { %v3725_v42 = vadd.f32 %v3706_v32, %v3651_v12 }
0x176d   : > { %v3842_v6 = vpop.permute.xlu0 %3841 }
0x176e   : > { %v3828_v26 = vpop.permute.xlu1 %3827 }
0x176f   : > { %v3846_v23 = vsel %vm3845_vm7, %v3826_v59, %v3828_v26  ;;  %v3847_v17 = vsel %vm3845_vm7, %v3828_v26, %v3830_v7  ;;  %v3794_v59 = vadd.f32 %v3775_v47, %v3720_v4 }
0x1770   : > { %v3865_v30 = vadd.f32 %v3846_v23, %v3791_v61  ;;  %v3866_v13 = vadd.f32 %v3847_v17, %v3792_v58  ;;  %v3726_v61 = vadd.f32 %v7329_v41, %v3652_v40  ;;  %v3799_v41 = vadd.f32 %v3780_v52, %v3725_v42 }
0x1772   : > { %v3881_v44 = vadd.f32 %v7352_v37, %v3865_v30  ;;  %v3882_v63 = vadd.f32 %v7352_v37, %v3866_v13  ;;  %v3832_v54 = vpop.permute.xlu1 %3831  ;;  %v3800_v26 = vadd.f32 %v7387_v38, %v3726_v61 }
0x1773   : > { %v3848_v21 = vsel %vm3845_vm7, %v3830_v7, %v3832_v54  ;;  %v3849_v50 = vsel %vm3845_vm7, %v3832_v54, %v3834_v43  ;;  %v3705_v7 = vsel %vm3697_vm10, %v7325_v16, %v7343_v15  ;;  %v3723_v16 = vadd.f32 %v3704_v8, %v3649_v14 }
0x1774   : > { %3891 = vst [vmem:[%s7429_s10] sm:$0xff] %v3881_v44  ;;  %3892 = vst [vmem:[%s7429_s10 + $0x8] sm:$0xff] %v3882_v63  ;;  %v3867_v28 = vadd.f32 %v3848_v21, %v3793_v22  ;;  %v3868_v18 = vadd.f32 %v3849_v50, %v3794_v59  ;;  %v3724_v34 = vadd.f32 %v3705_v7, %v3650_v57 }
0x1775   : > { %v3797_v10 = vadd.f32 %v3778_v25, %v3723_v16 }
0x1776   : > { %v3883_v3 = vadd.f32 %v7352_v37, %v3867_v28  ;;  %v3884_v33 = vadd.f32 %v7352_v37, %v3868_v18  ;;  %v3836_v56 = vpop.permute.xlu1 %3835  ;;  %v3798_v29 = vadd.f32 %v3779_v45, %v3724_v34 }
0x1777   : > { %v3850_v62 = vsel %vm3845_vm7, %v3834_v43, %v3836_v56  ;;  %v3851_v27 = vsel %vm3845_vm7, %v3836_v56, %v3838_v49 }
0x1778   : > { %3893 = vst [vmem:[%s7429_s10 + $0x10] sm:$0xff] %v3883_v3  ;;  %3894 = vst [vmem:[%s7429_s10 + $0x18] sm:$0xff] %v3884_v33  ;;  %v3869_v19 = vadd.f32 %v3850_v62, %v3795_v35  ;;  %v3870_v31 = vadd.f32 %v3851_v27, %v3796_v5 }
0x177a   : > { %v3885_v55 = vadd.f32 %v7352_v37, %v3869_v19  ;;  %v3886_v51 = vadd.f32 %v7352_v37, %v3870_v31  ;;  %v3840_v60 = vpop.permute.xlu1 %3839 }
0x177b   : > { %v3852_v1 = vsel %vm3845_vm7, %v3838_v49, %v3840_v60  ;;  %v3853_v15 = vsel %vm3845_vm7, %v3840_v60, %v3842_v6 }
0x177c   : > { %3895 = vst [vmem:[%s7429_s10 + $0x20] sm:$0xff] %v3885_v55  ;;  %3896 = vst [vmem:[%s7429_s10 + $0x28] sm:$0xff] %v3886_v51  ;;  %v3871_v58 = vadd.f32 %v3852_v1, %v3797_v10  ;;  %v3872_v43 = vadd.f32 %v3853_v15, %v3798_v29 }
0x177e   : > { %v3887_v9 = vadd.f32 %v7352_v37, %v3871_v58  ;;  %v3888_v47 = vadd.f32 %v7352_v37, %v3872_v43  ;;  %v3844_v11 = vpop.permute.xlu1 %3843 }
0x177f   : > { %v3854_v23 = vsel %vm3845_vm7, %v3842_v6, %v3844_v11  ;;  %v3874_v17 = vadd.f32 %v3844_v11, %v3800_v26 }
0x1780   : > { %3897 = vst [vmem:[%s7429_s10 + $0x30] sm:$0xff] %v3887_v9  ;;  %3898 = vst [vmem:[%s7429_s10 + $0x38] sm:$0xff] %v3888_v47  ;;  %v3873_v36 = vadd.f32 %v3854_v23, %v3799_v41 }
0x1781   : > { %v3890_v4 = vadd.f32 %v7352_v37, %v3874_v17 }
0x1782   : > { %v3889_v30 = vadd.f32 %v7352_v37, %v3873_v36 }
0x1783   : > { %3901 = vst.msk [vmem:[%s7429_s10 + $0x48] sm:$0xff] %vm3900_vm6, %v3890_v4 }
0x1784   : > { %3899 = vst [vmem:[%s7429_s10 + $0x40] sm:$0xff] %v3889_v30 }
0x1785 PF: > { %s13_s14 = sadd.s32 1, %s4266_s14   ;;  %s8757_s12 = smov %s4262_s13 }
0x1786   : > { %p10_p5 = scmp.ge.s32.totalorder %s13_s14, 4   ;;  %s8758_s13 = smov %s8760_s15 }
0x1788   :  { %12 = sbr.rel (!%p10_p5) target bundleno = 2 (0x2), region = 68 }

// kernel: lka_block_forward.16
= control target key start
LH: loop header
LB: loop body
LE: loop exit
PB: predicated region body
PF: predicated region fallthrough
CT: control target
= control target key end

     0   :  { %s1061_s12 = smov 0   ;;  %s1063_s13 = smov 0   ;;  %s1301_s0 = inlined_call_operand.vmem [shape: f32[2,32,362], index: 0, kind: input, shape index: {}]   ;;  %s1302_s1 = inlined_call_operand.vmem [shape: f32[32,9], index: 1, kind: input, shape index: {}]   ;;  %s1303_s2 = inlined_call_operand.vmem [shape: f32[32,1], index: 2, kind: input, shape index: {}]   ;;  %s1304_s3 = inlined_call_operand.vmem [shape: f32[2,32,324], index: 3, kind: output, shape index: {}]  }
   0x1   :  { %s1065_s14 = smov 0   ;;  %s1067_s15 = smov 0  }
   0x2   :  { %s1069_s16 = smov 0  }
   0x3 LB: > { %s22_s17 = sadd.s32 1, %s1014_s14  ;;  %s25_s18 = sadd.s32 1, %s1018_s15  ;;  %s1022_s16 = sphi %s1069_s16, %s13_s16   ;;  %s1018_s15 = sphi %s1067_s15, %s1308_s15   ;;  %s1014_s14 = sphi %s1065_s14, %s1307_s14   ;;  %s1010_s13 = sphi %s1063_s13, %s1306_s13   ;;  %s1006_s12 = sphi %s1061_s12, %s1305_s12  }
   0x4   : > { %p23_p0 = scmp.ge.s32.totalorder %s22_s17, 2  ;;  %p887_p1 = scmp.ge.s32.totalorder %s1022_s16, 1 }
   0x5   : > { %p181_p2 = scmp.lt.s32.totalorder %s1022_s16, 5 }
   0x6   : > { %s1310_s17 = smov (%p23_p0, %s22_s17), 0  ;;  %s1312_s18 = smov (!%p23_p0, %s25_s18), %s1018_s15 }
   0x7   : > { %p182_p3 = pnand %p887_p1, %p181_p2  ;;  %p27_p4 = scmp.ge.s32.totalorder %s1312_s18, 2 }
   0x8   : > { %s888_s19 = sshll.u32 (!%p182_p3), %s1006_s12, 1  ;;  %v1024_v0 = vmov (!%p182_p3), 1   ;;  %v1025_v1 = vmov (!%p182_p3), 2   ;;  %v1026_v4 = vmov (!%p182_p3), 3   ;;  %v1027_v5 = vmov (!%p182_p3), 5   ;;  %p226_p6 = scmp.lt.s32.totalorder (!%p182_p3), %s1010_s13, 1 }
   0x9   : > { %s1314_s18 = smov (%p27_p4, %s1312_s18), 0  ;;  %185 = sbr.rel (%p182_p3) target bundleno = 392 (0x188), region = 32 }
   0xa   : > { %957 = vset.pattern.permute.xlu1 (!%p182_p3), %v1024_v0  ;;  %p228_p5 = scmp.lt.s32.totalorder (!%p182_p3), %s888_s19, 3  ;;  %958 = vset.pattern.permute.xlu0 (!%p182_p3), %v1025_v1  ;;  %v1028_v6 = vmov (!%p182_p3), 6   ;;  %v1029_v7 = vmov (!%p182_p3), 4   ;;  %v1030_v8 = vmov (!%p182_p3), 8   ;;  %v1031_v9 = vmov (!%p182_p3), 0   ;;  %s1033_s7 = smov (!%p182_p3), 127  }
   0xb   : > { %v1032_v11 = vmov (!%p182_p3), 7   ;;  %s1034_s8 = smov (!%p182_p3), 126   ;;  %s1035_s9 = smov (!%p182_p3), 110   ;;  %vm321_vm0 = vcmask (!%p182_p3), 1039360   ;;  %vm370_vm1 = vcmask (!%p182_p3), 1031168   ;;  %vm419_vm2 = vcmask (!%p182_p3), 900096  }
   0xc   : > { %s1036_s10 = smov (!%p182_p3), 109   ;;  %s1037_s11 = smov (!%p182_p3), 108   ;;  %vm468_vm3 = vcmask (!%p182_p3), 891904   ;;  %vm517_vm4 = vcmask (!%p182_p3), 883712   ;;  %vm566_vm5 = vcmask (!%p182_p3), 752640   ;;  %vm615_vm6 = vcmask (!%p182_p3), 744448  }
   0xd   : > { %s1038_s12 = smov (!%p182_p3), 92   ;;  %vm664_vm7 = vcmask (!%p182_p3), 736256   ;;  %vm755_vm8 = vcmask (!%p182_p3), 556032  }
  0x10   : > { %s1316_s19 = smov (!%p228_p5, %s888_s19), 3  ;;  %s1318_s13 = smov (!%p226_p6, %s1010_s13), 1 }
  0x11   : > { %s891_s20 = sshll.u32 %s1316_s19, 3  ;;  %s899_s27 = smul.u32 12, %s1318_s13 }
  0x12   : > { %s240_s23 = scalar_lea.vmem %s1302_s1, %s891_s20  ;;  %s246_s26 = scalar_lea.vmem %s1303_s2, %s891_s20 }
  0x13   : > { %v259_v2 = vld [vmem:[%s240_s23] sm:$0xff]  ;;  %v260_v3 = vld [vmem:[%s240_s23 + $0x8] sm:$0xff]  ;;  %s898_s28 = smul.u32 3, %s1316_s19  ;;  %s1039_s13 = smov 91  }
  0x14   : > { %290 = vperm.xlu1 %957, %v259_v2   ;;  %339 = vperm.xlu0 %958, %v259_v2   ;;  %v682_v10 = vld [vmem:[%s246_s26 + $0x8] sm:$0xff]  ;;  %v681_v12 = vld [vmem:[%s246_s26] sm:$0xff]  ;;  %s1040_s19 = smov 90  }
  0x15   : > { %s1109_s29 = sadd.s32 %s899_s27, %s898_s28 }
  0x16   : > { %s889_s30 = sshll.u32 %s1109_s29, 3 }
  0x17   : > { %s234_s6 = scalar_lea.vmem %s1301_s0, %s889_s30  ;;  %s1276_s22 = scalar_lea.vmem %s1304_s3, %s889_s30 }
  0x18   : > { %294 = vperm.xlu1 %957, %v260_v3   ;;  %961 = vset.pattern.permute.xlu0 %v1026_v4  ;;  %v1117_v13 = vld [vmem:[%s234_s6] sm:$0xff]  ;;  %v1119_v14 = vld [vmem:[%s234_s6 + $0x8] sm:$0xff]  ;;  %v1123_v18 = vld [vmem:[%s234_s6 + $0x10] sm:$0xff] }
  0x19   : > { %392 = vperm.xlu0 %961, %v260_v3   ;;  %v1125_v19 = vld [vmem:[%s234_s6 + $0x18] sm:$0xff]  ;;  %v1129_v24 = vld [vmem:[%s234_s6 + $0x20] sm:$0xff]  ;;  %v1131_v25 = vld [vmem:[%s234_s6 + $0x28] sm:$0xff] }
  0x1c   : > { %959 = vset.pattern.permute.xlu1 %v1025_v1 }
  0x1d   : > { %343 = vperm.xlu1 %959, %v260_v3   ;;  %963 = vset.pattern.permute.xlu0 %v1027_v5 }
  0x1e   : > { %486 = vperm.xlu0 %963, %v259_v2  }
  0x21   : > { %960 = vset.pattern.permute.xlu1 %v1026_v4 }
  0x22   : > { %388 = vperm.xlu1 %960, %v259_v2   ;;  %966 = vset.pattern.permute.xlu0 %v1028_v6 }
  0x23   : > { %539 = vperm.xlu0 %966, %v260_v3  }
  0x26   : > { %962 = vset.pattern.permute.xlu1 %v1029_v7 }
  0x27   : > { %437 = vperm.xlu1 %962, %v259_v2   ;;  %968 = vset.pattern.permute.xlu0 %v1030_v8 }
  0x28   : > { %633 = vperm.xlu0 %968, %v259_v2  }
  0x2b   : > { %441 = vperm.xlu1 %962, %v260_v3  }
  0x2c   : > { %969 = vset.pattern.permute.xlu0 %v1031_v9 }
  0x2d   : > { %269 = vperm.xlu0 %969, %v259_v2  }
  0x2f   : > { %964 = vset.pattern.permute.xlu1 %v1027_v5 }
  0x30   : > { %490 = vperm.xlu1 %964, %v260_v3  }
  0x31   : > { %274 = vperm.xlu0 %969, %v260_v3  }
  0x34   : > { %965 = vset.pattern.permute.xlu1 %v1028_v6 }
  0x35   : > { %535 = vperm.xlu1 %965, %v259_v2   ;;  %690 = vperm.xlu0 %969, %v682_v10  }
  0x39   : > { %967 = vset.pattern.permute.xlu1 %v1032_v11 }
  0x3a   : > { %584 = vperm.xlu1 %967, %v259_v2  }
  0x3e   : > { %588 = vperm.xlu1 %967, %v260_v3  }
  0x42   : > { %970 = vset.pattern.permute.xlu1 %v1030_v8 }
  0x43   : > { %637 = vperm.xlu1 %970, %v260_v3  }
  0x47   : > { %971 = vset.pattern.permute.xlu1 %v1031_v9 }
  0x48   : > { %685 = vperm.xlu1 %971, %v681_v12  }
  0x93   : > { %v291_v15 = vpop.permute.xlu1 %290  ;;  %v340_v23 = vpop.permute.xlu0 %339 }
  0x94   : > { %v297_v16 = vmul.f32 %v291_v15, %v1117_v13  ;;  %v298_v17 = vmul.f32 %v291_v15, %v1119_v14  ;;  %v299_v21 = vmul.f32 %v291_v15, %v1123_v18  ;;  %v346_v29 = vmul.f32 %v340_v23, %v1117_v13 }
  0x95   : > { %v347_v30 = vmul.f32 %v340_v23, %v1119_v14  ;;  %v348_v34 = vmul.f32 %v340_v23, %v1123_v18 }
  0x96   : > { %311 = vrot.lane.b32.xlu0 %v298_v17, %s1033_s7  ;;  %309 = vrot.lane.b32.xlu1 %v297_v16, %s1033_s7 }
  0x97   : > { %v295_v20 = vpop.permute.xlu1 %294 }
  0x98   : > { %v300_v22 = vmul.f32 %v295_v20, %v1125_v19  ;;  %v301_v26 = vmul.f32 %v295_v20, %v1129_v24  ;;  %v302_v27 = vmul.f32 %v295_v20, %v1131_v25  ;;  %v393_v28 = vpop.permute.xlu0 %392 }
  0x99   : > { %v398_v46 = vmul.f32 %v393_v28, %v1125_v19  ;;  %v399_v52 = vmul.f32 %v393_v28, %v1129_v24  ;;  %v400_v53 = vmul.f32 %v393_v28, %v1131_v25 }
  0x9a   : > { %315 = vrot.lane.b32.xlu0 %v300_v22, %s1033_s7  ;;  %313 = vrot.lane.b32.xlu1 %v299_v21, %s1033_s7 }
  0x9c   : > { %v344_v31 = vpop.permute.xlu1 %343 }
  0x9d   : > { %v487_v32 = vpop.permute.xlu0 %486  ;;  %v349_v33 = vmul.f32 %v344_v31, %v1125_v19  ;;  %v350_v36 = vmul.f32 %v344_v31, %v1129_v24  ;;  %v351_v37 = vmul.f32 %v344_v31, %v1131_v25 }
  0x9e   : > { %319 = vrot.lane.b32.xlu0 %v302_v27, %s1033_s7  ;;  %317 = vrot.lane.b32.xlu1 %v301_v26, %s1033_s7  ;;  %v493_v62 = vmul.f32 %v487_v32, %v1117_v13  ;;  %v494_v63 = vmul.f32 %v487_v32, %v1119_v14  ;;  %v495_v2 = vmul.f32 %v487_v32, %v1123_v18 }
  0xa1   : > { %v389_v38 = vpop.permute.xlu1 %388 }
  0xa2   : > { %360 = vrot.lane.b32.xlu0 %v347_v30, %s1034_s8  ;;  %358 = vrot.lane.b32.xlu1 %v346_v29, %s1034_s8  ;;  %v1139_v35 = vpop.permute.xlu0 %539  ;;  %v395_v40 = vmul.f32 %v389_v38, %v1117_v13  ;;  %v396_v41 = vmul.f32 %v389_v38, %v1119_v14  ;;  %v397_v47 = vmul.f32 %v389_v38, %v1123_v18 }
  0xa3   : > { %v545_v8 = vmul.f32 %v1139_v35, %v1125_v19  ;;  %v546_v10 = vmul.f32 %v1139_v35, %v1129_v24  ;;  %v547_v11 = vmul.f32 %v1139_v35, %v1131_v25 }
  0xa6   : > { %364 = vrot.lane.b32.xlu0 %v349_v33, %s1034_s8  ;;  %362 = vrot.lane.b32.xlu1 %v348_v34, %s1034_s8  ;;  %v438_v54 = vpop.permute.xlu1 %437 }
  0xa7   : > { %v1143_v39 = vpop.permute.xlu0 %633  ;;  %v444_v55 = vmul.f32 %v438_v54, %v1117_v13  ;;  %v445_v56 = vmul.f32 %v438_v54, %v1119_v14  ;;  %v446_v58 = vmul.f32 %v438_v54, %v1123_v18 }
  0xa8   : > { %v640_v22 = vmul.f32 %v1143_v39, %v1117_v13  ;;  %v642_v26 = vmul.f32 %v1143_v39, %v1123_v18  ;;  %v641_v29 = vmul.f32 %v1143_v39, %v1119_v14 }
  0xaa   : > { %368 = vrot.lane.b32.xlu0 %v351_v37, %s1034_s8  ;;  %366 = vrot.lane.b32.xlu1 %v350_v36, %s1034_s8  ;;  %v442_v57 = vpop.permute.xlu1 %441 }
  0xab   : > { %v447_v59 = vmul.f32 %v442_v57, %v1125_v19  ;;  %v448_v60 = vmul.f32 %v442_v57, %v1129_v24  ;;  %v449_v61 = vmul.f32 %v442_v57, %v1131_v25 }
  0xac   : > { %v270_v42 = vpop.permute.xlu0 %269 }
  0xad   : > { %v1148_v43 = vmul.f32 %v270_v42, %v1117_v13  ;;  %v1151_v44 = vmul.f32 %v270_v42, %v1119_v14  ;;  %v1154_v45 = vmul.f32 %v270_v42, %v1123_v18 }
  0xae   : > { %409 = vrot.lane.b32.xlu0 %v396_v41, %s1035_s9  ;;  %407 = vrot.lane.b32.xlu1 %v395_v40, %s1035_s9 }
  0xaf   : > { %v491_v0 = vpop.permute.xlu1 %490 }
  0xb0   : > { %v275_v48 = vpop.permute.xlu0 %274  ;;  %v496_v1 = vmul.f32 %v491_v0, %v1125_v19  ;;  %v497_v3 = vmul.f32 %v491_v0, %v1129_v24  ;;  %v498_v4 = vmul.f32 %v491_v0, %v1131_v25 }
  0xb1   : > { %v1159_v49 = vmul.f32 %v275_v48, %v1125_v19  ;;  %v1162_v50 = vmul.f32 %v275_v48, %v1129_v24  ;;  %v1165_v51 = vmul.f32 %v275_v48, %v1131_v25 }
  0xb2   : > { %413 = vrot.lane.b32.xlu0 %v398_v46, %s1035_s9  ;;  %411 = vrot.lane.b32.xlu1 %v397_v47, %s1035_s9 }
  0xb4   : > { %v536_v5 = vpop.permute.xlu1 %535  ;;  %v1205_v31 = vpop.permute.xlu0 %690 }
  0xb5   : > { %v542_v6 = vmul.f32 %v536_v5, %v1117_v13  ;;  %v543_v7 = vmul.f32 %v536_v5, %v1119_v14  ;;  %v544_v9 = vmul.f32 %v536_v5, %v1123_v18 }
  0xb6   : > { %417 = vrot.lane.b32.xlu0 %v400_v53, %s1035_s9  ;;  %415 = vrot.lane.b32.xlu1 %v399_v52, %s1035_s9 }
  0xb9   : > { %v585_v12 = vpop.permute.xlu1 %584 }
  0xba   : > { %458 = vrot.lane.b32.xlu0 %v445_v56, %s1036_s10  ;;  %456 = vrot.lane.b32.xlu1 %v444_v55, %s1036_s10  ;;  %v591_v15 = vmul.f32 %v585_v12, %v1117_v13  ;;  %v593_v16 = vmul.f32 %v585_v12, %v1123_v18  ;;  %v592_v20 = vmul.f32 %v585_v12, %v1119_v14 }
  0xbd   : > { %v589_v17 = vpop.permute.xlu1 %588 }
  0xbe   : > { %462 = vrot.lane.b32.xlu0 %v447_v59, %s1036_s10  ;;  %460 = vrot.lane.b32.xlu1 %v446_v58, %s1036_s10  ;;  %v595_v21 = vmul.f32 %v589_v17, %v1129_v24  ;;  %v594_v23 = vmul.f32 %v589_v17, %v1125_v19  ;;  %v596_v28 = vmul.f32 %v589_v17, %v1131_v25 }
  0xc2   : > { %466 = vrot.lane.b32.xlu0 %v449_v61, %s1036_s10  ;;  %464 = vrot.lane.b32.xlu1 %v448_v60, %s1036_s10  ;;  %v638_v27 = vpop.permute.xlu1 %637 }
  0xc3   : > { %v644_v30 = vmul.f32 %v638_v27, %v1129_v24  ;;  %v643_v13 = vmul.f32 %v638_v27, %v1125_v19  ;;  %v645_v18 = vmul.f32 %v638_v27, %v1131_v25 }
  0xc6   : > { %507 = vrot.lane.b32.xlu0 %v494_v63, %s1037_s11  ;;  %505 = vrot.lane.b32.xlu1 %v493_v62, %s1037_s11 }
  0xc7   : > { %v1207_v32 = vpop.permute.xlu1 %685 }
  0xca   : > { %511 = vrot.lane.b32.xlu0 %v496_v1, %s1037_s11  ;;  %509 = vrot.lane.b32.xlu1 %v495_v2, %s1037_s11 }
  0xce   : > { %515 = vrot.lane.b32.xlu0 %v498_v4, %s1037_s11  ;;  %513 = vrot.lane.b32.xlu1 %v497_v3, %s1037_s11 }
  0xd2   : > { %556 = vrot.lane.b32.xlu0 %v543_v7, %s1038_s12  ;;  %554 = vrot.lane.b32.xlu1 %v542_v6, %s1038_s12 }
  0xd6   : > { %560 = vrot.lane.b32.xlu0 %v545_v8, %s1038_s12  ;;  %558 = vrot.lane.b32.xlu1 %v544_v9, %s1038_s12 }
  0xda   : > { %564 = vrot.lane.b32.xlu0 %v547_v11, %s1038_s12  ;;  %562 = vrot.lane.b32.xlu1 %v546_v10, %s1038_s12 }
  0xde   : > { %607 = vrot.lane.b32.xlu0 %v593_v16, %s1039_s13  ;;  %603 = vrot.lane.b32.xlu1 %v591_v15, %s1039_s13 }
  0xe2   : > { %611 = vrot.lane.b32.xlu0 %v595_v21, %s1039_s13  ;;  %605 = vrot.lane.b32.xlu1 %v592_v20, %s1039_s13 }
  0xe6   : > { %652 = vrot.lane.b32.xlu0 %v640_v22, %s1040_s19  ;;  %609 = vrot.lane.b32.xlu1 %v594_v23, %s1039_s13 }
  0xea   : > { %656 = vrot.lane.b32.xlu0 %v642_v26, %s1040_s19  ;;  %613 = vrot.lane.b32.xlu1 %v596_v28, %s1039_s13 }
  0xee   : > { %654 = vrot.lane.b32.xlu1 %v641_v29, %s1040_s19  ;;  %660 = vrot.lane.b32.xlu0 %v644_v30, %s1040_s19 }
  0xf2   : > { %658 = vrot.lane.b32.xlu1 %v643_v13, %s1040_s19 }
  0xf6   : > { %662 = vrot.lane.b32.xlu1 %v645_v18, %s1040_s19 }
 0x108   : > { %v312_v33 = vpop.permute.xlu0 %311  ;;  %v310_v34 = vpop.permute.xlu1 %309 }
 0x109   : > { %v322_v14 = vsel %vm321_vm0, %v310_v34, %v312_v33 }
 0x10a   : > { %v332_v35 = vadd.f32 %v322_v14, %v1148_v43 }
 0x10c   : > { %v316_v36 = vpop.permute.xlu0 %315  ;;  %v314_v24 = vpop.permute.xlu1 %313 }
 0x10d   : > { %v323_v37 = vsel %vm321_vm0, %v312_v33, %v314_v24  ;;  %v334_v19 = vadd.f32 %v314_v24, %v1154_v45 }
 0x10e   : > { %v333_v38 = vadd.f32 %v323_v37, %v1151_v44 }
 0x110   : > { %v320_v39 = vpop.permute.xlu0 %319  ;;  %v318_v25 = vpop.permute.xlu1 %317 }
 0x111   : > { %v337_v40 = vadd.f32 %v320_v39, %v1165_v51  ;;  %v324_v41 = vsel %vm321_vm0, %v316_v36, %v318_v25  ;;  %v325_v42 = vsel %vm321_vm0, %v318_v25, %v320_v39 }
 0x112   : > { %v335_v46 = vadd.f32 %v324_v41, %v1159_v49  ;;  %v336_v47 = vadd.f32 %v325_v42, %v1162_v50 }
 0x114   : > { %v361_v48 = vpop.permute.xlu0 %360  ;;  %v359_v43 = vpop.permute.xlu1 %358 }
 0x115   : > { %v371_v52 = vsel %vm370_vm1, %v359_v43, %v361_v48 }
 0x116   : > { %v381_v53 = vadd.f32 %v371_v52, %v332_v35 }
 0x118   : > { %v365_v54 = vpop.permute.xlu0 %364  ;;  %v363_v55 = vpop.permute.xlu1 %362 }
 0x119   : > { %v372_v45 = vsel %vm370_vm1, %v361_v48, %v363_v55  ;;  %v383_v28 = vadd.f32 %v363_v55, %v334_v19 }
 0x11a   : > { %v382_v56 = vadd.f32 %v372_v45, %v333_v38 }
 0x11c   : > { %v369_v44 = vpop.permute.xlu0 %368  ;;  %v367_v57 = vpop.permute.xlu1 %366 }
 0x11d   : > { %v386_v58 = vadd.f32 %v369_v44, %v337_v40  ;;  %v373_v59 = vsel %vm370_vm1, %v365_v54, %v367_v57  ;;  %v374_v51 = vsel %vm370_vm1, %v367_v57, %v369_v44 }
 0x11e   : > { %v384_v60 = vadd.f32 %v373_v59, %v335_v46  ;;  %v1215_v61 = vadd.f32 %v374_v51, %v336_v47 }
 0x120   : > { %v410_v49 = vpop.permute.xlu0 %409  ;;  %v408_v62 = vpop.permute.xlu1 %407 }
 0x121   : > { %v420_v18 = vsel %vm419_vm2, %v408_v62, %v410_v49 }
 0x122   : > { %v430_v24 = vadd.f32 %v420_v18, %v381_v53 }
 0x124   : > { %v414_v50 = vpop.permute.xlu0 %413  ;;  %v412_v63 = vpop.permute.xlu1 %411 }
 0x125   : > { %v432_v29 = vadd.f32 %v412_v63, %v383_v28  ;;  %v421_v33 = vsel %vm419_vm2, %v410_v49, %v412_v63 }
 0x126   : > { %v431_v37 = vadd.f32 %v421_v33, %v382_v56 }
 0x128   : > { %v418_v0 = vpop.permute.xlu0 %417  ;;  %v416_v1 = vpop.permute.xlu1 %415 }
 0x129   : > { %v422_v19 = vsel %vm419_vm2, %v414_v50, %v416_v1  ;;  %v435_v42 = vadd.f32 %v418_v0, %v386_v58  ;;  %v423_v46 = vsel %vm419_vm2, %v416_v1, %v418_v0 }
 0x12a   : > { %v433_v43 = vadd.f32 %v422_v19, %v384_v60  ;;  %v434_v58 = vadd.f32 %v423_v46, %v1215_v61 }
 0x12c   : > { %v459_v2 = vpop.permute.xlu0 %458  ;;  %v457_v3 = vpop.permute.xlu1 %456 }
 0x12d   : > { %v469_v14 = vsel %vm468_vm3, %v457_v3, %v459_v2 }
 0x12e   : > { %v479_v47 = vadd.f32 %v469_v14, %v430_v24 }
 0x130   : > { %v463_v4 = vpop.permute.xlu0 %462  ;;  %v461_v5 = vpop.permute.xlu1 %460 }
 0x131   : > { %v481_v34 = vadd.f32 %v461_v5, %v432_v29  ;;  %v470_v35 = vsel %vm468_vm3, %v459_v2, %v461_v5 }
 0x132   : > { %v480_v48 = vadd.f32 %v470_v35, %v431_v37 }
 0x134   : > { %v467_v6 = vpop.permute.xlu0 %466  ;;  %v465_v7 = vpop.permute.xlu1 %464 }
 0x135   : > { %v471_v55 = vsel %vm468_vm3, %v463_v4, %v465_v7  ;;  %v472_v45 = vsel %vm468_vm3, %v465_v7, %v467_v6  ;;  %v484_v0 = vadd.f32 %v467_v6, %v435_v42 }
 0x136   : > { %v482_v1 = vadd.f32 %v471_v55, %v433_v43  ;;  %v483_v2 = vadd.f32 %v472_v45, %v434_v58 }
 0x138   : > { %v508_v8 = vpop.permute.xlu0 %507  ;;  %v506_v9 = vpop.permute.xlu1 %505 }
 0x139   : > { %v518_v25 = vsel %vm517_vm4, %v506_v9, %v508_v8 }
 0x13a   : > { %v528_v56 = vadd.f32 %v518_v25, %v479_v47 }
 0x13c   : > { %v512_v10 = vpop.permute.xlu0 %511  ;;  %v510_v11 = vpop.permute.xlu1 %509 }
 0x13d   : > { %v530_v36 = vadd.f32 %v510_v11, %v481_v34  ;;  %v519_v40 = vsel %vm517_vm4, %v508_v8, %v510_v11 }
 0x13e   : > { %v529_v44 = vadd.f32 %v519_v40, %v480_v48 }
 0x140   : > { %v1217_v12 = vpop.permute.xlu0 %515  ;;  %v514_v15 = vpop.permute.xlu1 %513 }
 0x141   : > { %v520_v62 = vsel %vm517_vm4, %v512_v10, %v514_v15  ;;  %v521_v4 = vsel %vm517_vm4, %v514_v15, %v1217_v12 }
 0x142   : > { %v531_v9 = vadd.f32 %v520_v62, %v482_v1  ;;  %v532_v29 = vadd.f32 %v521_v4, %v483_v2 }
 0x144   : > { %v557_v16 = vpop.permute.xlu0 %556  ;;  %v555_v17 = vpop.permute.xlu1 %554 }
 0x145   : > { %v567_v52 = vsel %vm566_vm5, %v555_v17, %v557_v16 }
 0x146   : > { %v577_v50 = vadd.f32 %v567_v52, %v528_v56 }
 0x148   : > { %v561_v20 = vpop.permute.xlu0 %560  ;;  %v559_v21 = vpop.permute.xlu1 %558 }
 0x149   : > { %v579_v41 = vadd.f32 %v559_v21, %v530_v36  ;;  %v568_v53 = vsel %vm566_vm5, %v557_v16, %v559_v21  ;;  %v533_v16 = vadd.f32 %v1217_v12, %v484_v0 }
 0x14a   : > { %v578_v63 = vadd.f32 %v568_v53, %v529_v44 }
 0x14c   : > { %v1219_v22 = vpop.permute.xlu0 %564  ;;  %v1221_v23 = vpop.permute.xlu1 %562 }
 0x14d   : > { %v569_v61 = vsel %vm566_vm5, %v561_v20, %v1221_v23  ;;  %v570_v20 = vsel %vm566_vm5, %v1221_v23, %v1219_v22 }
 0x14e   : > { %v581_v23 = vadd.f32 %v570_v20, %v532_v29 }
 0x150   : > { %v608_v26 = vpop.permute.xlu0 %607  ;;  %v604_v27 = vpop.permute.xlu1 %603 }
 0x151   : > { %v628_v54 = vadd.f32 %v608_v26, %v579_v41 }
 0x154   : > { %v1223_v30 = vpop.permute.xlu0 %611  ;;  %v606_v13 = vpop.permute.xlu1 %605 }
 0x155   : > { %v616_v51 = vsel %vm615_vm6, %v604_v27, %v606_v13  ;;  %v617_v49 = vsel %vm615_vm6, %v606_v13, %v608_v26  ;;  %v580_v27 = vadd.f32 %v569_v61, %v531_v9  ;;  %v582_v13 = vadd.f32 %v1219_v22, %v533_v16 }
 0x156   : > { %v626_v5 = vadd.f32 %v616_v51, %v577_v50  ;;  %v627_v7 = vadd.f32 %v617_v49, %v578_v63 }
 0x158   : > { %v653_v38 = vpop.permute.xlu0 %652  ;;  %v610_v39 = vpop.permute.xlu1 %609 }
 0x159   : > { %v618_v17 = vsel %vm615_vm6, %v610_v39, %v1223_v30 }
 0x15a   : > { %v629_v34 = vadd.f32 %v618_v17, %v580_v27 }
 0x15c   : > { %v657_v57 = vpop.permute.xlu0 %656  ;;  %v614_v59 = vpop.permute.xlu1 %613 }
 0x15d   : > { %v677_v60 = vadd.f32 %v657_v57, %v628_v54  ;;  %v619_v35 = vsel %vm615_vm6, %v1223_v30, %v614_v59 }
 0x15e   : > { %v630_v39 = vadd.f32 %v619_v35, %v581_v23 }
 0x15f   : > { %v1242_v3 = vadd.f32 %v1207_v32, %v677_v60 }
 0x160   : > { %v655_v8 = vpop.permute.xlu1 %654  ;;  %v661_v26 = vpop.permute.xlu0 %660 }
 0x161   : > { %v707_v10 = vmul.f32 0.044715, %v1242_v3  ;;  %v665_v11 = vsel %vm664_vm7, %v653_v38, %v655_v8  ;;  %v666_v6 = vsel %vm664_vm7, %v655_v8, %v657_v57  ;;  %v631_v38 = vadd.f32 %v614_v59, %v582_v13 }
 0x162   : > { %v675_v21 = vadd.f32 %v665_v11, %v626_v5  ;;  %v676_v15 = vadd.f32 %v666_v6, %v627_v7  ;;  %v701_v61 = vmul.f32 0.5, %v1242_v3 }
 0x163   : > { %v713_v28 = vmul.f32 %v707_v10, %v1242_v3 }
 0x164   : > { %v693_v18 = vadd.f32 %v1207_v32, %v675_v21  ;;  %v694_v12 = vadd.f32 %v1207_v32, %v676_v15  ;;  %v659_v33 = vpop.permute.xlu1 %658 }
 0x165   : > { %v719_v14 = vmul.f32 %v713_v28, %v1242_v3  ;;  %v667_v36 = vsel %vm664_vm7, %v659_v33, %v661_v26 }
 0x166   : > { %v705_v24 = vmul.f32 0.044715, %v693_v18  ;;  %v706_v37 = vmul.f32 0.044715, %v694_v12  ;;  %v678_v22 = vadd.f32 %v667_v36, %v629_v34  ;;  %v700_v6 = vmul.f32 0.5, %v694_v12 }
 0x167   : > { %v725_v19 = vadd.f32 %v719_v14, %v1242_v3  ;;  %v699_v3 = vmul.f32 0.5, %v693_v18 }
 0x168   : > { %v711_v25 = vmul.f32 %v705_v24, %v693_v18  ;;  %v712_v40 = vmul.f32 %v706_v37, %v694_v12  ;;  %v663_v32 = vpop.permute.xlu1 %662  ;;  %v696_v42 = vadd.f32 %v1205_v31, %v678_v22 }
 0x169   : > { %v731_v41 = vmul.f32 0.7978846, %v725_v19  ;;  %v668_v46 = vsel %vm664_vm7, %v661_v26, %v663_v32  ;;  %v680_v47 = vadd.f32 %v663_v32, %v631_v38 }
 0x16a   : > { %v717_v30 = vmul.f32 %v711_v25, %v693_v18  ;;  %v718_v48 = vmul.f32 %v712_v40, %v694_v12  ;;  %v679_v43 = vadd.f32 %v668_v46, %v630_v39  ;;  %v708_v52 = vmul.f32 0.044715, %v696_v42 }
 0x16b   : > { %972 = vtanh.f32 %v731_v41  ;;  %v698_v53 = vadd.f32 %v1205_v31, %v680_v47  ;;  %v702_v26 = vmul.f32 0.5, %v696_v42 }
 0x16c   : > { %v723_v54 = vadd.f32 %v717_v30, %v693_v18  ;;  %v724_v55 = vadd.f32 %v718_v48, %v694_v12  ;;  %v697_v45 = vadd.f32 %v1205_v31, %v679_v43  ;;  %v714_v56 = vmul.f32 %v708_v52, %v696_v42 }
 0x16d   : > { %v710_v44 = vmul.f32 0.044715, %v698_v53  ;;  %v704_v29 = vmul.f32 0.5, %v698_v53 }
 0x16e   : > { %v729_v57 = vmul.f32 0.7978846, %v723_v54  ;;  %v730_v59 = vmul.f32 0.7978846, %v724_v55  ;;  %v720_v58 = vmul.f32 %v714_v56, %v696_v42  ;;  %v709_v51 = vmul.f32 0.044715, %v697_v45 }
 0x16f   : > { %v716_v49 = vmul.f32 %v710_v44, %v698_v53  ;;  %v703_v18 = vmul.f32 0.5, %v697_v45 }
 0x170   : > { %974 = vtanh.f32 %v729_v57  ;;  %v726_v60 = vadd.f32 %v720_v58, %v696_v42  ;;  %v715_v62 = vmul.f32 %v709_v51, %v697_v45 }
 0x171   : > { %976 = vtanh.f32 %v730_v59  ;;  %v722_v50 = vmul.f32 %v716_v49, %v698_v53 }
 0x172   : > { %v732_v63 = vmul.f32 0.7978846, %v726_v60  ;;  %v721_v0 = vmul.f32 %v715_v62, %v697_v45 }
 0x173   : > { %v728_v1 = vadd.f32 %v722_v50, %v698_v53 }
 0x174   : > { %978 = vtanh.f32 %v732_v63  ;;  %v727_v4 = vadd.f32 %v721_v0, %v697_v45 }
 0x175   : > { %v973_v2 = vpop.eup %972  ;;  %v734_v31 = vmul.f32 0.7978846, %v728_v1 }
 0x176   : > { %v743_v5 = vadd.f32 1.0, %v973_v2  ;;  %v733_v7 = vmul.f32 0.7978846, %v727_v4 }
 0x177   : > { %980 = vtanh.f32 %v734_v31 }
 0x178   : > { %v749_v8 = vmul.f32 %v743_v5, %v701_v61  ;;  %982 = vtanh.f32 %v733_v7 }
 0x17a   : > { %v975_v9 = vpop.eup %974  ;;  %756 = vst.msk [vmem:[%s1276_s22 + $0x10] sm:$0xff] %vm755_vm8, %v749_v8 }
 0x17b   : > { %v977_v10 = vpop.eup %976  ;;  %v741_v11 = vadd.f32 1.0, %v975_v9 }
 0x17c   : > { %v742_v16 = vadd.f32 1.0, %v977_v10 }
 0x17d   : > { %v747_v17 = vmul.f32 %v741_v11, %v699_v3 }
 0x17e   : > { %v748_v21 = vmul.f32 %v742_v16, %v700_v6  ;;  %v979_v15 = vpop.eup %978 }
 0x17f   : > { %753 = vst [vmem:[%s1276_s22] sm:$0xff] %v747_v17  ;;  %v744_v20 = vadd.f32 1.0, %v979_v15 }
 0x180   : > { %754 = vst [vmem:[%s1276_s22 + $0x8] sm:$0xff] %v748_v21 }
 0x181   : > { %v981_v27 = vpop.eup %980  ;;  %v750_v28 = vmul.f32 %v744_v20, %v702_v26 }
 0x182   : > { %v746_v13 = vadd.f32 1.0, %v981_v27  ;;  %v983_v33 = vpop.eup %982 }
 0x183   : > { %757 = vst [vmem:[%s1276_s22 + $0x18] sm:$0xff] %v750_v28  ;;  %v745_v34 = vadd.f32 1.0, %v983_v33 }
 0x184   : > { %v752_v14 = vmul.f32 %v746_v13, %v704_v29 }
 0x185   : > { %v751_v12 = vmul.f32 %v745_v34, %v703_v18 }
 0x186   : > { %759 = vst.msk [vmem:[%s1276_s22 + $0x28] sm:$0xff] %vm755_vm8, %v752_v14 }
 0x187   : > { %758 = vst [vmem:[%s1276_s22 + $0x20] sm:$0xff] %v751_v12 }
 0x188 PF: > { %s13_s16 = sadd.s32 1, %s1022_s16   ;;  %s1305_s12 = smov %s1014_s14 }
 0x189   : > { %p10_p7 = scmp.ge.s32.totalorder %s13_s16, 6   ;;  %s1306_s13 = smov %s1018_s15 }
 0x18a   : > { %s1307_s14 = smov %s1310_s17  ;;  %s1308_s15 = smov %s1314_s18 }
 0x18b   :  { %12 = sbr.rel (!%p10_p7) target bundleno = 3 (0x3), region = 68 }

// kernel: lka_block_forward.17
= control target key start
LH: loop header
LB: loop body
LE: loop exit
PB: predicated region body
PF: predicated region fallthrough
CT: control target
= control target key end

     0   :  { %s617_s18 = smov 0   ;;  %s619_s19 = smov 0   ;;  %s666_s0 = inlined_call_operand.vmem [shape: f32[2,32,256], index: 0, kind: input, shape index: {}]   ;;  %s667_s1 = inlined_call_operand.vmem [shape: f32[2,8,256], index: 1, kind: input, shape index: {}, may-alias: {1,5}]   ;;  %s668_s2 = inlined_call_operand.vmem [shape: f32[8,32], index: 2, kind: input, shape index: {}]   ;;  %s669_s3 = inlined_call_operand.vmem [shape: f32[8,1], index: 3, kind: input, shape index: {}]   ;;  %s670_s4 = inlined_call_operand.vmem [shape: f32[8,1], index: 4, kind: input, shape index: {}]   ;;  %s671_s5 = inlined_call_operand.vmem [shape: f32[2,8,256], index: 5, kind: output, shape index: {}, may-alias: {1,5}]  }
   0x1   :  { %s621_s20 = smov 0  }
   0x2 LB: > { %s27_s21 = sadd.s32 1, %s579_s19  ;;  %p513_p0 = scmp.ge.s32.totalorder %s583_s20, 1  ;;  %s583_s20 = sphi %s621_s20, %s15_s20   ;;  %s579_s19 = sphi %s619_s19, %s673_s19   ;;  %s575_s18 = sphi %s617_s18, %s672_s18  }
   0x3   : > { %p29_p1 = scmp.ge.s32.totalorder %s27_s21, 2  ;;  %p225_p2 = scmp.lt.s32.totalorder %s583_s20, 3 }
   0x5   : > { %s675_s21 = smov (%p29_p1, %s27_s21), 0  ;;  %p226_p3 = pnand %p513_p0, %p225_p2 }
   0x6   : > { %p271_p4 = scmp.lt.s32.totalorder (!%p226_p3), %s575_s18, 1  ;;  %v309_v0 = vld [vmem:[%s669_s3] sm:$0xff] (!%p226_p3)  ;;  %v585_v1 = vmov (!%p226_p3), 0.0   ;;  %v586_v2 = vmov (!%p226_p3), 0   ;;  %vm315_vm0 = vcmask (!%p226_p3), 261120  }
   0x7   : > { %229 = sbr.rel (%p226_p3) target bundleno = 248 (0xf8), region = 40  ;;  %383 = vmatprep.mubr.f32.mxu0 (!%p226_p3), %v585_v1  ;;  %560 = vset.pattern.permute.xlu0 (!%p226_p3), %v586_v2  ;;  %v392_v3 = vld [vmem:[%s670_s4] sm:$0xff] (!%p226_p3) }
   0x8   : > { %312 = vperm.xlu0 (!%p226_p3), %560, %v309_v0   ;;  %v300_v16 = vld [vmem:[%s668_s2] sm:$0xff] (!%p226_p3) }
   0xc   : > { %395 = vperm.xlu0 (!%p226_p3), %560, %v392_v3  }
   0xe   : > { %s677_s18 = smov (!%p271_p4, %s575_s18), 1 }
   0xf   : > { %s523_s26 = sshll.u32 %s677_s18, 6  ;;  %s524_s7 = sshll.u32 %s677_s18, 4 }
  0x10   : > { %s278_s29 = scalar_lea.vmem %s666_s0, %s523_s26  ;;  %s288_s10 = scalar_lea.vmem %s667_s1, %s524_s7 }
  0x11   : > { %v302_v4 = vld [vmem:[%s278_s29 + $0x8] sm:$0xff]  ;;  %v304_v5 = vld [vmem:[%s278_s29 + $0x18] sm:$0xff]  ;;  %v301_v6 = vld [vmem:[%s278_s29] sm:$0xff]  ;;  %s298_s13 = scalar_lea.vmem %s671_s5, %s524_s7 }
  0x12   : > { %v526_v7 = vpack.c.bf16 %v304_v5, %v302_v4  ;;  %v303_v8 = vld [vmem:[%s278_s29 + $0x10] sm:$0xff]  ;;  %v306_v9 = vld [vmem:[%s278_s29 + $0x28] sm:$0xff]  ;;  %v308_v10 = vld [vmem:[%s278_s29 + $0x38] sm:$0xff] }
  0x13   : > { %v528_v11 = vpack.c.bf16 %v303_v8, %v301_v6  ;;  %v530_v12 = vpack.c.bf16 %v308_v10, %v306_v9  ;;  %v305_v13 = vld [vmem:[%s278_s29 + $0x20] sm:$0xff]  ;;  %v307_v14 = vld [vmem:[%s278_s29 + $0x30] sm:$0xff]  ;;  %v391_v25 = vld [vmem:[%s288_s10 + $0x8] sm:$0xff] }
  0x14   : > { %527 = vmatprep.subr.bf16.mxu0 %v526_v7  ;;  %v532_v15 = vpack.c.bf16 %v307_v14, %v305_v13  ;;  %v390_v22 = vld [vmem:[%s288_s10] sm:$0xff] }
  0x15   : > { %529 = vmatpush1.bf16.msra.mxu0 %v528_v11 }
  0x16   : > { %531 = vmatprep.subr.bf16.mxu0 %v530_v12 }
  0x19   : > { %533 = vmatpush1.bf16.msra.mxu0 %v532_v15 }
  0x1c   : > { %520 = vmatmul.mubr.msk.f32.vlgmr.msra.gmra.mrb[0].mxu0 %vm315_vm0, %v300_v16 }
  0x87   : > { %v313_v17 = vpop.permute.xlu0 %312 }
  0x8b   : > { %v396_v21 = vpop.permute.xlu0 %395 }
  0xef   : > { %v385_v18 = vpop.f32.mrb[0].mxu0 }
  0xf0   : > { %v386_v19 = vadd.f32 %v385_v18, %v313_v17  ;;  %v387_v20 = vpop.f32.mrb[1].mxu0 }
  0xf1   : > { %v388_v23 = vadd.f32 %v387_v20, %v313_v17 }
  0xf2   : > { %v398_v24 = vmul.f32 %v396_v21, %v386_v19 }
  0xf3   : > { %v399_v26 = vmul.f32 %v396_v21, %v388_v23 }
  0xf4   : > { %v400_v27 = vadd.f32 %v398_v24, %v390_v22 }
  0xf5   : > { %v401_v28 = vadd.f32 %v399_v26, %v391_v25 }
  0xf6   : > { %402 = vst [vmem:[%s298_s13] sm:$0xff] %v400_v27 }
  0xf7   : > { %403 = vst [vmem:[%s298_s13 + $0x8] sm:$0xff] %v401_v28 }
  0xf8 PF: > { %s15_s20 = sadd.s32 1, %s583_s20   ;;  %s672_s18 = smov %s579_s19 }
  0xf9   : > { %p12_p5 = scmp.ge.s32.totalorder %s15_s20, 4   ;;  %s673_s19 = smov %s675_s21 }
  0xfb   :  { %14 = sbr.rel (!%p12_p5) target bundleno = 2 (0x2), region = 73 }

</bundles_post_ra>
